<compile_context>
chip_gen: v6e
topology: v6e:2x2x1
jax: 0.10.0
libtpu: 0.0.40
codegen_flags: <defaults>
</compile_context>

<pallas_src>
import numpy as np
import jax
import jax.numpy as jnp
from jax.experimental import pallas as pl
from jax.experimental.pallas import tpu as pltpu  # noqa: F401  (TPU backend)


# --------------------------------------------------------------------------
# Fused conv-GEMM kernel: one shot, single K step, epilogue fused.
# --------------------------------------------------------------------------

def fused_gemm(a, b, *, bias=None, bn=None, residual=None, relu=False):
    """out = epilogue(a @ b);  a:(M,K), b:(K,N) -> (M,N) float32.

    Epilogue order matches the PyTorch module: +bias, BatchNorm (training-mode
    batch statistics, eps=1e-5), +residual, ReLU.
    """
    M, K = a.shape
    Nc = b.shape[1]
    has_bias = bias is not None
    has_bn = bn is not None
    has_res = residual is not None

    inputs = [a.astype(jnp.float32), b.astype(jnp.float32)]
    if has_bias:
        inputs.append(bias.reshape(1, Nc).astype(jnp.float32))
    if has_bn:
        gamma, beta = bn
        inputs.append(gamma.reshape(1, Nc).astype(jnp.float32))
        inputs.append(beta.reshape(1, Nc).astype(jnp.float32))
    if has_res:
        inputs.append(residual.astype(jnp.float32))

    def kernel(*refs):
        it = iter(refs)
        a_ref = next(it)
        b_ref = next(it)
        bias_ref = next(it) if has_bias else None
        g_ref = next(it) if has_bn else None
        be_ref = next(it) if has_bn else None
        res_ref = next(it) if has_res else None
        o_ref = next(it)

        y = jnp.dot(a_ref[...], b_ref[...], preferred_element_type=jnp.float32)
        if has_bias:
            y = y + bias_ref[...]
        if has_bn:
            mean = jnp.mean(y, axis=0, keepdims=True)
            var = jnp.mean(jnp.square(y - mean), axis=0, keepdims=True)
            y = (y - mean) * jax.lax.rsqrt(var + 1e-5) * g_ref[...] + be_ref[...]
        if has_res:
            y = y + res_ref[...]
        if relu:
            y = jnp.maximum(y, 0.0)
        o_ref[...] = y

    return pl.pallas_call(
        kernel,
        out_shape=jax.ShapeDtypeStruct((M, Nc), jnp.float32),
    )(*inputs)


# --------------------------------------------------------------------------
# Fused ReLU + MaxPool2d(2,2)  (relu∘max == max∘relu, so fusion is exact)
# --------------------------------------------------------------------------

def _relu_max4_kernel(a_ref, b_ref, c_ref, d_ref, o_ref):
    o_ref[...] = jnp.maximum(
        jnp.maximum(jnp.maximum(a_ref[...], b_ref[...]),
                    jnp.maximum(c_ref[...], d_ref[...])),
        0.0)


def relu_maxpool2x2(x_nhwc):
    N, H, W, C = x_nhwc.shape
    Hp, Wp = H // 2, W // 2
    parts = [x_nhwc[:, di::2, dj::2, :][:, :Hp, :Wp, :]
             for di in (0, 1) for dj in (0, 1)]
    total = N * Hp * Wp * C
    shape2d = (total // 128, 128) if total % 128 == 0 else (N * Hp * Wp, C)
    flat = [q.reshape(shape2d) for q in parts]
    out = pl.pallas_call(
        _relu_max4_kernel,
        out_shape=jax.ShapeDtypeStruct(shape2d, jnp.float32),
    )(*flat)
    return out.reshape(N, Hp, Wp, C)


# --------------------------------------------------------------------------
# Bilinear resize (align_corners=True) = trace-time gather + fused weighted add
# --------------------------------------------------------------------------

def _wsum4_kernel(a_ref, b_ref, c_ref, d_ref, wa_ref, wb_ref, wc_ref, wd_ref,
                  o_ref):
    o_ref[...] = (wa_ref[...] * a_ref[...] + wb_ref[...] * b_ref[...] +
                  wc_ref[...] * c_ref[...] + wd_ref[...] * d_ref[...])


def _axis_idx_weights(O, I):
    o = np.arange(O, dtype=np.float64)
    src = o * (I - 1) / max(O - 1, 1)
    i0 = np.clip(np.floor(src).astype(np.int64), 0, I - 1)
    i1 = np.minimum(i0 + 1, I - 1)
    f = src - i0
    return i0, i1, f


def bilinear_resize_nhwc(x, OH, OW):
    """F.interpolate(mode='bilinear', align_corners=True) on an NHWC tensor."""
    N, IH, IW, C = x.shape
    if (OH, OW) == (IH, IW):
        return x                                    # exact identity
    h0, h1, fh = _axis_idx_weights(OH, IH)
    w0, w1, fw = _axis_idx_weights(OW, IW)
    idx = [(h0[:, None] * IW + w0[None, :]).reshape(-1),
           (h0[:, None] * IW + w1[None, :]).reshape(-1),
           (h1[:, None] * IW + w0[None, :]).reshape(-1),
           (h1[:, None] * IW + w1[None, :]).reshape(-1)]
    wts = [((1 - fh)[:, None] * (1 - fw)[None, :]).reshape(-1),
           ((1 - fh)[:, None] * fw[None, :]).reshape(-1),
           (fh[:, None] * (1 - fw)[None, :]).reshape(-1),
           (fh[:, None] * fw[None, :]).reshape(-1)]
    xf = x.reshape(N, IH * IW, C)
    R = N * OH * OW
    gathered = [jnp.take(xf, jnp.asarray(i, dtype=jnp.int32), axis=1
                         ).reshape(R, C) for i in idx]
    weights = [jnp.asarray(np.tile(wv.astype(np.float32), N).reshape(R, 1))
               for wv in wts]
    out = pl.pallas_call(
        _wsum4_kernel,
        out_shape=jax.ShapeDtypeStruct((R, C), jnp.float32),
    )(*gathered, *weights)
    return out.reshape(N, OH, OW, C)


# --------------------------------------------------------------------------
# Fused sigmoid + 3x3 NMS (maxpool stride 1, -inf pad) + clamp
# --------------------------------------------------------------------------

def _sigmoid_nms_clamp_kernel(l_ref, s_ref, o_ref):
    probs = jax.nn.sigmoid(l_ref[...])                              # (1, R)
    hmax = jnp.max(jax.nn.sigmoid(s_ref[...]), axis=0, keepdims=True)
    keep = (hmax == probs).astype(jnp.float32)
    eps = jnp.finfo(jnp.float32).eps
    o_ref[...] = jnp.clip(probs * keep, eps, 1.0 - eps)


def sigmoid_nms_clamp(logits_nhw):
    N, h, w = logits_nhw.shape
    R = N * h * w
    lp = jnp.pad(logits_nhw, ((0, 0), (1, 1), (1, 1)), constant_values=-1e30)
    shifts = jnp.stack([lp[:, di:di + h, dj:dj + w]
                        for di in range(3) for dj in range(3)], axis=0)
    out = pl.pallas_call(
        _sigmoid_nms_clamp_kernel,
        out_shape=jax.ShapeDtypeStruct((1, R), jnp.float32),
    )(logits_nhw.reshape(1, R), shifts.reshape(9, R))
    return out.reshape(N, 1, h, w)


# --------------------------------------------------------------------------
# NHWC im2col + weight-matrix glue (pure data movement)
# --------------------------------------------------------------------------

def _im2col_nhwc(xp, kh, kw, stride):
    """xp: padded NHWC -> ((N*Ho*Wo, kh*kw*C), Ho, Wo); order (i, j, cin)."""
    N, Hp, Wp, C = xp.shape
    Ho = (Hp - kh) // stride + 1
    Wo = (Wp - kw) // stride + 1
    cols = []
    for i in range(kh):
        for j in range(kw):
            cols.append(xp[:, i::stride, j::stride, :][:, :Ho, :Wo, :])
    patches = jnp.concatenate(cols, axis=-1)            # (N, Ho, Wo, kh*kw*C)
    return patches.reshape(N * Ho * Wo, kh * kw * C), Ho, Wo


def _weight_matrix(w):
    """(Cout, Cin, kh, kw) -> (kh*kw*Cin, Cout) matching _im2col_nhwc order."""
    Cout, Cin, kh, kw = w.shape
    return w.transpose(2, 3, 1, 0).reshape(kh * kw * Cin, Cout)


# --------------------------------------------------------------------------
# BasicBlock (conv-bn-relu-conv-bn (+downsample) -add-relu), fully fused GEMMs
# --------------------------------------------------------------------------

def basic_block(x_nhwc, bp, stride=1, downsample=None):
    N, H, W, Cin = x_nhwc.shape
    Cout = bp['conv1_w'].shape[0]

    # conv1 (3x3, stride, pad 1) + BN + ReLU  -> one fused kernel
    xp = jnp.pad(x_nhwc, ((0, 0), (1, 1), (1, 1), (0, 0)))
    p1, Ho, Wo = _im2col_nhwc(xp, 3, 3, stride)
    y = fused_gemm(p1, _weight_matrix(bp['conv1_w']),
                   bn=(bp['bn1_g'], bp['bn1_b']), relu=True)

    # identity / downsample branch
    if downsample is not None:
        xs = x_nhwc[:, ::stride, ::stride, :][:, :Ho, :Wo, :]
        idn = fused_gemm(xs.reshape(N * Ho * Wo, Cin),
                         downsample['w'].reshape(Cout, Cin).T,
                         bn=(downsample['g'], downsample['b']))
    else:
        idn = x_nhwc.reshape(N * H * W, Cin)

    # conv2 (3x3, stride 1, pad 1) + BN + residual + ReLU -> one fused kernel
    yp = jnp.pad(y.reshape(N, Ho, Wo, Cout), ((0, 0), (1, 1), (1, 1), (0, 0)))
    p2, Ho2, Wo2 = _im2col_nhwc(yp, 3, 3, 1)
    out = fused_gemm(p2, _weight_matrix(bp['conv2_w']),
                     bn=(bp['bn2_g'], bp['bn2_b']), residual=idn, relu=True)
    return out.reshape(N, Ho2, Wo2, Cout)


# --------------------------------------------------------------------------
# Heatmap2FeatNetwork forward
# --------------------------------------------------------------------------

def heatmap2feat_forward(x, p):
    N, _, H, W = x.shape
    h, w = H // 4, W // 4
    xh = jnp.transpose(x, (0, 2, 3, 1)).astype(jnp.float32)         # NHWC

    # ---- layer1: ReplicationPad2d((0,0,3,3)) + circular W pad (3) +
    #      Conv(3->64, k8, s2, no bias) + BatchNorm2d(64)   (one fused kernel)
    x1 = jnp.pad(xh, ((0, 0), (3, 3), (0, 0), (0, 0)), mode='edge')
    x1 = jnp.pad(x1, ((0, 0), (0, 0), (3, 3), (0, 0)), mode='wrap')
    p1, Ho, Wo = _im2col_nhwc(x1, 8, 8, 2)
    y1 = fused_gemm(p1, _weight_matrix(p['conv1_w']),
                    bn=(p['bn1_g'], p['bn1_b']))

    # ---- layer2: ReLU + MaxPool2d(2,2)   (one lane-dense kernel)
    x2 = relu_maxpool2x2(y1.reshape(N, Ho, Wo, 64))

    # ---- block64 (skip1)
    s1 = basic_block(x2, p['b64_0'], stride=1)
    s1 = basic_block(s1, p['b64_1'], stride=1)

    # ---- block128 (skip2)
    s2 = basic_block(s1, p['b128_0'], stride=2, downsample=p['ds1'])
    s2 = basic_block(s2, p['b128_1'], stride=1)

    # ---- out3 = 2x bilinear upsample (align_corners) ; concat with skip1
    _, h2, w2, _ = s2.shape
    out3 = bilinear_resize_nhwc(s2, 2 * h2, 2 * w2)
    cat = jnp.concatenate([out3, s1], axis=-1)                      # C = 192

    # ---- layer5 (1x1 conv + bias) then bilinear resize to (h, w)
    Nc5 = cat.shape[-1]
    y5 = fused_gemm(cat.reshape(-1, Nc5),
                    p['l5_w'].reshape(64, Nc5).T, bias=p['l5_b'])
    y5 = bilinear_resize_nhwc(y5.reshape(N, cat.shape[1], cat.shape[2], 64),
                              h, w)

    # ---- layer6 (1x1 conv 64->1 + bias); output padded to 128 lanes
    w6 = jnp.pad(p['l6_w'].reshape(1, 64).T, ((0, 0), (0, 127)))
    b6 = jnp.pad(p['l6_b'], (0, 127))
    y6 = fused_gemm(y5.reshape(N * h * w, 64), w6, bias=b6)
    logits = y6[:, 0].reshape(N, h, w)

    # ---- sigmoid + 3x3 NMS + clamp  (one fused kernel)
    return sigmoid_nms_clamp(logits)


# --------------------------------------------------------------------------
# Deterministic parameter init (matches module __init__ shapes)
# --------------------------------------------------------------------------

def init_params(key):
    keys = iter(jax.random.split(key, 64))

    def conv(shape, scale=0.1):
        return scale * jax.random.normal(next(keys), shape, dtype=jnp.float32)

    def bn(c):
        g = 1.0 + 0.1 * jax.random.normal(next(keys), (c,), dtype=jnp.float32)
        b = 0.1 * jax.random.normal(next(keys), (c,), dtype=jnp.float32)
        return g, b

    def block(cin, cout):
        w1 = conv((cout, cin, 3, 3))
        g1, b1 = bn(cout)
        w2 = conv((cout, cout, 3, 3))
        g2, b2 = bn(cout)
        return dict(conv1_w=w1, bn1_g=g1, bn1_b=b1,
                    conv2_w=w2, bn2_g=g2, bn2_b=b2)

    p = {}
    p['conv1_w'] = conv((64, 3, 8, 8))
    p['bn1_g'], p['bn1_b'] = bn(64)
    p['b64_0'] = block(64, 64)
    p['b64_1'] = block(64, 64)
    dw = conv((128, 64, 1, 1))
    dg, db = bn(128)
    p['ds1'] = dict(w=dw, g=dg, b=db)
    p['b128_0'] = block(64, 128)
    p['b128_1'] = block(128, 128)
    p['l5_w'] = conv((64, 192, 1, 1))
    p['l5_b'] = 0.1 * jax.random.normal(next(keys), (64,), dtype=jnp.float32)
    p['l6_w'] = conv((1, 64, 1, 1))
    p['l6_b'] = 0.1 * jax.random.normal(next(keys), (1,), dtype=jnp.float32)
    return p


if __name__ == "__main__":
    key = jax.random.PRNGKey(0)
    pkey, xkey = jax.random.split(key)
    params = init_params(pkey)
    x = jax.random.normal(xkey, (2, 3, 32, 32), dtype=jnp.float32)

    fwd = jax.jit(heatmap2feat_forward)
    out = fwd(x, params)
    out = jax.block_until_ready(out)

    assert out.shape == (2, 1, 8, 8), out.shape
    assert bool(jnp.all(jnp.isfinite(out)))
    assert bool(jnp.all(out > 0.0)) and bool(jnp.all(out < 1.0))
    print("KERNEL_OK")
</pallas_src>

<mosaic_0001>
module attributes {stable_mosaic.version = 11 : i64} {
  func.func @kernel(%arg0: memref<512x192xf32, #tpu.memory_space<vmem>>, %arg1: memref<192x64xf32, #tpu.memory_space<vmem>>, %arg2: memref<1x64xf32, #tpu.memory_space<vmem>>, %arg3: memref<1x64xf32, #tpu.memory_space<vmem>>, %arg4: memref<512x64xf32, #tpu.memory_space<vmem>>) attributes {dimension_semantics = [], scalar_prefetch = 0 : i64, scratch_operands = 0 : i64, tpu.core_type = #tpu.core_type<tc>} {
    %c0 = arith.constant 0 : index
    %c0_0 = arith.constant 0 : index
    %0 = vector.load %arg0[%c0, %c0_0] : memref<512x192xf32, #tpu.memory_space<vmem>>, vector<512x192xf32>
    %c0_1 = arith.constant 0 : index
    %c0_2 = arith.constant 0 : index
    %1 = vector.load %arg1[%c0_1, %c0_2] : memref<192x64xf32, #tpu.memory_space<vmem>>, vector<192x64xf32>
    %cst = arith.constant dense<0.000000e+00> : vector<512x64xf32>
    %2 = tpu.matmul %0, %1, %cst {dimension_numbers = #tpu.dot_dimension_numbers<[1], [0], [0], [1], [0, 0, 1, 1], [], []>} : vector<512x192xf32>, vector<192x64xf32>, vector<512x64xf32> -> vector<512x64xf32>
    %cst_3 = arith.constant dense<0.000000e+00> : vector<64xf32>
    %3 = vector.multi_reduction <add>, %2, %cst_3 [0] : vector<512x64xf32> to vector<64xf32>
    %4 = vector.shape_cast %3 : vector<64xf32> to vector<1x64xf32>
    %cst_4 = arith.constant 5.120000e+02 : f32
    %5 = vector.broadcast %cst_4 : f32 to vector<1x64xf32>
    %6 = arith.divf %4, %5 : vector<1x64xf32>
    %7 = vector.broadcast %6 : vector<1x64xf32> to vector<512x64xf32>
    %8 = arith.subf %2, %7 : vector<512x64xf32>
    %9 = arith.mulf %8, %8 : vector<512x64xf32>
    %cst_5 = arith.constant dense<0.000000e+00> : vector<64xf32>
    %10 = vector.multi_reduction <add>, %9, %cst_5 [0] : vector<512x64xf32> to vector<64xf32>
    %11 = vector.shape_cast %10 : vector<64xf32> to vector<1x64xf32>
    %cst_6 = arith.constant 5.120000e+02 : f32
    %12 = vector.broadcast %cst_6 : f32 to vector<1x64xf32>
    %13 = arith.divf %11, %12 : vector<1x64xf32>
    %14 = vector.broadcast %6 : vector<1x64xf32> to vector<512x64xf32>
    %15 = arith.subf %2, %14 : vector<512x64xf32>
    %cst_7 = arith.constant 9.99999974E-6 : f32
    %16 = vector.broadcast %cst_7 : f32 to vector<1x64xf32>
    %17 = arith.addf %13, %16 : vector<1x64xf32>
    %18 = math.rsqrt %17 : vector<1x64xf32>
    %19 = vector.broadcast %18 : vector<1x64xf32> to vector<512x64xf32>
    %20 = arith.mulf %15, %19 : vector<512x64xf32>
    %c0_8 = arith.constant 0 : index
    %c0_9 = arith.constant 0 : index
    %21 = vector.load %arg2[%c0_8, %c0_9] : memref<1x64xf32, #tpu.memory_space<vmem>>, vector<1x64xf32>
    %22 = vector.broadcast %21 : vector<1x64xf32> to vector<512x64xf32>
    %23 = arith.mulf %20, %22 : vector<512x64xf32>
    %c0_10 = arith.constant 0 : index
    %c0_11 = arith.constant 0 : index
    %24 = vector.load %arg3[%c0_10, %c0_11] : memref<1x64xf32, #tpu.memory_space<vmem>>, vector<1x64xf32>
    %25 = vector.broadcast %24 : vector<1x64xf32> to vector<512x64xf32>
    %26 = arith.addf %23, %25 : vector<512x64xf32>
    %c0_12 = arith.constant 0 : index
    %c0_13 = arith.constant 0 : index
    %27 = vector.load %arg4[%c0_12, %c0_13] : memref<512x64xf32, #tpu.memory_space<vmem>>, vector<512x64xf32>
    tpu.vector_store %arg4[%c0_12, %c0_13], %26 {strides = array<i32>} : memref<512x64xf32, #tpu.memory_space<vmem>>, vector<512x64xf32>,
    return
  }
}

module attributes {stable_mosaic.version = 11 : i64} {
  func.func @_relu_max4_kernel(%arg0: memref<64x128xf32, #tpu.memory_space<vmem>>, %arg1: memref<64x128xf32, #tpu.memory_space<vmem>>, %arg2: memref<64x128xf32, #tpu.memory_space<vmem>>, %arg3: memref<64x128xf32, #tpu.memory_space<vmem>>, %arg4: memref<64x128xf32, #tpu.memory_space<vmem>>) attributes {dimension_semantics = [], scalar_prefetch = 0 : i64, scratch_operands = 0 : i64, tpu.core_type = #tpu.core_type<tc>} {
    %c0 = arith.constant 0 : index
    %c0_0 = arith.constant 0 : index
    %0 = vector.load %arg0[%c0, %c0_0] : memref<64x128xf32, #tpu.memory_space<vmem>>, vector<64x128xf32>
    %c0_1 = arith.constant 0 : index
    %c0_2 = arith.constant 0 : index
    %1 = vector.load %arg1[%c0_1, %c0_2] : memref<64x128xf32, #tpu.memory_space<vmem>>, vector<64x128xf32>
    %2 = arith.maximumf %0, %1 : vector<64x128xf32>
    %c0_3 = arith.constant 0 : index
    %c0_4 = arith.constant 0 : index
    %3 = vector.load %arg2[%c0_3, %c0_4] : memref<64x128xf32, #tpu.memory_space<vmem>>, vector<64x128xf32>
    %c0_5 = arith.constant 0 : index
    %c0_6 = arith.constant 0 : index
    %4 = vector.load %arg3[%c0_5, %c0_6] : memref<64x128xf32, #tpu.memory_space<vmem>>, vector<64x128xf32>
    %5 = arith.maximumf %3, %4 : vector<64x128xf32>
    %6 = arith.maximumf %2, %5 : vector<64x128xf32>
    %cst = arith.constant 0.000000e+00 : f32
    %7 = vector.broadcast %cst : f32 to vector<64x128xf32>
    %8 = arith.maximumf %6, %7 : vector<64x128xf32>
    %c0_7 = arith.constant 0 : index
    %c0_8 = arith.constant 0 : index
    %9 = vector.load %arg4[%c0_7, %c0_8] : memref<64x128xf32, #tpu.memory_space<vmem>>, vector<64x128xf32>
    tpu.vector_store %arg4[%c0_7, %c0_8], %8 {strides = array<i32>} : memref<64x128xf32, #tpu.memory_space<vmem>>, vector<64x128xf32>,
    return
  }
}

module attributes {stable_mosaic.version = 11 : i64} {
  func.func @kernel(%arg0: memref<128x576xf32, #tpu.memory_space<vmem>>, %arg1: memref<576x64xf32, #tpu.memory_space<vmem>>, %arg2: memref<1x64xf32, #tpu.memory_space<vmem>>, %arg3: memref<1x64xf32, #tpu.memory_space<vmem>>, %arg4: memref<128x64xf32, #tpu.memory_space<vmem>>) attributes {dimension_semantics = [], scalar_prefetch = 0 : i64, scratch_operands = 0 : i64, tpu.core_type = #tpu.core_type<tc>} {
    %c0 = arith.constant 0 : index
    %c0_0 = arith.constant 0 : index
    %0 = vector.load %arg0[%c0, %c0_0] : memref<128x576xf32, #tpu.memory_space<vmem>>, vector<128x576xf32>
    %c0_1 = arith.constant 0 : index
    %c0_2 = arith.constant 0 : index
    %1 = vector.load %arg1[%c0_1, %c0_2] : memref<576x64xf32, #tpu.memory_space<vmem>>, vector<576x64xf32>
    %cst = arith.constant dense<0.000000e+00> : vector<128x64xf32>
    %2 = tpu.matmul %0, %1, %cst {dimension_numbers = #tpu.dot_dimension_numbers<[1], [0], [0], [1], [0, 0, 1, 1], [], []>} : vector<128x576xf32>, vector<576x64xf32>, vector<128x64xf32> -> vector<128x64xf32>
    %cst_3 = arith.constant dense<0.000000e+00> : vector<64xf32>
    %3 = vector.multi_reduction <add>, %2, %cst_3 [0] : vector<128x64xf32> to vector<64xf32>
    %4 = vector.shape_cast %3 : vector<64xf32> to vector<1x64xf32>
    %cst_4 = arith.constant 1.280000e+02 : f32
    %5 = vector.broadcast %cst_4 : f32 to vector<1x64xf32>
    %6 = arith.divf %4, %5 : vector<1x64xf32>
    %7 = vector.broadcast %6 : vector<1x64xf32> to vector<128x64xf32>
    %8 = arith.subf %2, %7 : vector<128x64xf32>
    %9 = arith.mulf %8, %8 : vector<128x64xf32>
    %cst_5 = arith.constant dense<0.000000e+00> : vector<64xf32>
    %10 = vector.multi_reduction <add>, %9, %cst_5 [0] : vector<128x64xf32> to vector<64xf32>
    %11 = vector.shape_cast %10 : vector<64xf32> to vector<1x64xf32>
    %cst_6 = arith.constant 1.280000e+02 : f32
    %12 = vector.broadcast %cst_6 : f32 to vector<1x64xf32>
    %13 = arith.divf %11, %12 : vector<1x64xf32>
    %14 = vector.broadcast %6 : vector<1x64xf32> to vector<128x64xf32>
    %15 = arith.subf %2, %14 : vector<128x64xf32>
    %cst_7 = arith.constant 9.99999974E-6 : f32
    %16 = vector.broadcast %cst_7 : f32 to vector<1x64xf32>
    %17 = arith.addf %13, %16 : vector<1x64xf32>
    %18 = math.rsqrt %17 : vector<1x64xf32>
    %19 = vector.broadcast %18 : vector<1x64xf32> to vector<128x64xf32>
    %20 = arith.mulf %15, %19 : vector<128x64xf32>
    %c0_8 = arith.constant 0 : index
    %c0_9 = arith.constant 0 : index
    %21 = vector.load %arg2[%c0_8, %c0_9] : memref<1x64xf32, #tpu.memory_space<vmem>>, vector<1x64xf32>
    %22 = vector.broadcast %21 : vector<1x64xf32> to vector<128x64xf32>
    %23 = arith.mulf %20, %22 : vector<128x64xf32>
    %c0_10 = arith.constant 0 : index
    %c0_11 = arith.constant 0 : index
    %24 = vector.load %arg3[%c0_10, %c0_11] : memref<1x64xf32, #tpu.memory_space<vmem>>, vector<1x64xf32>
    %25 = vector.broadcast %24 : vector<1x64xf32> to vector<128x64xf32>
    %26 = arith.addf %23, %25 : vector<128x64xf32>
    %cst_12 = arith.constant 0.000000e+00 : f32
    %27 = vector.broadcast %cst_12 : f32 to vector<128x64xf32>
    %28 = arith.maximumf %26, %27 : vector<128x64xf32>
    %c0_13 = arith.constant 0 : index
    %c0_14 = arith.constant 0 : index
    %29 = vector.load %arg4[%c0_13, %c0_14] : memref<128x64xf32, #tpu.memory_space<vmem>>, vector<128x64xf32>
    tpu.vector_store %arg4[%c0_13, %c0_14], %28 {strides = array<i32>} : memref<128x64xf32, #tpu.memory_space<vmem>>, vector<128x64xf32>,
    return
  }
}

module attributes {stable_mosaic.version = 11 : i64} {
  func.func @kernel(%arg0: memref<128x576xf32, #tpu.memory_space<vmem>>, %arg1: memref<576x64xf32, #tpu.memory_space<vmem>>, %arg2: memref<1x64xf32, #tpu.memory_space<vmem>>, %arg3: memref<1x64xf32, #tpu.memory_space<vmem>>, %arg4: memref<128x64xf32, #tpu.memory_space<vmem>>, %arg5: memref<128x64xf32, #tpu.memory_space<vmem>>) attributes {dimension_semantics = [], scalar_prefetch = 0 : i64, scratch_operands = 0 : i64, tpu.core_type = #tpu.core_type<tc>} {
    %c0 = arith.constant 0 : index
    %c0_0 = arith.constant 0 : index
    %0 = vector.load %arg0[%c0, %c0_0] : memref<128x576xf32, #tpu.memory_space<vmem>>, vector<128x576xf32>
    %c0_1 = arith.constant 0 : index
    %c0_2 = arith.constant 0 : index
    %1 = vector.load %arg1[%c0_1, %c0_2] : memref<576x64xf32, #tpu.memory_space<vmem>>, vector<576x64xf32>
    %cst = arith.constant dense<0.000000e+00> : vector<128x64xf32>
    %2 = tpu.matmul %0, %1, %cst {dimension_numbers = #tpu.dot_dimension_numbers<[1], [0], [0], [1], [0, 0, 1, 1], [], []>} : vector<128x576xf32>, vector<576x64xf32>, vector<128x64xf32> -> vector<128x64xf32>
    %cst_3 = arith.constant dense<0.000000e+00> : vector<64xf32>
    %3 = vector.multi_reduction <add>, %2, %cst_3 [0] : vector<128x64xf32> to vector<64xf32>
    %4 = vector.shape_cast %3 : vector<64xf32> to vector<1x64xf32>
    %cst_4 = arith.constant 1.280000e+02 : f32
    %5 = vector.broadcast %cst_4 : f32 to vector<1x64xf32>
    %6 = arith.divf %4, %5 : vector<1x64xf32>
    %7 = vector.broadcast %6 : vector<1x64xf32> to vector<128x64xf32>
    %8 = arith.subf %2, %7 : vector<128x64xf32>
    %9 = arith.mulf %8, %8 : vector<128x64xf32>
    %cst_5 = arith.constant dense<0.000000e+00> : vector<64xf32>
    %10 = vector.multi_reduction <add>, %9, %cst_5 [0] : vector<128x64xf32> to vector<64xf32>
    %11 = vector.shape_cast %10 : vector<64xf32> to vector<1x64xf32>
    %cst_6 = arith.constant 1.280000e+02 : f32
    %12 = vector.broadcast %cst_6 : f32 to vector<1x64xf32>
    %13 = arith.divf %11, %12 : vector<1x64xf32>
    %14 = vector.broadcast %6 : vector<1x64xf32> to vector<128x64xf32>
    %15 = arith.subf %2, %14 : vector<128x64xf32>
    %cst_7 = arith.constant 9.99999974E-6 : f32
    %16 = vector.broadcast %cst_7 : f32 to vector<1x64xf32>
    %17 = arith.addf %13, %16 : vector<1x64xf32>
    %18 = math.rsqrt %17 : vector<1x64xf32>
    %19 = vector.broadcast %18 : vector<1x64xf32> to vector<128x64xf32>
    %20 = arith.mulf %15, %19 : vector<128x64xf32>
    %c0_8 = arith.constant 0 : index
    %c0_9 = arith.constant 0 : index
    %21 = vector.load %arg2[%c0_8, %c0_9] : memref<1x64xf32, #tpu.memory_space<vmem>>, vector<1x64xf32>
    %22 = vector.broadcast %21 : vector<1x64xf32> to vector<128x64xf32>
    %23 = arith.mulf %20, %22 : vector<128x64xf32>
    %c0_10 = arith.constant 0 : index
    %c0_11 = arith.constant 0 : index
    %24 = vector.load %arg3[%c0_10, %c0_11] : memref<1x64xf32, #tpu.memory_space<vmem>>, vector<1x64xf32>
    %25 = vector.broadcast %24 : vector<1x64xf32> to vector<128x64xf32>
    %26 = arith.addf %23, %25 : vector<128x64xf32>
    %c0_12 = arith.constant 0 : index
    %c0_13 = arith.constant 0 : index
    %27 = vector.load %arg4[%c0_12, %c0_13] : memref<128x64xf32, #tpu.memory_space<vmem>>, vector<128x64xf32>
    %28 = arith.addf %26, %27 : vector<128x64xf32>
    %cst_14 = arith.constant 0.000000e+00 : f32
    %29 = vector.broadcast %cst_14 : f32 to vector<128x64xf32>
    %30 = arith.maximumf %28, %29 : vector<128x64xf32>
    %c0_15 = arith.constant 0 : index
    %c0_16 = arith.constant 0 : index
    %31 = vector.load %arg5[%c0_15, %c0_16] : memref<128x64xf32, #tpu.memory_space<vmem>>, vector<128x64xf32>
    tpu.vector_store %arg5[%c0_15, %c0_16], %30 {strides = array<i32>} : memref<128x64xf32, #tpu.memory_space<vmem>>, vector<128x64xf32>,
    return
  }
}

module attributes {stable_mosaic.version = 11 : i64} {
  func.func @kernel(%arg0: memref<32x576xf32, #tpu.memory_space<vmem>>, %arg1: memref<576x128xf32, #tpu.memory_space<vmem>>, %arg2: memref<1x128xf32, #tpu.memory_space<vmem>>, %arg3: memref<1x128xf32, #tpu.memory_space<vmem>>, %arg4: memref<32x128xf32, #tpu.memory_space<vmem>>) attributes {dimension_semantics = [], scalar_prefetch = 0 : i64, scratch_operands = 0 : i64, tpu.core_type = #tpu.core_type<tc>} {
    %c0 = arith.constant 0 : index
    %c0_0 = arith.constant 0 : index
    %0 = vector.load %arg0[%c0, %c0_0] : memref<32x576xf32, #tpu.memory_space<vmem>>, vector<32x576xf32>
    %c0_1 = arith.constant 0 : index
    %c0_2 = arith.constant 0 : index
    %1 = vector.load %arg1[%c0_1, %c0_2] : memref<576x128xf32, #tpu.memory_space<vmem>>, vector<576x128xf32>
    %cst = arith.constant dense<0.000000e+00> : vector<32x128xf32>
    %2 = tpu.matmul %0, %1, %cst {dimension_numbers = #tpu.dot_dimension_numbers<[1], [0], [0], [1], [0, 0, 1, 1], [], []>} : vector<32x576xf32>, vector<576x128xf32>, vector<32x128xf32> -> vector<32x128xf32>
    %cst_3 = arith.constant dense<0.000000e+00> : vector<128xf32>
    %3 = vector.multi_reduction <add>, %2, %cst_3 [0] : vector<32x128xf32> to vector<128xf32>
    %4 = vector.shape_cast %3 : vector<128xf32> to vector<1x128xf32>
    %cst_4 = arith.constant 3.200000e+01 : f32
    %5 = vector.broadcast %cst_4 : f32 to vector<1x128xf32>
    %6 = arith.divf %4, %5 : vector<1x128xf32>
    %7 = vector.broadcast %6 : vector<1x128xf32> to vector<32x128xf32>
    %8 = arith.subf %2, %7 : vector<32x128xf32>
    %9 = arith.mulf %8, %8 : vector<32x128xf32>
    %cst_5 = arith.constant dense<0.000000e+00> : vector<128xf32>
    %10 = vector.multi_reduction <add>, %9, %cst_5 [0] : vector<32x128xf32> to vector<128xf32>
    %11 = vector.shape_cast %10 : vector<128xf32> to vector<1x128xf32>
    %cst_6 = arith.constant 3.200000e+01 : f32
    %12 = vector.broadcast %cst_6 : f32 to vector<1x128xf32>
    %13 = arith.divf %11, %12 : vector<1x128xf32>
    %14 = vector.broadcast %6 : vector<1x128xf32> to vector<32x128xf32>
    %15 = arith.subf %2, %14 : vector<32x128xf32>
    %cst_7 = arith.constant 9.99999974E-6 : f32
    %16 = vector.broadcast %cst_7 : f32 to vector<1x128xf32>
    %17 = arith.addf %13, %16 : vector<1x128xf32>
    %18 = math.rsqrt %17 : vector<1x128xf32>
    %19 = vector.broadcast %18 : vector<1x128xf32> to vector<32x128xf32>
    %20 = arith.mulf %15, %19 : vector<32x128xf32>
    %c0_8 = arith.constant 0 : index
    %c0_9 = arith.constant 0 : index
    %21 = vector.load %arg2[%c0_8, %c0_9] : memref<1x128xf32, #tpu.memory_space<vmem>>, vector<1x128xf32>
    %22 = vector.broadcast %21 : vector<1x128xf32> to vector<32x128xf32>
    %23 = arith.mulf %20, %22 : vector<32x128xf32>
    %c0_10 = arith.constant 0 : index
    %c0_11 = arith.constant 0 : index
    %24 = vector.load %arg3[%c0_10, %c0_11] : memref<1x128xf32, #tpu.memory_space<vmem>>, vector<1x128xf32>
    %25 = vector.broadcast %24 : vector<1x128xf32> to vector<32x128xf32>
    %26 = arith.addf %23, %25 : vector<32x128xf32>
    %cst_12 = arith.constant 0.000000e+00 : f32
    %27 = vector.broadcast %cst_12 : f32 to vector<32x128xf32>
    %28 = arith.maximumf %26, %27 : vector<32x128xf32>
    %c0_13 = arith.constant 0 : index
    %c0_14 = arith.constant 0 : index
    %29 = vector.load %arg4[%c0_13, %c0_14] : memref<32x128xf32, #tpu.memory_space<vmem>>, vector<32x128xf32>
    tpu.vector_store %arg4[%c0_13, %c0_14], %28 {strides = array<i32>} : memref<32x128xf32, #tpu.memory_space<vmem>>, vector<32x128xf32>,
    return
  }
}

module attributes {stable_mosaic.version = 11 : i64} {
  func.func @kernel(%arg0: memref<32x64xf32, #tpu.memory_space<vmem>>, %arg1: memref<64x128xf32, #tpu.memory_space<vmem>>, %arg2: memref<1x128xf32, #tpu.memory_space<vmem>>, %arg3: memref<1x128xf32, #tpu.memory_space<vmem>>, %arg4: memref<32x128xf32, #tpu.memory_space<vmem>>) attributes {dimension_semantics = [], scalar_prefetch = 0 : i64, scratch_operands = 0 : i64, tpu.core_type = #tpu.core_type<tc>} {
    %c0 = arith.constant 0 : index
    %c0_0 = arith.constant 0 : index
    %0 = vector.load %arg0[%c0, %c0_0] : memref<32x64xf32, #tpu.memory_space<vmem>>, vector<32x64xf32>
    %c0_1 = arith.constant 0 : index
    %c0_2 = arith.constant 0 : index
    %1 = vector.load %arg1[%c0_1, %c0_2] : memref<64x128xf32, #tpu.memory_space<vmem>>, vector<64x128xf32>
    %cst = arith.constant dense<0.000000e+00> : vector<32x128xf32>
    %2 = tpu.matmul %0, %1, %cst {dimension_numbers = #tpu.dot_dimension_numbers<[1], [0], [0], [1], [0, 0, 1, 1], [], []>} : vector<32x64xf32>, vector<64x128xf32>, vector<32x128xf32> -> vector<32x128xf32>
    %cst_3 = arith.constant dense<0.000000e+00> : vector<128xf32>
    %3 = vector.multi_reduction <add>, %2, %cst_3 [0] : vector<32x128xf32> to vector<128xf32>
    %4 = vector.shape_cast %3 : vector<128xf32> to vector<1x128xf32>
    %cst_4 = arith.constant 3.200000e+01 : f32
    %5 = vector.broadcast %cst_4 : f32 to vector<1x128xf32>
    %6 = arith.divf %4, %5 : vector<1x128xf32>
    %7 = vector.broadcast %6 : vector<1x128xf32> to vector<32x128xf32>
    %8 = arith.subf %2, %7 : vector<32x128xf32>
    %9 = arith.mulf %8, %8 : vector<32x128xf32>
    %cst_5 = arith.constant dense<0.000000e+00> : vector<128xf32>
    %10 = vector.multi_reduction <add>, %9, %cst_5 [0] : vector<32x128xf32> to vector<128xf32>
    %11 = vector.shape_cast %10 : vector<128xf32> to vector<1x128xf32>
    %cst_6 = arith.constant 3.200000e+01 : f32
    %12 = vector.broadcast %cst_6 : f32 to vector<1x128xf32>
    %13 = arith.divf %11, %12 : vector<1x128xf32>
    %14 = vector.broadcast %6 : vector<1x128xf32> to vector<32x128xf32>
    %15 = arith.subf %2, %14 : vector<32x128xf32>
    %cst_7 = arith.constant 9.99999974E-6 : f32
    %16 = vector.broadcast %cst_7 : f32 to vector<1x128xf32>
    %17 = arith.addf %13, %16 : vector<1x128xf32>
    %18 = math.rsqrt %17 : vector<1x128xf32>
    %19 = vector.broadcast %18 : vector<1x128xf32> to vector<32x128xf32>
    %20 = arith.mulf %15, %19 : vector<32x128xf32>
    %c0_8 = arith.constant 0 : index
    %c0_9 = arith.constant 0 : index
    %21 = vector.load %arg2[%c0_8, %c0_9] : memref<1x128xf32, #tpu.memory_space<vmem>>, vector<1x128xf32>
    %22 = vector.broadcast %21 : vector<1x128xf32> to vector<32x128xf32>
    %23 = arith.mulf %20, %22 : vector<32x128xf32>
    %c0_10 = arith.constant 0 : index
    %c0_11 = arith.constant 0 : index
    %24 = vector.load %arg3[%c0_10, %c0_11] : memref<1x128xf32, #tpu.memory_space<vmem>>, vector<1x128xf32>
    %25 = vector.broadcast %24 : vector<1x128xf32> to vector<32x128xf32>
    %26 = arith.addf %23, %25 : vector<32x128xf32>
    %c0_12 = arith.constant 0 : index
    %c0_13 = arith.constant 0 : index
    %27 = vector.load %arg4[%c0_12, %c0_13] : memref<32x128xf32, #tpu.memory_space<vmem>>, vector<32x128xf32>
    tpu.vector_store %arg4[%c0_12, %c0_13], %26 {strides = array<i32>} : memref<32x128xf32, #tpu.memory_space<vmem>>, vector<32x128xf32>,
    return
  }
}

module attributes {stable_mosaic.version = 11 : i64} {
  func.func @kernel(%arg0: memref<32x1152xf32, #tpu.memory_space<vmem>>, %arg1: memref<1152x128xf32, #tpu.memory_space<vmem>>, %arg2: memref<1x128xf32, #tpu.memory_space<vmem>>, %arg3: memref<1x128xf32, #tpu.memory_space<vmem>>, %arg4: memref<32x128xf32, #tpu.memory_space<vmem>>, %arg5: memref<32x128xf32, #tpu.memory_space<vmem>>) attributes {dimension_semantics = [], scalar_prefetch = 0 : i64, scratch_operands = 0 : i64, tpu.core_type = #tpu.core_type<tc>} {
    %c0 = arith.constant 0 : index
    %c0_0 = arith.constant 0 : index
    %0 = vector.load %arg0[%c0, %c0_0] : memref<32x1152xf32, #tpu.memory_space<vmem>>, vector<32x1152xf32>
    %c0_1 = arith.constant 0 : index
    %c0_2 = arith.constant 0 : index
    %1 = vector.load %arg1[%c0_1, %c0_2] : memref<1152x128xf32, #tpu.memory_space<vmem>>, vector<1152x128xf32>
    %cst = arith.constant dense<0.000000e+00> : vector<32x128xf32>
    %2 = tpu.matmul %0, %1, %cst {dimension_numbers = #tpu.dot_dimension_numbers<[1], [0], [0], [1], [0, 0, 1, 1], [], []>} : vector<32x1152xf32>, vector<1152x128xf32>, vector<32x128xf32> -> vector<32x128xf32>
    %cst_3 = arith.constant dense<0.000000e+00> : vector<128xf32>
    %3 = vector.multi_reduction <add>, %2, %cst_3 [0] : vector<32x128xf32> to vector<128xf32>
    %4 = vector.shape_cast %3 : vector<128xf32> to vector<1x128xf32>
    %cst_4 = arith.constant 3.200000e+01 : f32
    %5 = vector.broadcast %cst_4 : f32 to vector<1x128xf32>
    %6 = arith.divf %4, %5 : vector<1x128xf32>
    %7 = vector.broadcast %6 : vector<1x128xf32> to vector<32x128xf32>
    %8 = arith.subf %2, %7 : vector<32x128xf32>
    %9 = arith.mulf %8, %8 : vector<32x128xf32>
    %cst_5 = arith.constant dense<0.000000e+00> : vector<128xf32>
    %10 = vector.multi_reduction <add>, %9, %cst_5 [0] : vector<32x128xf32> to vector<128xf32>
    %11 = vector.shape_cast %10 : vector<128xf32> to vector<1x128xf32>
    %cst_6 = arith.constant 3.200000e+01 : f32
    %12 = vector.broadcast %cst_6 : f32 to vector<1x128xf32>
    %13 = arith.divf %11, %12 : vector<1x128xf32>
    %14 = vector.broadcast %6 : vector<1x128xf32> to vector<32x128xf32>
    %15 = arith.subf %2, %14 : vector<32x128xf32>
    %cst_7 = arith.constant 9.99999974E-6 : f32
    %16 = vector.broadcast %cst_7 : f32 to vector<1x128xf32>
    %17 = arith.addf %13, %16 : vector<1x128xf32>
    %18 = math.rsqrt %17 : vector<1x128xf32>
    %19 = vector.broadcast %18 : vector<1x128xf32> to vector<32x128xf32>
    %20 = arith.mulf %15, %19 : vector<32x128xf32>
    %c0_8 = arith.constant 0 : index
    %c0_9 = arith.constant 0 : index
    %21 = vector.load %arg2[%c0_8, %c0_9] : memref<1x128xf32, #tpu.memory_space<vmem>>, vector<1x128xf32>
    %22 = vector.broadcast %21 : vector<1x128xf32> to vector<32x128xf32>
    %23 = arith.mulf %20, %22 : vector<32x128xf32>
    %c0_10 = arith.constant 0 : index
    %c0_11 = arith.constant 0 : index
    %24 = vector.load %arg3[%c0_10, %c0_11] : memref<1x128xf32, #tpu.memory_space<vmem>>, vector<1x128xf32>
    %25 = vector.broadcast %24 : vector<1x128xf32> to vector<32x128xf32>
    %26 = arith.addf %23, %25 : vector<32x128xf32>
    %c0_12 = arith.constant 0 : index
    %c0_13 = arith.constant 0 : index
    %27 = vector.load %arg4[%c0_12, %c0_13] : memref<32x128xf32, #tpu.memory_space<vmem>>, vector<32x128xf32>
    %28 = arith.addf %26, %27 : vector<32x128xf32>
    %cst_14 = arith.constant 0.000000e+00 : f32
    %29 = vector.broadcast %cst_14 : f32 to vector<32x128xf32>
    %30 = arith.maximumf %28, %29 : vector<32x128xf32>
    %c0_15 = arith.constant 0 : index
    %c0_16 = arith.constant 0 : index
    %31 = vector.load %arg5[%c0_15, %c0_16] : memref<32x128xf32, #tpu.memory_space<vmem>>, vector<32x128xf32>
    tpu.vector_store %arg5[%c0_15, %c0_16], %30 {strides = array<i32>} : memref<32x128xf32, #tpu.memory_space<vmem>>, vector<32x128xf32>,
    return
  }
}

module attributes {stable_mosaic.version = 11 : i64} {
  func.func @kernel(%arg0: memref<32x1152xf32, #tpu.memory_space<vmem>>, %arg1: memref<1152x128xf32, #tpu.memory_space<vmem>>, %arg2: memref<1x128xf32, #tpu.memory_space<vmem>>, %arg3: memref<1x128xf32, #tpu.memory_space<vmem>>, %arg4: memref<32x128xf32, #tpu.memory_space<vmem>>) attributes {dimension_semantics = [], scalar_prefetch = 0 : i64, scratch_operands = 0 : i64, tpu.core_type = #tpu.core_type<tc>} {
    %c0 = arith.constant 0 : index
    %c0_0 = arith.constant 0 : index
    %0 = vector.load %arg0[%c0, %c0_0] : memref<32x1152xf32, #tpu.memory_space<vmem>>, vector<32x1152xf32>
    %c0_1 = arith.constant 0 : index
    %c0_2 = arith.constant 0 : index
    %1 = vector.load %arg1[%c0_1, %c0_2] : memref<1152x128xf32, #tpu.memory_space<vmem>>, vector<1152x128xf32>
    %cst = arith.constant dense<0.000000e+00> : vector<32x128xf32>
    %2 = tpu.matmul %0, %1, %cst {dimension_numbers = #tpu.dot_dimension_numbers<[1], [0], [0], [1], [0, 0, 1, 1], [], []>} : vector<32x1152xf32>, vector<1152x128xf32>, vector<32x128xf32> -> vector<32x128xf32>
    %cst_3 = arith.constant dense<0.000000e+00> : vector<128xf32>
    %3 = vector.multi_reduction <add>, %2, %cst_3 [0] : vector<32x128xf32> to vector<128xf32>
    %4 = vector.shape_cast %3 : vector<128xf32> to vector<1x128xf32>
    %cst_4 = arith.constant 3.200000e+01 : f32
    %5 = vector.broadcast %cst_4 : f32 to vector<1x128xf32>
    %6 = arith.divf %4, %5 : vector<1x128xf32>
    %7 = vector.broadcast %6 : vector<1x128xf32> to vector<32x128xf32>
    %8 = arith.subf %2, %7 : vector<32x128xf32>
    %9 = arith.mulf %8, %8 : vector<32x128xf32>
    %cst_5 = arith.constant dense<0.000000e+00> : vector<128xf32>
    %10 = vector.multi_reduction <add>, %9, %cst_5 [0] : vector<32x128xf32> to vector<128xf32>
    %11 = vector.shape_cast %10 : vector<128xf32> to vector<1x128xf32>
    %cst_6 = arith.constant 3.200000e+01 : f32
    %12 = vector.broadcast %cst_6 : f32 to vector<1x128xf32>
    %13 = arith.divf %11, %12 : vector<1x128xf32>
    %14 = vector.broadcast %6 : vector<1x128xf32> to vector<32x128xf32>
    %15 = arith.subf %2, %14 : vector<32x128xf32>
    %cst_7 = arith.constant 9.99999974E-6 : f32
    %16 = vector.broadcast %cst_7 : f32 to vector<1x128xf32>
    %17 = arith.addf %13, %16 : vector<1x128xf32>
    %18 = math.rsqrt %17 : vector<1x128xf32>
    %19 = vector.broadcast %18 : vector<1x128xf32> to vector<32x128xf32>
    %20 = arith.mulf %15, %19 : vector<32x128xf32>
    %c0_8 = arith.constant 0 : index
    %c0_9 = arith.constant 0 : index
    %21 = vector.load %arg2[%c0_8, %c0_9] : memref<1x128xf32, #tpu.memory_space<vmem>>, vector<1x128xf32>
    %22 = vector.broadcast %21 : vector<1x128xf32> to vector<32x128xf32>
    %23 = arith.mulf %20, %22 : vector<32x128xf32>
    %c0_10 = arith.constant 0 : index
    %c0_11 = arith.constant 0 : index
    %24 = vector.load %arg3[%c0_10, %c0_11] : memref<1x128xf32, #tpu.memory_space<vmem>>, vector<1x128xf32>
    %25 = vector.broadcast %24 : vector<1x128xf32> to vector<32x128xf32>
    %26 = arith.addf %23, %25 : vector<32x128xf32>
    %cst_12 = arith.constant 0.000000e+00 : f32
    %27 = vector.broadcast %cst_12 : f32 to vector<32x128xf32>
    %28 = arith.maximumf %26, %27 : vector<32x128xf32>
    %c0_13 = arith.constant 0 : index
    %c0_14 = arith.constant 0 : index
    %29 = vector.load %arg4[%c0_13, %c0_14] : memref<32x128xf32, #tpu.memory_space<vmem>>, vector<32x128xf32>
    tpu.vector_store %arg4[%c0_13, %c0_14], %28 {strides = array<i32>} : memref<32x128xf32, #tpu.memory_space<vmem>>, vector<32x128xf32>,
    return
  }
}

module attributes {stable_mosaic.version = 11 : i64} {
  func.func @_wsum4_kernel(%arg0: memref<128x128xf32, #tpu.memory_space<vmem>>, %arg1: memref<128x128xf32, #tpu.memory_space<vmem>>, %arg2: memref<128x128xf32, #tpu.memory_space<vmem>>, %arg3: memref<128x128xf32, #tpu.memory_space<vmem>>, %arg4: memref<128x1xf32, #tpu.memory_space<vmem>>, %arg5: memref<128x1xf32, #tpu.memory_space<vmem>>, %arg6: memref<128x1xf32, #tpu.memory_space<vmem>>, %arg7: memref<128x1xf32, #tpu.memory_space<vmem>>, %arg8: memref<128x128xf32, #tpu.memory_space<vmem>>) attributes {dimension_semantics = [], scalar_prefetch = 0 : i64, scratch_operands = 0 : i64, tpu.core_type = #tpu.core_type<tc>} {
    %c0 = arith.constant 0 : index
    %c0_0 = arith.constant 0 : index
    %0 = vector.load %arg4[%c0, %c0_0] : memref<128x1xf32, #tpu.memory_space<vmem>>, vector<128x1xf32>
    %c0_1 = arith.constant 0 : index
    %c0_2 = arith.constant 0 : index
    %1 = vector.load %arg0[%c0_1, %c0_2] : memref<128x128xf32, #tpu.memory_space<vmem>>, vector<128x128xf32>
    %2 = vector.broadcast %0 : vector<128x1xf32> to vector<128x128xf32>
    %3 = arith.mulf %2, %1 : vector<128x128xf32>
    %c0_3 = arith.constant 0 : index
    %c0_4 = arith.constant 0 : index
    %4 = vector.load %arg5[%c0_3, %c0_4] : memref<128x1xf32, #tpu.memory_space<vmem>>, vector<128x1xf32>
    %c0_5 = arith.constant 0 : index
    %c0_6 = arith.constant 0 : index
    %5 = vector.load %arg1[%c0_5, %c0_6] : memref<128x128xf32, #tpu.memory_space<vmem>>, vector<128x128xf32>
    %6 = vector.broadcast %4 : vector<128x1xf32> to vector<128x128xf32>
    %7 = arith.mulf %6, %5 : vector<128x128xf32>
    %8 = arith.addf %3, %7 : vector<128x128xf32>
    %c0_7 = arith.constant 0 : index
    %c0_8 = arith.constant 0 : index
    %9 = vector.load %arg6[%c0_7, %c0_8] : memref<128x1xf32, #tpu.memory_space<vmem>>, vector<128x1xf32>
    %c0_9 = arith.constant 0 : index
    %c0_10 = arith.constant 0 : index
    %10 = vector.load %arg2[%c0_9, %c0_10] : memref<128x128xf32, #tpu.memory_space<vmem>>, vector<128x128xf32>
    %11 = vector.broadcast %9 : vector<128x1xf32> to vector<128x128xf32>
    %12 = arith.mulf %11, %10 : vector<128x128xf32>
    %13 = arith.addf %8, %12 : vector<128x128xf32>
    %c0_11 = arith.constant 0 : index
    %c0_12 = arith.constant 0 : index
    %14 = vector.load %arg7[%c0_11, %c0_12] : memref<128x1xf32, #tpu.memory_space<vmem>>, vector<128x1xf32>
    %c0_13 = arith.constant 0 : index
    %c0_14 = arith.constant 0 : index
    %15 = vector.load %arg3[%c0_13, %c0_14] : memref<128x128xf32, #tpu.memory_space<vmem>>, vector<128x128xf32>
    %16 = vector.broadcast %14 : vector<128x1xf32> to vector<128x128xf32>
    %17 = arith.mulf %16, %15 : vector<128x128xf32>
    %18 = arith.addf %13, %17 : vector<128x128xf32>
    %c0_15 = arith.constant 0 : index
    %c0_16 = arith.constant 0 : index
    %19 = vector.load %arg8[%c0_15, %c0_16] : memref<128x128xf32, #tpu.memory_space<vmem>>, vector<128x128xf32>
    tpu.vector_store %arg8[%c0_15, %c0_16], %18 {strides = array<i32>} : memref<128x128xf32, #tpu.memory_space<vmem>>, vector<128x128xf32>,
    return
  }
}

module attributes {stable_mosaic.version = 11 : i64} {
  func.func @kernel(%arg0: memref<128x192xf32, #tpu.memory_space<vmem>>, %arg1: memref<192x64xf32, #tpu.memory_space<vmem>>, %arg2: memref<1x64xf32, #tpu.memory_space<vmem>>, %arg3: memref<128x64xf32, #tpu.memory_space<vmem>>) attributes {dimension_semantics = [], scalar_prefetch = 0 : i64, scratch_operands = 0 : i64, tpu.core_type = #tpu.core_type<tc>} {
    %c0 = arith.constant 0 : index
    %c0_0 = arith.constant 0 : index
    %0 = vector.load %arg0[%c0, %c0_0] : memref<128x192xf32, #tpu.memory_space<vmem>>, vector<128x192xf32>
    %c0_1 = arith.constant 0 : index
    %c0_2 = arith.constant 0 : index
    %1 = vector.load %arg1[%c0_1, %c0_2] : memref<192x64xf32, #tpu.memory_space<vmem>>, vector<192x64xf32>
    %cst = arith.constant dense<0.000000e+00> : vector<128x64xf32>
    %2 = tpu.matmul %0, %1, %cst {dimension_numbers = #tpu.dot_dimension_numbers<[1], [0], [0], [1], [0, 0, 1, 1], [], []>} : vector<128x192xf32>, vector<192x64xf32>, vector<128x64xf32> -> vector<128x64xf32>
    %c0_3 = arith.constant 0 : index
    %c0_4 = arith.constant 0 : index
    %3 = vector.load %arg2[%c0_3, %c0_4] : memref<1x64xf32, #tpu.memory_space<vmem>>, vector<1x64xf32>
    %4 = vector.broadcast %3 : vector<1x64xf32> to vector<128x64xf32>
    %5 = arith.addf %2, %4 : vector<128x64xf32>
    %c0_5 = arith.constant 0 : index
    %c0_6 = arith.constant 0 : index
    %6 = vector.load %arg3[%c0_5, %c0_6] : memref<128x64xf32, #tpu.memory_space<vmem>>, vector<128x64xf32>
    tpu.vector_store %arg3[%c0_5, %c0_6], %5 {strides = array<i32>} : memref<128x64xf32, #tpu.memory_space<vmem>>, vector<128x64xf32>,
    return
  }
}

module attributes {stable_mosaic.version = 11 : i64} {
  func.func @kernel(%arg0: memref<128x64xf32, #tpu.memory_space<vmem>>, %arg1: memref<64x128xf32, #tpu.memory_space<vmem>>, %arg2: memref<1x128xf32, #tpu.memory_space<vmem>>, %arg3: memref<128x128xf32, #tpu.memory_space<vmem>>) attributes {dimension_semantics = [], scalar_prefetch = 0 : i64, scratch_operands = 0 : i64, tpu.core_type = #tpu.core_type<tc>} {
    %c0 = arith.constant 0 : index
    %c0_0 = arith.constant 0 : index
    %0 = vector.load %arg0[%c0, %c0_0] : memref<128x64xf32, #tpu.memory_space<vmem>>, vector<128x64xf32>
    %c0_1 = arith.constant 0 : index
    %c0_2 = arith.constant 0 : index
    %1 = vector.load %arg1[%c0_1, %c0_2] : memref<64x128xf32, #tpu.memory_space<vmem>>, vector<64x128xf32>
    %cst = arith.constant dense<0.000000e+00> : vector<128x128xf32>
    %2 = tpu.matmul %0, %1, %cst {dimension_numbers = #tpu.dot_dimension_numbers<[1], [0], [0], [1], [0, 0, 1, 1], [], []>} : vector<128x64xf32>, vector<64x128xf32>, vector<128x128xf32> -> vector<128x128xf32>
    %c0_3 = arith.constant 0 : index
    %c0_4 = arith.constant 0 : index
    %3 = vector.load %arg2[%c0_3, %c0_4] : memref<1x128xf32, #tpu.memory_space<vmem>>, vector<1x128xf32>
    %4 = vector.broadcast %3 : vector<1x128xf32> to vector<128x128xf32>
    %5 = arith.addf %2, %4 : vector<128x128xf32>
    %c0_5 = arith.constant 0 : index
    %c0_6 = arith.constant 0 : index
    %6 = vector.load %arg3[%c0_5, %c0_6] : memref<128x128xf32, #tpu.memory_space<vmem>>, vector<128x128xf32>
    tpu.vector_store %arg3[%c0_5, %c0_6], %5 {strides = array<i32>} : memref<128x128xf32, #tpu.memory_space<vmem>>, vector<128x128xf32>,
    return
  }
}

module attributes {stable_mosaic.version = 11 : i64} {
  func.func @_sigmoid_nms_clamp_kernel(%arg0: memref<1x128xf32, #tpu.memory_space<vmem>>, %arg1: memref<9x128xf32, #tpu.memory_space<vmem>>, %arg2: memref<1x128xf32, #tpu.memory_space<vmem>>) attributes {dimension_semantics = [], scalar_prefetch = 0 : i64, scratch_operands = 0 : i64, tpu.core_type = #tpu.core_type<tc>} {
    %c0 = arith.constant 0 : index
    %c0_0 = arith.constant 0 : index
    %0 = vector.load %arg0[%c0, %c0_0] : memref<1x128xf32, #tpu.memory_space<vmem>>, vector<1x128xf32>
    %1 = arith.negf %0 : vector<1x128xf32>
    %2 = math.exp %1 : vector<1x128xf32>
    %cst = arith.constant 1.000000e+00 : f32
    %3 = vector.broadcast %cst : f32 to vector<1x128xf32>
    %4 = arith.addf %3, %2 : vector<1x128xf32>
    %5 = arith.divf %3, %4 : vector<1x128xf32>
    %c0_1 = arith.constant 0 : index
    %c0_2 = arith.constant 0 : index
    %6 = vector.load %arg1[%c0_1, %c0_2] : memref<9x128xf32, #tpu.memory_space<vmem>>, vector<9x128xf32>
    %7 = arith.negf %6 : vector<9x128xf32>
    %8 = math.exp %7 : vector<9x128xf32>
    %cst_3 = arith.constant 1.000000e+00 : f32
    %9 = vector.broadcast %cst_3 : f32 to vector<9x128xf32>
    %10 = arith.addf %9, %8 : vector<9x128xf32>
    %11 = arith.divf %9, %10 : vector<9x128xf32>
    %cst_4 = arith.constant dense<0xFF800000> : vector<128xf32>
    %12 = vector.multi_reduction <maximumf>, %11, %cst_4 [0] : vector<9x128xf32> to vector<128xf32>
    %13 = vector.shape_cast %12 : vector<128xf32> to vector<1x128xf32>
    %14 = arith.cmpf oeq, %13, %5 : vector<1x128xf32>
    %15 = arith.extui %14 : vector<1x128xi1> to vector<1x128xi32>
    %16 = arith.sitofp %15 : vector<1x128xi32> to vector<1x128xf32>
    %17 = arith.mulf %5, %16 : vector<1x128xf32>
    %cst_5 = arith.constant 1.1920929E-7 : f32
    %cst_6 = arith.constant 0.99999988 : f32
    %18 = vector.broadcast %cst_5 : f32 to vector<1x128xf32>
    %19 = arith.maximumf %18, %17 : vector<1x128xf32>
    %20 = vector.broadcast %cst_6 : f32 to vector<1x128xf32>
    %21 = arith.minimumf %20, %19 : vector<1x128xf32>
    %c0_7 = arith.constant 0 : index
    %c0_8 = arith.constant 0 : index
    %22 = vector.load %arg2[%c0_7, %c0_8] : memref<1x128xf32, #tpu.memory_space<vmem>>, vector<1x128xf32>
    tpu.vector_store %arg2[%c0_7, %c0_8], %21 {strides = array<i32>} : memref<1x128xf32, #tpu.memory_space<vmem>>, vector<1x128xf32>,
    return
  }
}

</mosaic_0001>

<bundles_post_ra>
// kernel: heatmap2feat_forward.16
= control target key start
LH: loop header
LB: loop body
LE: loop exit
PB: predicated region body
PF: predicated region fallthrough
CT: control target
= control target key end

     0   :  { %s238_s0 = inlined_call_operand.vmem [shape: f32[64,128], index: 0, kind: input, shape index: {}]   ;;  %s239_s1 = inlined_call_operand.vmem [shape: f32[64,128], index: 1, kind: input, shape index: {}]   ;;  %s240_s2 = inlined_call_operand.vmem [shape: f32[64,128], index: 2, kind: input, shape index: {}]   ;;  %s241_s3 = inlined_call_operand.vmem [shape: f32[64,128], index: 3, kind: input, shape index: {}]   ;;  %s242_s4 = inlined_call_operand.vmem [shape: f32[64,128], index: 4, kind: output, shape index: {}]  }
   0x1   :  { %v17_v0 = vld [vmem:[%s238_s0] sm:$0xff]  ;;  %v18_v5 = vld [vmem:[%s238_s0 + $0x8] sm:$0xff]  ;;  %v19_v11 = vld [vmem:[%s238_s0 + $0x10] sm:$0xff] }
   0x2   :  { %v25_v1 = vld [vmem:[%s239_s1] sm:$0xff]  ;;  %v26_v6 = vld [vmem:[%s239_s1 + $0x8] sm:$0xff]  ;;  %v27_v13 = vld [vmem:[%s239_s1 + $0x10] sm:$0xff] }
   0x3   :  { %v41_v2 = vld [vmem:[%s240_s2] sm:$0xff]  ;;  %v33_v3 = vmax.f32 %v17_v0, %v25_v1  ;;  %v34_v8 = vmax.f32 %v18_v5, %v26_v6  ;;  %v42_v9 = vld [vmem:[%s240_s2 + $0x8] sm:$0xff]  ;;  %v43_v14 = vld [vmem:[%s240_s2 + $0x10] sm:$0xff]  ;;  %v35_v17 = vmax.f32 %v19_v11, %v27_v13 }
   0x4   :  { %v49_v4 = vld [vmem:[%s241_s3] sm:$0xff]  ;;  %v50_v10 = vld [vmem:[%s241_s3 + $0x8] sm:$0xff]  ;;  %v51_v15 = vld [vmem:[%s241_s3 + $0x10] sm:$0xff] }
   0x5   :  { %v57_v7 = vmax.f32 %v41_v2, %v49_v4  ;;  %v58_v12 = vmax.f32 %v42_v9, %v50_v10  ;;  %v59_v18 = vmax.f32 %v43_v14, %v51_v15  ;;  %v20_v19 = vld [vmem:[%s238_s0 + $0x18] sm:$0xff]  ;;  %v21_v25 = vld [vmem:[%s238_s0 + $0x20] sm:$0xff]  ;;  %v22_v33 = vld [vmem:[%s238_s0 + $0x28] sm:$0xff] }
   0x6   :  { %v28_v20 = vld [vmem:[%s239_s1 + $0x18] sm:$0xff]  ;;  %v29_v26 = vld [vmem:[%s239_s1 + $0x20] sm:$0xff]  ;;  %v30_v36 = vld [vmem:[%s239_s1 + $0x28] sm:$0xff] }
   0x7   :  { %v65_v16 = vmax.f32 %v33_v3, %v57_v7  ;;  %v44_v21 = vld [vmem:[%s240_s2 + $0x18] sm:$0xff]  ;;  %v66_v22 = vmax.f32 %v34_v8, %v58_v12  ;;  %v36_v23 = vmax.f32 %v20_v19, %v28_v20  ;;  %v67_v28 = vmax.f32 %v35_v17, %v59_v18  ;;  %v45_v31 = vld [vmem:[%s240_s2 + $0x20] sm:$0xff]  ;;  %v46_v37 = vld [vmem:[%s240_s2 + $0x28] sm:$0xff] }
   0x8   :  { %v52_v24 = vld [vmem:[%s241_s3 + $0x18] sm:$0xff]  ;;  %v37_v30 = vmax.f32 %v21_v25, %v29_v26  ;;  %v53_v32 = vld [vmem:[%s241_s3 + $0x20] sm:$0xff]  ;;  %v54_v38 = vld [vmem:[%s241_s3 + $0x28] sm:$0xff]  ;;  %v38_v41 = vmax.f32 %v22_v33, %v30_v36 }
   0x9   :  { %v73_v27 = vmax.f32 %v65_v16, 0.0  ;;  %v60_v29 = vmax.f32 %v44_v21, %v52_v24  ;;  %v74_v34 = vmax.f32 %v66_v22, 0.0  ;;  %v61_v35 = vmax.f32 %v45_v31, %v53_v32  ;;  %v23_v43 = vld [vmem:[%s238_s0 + $0x30] sm:$0xff]  ;;  %v24_v49 = vld [vmem:[%s238_s0 + $0x38] sm:$0xff] }
   0xa   :  { %v75_v39 = vmax.f32 %v67_v28, 0.0  ;;  %v62_v42 = vmax.f32 %v46_v37, %v54_v38  ;;  %v31_v44 = vld [vmem:[%s239_s1 + $0x30] sm:$0xff]  ;;  %v32_v50 = vld [vmem:[%s239_s1 + $0x38] sm:$0xff] }
   0xb   :  { %81 = vst [vmem:[%s242_s4] sm:$0xff] %v73_v27  ;;  %v68_v40 = vmax.f32 %v36_v23, %v60_v29  ;;  %v47_v45 = vld [vmem:[%s240_s2 + $0x30] sm:$0xff]  ;;  %82 = vst [vmem:[%s242_s4 + $0x8] sm:$0xff] %v74_v34  ;;  %v69_v46 = vmax.f32 %v37_v30, %v61_v35  ;;  %v39_v47 = vmax.f32 %v23_v43, %v31_v44  ;;  %v48_v55 = vld [vmem:[%s240_s2 + $0x38] sm:$0xff] }
   0xc   :  { %v55_v48 = vld [vmem:[%s241_s3 + $0x30] sm:$0xff]  ;;  %83 = vst [vmem:[%s242_s4 + $0x10] sm:$0xff] %v75_v39  ;;  %v70_v52 = vmax.f32 %v38_v41, %v62_v42  ;;  %v40_v54 = vmax.f32 %v24_v49, %v32_v50  ;;  %v56_v56 = vld [vmem:[%s241_s3 + $0x38] sm:$0xff] }
   0xd   :  { %v76_v51 = vmax.f32 %v68_v40, 0.0  ;;  %v63_v53 = vmax.f32 %v47_v45, %v55_v48  ;;  %v77_v57 = vmax.f32 %v69_v46, 0.0  ;;  %v64_v58 = vmax.f32 %v48_v55, %v56_v56 }
   0xe   :  { %v78_v59 = vmax.f32 %v70_v52, 0.0 }
   0xf   :  { %84 = vst [vmem:[%s242_s4 + $0x18] sm:$0xff] %v76_v51  ;;  %v71_v60 = vmax.f32 %v39_v47, %v63_v53  ;;  %85 = vst [vmem:[%s242_s4 + $0x20] sm:$0xff] %v77_v57  ;;  %v72_v61 = vmax.f32 %v40_v54, %v64_v58 }
  0x10   :  { %86 = vst [vmem:[%s242_s4 + $0x28] sm:$0xff] %v78_v59 }
  0x11   :  { %v79_v62 = vmax.f32 %v71_v60, 0.0  ;;  %v80_v63 = vmax.f32 %v72_v61, 0.0 }
  0x13   :  { %87 = vst [vmem:[%s242_s4 + $0x30] sm:$0xff] %v79_v62  ;;  %88 = vst [vmem:[%s242_s4 + $0x38] sm:$0xff] %v80_v63 }

// kernel: heatmap2feat_forward.15
= control target key start
LH: loop header
LB: loop body
LE: loop exit
PB: predicated region body
PF: predicated region fallthrough
CT: control target
= control target key end

     0   :  { %v1537_v0 = vmov 0.0   ;;  %vm169_vm0 = vcmask 523264   ;;  %s3745_s1 = inlined_call_operand.vmem [shape: f32[192,64], index: 1, kind: input, shape index: {}]   ;;  %s3746_s0 = inlined_call_operand.vmem [shape: f32[512,192], index: 0, kind: input, shape index: {}]   ;;  %s3747_s2 = inlined_call_operand.vmem [shape: f32[1,64], index: 2, kind: input, shape index: {}]   ;;  %s3748_s3 = inlined_call_operand.vmem [shape: f32[1,64], index: 3, kind: input, shape index: {}]   ;;  %s3749_s4 = inlined_call_operand.vmem [shape: f32[512,64], index: 4, kind: output, shape index: {}]  }
   0x1   :  { %362 = vmatprep.subr.mxu0 %v1537_v0  ;;  %v160_v1 = vld [vmem:[%s3745_s1 + $0x78] sm:$0xff]  ;;  %v159_v2 = vld [vmem:[%s3745_s1 + $0x70] sm:$0xff]  ;;  %1486 = vmatprep.subr.mxu1 %v1537_v0  ;;  %v158_v3 = vld [vmem:[%s3745_s1 + $0x68] sm:$0xff] }
   0x2   :  { %363 = vmatpush1.msra.mxu0 %v160_v1  ;;  %1510 = vmatpush1.msra.mxu1 %v160_v1  ;;  %v157_v4 = vld [vmem:[%s3745_s1 + $0x60] sm:$0xff]  ;;  %v156_v5 = vld [vmem:[%s3745_s1 + $0x58] sm:$0xff]  ;;  %v155_v6 = vld [vmem:[%s3745_s1 + $0x50] sm:$0xff] }
   0x3   :  { %364 = vmatprep.subr.mxu0 %v1537_v0  ;;  %1487 = vmatprep.subr.mxu1 %v1537_v0  ;;  %v18_v7 = vld [vmem:[%s3746_s0 + $0x8] sm:$0xff]  ;;  %v153_v9 = vld [vmem:[%s3745_s1 + $0x40] sm:$0xff]  ;;  %v152_v10 = vld [vmem:[%s3745_s1 + $0x38] sm:$0xff] }
   0x4   :  { %365 = vmatpush1.msra.mxu0 %v159_v2  ;;  %1511 = vmatpush1.msra.mxu1 %v159_v2  ;;  %v154_v8 = vld [vmem:[%s3745_s1 + $0x48] sm:$0xff]  ;;  %v151_v11 = vld [vmem:[%s3745_s1 + $0x30] sm:$0xff]  ;;  %v149_v13 = vld [vmem:[%s3745_s1 + $0x20] sm:$0xff] }
   0x5   :  { %366 = vmatprep.subr.mxu0 %v1537_v0  ;;  %1488 = vmatprep.subr.mxu1 %v1537_v0  ;;  %v150_v12 = vld [vmem:[%s3745_s1 + $0x28] sm:$0xff]  ;;  %v148_v14 = vld [vmem:[%s3745_s1 + $0x18] sm:$0xff]  ;;  %v147_v15 = vld [vmem:[%s3745_s1 + $0x10] sm:$0xff] }
   0x6   :  { %367 = vmatpush1.msra.mxu0 %v158_v3  ;;  %1512 = vmatpush1.msra.mxu1 %v158_v3  ;;  %v146_v16 = vld [vmem:[%s3745_s1 + $0x8] sm:$0xff]  ;;  %v145_v17 = vld [vmem:[%s3745_s1] sm:$0xff]  ;;  %v168_v18 = vld [vmem:[%s3745_s1 + $0xb8] sm:$0xff] }
   0x7   :  { %368 = vmatprep.subr.mxu0 %v1537_v0  ;;  %1489 = vmatprep.subr.mxu1 %v1537_v0  ;;  %v167_v19 = vld [vmem:[%s3745_s1 + $0xb0] sm:$0xff]  ;;  %v166_v20 = vld [vmem:[%s3745_s1 + $0xa8] sm:$0xff]  ;;  %v165_v21 = vld [vmem:[%s3745_s1 + $0xa0] sm:$0xff] }
   0x8   :  { %369 = vmatpush1.msra.mxu0 %v157_v4  ;;  %1513 = vmatpush1.msra.mxu1 %v157_v4  ;;  %v164_v22 = vld [vmem:[%s3745_s1 + $0x98] sm:$0xff]  ;;  %v163_v23 = vld [vmem:[%s3745_s1 + $0x90] sm:$0xff]  ;;  %v162_v24 = vld [vmem:[%s3745_s1 + $0x88] sm:$0xff] }
   0x9   :  { %370 = vmatprep.subr.mxu0 %v1537_v0  ;;  %1490 = vmatprep.subr.mxu1 %v1537_v0  ;;  %v161_v25 = vld [vmem:[%s3745_s1 + $0x80] sm:$0xff]  ;;  %v20_v27 = vld [vmem:[%s3746_s0 + $0x18] sm:$0xff]  ;;  %v82_v28 = vld [vmem:[%s3746_s0 + $0x208] sm:$0xff] }
   0xa   :  { %371 = vmatpush1.msra.mxu0 %v156_v5  ;;  %1420 = vmatprep.mubr.msk.f32.mxu0 %vm169_vm0, %v18_v7  ;;  %v17_v26 = vld [vmem:[%s3746_s0] sm:$0xff]  ;;  %v84_v30 = vld [vmem:[%s3746_s0 + $0x218] sm:$0xff]  ;;  %v19_v31 = vld [vmem:[%s3746_s0 + $0x10] sm:$0xff] }
   0xb   :  { %372 = vmatprep.subr.mxu0 %v1537_v0  ;;  %1514 = vmatpush1.msra.mxu1 %v156_v5  ;;  %v81_v29 = vld [vmem:[%s3746_s0 + $0x200] sm:$0xff]  ;;  %v22_v32 = vld [vmem:[%s3746_s0 + $0x28] sm:$0xff]  ;;  %v83_v33 = vld [vmem:[%s3746_s0 + $0x210] sm:$0xff] }
   0xc   :  { %373 = vmatpush1.msra.mxu0 %v155_v6  ;;  %1491 = vmatprep.subr.mxu1 %v1537_v0  ;;  %v86_v34 = vld [vmem:[%s3746_s0 + $0x228] sm:$0xff]  ;;  %v21_v35 = vld [vmem:[%s3746_s0 + $0x20] sm:$0xff]  ;;  %v24_v36 = vld [vmem:[%s3746_s0 + $0x38] sm:$0xff] }
   0xd   :  { %374 = vmatprep.subr.mxu0 %v1537_v0  ;;  %1515 = vmatpush1.msra.mxu1 %v155_v6  ;;  %v85_v37 = vld [vmem:[%s3746_s0 + $0x220] sm:$0xff]  ;;  %v88_v38 = vld [vmem:[%s3746_s0 + $0x238] sm:$0xff]  ;;  %v23_v39 = vld [vmem:[%s3746_s0 + $0x30] sm:$0xff] }
   0xe   :  { %375 = vmatpush1.msra.mxu0 %v154_v8  ;;  %1492 = vmatprep.subr.mxu1 %v1537_v0  ;;  %v26_v40 = vld [vmem:[%s3746_s0 + $0x48] sm:$0xff]  ;;  %v87_v41 = vld [vmem:[%s3746_s0 + $0x230] sm:$0xff]  ;;  %v25_v43 = vld [vmem:[%s3746_s0 + $0x40] sm:$0xff] }
   0xf   :  { %376 = vmatprep.subr.mxu0 %v1537_v0  ;;  %1516 = vmatpush1.msra.mxu1 %v154_v8  ;;  %v90_v42 = vld [vmem:[%s3746_s0 + $0x248] sm:$0xff]  ;;  %v28_v44 = vld [vmem:[%s3746_s0 + $0x58] sm:$0xff]  ;;  %v89_v45 = vld [vmem:[%s3746_s0 + $0x240] sm:$0xff] }
  0x10   :  { %377 = vmatpush1.msra.mxu0 %v153_v9  ;;  %1493 = vmatprep.subr.mxu1 %v1537_v0  ;;  %v92_v46 = vld [vmem:[%s3746_s0 + $0x258] sm:$0xff]  ;;  %v27_v47 = vld [vmem:[%s3746_s0 + $0x50] sm:$0xff]  ;;  %v30_v48 = vld [vmem:[%s3746_s0 + $0x68] sm:$0xff] }
  0x11   :  { %378 = vmatprep.subr.mxu0 %v1537_v0  ;;  %1517 = vmatpush1.msra.mxu1 %v153_v9  ;;  %v91_v49 = vld [vmem:[%s3746_s0 + $0x250] sm:$0xff]  ;;  %v94_v50 = vld [vmem:[%s3746_s0 + $0x268] sm:$0xff]  ;;  %v29_v51 = vld [vmem:[%s3746_s0 + $0x60] sm:$0xff] }
  0x12   :  { %379 = vmatpush1.msra.mxu0 %v152_v10  ;;  %1494 = vmatprep.subr.mxu1 %v1537_v0  ;;  %v32_v52 = vld [vmem:[%s3746_s0 + $0x78] sm:$0xff]  ;;  %v93_v53 = vld [vmem:[%s3746_s0 + $0x260] sm:$0xff]  ;;  %v31_v55 = vld [vmem:[%s3746_s0 + $0x70] sm:$0xff] }
  0x13   :  { %380 = vmatprep.subr.mxu0 %v1537_v0  ;;  %1518 = vmatpush1.msra.mxu1 %v152_v10  ;;  %v96_v54 = vld [vmem:[%s3746_s0 + $0x278] sm:$0xff]  ;;  %v34_v56 = vld [vmem:[%s3746_s0 + $0x88] sm:$0xff]  ;;  %v95_v57 = vld [vmem:[%s3746_s0 + $0x270] sm:$0xff] }
  0x14   :  { %381 = vmatpush1.msra.mxu0 %v151_v11  ;;  %1495 = vmatprep.subr.mxu1 %v1537_v0  ;;  %v98_v58 = vld [vmem:[%s3746_s0 + $0x288] sm:$0xff]  ;;  %v33_v59 = vld [vmem:[%s3746_s0 + $0x80] sm:$0xff]  ;;  %v36_v60 = vld [vmem:[%s3746_s0 + $0x98] sm:$0xff] }
  0x15   :  { %382 = vmatprep.subr.mxu0 %v1537_v0  ;;  %1519 = vmatpush1.msra.mxu1 %v151_v11  ;;  %v97_v61 = vld [vmem:[%s3746_s0 + $0x280] sm:$0xff]  ;;  %v100_v62 = vld [vmem:[%s3746_s0 + $0x298] sm:$0xff]  ;;  %v35_v63 = vld [vmem:[%s3746_s0 + $0x90] sm:$0xff] }
  0x16   :  { %383 = vmatpush1.msra.mxu0 %v150_v12  ;;  %1496 = vmatprep.subr.mxu1 %v1537_v0  ;;  %v99_v1 = vld [vmem:[%s3746_s0 + $0x290] sm:$0xff]  ;;  %v102_v2 = vld [vmem:[%s3746_s0 + $0x2a8] sm:$0xff]  ;;  %v37_v3 = vld [vmem:[%s3746_s0 + $0xa0] sm:$0xff] }
  0x17   :  { %384 = vmatprep.subr.mxu0 %v1537_v0  ;;  %1520 = vmatpush1.msra.mxu1 %v150_v12  ;;  %v40_v4 = vld [vmem:[%s3746_s0 + $0xb8] sm:$0xff]  ;;  %v101_v5 = vld [vmem:[%s3746_s0 + $0x2a0] sm:$0xff]  ;;  %v39_v7 = vld [vmem:[%s3746_s0 + $0xb0] sm:$0xff] }
  0x18   :  { %385 = vmatpush1.msra.mxu0 %v149_v13  ;;  %1497 = vmatprep.subr.mxu1 %v1537_v0  ;;  %v104_v6 = vld [vmem:[%s3746_s0 + $0x2b8] sm:$0xff]  ;;  %v42_v8 = vld [vmem:[%s3746_s0 + $0xc8] sm:$0xff]  ;;  %v103_v9 = vld [vmem:[%s3746_s0 + $0x2b0] sm:$0xff] }
  0x19   :  { %386 = vmatprep.subr.mxu0 %v1537_v0  ;;  %1521 = vmatpush1.msra.mxu1 %v149_v13  ;;  %v106_v10 = vld [vmem:[%s3746_s0 + $0x2c8] sm:$0xff]  ;;  %v41_v11 = vld [vmem:[%s3746_s0 + $0xc0] sm:$0xff]  ;;  %v44_v12 = vld [vmem:[%s3746_s0 + $0xd8] sm:$0xff] }
  0x1a   :  { %387 = vmatpush1.msra.mxu0 %v148_v14  ;;  %1498 = vmatprep.subr.mxu1 %v1537_v0  ;;  %v105_v13 = vld [vmem:[%s3746_s0 + $0x2c0] sm:$0xff] }
  0x1b   :  { %388 = vmatprep.subr.mxu0 %v1537_v0  ;;  %1522 = vmatpush1.msra.mxu1 %v148_v14  ;;  %v108_v14 = vld [vmem:[%s3746_s0 + $0x2d8] sm:$0xff] }
  0x1c   :  { %389 = vmatpush1.msra.mxu0 %v147_v15  ;;  %1499 = vmatprep.subr.mxu1 %v1537_v0 }
  0x1d   :  { %390 = vmatprep.subr.mxu0 %v1537_v0  ;;  %1523 = vmatpush1.msra.mxu1 %v147_v15  ;;  %v43_v15 = vld [vmem:[%s3746_s0 + $0xd0] sm:$0xff] }
  0x1e   :  { %391 = vmatpush1.msra.mxu0 %v146_v16  ;;  %1500 = vmatprep.subr.mxu1 %v1537_v0 }
  0x1f   :  { %392 = vmatprep.subr.mxu0 %v1537_v0  ;;  %1524 = vmatpush1.msra.mxu1 %v146_v16  ;;  %v46_v16 = vld [vmem:[%s3746_s0 + $0xe8] sm:$0xff] }
  0x20   :  { %393 = vmatpush1.msra.mxu0 %v145_v17  ;;  %1501 = vmatprep.subr.mxu1 %v1537_v0 }
  0x21   :  { %410 = vmatprep.subr.mxu0 %v1537_v0  ;;  %1525 = vmatpush1.msra.mxu1 %v145_v17  ;;  %v107_v17 = vld [vmem:[%s3746_s0 + $0x2d0] sm:$0xff] }
  0x22   :  { %411 = vmatpush2.msra.mxu0 %v168_v18  ;;  %1502 = vmatprep.subr.mxu1 %v1537_v0 }
  0x23   :  { %412 = vmatprep.subr.mxu0 %v1537_v0  ;;  %1526 = vmatpush2.msra.mxu1 %v168_v18  ;;  %v110_v18 = vld [vmem:[%s3746_s0 + $0x2e8] sm:$0xff] }
  0x24   :  { %413 = vmatpush2.msra.mxu0 %v167_v19  ;;  %1503 = vmatprep.subr.mxu1 %v1537_v0 }
  0x25   :  { %414 = vmatprep.subr.mxu0 %v1537_v0  ;;  %1527 = vmatpush2.msra.mxu1 %v167_v19  ;;  %v45_v19 = vld [vmem:[%s3746_s0 + $0xe0] sm:$0xff] }
  0x26   :  { %415 = vmatpush2.msra.mxu0 %v166_v20  ;;  %1504 = vmatprep.subr.mxu1 %v1537_v0 }
  0x27   :  { %416 = vmatprep.subr.mxu0 %v1537_v0  ;;  %1528 = vmatpush2.msra.mxu1 %v166_v20  ;;  %v48_v20 = vld [vmem:[%s3746_s0 + $0xf8] sm:$0xff] }
  0x28   :  { %417 = vmatpush2.msra.mxu0 %v165_v21  ;;  %1505 = vmatprep.subr.mxu1 %v1537_v0 }
  0x29   :  { %418 = vmatprep.subr.mxu0 %v1537_v0  ;;  %1529 = vmatpush2.msra.mxu1 %v165_v21  ;;  %v109_v21 = vld [vmem:[%s3746_s0 + $0x2e0] sm:$0xff] }
  0x2a   :  { %419 = vmatpush2.msra.mxu0 %v164_v22  ;;  %1506 = vmatprep.subr.mxu1 %v1537_v0 }
  0x2b   :  { %420 = vmatprep.subr.mxu0 %v1537_v0  ;;  %1530 = vmatpush2.msra.mxu1 %v164_v22  ;;  %v112_v22 = vld [vmem:[%s3746_s0 + $0x2f8] sm:$0xff] }
  0x2c   :  { %421 = vmatpush2.msra.mxu0 %v163_v23  ;;  %1507 = vmatprep.subr.mxu1 %v1537_v0 }
  0x2d   :  { %422 = vmatprep.subr.mxu0 %v1537_v0  ;;  %1531 = vmatpush2.msra.mxu1 %v163_v23  ;;  %v47_v23 = vld [vmem:[%s3746_s0 + $0xf0] sm:$0xff] }
  0x2e   :  { %423 = vmatpush2.msra.mxu0 %v162_v24  ;;  %1508 = vmatprep.subr.mxu1 %v1537_v0 }
  0x2f   :  { %424 = vmatprep.subr.mxu0 %v1537_v0  ;;  %1532 = vmatpush2.msra.mxu1 %v162_v24  ;;  %v50_v24 = vld [vmem:[%s3746_s0 + $0x108] sm:$0xff] }
  0x30   :  { %425 = vmatpush2.msra.mxu0 %v161_v25  ;;  %1509 = vmatprep.subr.mxu1 %v1537_v0  ;;  %v38_v0 = vld [vmem:[%s3746_s0 + $0xa8] sm:$0xff] }
  0x31   :  { %427 = vmatmul.mubr.f32.vlgmr.msra.gmra.mxu0 %v17_v26  ;;  %1533 = vmatpush2.msra.mxu1 %v161_v25  ;;  %v111_v25 = vld [vmem:[%s3746_s0 + $0x2f0] sm:$0xff]  ;;  %v114_v26 = vld [vmem:[%s3746_s0 + $0x308] sm:$0xff] }
  0x32   :  { %1421 = vmatprep.mubr.msk.f32.mxu0 %vm169_vm0, %v20_v27  ;;  %1452 = vmatprep.mubr.msk.f32.mxu1 %vm169_vm0, %v82_v28  ;;  %v49_v27 = vld [vmem:[%s3746_s0 + $0x100] sm:$0xff]  ;;  %v52_v28 = vld [vmem:[%s3746_s0 + $0x118] sm:$0xff] }
  0x33   :  { %587 = vmatmul.mubr.f32.vlgmr.msra.gmra.mxu1 %v81_v29  ;;  %v113_v29 = vld [vmem:[%s3746_s0 + $0x300] sm:$0xff] }
  0x34   :  { %1453 = vmatprep.mubr.msk.f32.mxu1 %vm169_vm0, %v84_v30  ;;  %v116_v30 = vld [vmem:[%s3746_s0 + $0x318] sm:$0xff] }
  0x35   :  { %432 = vmatmul.mubr.f32.gmra.mxu0 %v19_v31  ;;  %v51_v31 = vld [vmem:[%s3746_s0 + $0x110] sm:$0xff] }
  0x36   :  { %1422 = vmatprep.mubr.msk.f32.mxu0 %vm169_vm0, %v22_v32  ;;  %v54_v32 = vld [vmem:[%s3746_s0 + $0x128] sm:$0xff] }
  0x37   :  { %592 = vmatmul.mubr.f32.gmra.mxu1 %v83_v33  ;;  %v115_v33 = vld [vmem:[%s3746_s0 + $0x310] sm:$0xff] }
  0x38   :  { %1454 = vmatprep.mubr.msk.f32.mxu1 %vm169_vm0, %v86_v34  ;;  %v118_v34 = vld [vmem:[%s3746_s0 + $0x328] sm:$0xff] }
  0x39   :  { %437 = vmatmul.mubr.f32.gmra.mxu0 %v21_v35  ;;  %v53_v35 = vld [vmem:[%s3746_s0 + $0x120] sm:$0xff] }
  0x3a   :  { %1423 = vmatprep.mubr.msk.f32.mxu0 %vm169_vm0, %v24_v36  ;;  %v56_v36 = vld [vmem:[%s3746_s0 + $0x138] sm:$0xff] }
  0x3b   :  { %597 = vmatmul.mubr.f32.gmra.mxu1 %v85_v37  ;;  %v117_v37 = vld [vmem:[%s3746_s0 + $0x320] sm:$0xff] }
  0x3c   :  { %1455 = vmatprep.mubr.msk.f32.mxu1 %vm169_vm0, %v88_v38  ;;  %v120_v38 = vld [vmem:[%s3746_s0 + $0x338] sm:$0xff] }
  0x3d   :  { %442 = vmatmul.mubr.f32.gmra.mxu0 %v23_v39  ;;  %v55_v39 = vld [vmem:[%s3746_s0 + $0x130] sm:$0xff] }
  0x3e   :  { %1424 = vmatprep.mubr.msk.f32.mxu0 %vm169_vm0, %v26_v40  ;;  %v58_v40 = vld [vmem:[%s3746_s0 + $0x148] sm:$0xff] }
  0x3f   :  { %602 = vmatmul.mubr.f32.gmra.mxu1 %v87_v41  ;;  %v119_v41 = vld [vmem:[%s3746_s0 + $0x330] sm:$0xff] }
  0x40   :  { %1456 = vmatprep.mubr.msk.f32.mxu1 %vm169_vm0, %v90_v42  ;;  %v122_v42 = vld [vmem:[%s3746_s0 + $0x348] sm:$0xff] }
  0x41   :  { %447 = vmatmul.mubr.f32.gmra.mxu0 %v25_v43  ;;  %v57_v43 = vld [vmem:[%s3746_s0 + $0x140] sm:$0xff] }
  0x42   :  { %1425 = vmatprep.mubr.msk.f32.mxu0 %vm169_vm0, %v28_v44  ;;  %v60_v44 = vld [vmem:[%s3746_s0 + $0x158] sm:$0xff] }
  0x43   :  { %607 = vmatmul.mubr.f32.gmra.mxu1 %v89_v45  ;;  %v121_v45 = vld [vmem:[%s3746_s0 + $0x340] sm:$0xff] }
  0x44   :  { %1457 = vmatprep.mubr.msk.f32.mxu1 %vm169_vm0, %v92_v46  ;;  %v124_v46 = vld [vmem:[%s3746_s0 + $0x358] sm:$0xff] }
  0x45   :  { %452 = vmatmul.mubr.f32.gmra.mxu0 %v27_v47  ;;  %v59_v47 = vld [vmem:[%s3746_s0 + $0x150] sm:$0xff] }
  0x46   :  { %1426 = vmatprep.mubr.msk.f32.mxu0 %vm169_vm0, %v30_v48  ;;  %v62_v48 = vld [vmem:[%s3746_s0 + $0x168] sm:$0xff] }
  0x47   :  { %612 = vmatmul.mubr.f32.gmra.mxu1 %v91_v49  ;;  %v123_v49 = vld [vmem:[%s3746_s0 + $0x350] sm:$0xff] }
  0x48   :  { %1458 = vmatprep.mubr.msk.f32.mxu1 %vm169_vm0, %v94_v50  ;;  %v126_v50 = vld [vmem:[%s3746_s0 + $0x368] sm:$0xff] }
  0x49   :  { %457 = vmatmul.mubr.f32.gmra.mxu0 %v29_v51  ;;  %v61_v51 = vld [vmem:[%s3746_s0 + $0x160] sm:$0xff] }
  0x4a   :  { %1427 = vmatprep.mubr.msk.f32.mxu0 %vm169_vm0, %v32_v52  ;;  %v64_v52 = vld [vmem:[%s3746_s0 + $0x178] sm:$0xff] }
  0x4b   :  { %617 = vmatmul.mubr.f32.gmra.mxu1 %v93_v53  ;;  %v125_v53 = vld [vmem:[%s3746_s0 + $0x360] sm:$0xff] }
  0x4c   :  { %1459 = vmatprep.mubr.msk.f32.mxu1 %vm169_vm0, %v96_v54  ;;  %v128_v54 = vld [vmem:[%s3746_s0 + $0x378] sm:$0xff] }
  0x4d   :  { %462 = vmatmul.mubr.f32.gmra.mxu0 %v31_v55  ;;  %v63_v55 = vld [vmem:[%s3746_s0 + $0x170] sm:$0xff] }
  0x4e   :  { %1428 = vmatprep.mubr.msk.f32.mxu0 %vm169_vm0, %v34_v56  ;;  %v66_v56 = vld [vmem:[%s3746_s0 + $0x188] sm:$0xff] }
  0x4f   :  { %622 = vmatmul.mubr.f32.gmra.mxu1 %v95_v57  ;;  %v127_v57 = vld [vmem:[%s3746_s0 + $0x370] sm:$0xff] }
  0x50   :  { %1460 = vmatprep.mubr.msk.f32.mxu1 %vm169_vm0, %v98_v58  ;;  %v130_v58 = vld [vmem:[%s3746_s0 + $0x388] sm:$0xff] }
  0x51   :  { %467 = vmatmul.mubr.f32.gmra.mxu0 %v33_v59  ;;  %v65_v59 = vld [vmem:[%s3746_s0 + $0x180] sm:$0xff] }
  0x52   :  { %1429 = vmatprep.mubr.msk.f32.mxu0 %vm169_vm0, %v36_v60  ;;  %v68_v60 = vld [vmem:[%s3746_s0 + $0x198] sm:$0xff] }
  0x53   :  { %627 = vmatmul.mubr.f32.gmra.mxu1 %v97_v61  ;;  %v129_v61 = vld [vmem:[%s3746_s0 + $0x380] sm:$0xff] }
  0x54   :  { %1461 = vmatprep.mubr.msk.f32.mxu1 %vm169_vm0, %v100_v62  ;;  %v132_v62 = vld [vmem:[%s3746_s0 + $0x398] sm:$0xff] }
  0x55   :  { %472 = vmatmul.mubr.f32.gmra.mxu0 %v35_v63  ;;  %v67_v63 = vld [vmem:[%s3746_s0 + $0x190] sm:$0xff] }
  0x56   :  { %1430 = vmatprep.mubr.msk.f32.mxu0 %vm169_vm0, %v38_v0  ;;  %v70_v0 = vld [vmem:[%s3746_s0 + $0x1a8] sm:$0xff] }
  0x57   :  { %632 = vmatmul.mubr.f32.gmra.mxu1 %v99_v1  ;;  %v131_v1 = vld [vmem:[%s3746_s0 + $0x390] sm:$0xff] }
  0x58   :  { %1462 = vmatprep.mubr.msk.f32.mxu1 %vm169_vm0, %v102_v2  ;;  %v134_v2 = vld [vmem:[%s3746_s0 + $0x3a8] sm:$0xff] }
  0x59   :  { %477 = vmatmul.mubr.f32.gmra.mxu0 %v37_v3  ;;  %v69_v3 = vld [vmem:[%s3746_s0 + $0x1a0] sm:$0xff] }
  0x5a   :  { %1431 = vmatprep.mubr.msk.f32.mxu0 %vm169_vm0, %v40_v4  ;;  %v72_v4 = vld [vmem:[%s3746_s0 + $0x1b8] sm:$0xff] }
  0x5b   :  { %637 = vmatmul.mubr.f32.gmra.mxu1 %v101_v5  ;;  %v133_v5 = vld [vmem:[%s3746_s0 + $0x3a0] sm:$0xff] }
  0x5c   :  { %1463 = vmatprep.mubr.msk.f32.mxu1 %vm169_vm0, %v104_v6  ;;  %v136_v6 = vld [vmem:[%s3746_s0 + $0x3b8] sm:$0xff] }
  0x5d   :  { %482 = vmatmul.mubr.f32.gmra.mxu0 %v39_v7  ;;  %v71_v7 = vld [vmem:[%s3746_s0 + $0x1b0] sm:$0xff] }
  0x5e   :  { %1432 = vmatprep.mubr.msk.f32.mxu0 %vm169_vm0, %v42_v8  ;;  %v74_v8 = vld [vmem:[%s3746_s0 + $0x1c8] sm:$0xff] }
  0x5f   :  { %642 = vmatmul.mubr.f32.gmra.mxu1 %v103_v9  ;;  %v135_v9 = vld [vmem:[%s3746_s0 + $0x3b0] sm:$0xff] }
  0x60   :  { %1464 = vmatprep.mubr.msk.f32.mxu1 %vm169_vm0, %v106_v10  ;;  %v138_v10 = vld [vmem:[%s3746_s0 + $0x3c8] sm:$0xff] }
  0x61   :  { %487 = vmatmul.mubr.f32.gmra.mxu0 %v41_v11  ;;  %v73_v11 = vld [vmem:[%s3746_s0 + $0x1c0] sm:$0xff] }
  0x62   :  { %1433 = vmatprep.mubr.msk.f32.mxu0 %vm169_vm0, %v44_v12  ;;  %v76_v12 = vld [vmem:[%s3746_s0 + $0x1d8] sm:$0xff] }
  0x63   :  { %647 = vmatmul.mubr.f32.gmra.mxu1 %v105_v13  ;;  %v137_v13 = vld [vmem:[%s3746_s0 + $0x3c0] sm:$0xff] }
  0x64   :  { %1465 = vmatprep.mubr.msk.f32.mxu1 %vm169_vm0, %v108_v14  ;;  %v140_v14 = vld [vmem:[%s3746_s0 + $0x3d8] sm:$0xff] }
  0x65   :  { %492 = vmatmul.mubr.f32.gmra.mxu0 %v43_v15  ;;  %v75_v15 = vld [vmem:[%s3746_s0 + $0x1d0] sm:$0xff] }
  0x66   :  { %1434 = vmatprep.mubr.msk.f32.mxu0 %vm169_vm0, %v46_v16  ;;  %v78_v16 = vld [vmem:[%s3746_s0 + $0x1e8] sm:$0xff] }
  0x67   :  { %652 = vmatmul.mubr.f32.gmra.mxu1 %v107_v17  ;;  %v139_v17 = vld [vmem:[%s3746_s0 + $0x3d0] sm:$0xff] }
  0x68   :  { %1466 = vmatprep.mubr.msk.f32.mxu1 %vm169_vm0, %v110_v18  ;;  %v142_v18 = vld [vmem:[%s3746_s0 + $0x3e8] sm:$0xff] }
  0x69   :  { %497 = vmatmul.mubr.f32.gmra.mxu0 %v45_v19  ;;  %v77_v19 = vld [vmem:[%s3746_s0 + $0x1e0] sm:$0xff] }
  0x6a   :  { %1435 = vmatprep.mubr.msk.f32.mxu0 %vm169_vm0, %v48_v20  ;;  %v80_v20 = vld [vmem:[%s3746_s0 + $0x1f8] sm:$0xff] }
  0x6b   :  { %657 = vmatmul.mubr.f32.gmra.mxu1 %v109_v21  ;;  %v141_v21 = vld [vmem:[%s3746_s0 + $0x3e0] sm:$0xff] }
  0x6c   :  { %1467 = vmatprep.mubr.msk.f32.mxu1 %vm169_vm0, %v112_v22  ;;  %v144_v22 = vld [vmem:[%s3746_s0 + $0x3f8] sm:$0xff] }
  0x6d   :  { %502 = vmatmul.mubr.f32.gmra.mxu0 %v47_v23  ;;  %v79_v23 = vld [vmem:[%s3746_s0 + $0x1f0] sm:$0xff] }
  0x6e   :  { %1436 = vmatprep.mubr.msk.f32.mxu0 %vm169_vm0, %v50_v24  ;;  %v143_v24 = vld [vmem:[%s3746_s0 + $0x3f0] sm:$0xff] }
  0x6f   :  { %662 = vmatmul.mubr.f32.gmra.mxu1 %v111_v25 }
  0x70   :  { %1468 = vmatprep.mubr.msk.f32.mxu1 %vm169_vm0, %v114_v26 }
  0x71   :  { %507 = vmatmul.mubr.f32.gmra.mxu0 %v49_v27 }
  0x72   :  { %1437 = vmatprep.mubr.msk.f32.mxu0 %vm169_vm0, %v52_v28 }
  0x73   :  { %667 = vmatmul.mubr.f32.gmra.mxu1 %v113_v29 }
  0x74   :  { %1469 = vmatprep.mubr.msk.f32.mxu1 %vm169_vm0, %v116_v30 }
  0x75   :  { %512 = vmatmul.mubr.f32.gmra.mxu0 %v51_v31 }
  0x76   :  { %1438 = vmatprep.mubr.msk.f32.mxu0 %vm169_vm0, %v54_v32 }
  0x77   :  { %672 = vmatmul.mubr.f32.gmra.mxu1 %v115_v33 }
  0x78   :  { %1470 = vmatprep.mubr.msk.f32.mxu1 %vm169_vm0, %v118_v34 }
  0x79   :  { %517 = vmatmul.mubr.f32.gmra.mxu0 %v53_v35 }
  0x7a   :  { %1439 = vmatprep.mubr.msk.f32.mxu0 %vm169_vm0, %v56_v36 }
  0x7b   :  { %677 = vmatmul.mubr.f32.gmra.mxu1 %v117_v37 }
  0x7c   :  { %1471 = vmatprep.mubr.msk.f32.mxu1 %vm169_vm0, %v120_v38 }
  0x7d   :  { %522 = vmatmul.mubr.f32.gmra.mxu0 %v55_v39 }
  0x7e   :  { %1440 = vmatprep.mubr.msk.f32.mxu0 %vm169_vm0, %v58_v40 }
  0x7f   :  { %682 = vmatmul.mubr.f32.gmra.mxu1 %v119_v41 }
  0x80   :  { %1472 = vmatprep.mubr.msk.f32.mxu1 %vm169_vm0, %v122_v42 }
  0x81   :  { %527 = vmatmul.mubr.f32.gmra.mxu0 %v57_v43 }
  0x82   :  { %1441 = vmatprep.mubr.msk.f32.mxu0 %vm169_vm0, %v60_v44 }
  0x83   :  { %687 = vmatmul.mubr.f32.gmra.mxu1 %v121_v45 }
  0x84   :  { %1473 = vmatprep.mubr.msk.f32.mxu1 %vm169_vm0, %v124_v46 }
  0x85   :  { %532 = vmatmul.mubr.f32.gmra.mxu0 %v59_v47 }
  0x86   :  { %1442 = vmatprep.mubr.msk.f32.mxu0 %vm169_vm0, %v62_v48 }
  0x87   :  { %692 = vmatmul.mubr.f32.gmra.mxu1 %v123_v49 }
  0x88   :  { %1474 = vmatprep.mubr.msk.f32.mxu1 %vm169_vm0, %v126_v50 }
  0x89   :  { %537 = vmatmul.mubr.f32.gmra.mxu0 %v61_v51 }
  0x8a   :  { %1443 = vmatprep.mubr.msk.f32.mxu0 %vm169_vm0, %v64_v52 }
  0x8b   :  { %697 = vmatmul.mubr.f32.gmra.mxu1 %v125_v53 }
  0x8c   :  { %1475 = vmatprep.mubr.msk.f32.mxu1 %vm169_vm0, %v128_v54 }
  0x8d   :  { %542 = vmatmul.mubr.f32.gmra.mxu0 %v63_v55 }
  0x8e   :  { %1444 = vmatprep.mubr.msk.f32.mxu0 %vm169_vm0, %v66_v56 }
  0x8f   :  { %702 = vmatmul.mubr.f32.gmra.mxu1 %v127_v57 }
  0x90   :  { %1476 = vmatprep.mubr.msk.f32.mxu1 %vm169_vm0, %v130_v58 }
  0x91   :  { %547 = vmatmul.mubr.f32.gmra.mxu0 %v65_v59 }
  0x92   :  { %1445 = vmatprep.mubr.msk.f32.mxu0 %vm169_vm0, %v68_v60 }
  0x93   :  { %707 = vmatmul.mubr.f32.gmra.mxu1 %v129_v61 }
  0x94   :  { %1477 = vmatprep.mubr.msk.f32.mxu1 %vm169_vm0, %v132_v62 }
  0x95   :  { %552 = vmatmul.mubr.f32.gmra.mxu0 %v67_v63 }
  0x96   :  { %1446 = vmatprep.mubr.msk.f32.mxu0 %vm169_vm0, %v70_v0 }
  0x97   :  { %712 = vmatmul.mubr.f32.gmra.mxu1 %v131_v1 }
  0x98   :  { %1478 = vmatprep.mubr.msk.f32.mxu1 %vm169_vm0, %v134_v2 }
  0x99   :  { %557 = vmatmul.mubr.f32.gmra.mxu0 %v69_v3 }
  0x9a   :  { %1447 = vmatprep.mubr.msk.f32.mxu0 %vm169_vm0, %v72_v4 }
  0x9b   :  { %717 = vmatmul.mubr.f32.gmra.mxu1 %v133_v5 }
  0x9c   :  { %1479 = vmatprep.mubr.msk.f32.mxu1 %vm169_vm0, %v136_v6 }
  0x9d   :  { %562 = vmatmul.mubr.f32.gmra.mxu0 %v71_v7 }
  0x9e   :  { %1448 = vmatprep.mubr.msk.f32.mxu0 %vm169_vm0, %v74_v8 }
  0x9f   :  { %722 = vmatmul.mubr.f32.gmra.mxu1 %v135_v9 }
  0xa0   :  { %1480 = vmatprep.mubr.msk.f32.mxu1 %vm169_vm0, %v138_v10 }
  0xa1   :  { %567 = vmatmul.mubr.f32.gmra.mxu0 %v73_v11 }
  0xa2   :  { %1449 = vmatprep.mubr.msk.f32.mxu0 %vm169_vm0, %v76_v12 }
  0xa3   :  { %727 = vmatmul.mubr.f32.gmra.mxu1 %v137_v13 }
  0xa4   :  { %1481 = vmatprep.mubr.msk.f32.mxu1 %vm169_vm0, %v140_v14 }
  0xa5   :  { %572 = vmatmul.mubr.f32.gmra.mxu0 %v75_v15 }
  0xa6   :  { %1450 = vmatprep.mubr.msk.f32.mxu0 %vm169_vm0, %v78_v16 }
  0xa7   :  { %732 = vmatmul.mubr.f32.gmra.mxu1 %v139_v17 }
  0xa8   :  { %1482 = vmatprep.mubr.msk.f32.mxu1 %vm169_vm0, %v142_v18 }
  0xa9   :  { %577 = vmatmul.mubr.f32.gmra.mxu0 %v77_v19 }
  0xaa   :  { %1451 = vmatprep.mubr.msk.f32.mxu0 %vm169_vm0, %v80_v20 }
  0xab   :  { %737 = vmatmul.mubr.f32.gmra.mxu1 %v141_v21 }
  0xac   :  { %1483 = vmatprep.mubr.msk.f32.mxu1 %vm169_vm0, %v144_v22 }
  0xad   :  { %582 = vmatmul.mubr.f32.gmra.mxu0 %v79_v23 }
  0xaf   :  { %742 = vmatmul.mubr.f32.gmra.mxu1 %v143_v24 }
  0xf1   :  { %v2131_v25 = vpop.f32.mrf.mxu0 }
  0xf3   :  { %v430_v26 = vpop.f32.mrf.mxu0  ;;  %v2133_v27 = vpop.f32.mrf.mxu1 }
  0xf5   :  { %v2135_v28 = vpop.f32.mrf.mxu0  ;;  %v590_v29 = vpop.f32.mrf.mxu1 }
  0xf6   :  { %v748_v24 = vsel %vm169_vm0, %v2135_v28, 0.0 }
  0xf7   :  { %v435_v30 = vpop.f32.mrf.mxu0  ;;  %v2137_v31 = vpop.f32.mrf.mxu1 }
  0xf8   :  { %v747_v30 = vsel %vm169_vm0, %v2131_v25, 0.0 }
  0xf9   :  { %v2139_v32 = vpop.f32.mrf.mxu0  ;;  %v595_v33 = vpop.f32.mrf.mxu1 }
  0xfa   :  { %v750_v33 = vsel %vm169_vm0, %v2139_v32, 0.0 }
  0xfb   :  { %v440_v34 = vpop.f32.mrf.mxu0  ;;  %v2141_v35 = vpop.f32.mrf.mxu1 }
  0xfc   :  { %v749_v34 = vadd.f32 %v748_v24, %v747_v30 }
  0xfd   :  { %v2143_v36 = vpop.f32.mrf.mxu0  ;;  %v600_v37 = vpop.f32.mrf.mxu1 }
  0xff   :  { %v445_v38 = vpop.f32.mrf.mxu0  ;;  %v2145_v39 = vpop.f32.mrf.mxu1 }
 0x101   :  { %v2147_v40 = vpop.f32.mrf.mxu0  ;;  %v605_v41 = vpop.f32.mrf.mxu1 }
 0x102   :  { %v752_v41 = vsel %vm169_vm0, %v2143_v36, 0.0 }
 0x103   :  { %v450_v42 = vpop.f32.mrf.mxu0  ;;  %v2149_v43 = vpop.f32.mrf.mxu1 }
 0x104   :  { %v751_v42 = vadd.f32 %v750_v33, %v749_v34 }
 0x105   :  { %v2151_v44 = vpop.f32.mrf.mxu0  ;;  %v610_v45 = vpop.f32.mrf.mxu1 }
 0x107   :  { %v455_v46 = vpop.f32.mrf.mxu0  ;;  %v2153_v47 = vpop.f32.mrf.mxu1 }
 0x109   :  { %v2155_v48 = vpop.f32.mrf.mxu0  ;;  %v615_v49 = vpop.f32.mrf.mxu1 }
 0x10a   :  { %v754_v49 = vsel %vm169_vm0, %v2147_v40, 0.0 }
 0x10b   :  { %v460_v50 = vpop.f32.mrf.mxu0  ;;  %v2157_v51 = vpop.f32.mrf.mxu1 }
 0x10c   :  { %v753_v50 = vadd.f32 %v752_v41, %v751_v42 }
 0x10d   :  { %v2159_v52 = vpop.f32.mrf.mxu0  ;;  %v620_v53 = vpop.f32.mrf.mxu1 }
 0x10f   :  { %v465_v54 = vpop.f32.mrf.mxu0  ;;  %v2161_v55 = vpop.f32.mrf.mxu1 }
 0x111   :  { %v2163_v56 = vpop.f32.mrf.mxu0  ;;  %v625_v57 = vpop.f32.mrf.mxu1 }
 0x112   :  { %v756_v57 = vsel %vm169_vm0, %v2151_v44, 0.0 }
 0x113   :  { %v470_v58 = vpop.f32.mrf.mxu0  ;;  %v2165_v59 = vpop.f32.mrf.mxu1 }
 0x114   :  { %v755_v58 = vadd.f32 %v754_v49, %v753_v50 }
 0x115   :  { %v2167_v60 = vpop.f32.mrf.mxu0  ;;  %v630_v61 = vpop.f32.mrf.mxu1 }
 0x116   :  { %v764_v24 = vsel %vm169_vm0, %v2167_v60, 0.0 }
 0x117   :  { %v475_v62 = vpop.f32.mrf.mxu0  ;;  %v2169_v63 = vpop.f32.mrf.mxu1 }
 0x119   :  { %v2171_v0 = vpop.f32.mrf.mxu0  ;;  %v635_v1 = vpop.f32.mrf.mxu1 }
 0x11a   :  { %v758_v1 = vsel %vm169_vm0, %v2155_v48, 0.0  ;;  %v766_v34 = vsel %vm169_vm0, %v2171_v0, 0.0 }
 0x11b   :  { %v480_v2 = vpop.f32.mrf.mxu0  ;;  %v2173_v3 = vpop.f32.mrf.mxu1 }
 0x11c   :  { %v757_v2 = vadd.f32 %v756_v57, %v755_v58 }
 0x11d   :  { %v2175_v4 = vpop.f32.mrf.mxu0  ;;  %v640_v5 = vpop.f32.mrf.mxu1 }
 0x11f   :  { %v485_v6 = vpop.f32.mrf.mxu0  ;;  %v2177_v7 = vpop.f32.mrf.mxu1 }
 0x121   :  { %v2179_v8 = vpop.f32.mrf.mxu0  ;;  %v645_v9 = vpop.f32.mrf.mxu1 }
 0x122   :  { %v760_v9 = vsel %vm169_vm0, %v2159_v52, 0.0  ;;  %v770_v57 = vsel %vm169_vm0, %v2179_v8, 0.0 }
 0x123   :  { %v490_v10 = vpop.f32.mrf.mxu0  ;;  %v2181_v11 = vpop.f32.mrf.mxu1 }
 0x124   :  { %v759_v10 = vadd.f32 %v758_v1, %v757_v2 }
 0x125   :  { %v2183_v12 = vpop.f32.mrf.mxu0  ;;  %v650_v13 = vpop.f32.mrf.mxu1 }
 0x126   :  { %v772_v2 = vsel %vm169_vm0, %v2183_v12, 0.0 }
 0x127   :  { %v495_v14 = vpop.f32.mrf.mxu0  ;;  %v2185_v15 = vpop.f32.mrf.mxu1 }
 0x129   :  { %v2187_v16 = vpop.f32.mrf.mxu0  ;;  %v655_v17 = vpop.f32.mrf.mxu1 }
 0x12a   :  { %v762_v17 = vsel %vm169_vm0, %v2163_v56, 0.0 }
 0x12b   :  { %v500_v18 = vpop.f32.mrf.mxu0  ;;  %v2189_v19 = vpop.f32.mrf.mxu1 }
 0x12c   :  { %v761_v18 = vadd.f32 %v760_v9, %v759_v10 }
 0x12d   :  { %v2191_v20 = vpop.f32.mrf.mxu0  ;;  %v660_v21 = vpop.f32.mrf.mxu1 }
 0x12f   :  { %v505_v22 = vpop.f32.mrf.mxu0  ;;  %v2193_v23 = vpop.f32.mrf.mxu1 }
 0x131   :  { %v2197_v26 = vpop.f32.mrf.mxu0  ;;  %v665_v29 = vpop.f32.mrf.mxu1 }
 0x132   :  { %v763_v29 = vadd.f32 %v762_v17, %v761_v18 }
 0x133   :  { %v510_v37 = vpop.f32.mrf.mxu0  ;;  %v2203_v38 = vpop.f32.mrf.mxu1 }
 0x134   :  { %v765_v37 = vadd.f32 %v764_v24, %v763_v29  ;;  %v776_v24 = vsel %vm169_vm0, %v2191_v20, 0.0 }
 0x135   :  { %v2207_v45 = vpop.f32.mrf.mxu0  ;;  %v670_v46 = vpop.f32.mrf.mxu1 }
 0x136   :  { %v768_v46 = vsel %vm169_vm0, %v2175_v4, 0.0  ;;  %v767_v49 = vadd.f32 %v766_v34, %v765_v37  ;;  %v778_v37 = vsel %vm169_vm0, %v2197_v26, 0.0 }
 0x137   :  { %v515_v53 = vpop.f32.mrf.mxu0  ;;  %v2211_v54 = vpop.f32.mrf.mxu1 }
 0x138   :  { %v769_v58 = vadd.f32 %v768_v46, %v767_v49 }
 0x139   :  { %v2215_v61 = vpop.f32.mrf.mxu0  ;;  %v675_v62 = vpop.f32.mrf.mxu1 }
 0x13a   :  { %3785 = vst [vmem:[#allocation2_spill] sm:$0xff] %v2215_v61 }
 0x13b   :  { %v520_v5 = vpop.f32.mrf.mxu0  ;;  %v2219_v6 = vpop.f32.mrf.mxu1 }
 0x13c   :  { %v771_v5 = vadd.f32 %v770_v57, %v769_v58 }
 0x13d   :  { %v2223_v13 = vpop.f32.mrf.mxu0  ;;  %v680_v14 = vpop.f32.mrf.mxu1 }
 0x13e   :  { %3786 = vst [vmem:[#allocation3_spill] sm:$0xff] %v2223_v13  ;;  %v774_v14 = vsel %vm169_vm0, %v2187_v16, 0.0  ;;  %v773_v17 = vadd.f32 %v772_v2, %v771_v5  ;;  %v782_v2 = vsel %vm169_vm0, %v2215_v61, 0.0 }
 0x13f   :  { %v525_v21 = vpop.f32.mrf.mxu0  ;;  %v2227_v22 = vpop.f32.mrf.mxu1 }
 0x140   :  { %v775_v29 = vadd.f32 %v774_v14, %v773_v17  ;;  %v784_v17 = vsel %vm169_vm0, %v2223_v13, 0.0 }
 0x141   :  { %v2231_v30 = vpop.f32.mrf.mxu0  ;;  %v685_v33 = vpop.f32.mrf.mxu1 }
 0x142   :  { %3787 = vst [vmem:[#allocation4_spill] sm:$0xff] %v2231_v30 }
 0x143   :  { %v530_v41 = vpop.f32.mrf.mxu0  ;;  %v2235_v42 = vpop.f32.mrf.mxu1 }
 0x144   :  { %v777_v41 = vadd.f32 %v776_v24, %v775_v29 }
 0x145   :  { %v2239_v50 = vpop.f32.mrf.mxu0  ;;  %v690_v53 = vpop.f32.mrf.mxu1 }
 0x146   :  { %3788 = vst [vmem:[#allocation5_spill] sm:$0xff] %v2239_v50  ;;  %v780_v53 = vsel %vm169_vm0, %v2207_v45, 0.0  ;;  %v779_v57 = vadd.f32 %v778_v37, %v777_v41 }
 0x147   :  { %v535_v62 = vpop.f32.mrf.mxu0  ;;  %v2243_v1 = vpop.f32.mrf.mxu1 }
 0x148   :  { %v781_v5 = vadd.f32 %v780_v53, %v779_v57  ;;  %v788_v53 = vsel %vm169_vm0, %v2239_v50, 0.0 }
 0x149   :  { %v2247_v9 = vpop.f32.mrf.mxu0  ;;  %v695_v10 = vpop.f32.mrf.mxu1 }
 0x14a   :  { %3789 = vst [vmem:[#allocation6_spill] sm:$0xff] %v2247_v9 }
 0x14b   :  { %v540_v18 = vpop.f32.mrf.mxu0  ;;  %v2251_v21 = vpop.f32.mrf.mxu1 }
 0x14c   :  { %v783_v18 = vadd.f32 %v782_v2, %v781_v5  ;;  %v790_v2 = vsel %vm169_vm0, %v2247_v9, 0.0 }
 0x14d   :  { %v2255_v33 = vpop.f32.mrf.mxu0  ;;  %v700_v34 = vpop.f32.mrf.mxu1 }
 0x14e   :  { %3790 = vst [vmem:[#allocation7_spill] sm:$0xff] %v2255_v33  ;;  %v786_v34 = vsel %vm169_vm0, %v2231_v30, 0.0  ;;  %v785_v37 = vadd.f32 %v784_v17, %v783_v18  ;;  %v792_v17 = vsel %vm169_vm0, %v2255_v33, 0.0 }
 0x14f   :  { %v545_v46 = vpop.f32.mrf.mxu0  ;;  %v2259_v49 = vpop.f32.mrf.mxu1 }
 0x150   :  { %v787_v57 = vadd.f32 %v786_v34, %v785_v37 }
 0x151   :  { %v2263_v58 = vpop.f32.mrf.mxu0  ;;  %v705_v62 = vpop.f32.mrf.mxu1 }
 0x152   :  { %3791 = vst [vmem:[#allocation8_spill] sm:$0xff] %v2263_v58  ;;  %v789_v5 = vadd.f32 %v788_v53, %v787_v57  ;;  %v794_v34 = vsel %vm169_vm0, %v2263_v58, 0.0 }
 0x153   :  { %v550_v10 = vpop.f32.mrf.mxu0  ;;  %v2267_v14 = vpop.f32.mrf.mxu1 }
 0x154   :  { %v791_v18 = vadd.f32 %v790_v2, %v789_v5 }
 0x155   :  { %v2271_v24 = vpop.f32.mrf.mxu0  ;;  %v710_v29 = vpop.f32.mrf.mxu1 }
 0x156   :  { %3792 = vst [vmem:[#allocation9_spill] sm:$0xff] %v2271_v24  ;;  %v793_v37 = vadd.f32 %v792_v17, %v791_v18  ;;  %v796_v53 = vsel %vm169_vm0, %v2271_v24, 0.0 }
 0x157   :  { %v555_v41 = vpop.f32.mrf.mxu0  ;;  %v2275_v46 = vpop.f32.mrf.mxu1 }
 0x159   :  { %v2279_v62 = vpop.f32.mrf.mxu0  ;;  %v715_v10 = vpop.f32.mrf.mxu1 }
 0x15a   :  { %3793 = vst [vmem:[#allocation10_spill] sm:$0xff] %v2279_v62  ;;  %v798_v2 = vsel %vm169_vm0, %v2279_v62, 0.0 }
 0x15b   :  { %v560_v13 = vpop.f32.mrf.mxu0  ;;  %v2283_v29 = vpop.f32.mrf.mxu1 }
 0x15c   :  { %3794 = vst [vmem:[#allocation11_spill] sm:$0xff] %v2283_v29  ;;  %v795_v13 = vadd.f32 %v794_v34, %v793_v37 }
 0x15d   :  { %v2287_v41 = vpop.f32.mrf.mxu0  ;;  %v720_v30 = vpop.f32.mrf.mxu1 }
 0x15e   :  { %3795 = vst [vmem:[#allocation12_spill] sm:$0xff] %v2287_v41  ;;  %v797_v5 = vadd.f32 %v796_v53, %v795_v13  ;;  %v800_v17 = vsel %vm169_vm0, %v2287_v41, 0.0 }
 0x15f   :  { %v565_v50 = vpop.f32.mrf.mxu0  ;;  %v2291_v10 = vpop.f32.mrf.mxu1 }
 0x160   :  { %3796 = vst [vmem:[#allocation13_spill] sm:$0xff] %v2291_v10  ;;  %v799_v50 = vadd.f32 %v798_v2, %v797_v5 }
 0x161   :  { %v2295_v57 = vpop.f32.mrf.mxu0  ;;  %v725_v9 = vpop.f32.mrf.mxu1 }
 0x162   :  { %3797 = vst [vmem:[#allocation14_spill] sm:$0xff] %v2295_v57  ;;  %v802_v34 = vsel %vm169_vm0, %v2295_v57, 0.0  ;;  %v801_v37 = vadd.f32 %v800_v17, %v799_v50 }
 0x163   :  { %v570_v33 = vpop.f32.mrf.mxu0  ;;  %v2299_v30 = vpop.f32.mrf.mxu1 }
 0x164   :  { %3798 = vst [vmem:[#allocation15_spill] sm:$0xff] %v2299_v30  ;;  %v803_v33 = vadd.f32 %v802_v34, %v801_v37 }
 0x165   :  { %v2303_v18 = vpop.f32.mrf.mxu0  ;;  %v730_v58 = vpop.f32.mrf.mxu1 }
 0x166   :  { %3799 = vst [vmem:[#allocation16_spill] sm:$0xff] %v2303_v18  ;;  %v804_v53 = vsel %vm169_vm0, %v2303_v18, 0.0 }
 0x167   :  { %v575_v24 = vpop.f32.mrf.mxu0  ;;  %v2307_v9 = vpop.f32.mrf.mxu1  ;;  %v805_v5 = vadd.f32 %v804_v53, %v803_v33  ;;  %v814_v33 = vsel %vm169_vm0, %v2141_v35, 0.0 }
 0x169   :  { %v2311_v13 = vpop.f32.mrf.mxu0  ;;  %v735_v62 = vpop.f32.mrf.mxu1 }
 0x16a   :  { %3800 = vst [vmem:[#allocation17_spill] sm:$0xff] %v2311_v13  ;;  %v806_v2 = vsel %vm169_vm0, %v2311_v13, 0.0  ;;  %v810_v62 = vsel %vm169_vm0, %v2133_v27, 0.0 }
 0x16b   :  { %v580_v41 = vpop.f32.mrf.mxu0  ;;  %v2315_v58 = vpop.f32.mrf.mxu1  ;;  %v807_v61 = vadd.f32 %v806_v2, %v805_v5  ;;  %v816_v5 = vsel %vm169_vm0, %v2145_v39, 0.0 }
 0x16c   :  { %v812_v41 = vsel %vm169_vm0, %v2137_v31, 0.0 }
 0x16d   :  { %v2317_v57 = vpop.f32.mrf.mxu0  ;;  %v740_v24 = vpop.f32.mrf.mxu1 }
 0x16e   :  { %v808_v17 = vsel %vm169_vm0, %v2317_v57, 0.0 }
 0x16f   :  { %v809_v50 = vadd.f32 %v808_v17, %v807_v61  ;;  %v585_v18 = vpop.f32.mrf.mxu0  ;;  %v2321_v34 = vpop.f32.mrf.mxu1  ;;  %v820_v17 = vsel %vm169_vm0, %v2153_v47, 0.0 }
 0x170   :  { %v818_v18 = vsel %vm169_vm0, %v2149_v43, 0.0 }
 0x171   :  { %v811_v37 = vadd.f32 %v810_v62, %v809_v50  ;;  %v745_v13 = vpop.f32.mrf.mxu1  ;;  %v822_v50 = vsel %vm169_vm0, %v2157_v51, 0.0 }
 0x173   :  { %v813_v53 = vadd.f32 %v812_v41, %v811_v37  ;;  %v824_v37 = vsel %vm169_vm0, %v2161_v55, 0.0 }
 0x175   :  { %v815_v2 = vadd.f32 %v814_v33, %v813_v53  ;;  %v826_v53 = vsel %vm169_vm0, %v2165_v59, 0.0 }
 0x177   :  { %v817_v61 = vadd.f32 %v816_v5, %v815_v2  ;;  %v828_v2 = vsel %vm169_vm0, %v2169_v63, 0.0 }
 0x179   :  { %v819_v24 = vadd.f32 %v818_v18, %v817_v61  ;;  %v830_v61 = vsel %vm169_vm0, %v2173_v3, 0.0 }
 0x17b   :  { %v821_v13 = vadd.f32 %v820_v17, %v819_v24  ;;  %v832_v24 = vsel %vm169_vm0, %v2177_v7, 0.0 }
 0x17d   :  { %v823_v62 = vadd.f32 %v822_v50, %v821_v13  ;;  %v834_v13 = vsel %vm169_vm0, %v2181_v11, 0.0 }
 0x17f   :  { %v825_v41 = vadd.f32 %v824_v37, %v823_v62  ;;  %v836_v62 = vsel %vm169_vm0, %v2185_v15, 0.0 }
 0x181   :  { %v827_v33 = vadd.f32 %v826_v53, %v825_v41  ;;  %v838_v41 = vsel %vm169_vm0, %v2189_v19, 0.0 }
 0x183   :  { %v829_v5 = vadd.f32 %v828_v2, %v827_v33  ;;  %v840_v33 = vsel %vm169_vm0, %v2193_v23, 0.0 }
 0x185   :  { %v831_v18 = vadd.f32 %v830_v61, %v829_v5  ;;  %v842_v5 = vsel %vm169_vm0, %v2203_v38, 0.0 }
 0x187   :  { %v833_v17 = vadd.f32 %v832_v24, %v831_v18  ;;  %v844_v18 = vsel %vm169_vm0, %v2211_v54, 0.0 }
 0x189   :  { %v835_v50 = vadd.f32 %v834_v13, %v833_v17  ;;  %v846_v17 = vsel %vm169_vm0, %v2219_v6, 0.0 }
 0x18b   :  { %v837_v37 = vadd.f32 %v836_v62, %v835_v50  ;;  %v848_v50 = vsel %vm169_vm0, %v2227_v22, 0.0 }
 0x18d   :  { %v839_v53 = vadd.f32 %v838_v41, %v837_v37  ;;  %v850_v37 = vsel %vm169_vm0, %v2235_v42, 0.0 }
 0x18f   :  { %v841_v2 = vadd.f32 %v840_v33, %v839_v53  ;;  %v852_v53 = vsel %vm169_vm0, %v2243_v1, 0.0 }
 0x191   :  { %v843_v61 = vadd.f32 %v842_v5, %v841_v2  ;;  %v854_v2 = vsel %vm169_vm0, %v2251_v21, 0.0 }
 0x193   :  { %v845_v24 = vadd.f32 %v844_v18, %v843_v61  ;;  %v856_v61 = vsel %vm169_vm0, %v2259_v49, 0.0 }
 0x195   :  { %v847_v13 = vadd.f32 %v846_v17, %v845_v24  ;;  %v858_v24 = vsel %vm169_vm0, %v2267_v14, 0.0 }
 0x197   :  { %v849_v62 = vadd.f32 %v848_v50, %v847_v13  ;;  %v860_v13 = vsel %vm169_vm0, %v2275_v46, 0.0 }
 0x199   :  { %v851_v41 = vadd.f32 %v850_v37, %v849_v62  ;;  %v862_v62 = vsel %vm169_vm0, %v2283_v29, 0.0 }
 0x19b   :  { %v853_v33 = vadd.f32 %v852_v53, %v851_v41  ;;  %v864_v41 = vsel %vm169_vm0, %v2291_v10, 0.0 }
 0x19d   :  { %v855_v5 = vadd.f32 %v854_v2, %v853_v33  ;;  %v866_v33 = vsel %vm169_vm0, %v2299_v30, 0.0 }
 0x19f   :  { %v857_v18 = vadd.f32 %v856_v61, %v855_v5  ;;  %v868_v5 = vsel %vm169_vm0, %v2307_v9, 0.0 }
 0x1a1   :  { %v859_v17 = vadd.f32 %v858_v24, %v857_v18  ;;  %v870_v18 = vsel %vm169_vm0, %v2315_v58, 0.0 }
 0x1a3   :  { %v861_v50 = vadd.f32 %v860_v13, %v859_v17  ;;  %v872_v17 = vsel %vm169_vm0, %v2321_v34, 0.0 }
 0x1a5   :  { %v863_v37 = vadd.f32 %v862_v62, %v861_v50 }
 0x1a7   :  { %v865_v53 = vadd.f32 %v864_v41, %v863_v37 }
 0x1a9   :  { %v867_v2 = vadd.f32 %v866_v33, %v865_v53 }
 0x1ab   :  { %v869_v61 = vadd.f32 %v868_v5, %v867_v2 }
 0x1ad   :  { %v871_v24 = vadd.f32 %v870_v18, %v869_v61 }
 0x1af   :  { %v873_v13 = vadd.f32 %v872_v17, %v871_v24 }
 0x1b1   :  { %v874_v50 = vrot.slane %v873_v13, 4 }
 0x1b3   :  { %v875_v62 = vadd.f32 %v874_v50, %v873_v13 }
 0x1b5   :  { %v876_v10 = vrot.slane %v875_v62, 2 }
 0x1b7   :  { %v877_v37 = vadd.f32 %v876_v10, %v875_v62 }
 0x1b9   :  { %v878_v41 = vrot.slane %v877_v37, 1 }
 0x1bb   :  { %v879_v29 = vadd.f32 %v878_v41, %v877_v37 }
 0x1bd   :  { %v2387_v30 = vmul.f32 0.001953125, %v879_v29 }
 0x1bf   :  { %v2391_v53 = vsub.f32 %v2131_v25, %v2387_v30  ;;  %v2395_v33 = vsub.f32 %v2135_v28, %v2387_v30  ;;  %v2399_v2 = vsub.f32 %v2139_v32, %v2387_v30  ;;  %v2403_v5 = vsub.f32 %v2143_v36, %v2387_v30 }
 0x1c0   :  { %v2411_v25 = vsub.f32 %v2147_v40, %v2387_v30  ;;  %v2417_v32 = vsub.f32 %v2151_v44, %v2387_v30  ;;  %v2425_v17 = vsub.f32 %v2155_v48, %v2387_v30  ;;  %v2432_v44 = vsub.f32 %v2159_v52, %v2387_v30 }
 0x1c1   :  { %v946_v29 = vmul.f32 %v2391_v53, %v2391_v53  ;;  %v947_v10 = vmul.f32 %v2395_v33, %v2395_v33  ;;  %v948_v28 = vmul.f32 %v2399_v2, %v2399_v2  ;;  %v949_v36 = vmul.f32 %v2403_v5, %v2403_v5 }
 0x1c2   :  { %v950_v40 = vmul.f32 %v2411_v25, %v2411_v25  ;;  %v951_v62 = vmul.f32 %v2417_v32, %v2417_v32  ;;  %v2439_v48 = vsub.f32 %v2163_v56, %v2387_v30  ;;  %v2446_v52 = vsub.f32 %v2167_v60, %v2387_v30 }
 0x1c3   :  { %v1010_v61 = vsel %vm169_vm0, %v946_v29, 0.0  ;;  %v1011_v18 = vsel %vm169_vm0, %v947_v10, 0.0  ;;  %v1013_v13 = vsel %vm169_vm0, %v948_v28, 0.0  ;;  %v1015_v37 = vsel %vm169_vm0, %v949_v36, 0.0 }
 0x1c4   :  { %v1012_v24 = vadd.f32 %v1011_v18, %v1010_v61  ;;  %v952_v29 = vmul.f32 %v2425_v17, %v2425_v17  ;;  %v1017_v10 = vsel %vm169_vm0, %v950_v40, 0.0  ;;  %v953_v61 = vmul.f32 %v2432_v44, %v2432_v44 }
 0x1c5   :  { %v1019_v36 = vsel %vm169_vm0, %v951_v62, 0.0  ;;  %v2453_v56 = vsub.f32 %v2171_v0, %v2387_v30  ;;  %v2460_v60 = vsub.f32 %v2175_v4, %v2387_v30  ;;  %v2467_v0 = vsub.f32 %v2179_v8, %v2387_v30 }
 0x1c6   :  { %v1014_v50 = vadd.f32 %v1013_v13, %v1012_v24  ;;  %v954_v24 = vmul.f32 %v2439_v48, %v2439_v48  ;;  %v1021_v40 = vsel %vm169_vm0, %v952_v29, 0.0  ;;  %v1023_v62 = vsel %vm169_vm0, %v953_v61, 0.0 }
 0x1c7   :  { %v2474_v4 = vsub.f32 %v2183_v12, %v2387_v30  ;;  %v2481_v8 = vsub.f32 %v2187_v16, %v2387_v30  ;;  %v2488_v12 = vsub.f32 %v2191_v20, %v2387_v30  ;;  %v2495_v16 = vsub.f32 %v2197_v26, %v2387_v30 }
 0x1c8   :  { %v1016_v41 = vadd.f32 %v1015_v37, %v1014_v50  ;;  %v955_v50 = vmul.f32 %v2446_v52, %v2446_v52  ;;  %v1025_v29 = vsel %vm169_vm0, %v954_v24, 0.0  ;;  %v2502_v20 = vsub.f32 %v2207_v45, %v2387_v30 }
 0x1ca   :  { %v1018_v28 = vadd.f32 %v1017_v10, %v1016_v41  ;;  %v956_v41 = vmul.f32 %v2453_v56, %v2453_v56  ;;  %v1027_v61 = vsel %vm169_vm0, %v955_v50, 0.0  ;;  %3801 = vst [vmem:[#allocation18_spill] sm:$0xff] %v2502_v20 }
 0x1cc   :  { %v1020_v18 = vadd.f32 %v1019_v36, %v1018_v28  ;;  %v957_v28 = vmul.f32 %v2460_v60, %v2460_v60  ;;  %v1029_v24 = vsel %vm169_vm0, %v956_v41, 0.0 }
 0x1ce   :  { %v1022_v13 = vadd.f32 %v1021_v40, %v1020_v18  ;;  %v958_v18 = vmul.f32 %v2467_v0, %v2467_v0  ;;  %v1031_v50 = vsel %vm169_vm0, %v957_v28, 0.0 }
 0x1d0   :  { %v1024_v37 = vadd.f32 %v1023_v62, %v1022_v13  ;;  %v959_v13 = vmul.f32 %v2474_v4, %v2474_v4  ;;  %v1033_v41 = vsel %vm169_vm0, %v958_v18, 0.0 }
 0x1d2   :  { %v1026_v10 = vadd.f32 %v1025_v29, %v1024_v37  ;;  %v960_v37 = vmul.f32 %v2481_v8, %v2481_v8  ;;  %v1035_v28 = vsel %vm169_vm0, %v959_v13, 0.0 }
 0x1d4   :  { %v1028_v36 = vadd.f32 %v1027_v61, %v1026_v10  ;;  %v961_v10 = vmul.f32 %v2488_v12, %v2488_v12  ;;  %v1037_v18 = vsel %vm169_vm0, %v960_v37, 0.0 }
 0x1d6   :  { %v1030_v40 = vadd.f32 %v1029_v24, %v1028_v36  ;;  %v3802_v36 = vld [vmem:[#allocation2_spill] sm:$0xff]  ;;  %v962_v24 = vmul.f32 %v2495_v16, %v2495_v16  ;;  %v1039_v13 = vsel %vm169_vm0, %v961_v10, 0.0 }
 0x1d7   :  { %v2509_v26 = vsub.f32 %v3802_v36, %v2387_v30 }
 0x1d8   :  { %v1032_v62 = vadd.f32 %v1031_v50, %v1030_v40  ;;  %v3804_v50 = vld [vmem:[#allocation3_spill] sm:$0xff]  ;;  %v1041_v37 = vsel %vm169_vm0, %v962_v24, 0.0 }
 0x1d9   :  { %3803 = vst [vmem:[#allocation2_spill] sm:$0xff] %v2509_v26  ;;  %v2516_v45 = vsub.f32 %v3804_v50, %v2387_v30  ;;  %v964_v36 = vmul.f32 %v2509_v26, %v2509_v26 }
 0x1da   :  { %v1034_v29 = vadd.f32 %v1033_v41, %v1032_v62  ;;  %v963_v62 = vmul.f32 %v2502_v20, %v2502_v20 }
 0x1db   :  { %3805 = vst [vmem:[#allocation3_spill] sm:$0xff] %v2516_v45  ;;  %v965_v20 = vmul.f32 %v2516_v45, %v2516_v45  ;;  %v1045_v24 = vsel %vm169_vm0, %v964_v36, 0.0 }
 0x1dc   :  { %v1036_v61 = vadd.f32 %v1035_v28, %v1034_v29  ;;  %v3806_v29 = vld [vmem:[#allocation4_spill] sm:$0xff]  ;;  %v1043_v10 = vsel %vm169_vm0, %v963_v62, 0.0 }
 0x1dd   :  { %v2523_v28 = vsub.f32 %v3806_v29, %v2387_v30  ;;  %v1047_v62 = vsel %vm169_vm0, %v965_v20, 0.0 }
 0x1de   :  { %v1038_v40 = vadd.f32 %v1037_v18, %v1036_v61  ;;  %v3808_v18 = vld [vmem:[#allocation5_spill] sm:$0xff] }
 0x1df   :  { %3807 = vst [vmem:[#allocation4_spill] sm:$0xff] %v2523_v28  ;;  %v2530_v50 = vsub.f32 %v3808_v18, %v2387_v30  ;;  %v966_v26 = vmul.f32 %v2523_v28, %v2523_v28 }
 0x1e0   :  { %v1040_v41 = vadd.f32 %v1039_v13, %v1038_v40  ;;  %v3810_v13 = vld [vmem:[#allocation6_spill] sm:$0xff] }
 0x1e1   :  { %3809 = vst [vmem:[#allocation5_spill] sm:$0xff] %v2530_v50  ;;  %v2537_v29 = vsub.f32 %v3810_v13, %v2387_v30  ;;  %v967_v45 = vmul.f32 %v2530_v50, %v2530_v50  ;;  %v1049_v36 = vsel %vm169_vm0, %v966_v26, 0.0 }
 0x1e2   :  { %v1042_v61 = vadd.f32 %v1041_v37, %v1040_v41  ;;  %v3812_v37 = vld [vmem:[#allocation7_spill] sm:$0xff] }
 0x1e3   :  { %3811 = vst [vmem:[#allocation6_spill] sm:$0xff] %v2537_v29  ;;  %v2544_v18 = vsub.f32 %v3812_v37, %v2387_v30  ;;  %v968_v28 = vmul.f32 %v2537_v29, %v2537_v29  ;;  %v1051_v20 = vsel %vm169_vm0, %v967_v45, 0.0 }
 0x1e4   :  { %v1044_v40 = vadd.f32 %v1043_v10, %v1042_v61  ;;  %v3814_v10 = vld [vmem:[#allocation8_spill] sm:$0xff] }
 0x1e5   :  { %3813 = vst [vmem:[#allocation7_spill] sm:$0xff] %v2544_v18  ;;  %v2551_v13 = vsub.f32 %v3814_v10, %v2387_v30  ;;  %v969_v50 = vmul.f32 %v2544_v18, %v2544_v18  ;;  %v1053_v26 = vsel %vm169_vm0, %v968_v28, 0.0 }
 0x1e6   :  { %v1046_v41 = vadd.f32 %v1045_v24, %v1044_v40  ;;  %v3816_v24 = vld [vmem:[#allocation9_spill] sm:$0xff] }
 0x1e7   :  { %3815 = vst [vmem:[#allocation8_spill] sm:$0xff] %v2551_v13  ;;  %v2558_v37 = vsub.f32 %v3816_v24, %v2387_v30  ;;  %v970_v29 = vmul.f32 %v2551_v13, %v2551_v13  ;;  %v1055_v45 = vsel %vm169_vm0, %v969_v50, 0.0 }
 0x1e8   :  { %v1048_v61 = vadd.f32 %v1047_v62, %v1046_v41  ;;  %v3818_v62 = vld [vmem:[#allocation10_spill] sm:$0xff] }
 0x1e9   :  { %3817 = vst [vmem:[#allocation9_spill] sm:$0xff] %v2558_v37  ;;  %v2565_v10 = vsub.f32 %v3818_v62, %v2387_v30  ;;  %v971_v18 = vmul.f32 %v2558_v37, %v2558_v37  ;;  %v1057_v28 = vsel %vm169_vm0, %v970_v29, 0.0 }
 0x1ea   :  { %v1050_v40 = vadd.f32 %v1049_v36, %v1048_v61  ;;  %v3820_v36 = vld [vmem:[#allocation12_spill] sm:$0xff] }
 0x1eb   :  { %3819 = vst [vmem:[#allocation10_spill] sm:$0xff] %v2565_v10  ;;  %v2572_v24 = vsub.f32 %v3820_v36, %v2387_v30  ;;  %v972_v13 = vmul.f32 %v2565_v10, %v2565_v10  ;;  %v1059_v50 = vsel %vm169_vm0, %v971_v18, 0.0 }
 0x1ec   :  { %v1052_v41 = vadd.f32 %v1051_v20, %v1050_v40  ;;  %v3821_v20 = vld [vmem:[#allocation14_spill] sm:$0xff] }
 0x1ed   :  { %v2579_v62 = vsub.f32 %v3821_v20, %v2387_v30  ;;  %v973_v37 = vmul.f32 %v2572_v24, %v2572_v24  ;;  %v1061_v29 = vsel %vm169_vm0, %v972_v13, 0.0 }
 0x1ee   :  { %v1054_v61 = vadd.f32 %v1053_v26, %v1052_v41  ;;  %v3822_v26 = vld [vmem:[#allocation16_spill] sm:$0xff] }
 0x1ef   :  { %v2586_v36 = vsub.f32 %v3822_v26, %v2387_v30  ;;  %v974_v10 = vmul.f32 %v2579_v62, %v2579_v62  ;;  %v1063_v18 = vsel %vm169_vm0, %v973_v37, 0.0 }
 0x1f0   :  { %v1056_v40 = vadd.f32 %v1055_v45, %v1054_v61  ;;  %v3823_v45 = vld [vmem:[#allocation17_spill] sm:$0xff] }
 0x1f1   :  { %v2593_v20 = vsub.f32 %v3823_v45, %v2387_v30  ;;  %v975_v26 = vmul.f32 %v2586_v36, %v2586_v36  ;;  %v1065_v13 = vsel %vm169_vm0, %v974_v10, 0.0 }
 0x1f2   :  { %v1058_v41 = vadd.f32 %v1057_v28, %v1056_v40  ;;  %v2600_v28 = vsub.f32 %v2317_v57, %v2387_v30  ;;  %v2614_v57 = vsub.f32 %v2137_v31, %v2387_v30  ;;  %v2628_v31 = vsub.f32 %v2145_v39, %v2387_v30 }
 0x1f3   :  { %v976_v45 = vmul.f32 %v2593_v20, %v2593_v20  ;;  %v1067_v37 = vsel %vm169_vm0, %v975_v26, 0.0  ;;  %v2642_v39 = vsub.f32 %v2153_v47, %v2387_v30  ;;  %v2656_v47 = vsub.f32 %v2161_v55, %v2387_v30 }
 0x1f4   :  { %v1060_v61 = vadd.f32 %v1059_v50, %v1058_v41  ;;  %v2607_v50 = vsub.f32 %v2133_v27, %v2387_v30  ;;  %v2621_v27 = vsub.f32 %v2141_v35, %v2387_v30  ;;  %v2635_v35 = vsub.f32 %v2149_v43, %v2387_v30 }
 0x1f5   :  { %v1069_v10 = vsel %vm169_vm0, %v976_v45, 0.0  ;;  %v2649_v43 = vsub.f32 %v2157_v51, %v2387_v30  ;;  %v2663_v51 = vsub.f32 %v2165_v59, %v2387_v30  ;;  %v2670_v55 = vsub.f32 %v2169_v63, %v2387_v30 }
 0x1f6   :  { %v1062_v40 = vadd.f32 %v1061_v29, %v1060_v61  ;;  %v977_v29 = vmul.f32 %v2600_v28, %v2600_v28  ;;  %v2677_v59 = vsub.f32 %v2173_v3, %v2387_v30  ;;  %v2684_v63 = vsub.f32 %v2177_v7, %v2387_v30 }
 0x1f7   :  { %v2691_v3 = vsub.f32 %v2181_v11, %v2387_v30  ;;  %v2698_v7 = vsub.f32 %v2185_v15, %v2387_v30  ;;  %v2705_v11 = vsub.f32 %v2189_v19, %v2387_v30  ;;  %v2712_v15 = vsub.f32 %v2193_v23, %v2387_v30 }
 0x1f8   :  { %v1064_v41 = vadd.f32 %v1063_v18, %v1062_v40  ;;  %v978_v18 = vmul.f32 %v2607_v50, %v2607_v50  ;;  %v1071_v26 = vsel %vm169_vm0, %v977_v29, 0.0  ;;  %v2719_v19 = vsub.f32 %v2203_v38, %v2387_v30 }
 0x1f9   :  { %v2726_v23 = vsub.f32 %v2211_v54, %v2387_v30  ;;  %v2733_v38 = vsub.f32 %v2219_v6, %v2387_v30  ;;  %v2740_v54 = vsub.f32 %v2227_v22, %v2387_v30  ;;  %v2747_v6 = vsub.f32 %v2235_v42, %v2387_v30 }
 0x1fa   :  { %v1066_v61 = vadd.f32 %v1065_v13, %v1064_v41  ;;  %v979_v13 = vmul.f32 %v2614_v57, %v2614_v57  ;;  %v1073_v45 = vsel %vm169_vm0, %v978_v18, 0.0  ;;  %v2754_v22 = vsub.f32 %v2243_v1, %v2387_v30 }
 0x1fb   :  { %v2761_v42 = vsub.f32 %v2251_v21, %v2387_v30  ;;  %v2768_v1 = vsub.f32 %v2259_v49, %v2387_v30  ;;  %v2775_v21 = vsub.f32 %v2267_v14, %v2387_v30  ;;  %v2782_v49 = vsub.f32 %v2275_v46, %v2387_v30 }
 0x1fc   :  { %v1068_v40 = vadd.f32 %v1067_v37, %v1066_v61  ;;  %v980_v37 = vmul.f32 %v2621_v27, %v2621_v27  ;;  %v1075_v29 = vsel %vm169_vm0, %v979_v13, 0.0 }
 0x1fd   :  { %3824 = vst [vmem:[#allocation12_spill] sm:$0xff] %v2761_v42  ;;  %3825 = vst [vmem:[#allocation14_spill] sm:$0xff] %v2768_v1 }
 0x1fe   :  { %v1070_v41 = vadd.f32 %v1069_v10, %v1068_v40  ;;  %v981_v10 = vmul.f32 %v2628_v31, %v2628_v31  ;;  %v1077_v18 = vsel %vm169_vm0, %v980_v37, 0.0  ;;  %3826 = vst [vmem:[#allocation16_spill] sm:$0xff] %v2775_v21  ;;  %3827 = vst [vmem:[#allocation17_spill] sm:$0xff] %v2782_v49 }
 0x200   :  { %v1072_v61 = vadd.f32 %v1071_v26, %v1070_v41  ;;  %v982_v26 = vmul.f32 %v2635_v35, %v2635_v35  ;;  %v1079_v13 = vsel %vm169_vm0, %v981_v10, 0.0 }
 0x202   :  { %v1074_v40 = vadd.f32 %v1073_v45, %v1072_v61  ;;  %v983_v45 = vmul.f32 %v2642_v39, %v2642_v39  ;;  %v1081_v37 = vsel %vm169_vm0, %v982_v26, 0.0 }
 0x204   :  { %v1076_v41 = vadd.f32 %v1075_v29, %v1074_v40  ;;  %v984_v29 = vmul.f32 %v2649_v43, %v2649_v43  ;;  %v1083_v10 = vsel %vm169_vm0, %v983_v45, 0.0 }
 0x206   :  { %v1078_v61 = vadd.f32 %v1077_v18, %v1076_v41  ;;  %v985_v18 = vmul.f32 %v2656_v47, %v2656_v47  ;;  %v1085_v26 = vsel %vm169_vm0, %v984_v29, 0.0 }
 0x208   :  { %v1080_v40 = vadd.f32 %v1079_v13, %v1078_v61  ;;  %v986_v13 = vmul.f32 %v2663_v51, %v2663_v51  ;;  %v1087_v45 = vsel %vm169_vm0, %v985_v18, 0.0 }
 0x20a   :  { %v1082_v41 = vadd.f32 %v1081_v37, %v1080_v40  ;;  %v987_v37 = vmul.f32 %v2670_v55, %v2670_v55  ;;  %v1089_v29 = vsel %vm169_vm0, %v986_v13, 0.0 }
 0x20c   :  { %v1084_v61 = vadd.f32 %v1083_v10, %v1082_v41  ;;  %v988_v10 = vmul.f32 %v2677_v59, %v2677_v59  ;;  %v1091_v18 = vsel %vm169_vm0, %v987_v37, 0.0 }
 0x20e   :  { %v1086_v40 = vadd.f32 %v1085_v26, %v1084_v61  ;;  %v989_v26 = vmul.f32 %v2684_v63, %v2684_v63  ;;  %v1093_v13 = vsel %vm169_vm0, %v988_v10, 0.0 }
 0x210   :  { %v1088_v41 = vadd.f32 %v1087_v45, %v1086_v40  ;;  %v990_v45 = vmul.f32 %v2691_v3, %v2691_v3  ;;  %v1095_v37 = vsel %vm169_vm0, %v989_v26, 0.0 }
 0x212   :  { %v1090_v61 = vadd.f32 %v1089_v29, %v1088_v41  ;;  %v991_v29 = vmul.f32 %v2698_v7, %v2698_v7  ;;  %v1097_v10 = vsel %vm169_vm0, %v990_v45, 0.0 }
 0x214   :  { %v1092_v40 = vadd.f32 %v1091_v18, %v1090_v61  ;;  %v992_v18 = vmul.f32 %v2705_v11, %v2705_v11  ;;  %v1099_v26 = vsel %vm169_vm0, %v991_v29, 0.0 }
 0x216   :  { %v1094_v41 = vadd.f32 %v1093_v13, %v1092_v40  ;;  %v993_v13 = vmul.f32 %v2712_v15, %v2712_v15  ;;  %v1101_v45 = vsel %vm169_vm0, %v992_v18, 0.0 }
 0x218   :  { %v1096_v61 = vadd.f32 %v1095_v37, %v1094_v41  ;;  %v994_v37 = vmul.f32 %v2719_v19, %v2719_v19  ;;  %v1103_v29 = vsel %vm169_vm0, %v993_v13, 0.0 }
 0x21a   :  { %v1098_v40 = vadd.f32 %v1097_v10, %v1096_v61  ;;  %v995_v10 = vmul.f32 %v2726_v23, %v2726_v23  ;;  %v1105_v18 = vsel %vm169_vm0, %v994_v37, 0.0 }
 0x21c   :  { %v1100_v41 = vadd.f32 %v1099_v26, %v1098_v40  ;;  %v996_v26 = vmul.f32 %v2733_v38, %v2733_v38  ;;  %v1107_v13 = vsel %vm169_vm0, %v995_v10, 0.0 }
 0x21e   :  { %v1102_v61 = vadd.f32 %v1101_v45, %v1100_v41  ;;  %v997_v45 = vmul.f32 %v2740_v54, %v2740_v54  ;;  %v1109_v37 = vsel %vm169_vm0, %v996_v26, 0.0 }
 0x220   :  { %v1104_v40 = vadd.f32 %v1103_v29, %v1102_v61  ;;  %v998_v29 = vmul.f32 %v2747_v6, %v2747_v6  ;;  %v1111_v10 = vsel %vm169_vm0, %v997_v45, 0.0 }
 0x222   :  { %v1106_v41 = vadd.f32 %v1105_v18, %v1104_v40  ;;  %v999_v18 = vmul.f32 %v2754_v22, %v2754_v22  ;;  %v1113_v26 = vsel %vm169_vm0, %v998_v29, 0.0 }
 0x224   :  { %v1108_v61 = vadd.f32 %v1107_v13, %v1106_v41  ;;  %v1000_v13 = vmul.f32 %v2761_v42, %v2761_v42  ;;  %v1115_v45 = vsel %vm169_vm0, %v999_v18, 0.0  ;;  %v1002_v42 = vmul.f32 %v2775_v21, %v2775_v21 }
 0x226   :  { %v1110_v40 = vadd.f32 %v1109_v37, %v1108_v61  ;;  %v1001_v37 = vmul.f32 %v2768_v1, %v2768_v1  ;;  %v1117_v29 = vsel %vm169_vm0, %v1000_v13, 0.0  ;;  %v1003_v1 = vmul.f32 %v2782_v49, %v2782_v49 }
 0x227   :  { %v1121_v13 = vsel %vm169_vm0, %v1002_v42, 0.0 }
 0x228   :  { %v1112_v41 = vadd.f32 %v1111_v10, %v1110_v40  ;;  %v3828_v10 = vld [vmem:[#allocation11_spill] sm:$0xff]  ;;  %v1119_v18 = vsel %vm169_vm0, %v1001_v37, 0.0  ;;  %v1123_v37 = vsel %vm169_vm0, %v1003_v1, 0.0 }
 0x229   :  { %v2789_v14 = vsub.f32 %v3828_v10, %v2387_v30 }
 0x22a   :  { %v1114_v61 = vadd.f32 %v1113_v26, %v1112_v41  ;;  %v3830_v26 = vld [vmem:[#allocation13_spill] sm:$0xff] }
 0x22b   :  { %3829 = vst [vmem:[#allocation11_spill] sm:$0xff] %v2789_v14  ;;  %v2796_v46 = vsub.f32 %v3830_v26, %v2387_v30  ;;  %v1004_v21 = vmul.f32 %v2789_v14, %v2789_v14 }
 0x22c   :  { %v1116_v40 = vadd.f32 %v1115_v45, %v1114_v61  ;;  %v3832_v45 = vld [vmem:[#allocation15_spill] sm:$0xff] }
 0x22d   :  { %3831 = vst [vmem:[#allocation13_spill] sm:$0xff] %v2796_v46  ;;  %v2803_v10 = vsub.f32 %v3832_v45, %v2387_v30  ;;  %v1005_v26 = vmul.f32 %v2796_v46, %v2796_v46  ;;  %v1125_v42 = vsel %vm169_vm0, %v1004_v21, 0.0 }
 0x22e   :  { %v1118_v41 = vadd.f32 %v1117_v29, %v1116_v40  ;;  %v2810_v29 = vsub.f32 %v2307_v9, %v2387_v30  ;;  %v2824_v9 = vsub.f32 %v2321_v34, %v2387_v30 }
 0x22f   :  { %3833 = vst [vmem:[#allocation15_spill] sm:$0xff] %v2803_v10  ;;  %v1006_v45 = vmul.f32 %v2803_v10, %v2803_v10  ;;  %v1127_v1 = vsel %vm169_vm0, %v1005_v26, 0.0 }
 0x230   :  { %v1120_v61 = vadd.f32 %v1119_v18, %v1118_v41  ;;  %3834 = vst [vmem:[#allocation19_spill] sm:$0xff] %v2810_v29  ;;  %v2817_v18 = vsub.f32 %v2315_v58, %v2387_v30  ;;  %v1009_v21 = vmul.f32 %v2824_v9, %v2824_v9 }
 0x232   :  { %v1122_v40 = vadd.f32 %v1121_v13, %v1120_v61  ;;  %3835 = vst [vmem:[#allocation20_spill] sm:$0xff] %v2817_v18  ;;  %v1007_v13 = vmul.f32 %v2810_v29, %v2810_v29  ;;  %v1008_v58 = vmul.f32 %v2817_v18, %v2817_v18  ;;  %v1135_v29 = vsel %vm169_vm0, %v1009_v21, 0.0  ;;  %v3839_v21 = vld [vmem:[#allocation4_spill] sm:$0xff] }
 0x234   :  { %v1124_v41 = vadd.f32 %v1123_v37, %v1122_v40  ;;  %v1129_v37 = vsel %vm169_vm0, %v1006_v45, 0.0  ;;  %v1133_v30 = vsel %vm169_vm0, %v1008_v58, 0.0  ;;  %v3838_v58 = vld [vmem:[#allocation3_spill] sm:$0xff] }
 0x236   :  { %v1126_v61 = vadd.f32 %v1125_v42, %v1124_v41  ;;  %v1131_v41 = vsel %vm169_vm0, %v1007_v13, 0.0 }
 0x238   :  { %v1128_v40 = vadd.f32 %v1127_v1, %v1126_v61 }
 0x23a   :  { %v1130_v46 = vadd.f32 %v1129_v37, %v1128_v40 }
 0x23c   :  { %v1132_v42 = vadd.f32 %v1131_v41, %v1130_v46  ;;  %v3840_v41 = vld [vmem:[#allocation5_spill] sm:$0xff] }
 0x23e   :  { %v1134_v34 = vadd.f32 %v1133_v30, %v1132_v42  ;;  %v3841_v42 = vld [vmem:[#allocation6_spill] sm:$0xff] }
 0x240   :  { %v1136_v10 = vadd.f32 %v1135_v29, %v1134_v34  ;;  %v3836_v29 = vld [vmem:[#allocation18_spill] sm:$0xff]  ;;  %v3842_v34 = vld [vmem:[#allocation7_spill] sm:$0xff] }
 0x242   :  { %v1137_v26 = vrot.slane %v1136_v10, 4 }
 0x244   :  { %v1138_v61 = vadd.f32 %v1137_v26, %v1136_v10 }
 0x246   :  { %v1139_v1 = vrot.slane %v1138_v61, 2 }
 0x248   :  { %v1140_v14 = vadd.f32 %v1139_v1, %v1138_v61  ;;  %v3843_v61 = vld [vmem:[#allocation8_spill] sm:$0xff] }
 0x24a   :  { %v1141_v18 = vrot.slane %v1140_v14, 1 }
 0x24c   :  { %v1142_v49 = vadd.f32 %v1141_v18, %v1140_v14  ;;  %v3837_v18 = vld [vmem:[#allocation2_spill] sm:$0xff] }
 0x24e   :  { %v1143_v45 = vmul.f32 0.001953125, %v1142_v49 }
 0x250   :  { %v1144_v40 = vadd.f32 1e-05, %v1143_v45  ;;  %v3844_v45 = vld [vmem:[#allocation9_spill] sm:$0xff] }
 0x252   :  { %1535 = vrsqrt.f32 %v1144_v40 }
 0x25f   :  { %v2837_v37 = vpop.eup %1535 }
 0x260   :  { %v2841_v46 = vmul.f32 %v2837_v37, %v2391_v53  ;;  %v2845_v13 = vmul.f32 %v2837_v37, %v2395_v33  ;;  %v2849_v10 = vmul.f32 %v2837_v37, %v2399_v2  ;;  %v2853_v14 = vmul.f32 %v2837_v37, %v2403_v5 }
 0x261   :  { %v2857_v49 = vmul.f32 %v2837_v37, %v2411_v25  ;;  %v2861_v53 = vmul.f32 %v2837_v37, %v2417_v32  ;;  %v2865_v33 = vmul.f32 %v2837_v37, %v2425_v17  ;;  %v2869_v2 = vmul.f32 %v2837_v37, %v2432_v44 }
 0x262   :  { %v2873_v5 = vmul.f32 %v2837_v37, %v2439_v48  ;;  %v2877_v25 = vmul.f32 %v2837_v37, %v2446_v52  ;;  %v2881_v32 = vmul.f32 %v2837_v37, %v2453_v56  ;;  %v2885_v17 = vmul.f32 %v2837_v37, %v2460_v60 }
 0x263   :  { %v2889_v44 = vmul.f32 %v2837_v37, %v2467_v0  ;;  %v2893_v48 = vmul.f32 %v2837_v37, %v2474_v4  ;;  %v2897_v52 = vmul.f32 %v2837_v37, %v2481_v8  ;;  %v2901_v56 = vmul.f32 %v2837_v37, %v2488_v12 }
 0x264   :  { %v2905_v60 = vmul.f32 %v2837_v37, %v2495_v16  ;;  %v2909_v0 = vmul.f32 %v2837_v37, %v3836_v29  ;;  %v2913_v4 = vmul.f32 %v2837_v37, %v3837_v18  ;;  %v2917_v8 = vmul.f32 %v2837_v37, %v3838_v58  ;;  %v3845_v29 = vld [vmem:[#allocation10_spill] sm:$0xff] }
 0x265   :  { %v2921_v12 = vmul.f32 %v2837_v37, %v3839_v21  ;;  %v2925_v16 = vmul.f32 %v2837_v37, %v3840_v41  ;;  %v2929_v30 = vmul.f32 %v2837_v37, %v3841_v42  ;;  %v2933_v26 = vmul.f32 %v2837_v37, %v3842_v34 }
 0x266   :  { %v2937_v1 = vmul.f32 %v2837_v37, %v3843_v61  ;;  %v2941_v40 = vmul.f32 %v2837_v37, %v3844_v45  ;;  %v2945_v18 = vmul.f32 %v2837_v37, %v3845_v29  ;;  %v2949_v58 = vmul.f32 %v2837_v37, %v2572_v24  ;;  %v3850_v61 = vld [vmem:[#allocation12_spill] sm:$0xff]  ;;  %v3852_v45 = vld [vmem:[#allocation14_spill] sm:$0xff] }
 0x267   :  { %v2953_v21 = vmul.f32 %v2837_v37, %v2579_v62  ;;  %v2957_v41 = vmul.f32 %v2837_v37, %v2586_v36  ;;  %v2961_v42 = vmul.f32 %v2837_v37, %v2593_v20  ;;  %v2965_v34 = vmul.f32 %v2837_v37, %v2600_v28  ;;  %v3854_v29 = vld [vmem:[#allocation16_spill] sm:$0xff] }
 0x268   :  { %v2969_v24 = vmul.f32 %v2837_v37, %v2607_v50  ;;  %v2973_v62 = vmul.f32 %v2837_v37, %v2614_v57  ;;  %v2977_v36 = vmul.f32 %v2837_v37, %v2621_v27  ;;  %v2981_v20 = vmul.f32 %v2837_v37, %v2628_v31 }
 0x269   :  { %v2985_v28 = vmul.f32 %v2837_v37, %v2635_v35  ;;  %v2989_v50 = vmul.f32 %v2837_v37, %v2642_v39  ;;  %v2993_v57 = vmul.f32 %v2837_v37, %v2649_v43  ;;  %v2997_v27 = vmul.f32 %v2837_v37, %v2656_v47 }
 0x26a   :  { %v3001_v31 = vmul.f32 %v2837_v37, %v2663_v51  ;;  %v3005_v35 = vmul.f32 %v2837_v37, %v2670_v55  ;;  %v3009_v39 = vmul.f32 %v2837_v37, %v2677_v59  ;;  %v3013_v43 = vmul.f32 %v2837_v37, %v2684_v63 }
 0x26b   :  { %v3017_v47 = vmul.f32 %v2837_v37, %v2691_v3  ;;  %v3021_v51 = vmul.f32 %v2837_v37, %v2698_v7  ;;  %v3025_v55 = vmul.f32 %v2837_v37, %v2705_v11  ;;  %v3029_v59 = vmul.f32 %v2837_v37, %v2712_v15 }
 0x26c   :  { %v3033_v63 = vmul.f32 %v2837_v37, %v2719_v19  ;;  %v3037_v3 = vmul.f32 %v2837_v37, %v2726_v23  ;;  %v3041_v7 = vmul.f32 %v2837_v37, %v2733_v38  ;;  %v3045_v11 = vmul.f32 %v2837_v37, %v2740_v54  ;;  %v3066_v54 = vld [vmem:[%s3747_s2] ss:$0 sm:$0xff] }
 0x26d   :  { %v3049_v15 = vmul.f32 %v2837_v37, %v2747_v6  ;;  %v3053_v19 = vmul.f32 %v2837_v37, %v2754_v22  ;;  %v3057_v23 = vmul.f32 %v2837_v37, %v3850_v61  ;;  %v3061_v38 = vmul.f32 %v2837_v37, %v3852_v45 }
 0x26e   :  { %3846 = vst [vmem:[#allocation18_spill] sm:$0xff] %v3041_v7  ;;  %3847 = vst [vmem:[#allocation2_spill] sm:$0xff] %v3045_v11  ;;  %v3070_v6 = vmul.f32 %v2837_v37, %v3854_v29  ;;  %v3860_v7 = vld [vmem:[#allocation19_spill] sm:$0xff] }
 0x26f   :  { %3848 = vst [vmem:[#allocation3_spill] sm:$0xff] %v3049_v15  ;;  %3849 = vst [vmem:[#allocation4_spill] sm:$0xff] %v3053_v19  ;;  %v3856_v15 = vld [vmem:[#allocation17_spill] sm:$0xff]  ;;  %v3857_v19 = vld [vmem:[#allocation11_spill] sm:$0xff]  ;;  %v3090_v29 = vmul.f32 %v2837_v37, %v3860_v7  ;;  %v3110_v7 = vmul.f32 %v3066_v54, %v2849_v10  ;;  %v3134_v10 = vmul.f32 %v3066_v54, %v2873_v5 }
 0x270   :  { %3851 = vst [vmem:[#allocation5_spill] sm:$0xff] %v3057_v23  ;;  %3853 = vst [vmem:[#allocation6_spill] sm:$0xff] %v3061_v38  ;;  %v3074_v22 = vmul.f32 %v2837_v37, %v3856_v15  ;;  %v3078_v61 = vmul.f32 %v2837_v37, %v3857_v19  ;;  %v3858_v23 = vld [vmem:[#allocation13_spill] sm:$0xff]  ;;  %v3859_v38 = vld [vmem:[#allocation15_spill] sm:$0xff]  ;;  %v3098_v19 = vmul.f32 %v2837_v37, %v2824_v9 }
 0x271   :  { %3855 = vst [vmem:[#allocation7_spill] sm:$0xff] %v3070_v6  ;;  %v3082_v45 = vmul.f32 %v2837_v37, %v3858_v23  ;;  %v3086_v11 = vmul.f32 %v2837_v37, %v3859_v38  ;;  %v3861_v6 = vld [vmem:[#allocation20_spill] sm:$0xff]  ;;  %v3102_v23 = vmul.f32 %v3066_v54, %v2841_v46  ;;  %v3106_v38 = vmul.f32 %v3066_v54, %v2845_v13 }
 0x272   :  { %v3094_v15 = vmul.f32 %v2837_v37, %v3861_v6  ;;  %v3114_v6 = vmul.f32 %v3066_v54, %v2853_v14  ;;  %v3118_v9 = vmul.f32 %v3066_v54, %v2857_v49  ;;  %v3122_v37 = vmul.f32 %v3066_v54, %v2861_v53 }
 0x273   :  { %v3126_v46 = vmul.f32 %v3066_v54, %v2865_v33  ;;  %v3130_v13 = vmul.f32 %v3066_v54, %v2869_v2  ;;  %v3138_v14 = vmul.f32 %v3066_v54, %v2877_v25  ;;  %v3142_v49 = vmul.f32 %v3066_v54, %v2881_v32 }
 0x274   :  { %v3146_v53 = vmul.f32 %v3066_v54, %v2885_v17  ;;  %v3150_v33 = vmul.f32 %v3066_v54, %v2889_v44  ;;  %v3154_v2 = vmul.f32 %v3066_v54, %v2893_v48  ;;  %v3158_v5 = vmul.f32 %v3066_v54, %v2897_v52 }
 0x275   :  { %v3162_v25 = vmul.f32 %v3066_v54, %v2901_v56  ;;  %v3166_v32 = vmul.f32 %v3066_v54, %v2905_v60  ;;  %v3170_v17 = vmul.f32 %v3066_v54, %v2909_v0  ;;  %v3174_v44 = vmul.f32 %v3066_v54, %v2913_v4 }
 0x276   :  { %v3178_v48 = vmul.f32 %v3066_v54, %v2917_v8  ;;  %v3182_v52 = vmul.f32 %v3066_v54, %v2921_v12  ;;  %v3186_v56 = vmul.f32 %v3066_v54, %v2925_v16  ;;  %v3190_v60 = vmul.f32 %v3066_v54, %v2929_v30 }
 0x277   :  { %v3194_v0 = vmul.f32 %v3066_v54, %v2933_v26  ;;  %v3198_v4 = vmul.f32 %v3066_v54, %v2937_v1  ;;  %v3202_v8 = vmul.f32 %v3066_v54, %v2941_v40  ;;  %v3206_v12 = vmul.f32 %v3066_v54, %v2945_v18 }
 0x278   :  { %v3210_v16 = vmul.f32 %v3066_v54, %v2949_v58  ;;  %v3214_v30 = vmul.f32 %v3066_v54, %v2953_v21  ;;  %v3218_v26 = vmul.f32 %v3066_v54, %v2957_v41  ;;  %v3222_v1 = vmul.f32 %v3066_v54, %v2961_v42 }
 0x279   :  { %v3226_v40 = vmul.f32 %v3066_v54, %v2965_v34  ;;  %v3230_v18 = vmul.f32 %v3066_v54, %v2969_v24  ;;  %v3234_v58 = vmul.f32 %v3066_v54, %v2973_v62  ;;  %v3238_v21 = vmul.f32 %v3066_v54, %v2977_v36 }
 0x27a   :  { %v3242_v41 = vmul.f32 %v3066_v54, %v2981_v20  ;;  %v3246_v42 = vmul.f32 %v3066_v54, %v2985_v28  ;;  %v3250_v34 = vmul.f32 %v3066_v54, %v2989_v50  ;;  %v3254_v24 = vmul.f32 %v3066_v54, %v2993_v57 }
 0x27b   :  { %v3258_v62 = vmul.f32 %v3066_v54, %v2997_v27  ;;  %v3262_v36 = vmul.f32 %v3066_v54, %v3001_v31  ;;  %v3266_v20 = vmul.f32 %v3066_v54, %v3005_v35  ;;  %v3270_v28 = vmul.f32 %v3066_v54, %v3009_v39 }
 0x27c   :  { %v3274_v50 = vmul.f32 %v3066_v54, %v3013_v43  ;;  %v3278_v57 = vmul.f32 %v3066_v54, %v3017_v47  ;;  %v3282_v27 = vmul.f32 %v3066_v54, %v3021_v51  ;;  %v3286_v31 = vmul.f32 %v3066_v54, %v3025_v55  ;;  %v3867_v47 = vld [vmem:[#allocation18_spill] sm:$0xff] }
 0x27d   :  { %v3290_v35 = vmul.f32 %v3066_v54, %v3029_v59  ;;  %v3294_v39 = vmul.f32 %v3066_v54, %v3033_v63  ;;  %v3298_v43 = vmul.f32 %v3066_v54, %v3037_v3  ;;  %v3302_v51 = vmul.f32 %v3066_v54, %v3867_v47 }
 0x27e   :  { %3862 = vst [vmem:[#allocation8_spill] sm:$0xff] %v3282_v27  ;;  %3863 = vst [vmem:[#allocation9_spill] sm:$0xff] %v3286_v31  ;;  %v3868_v27 = vld [vmem:[#allocation2_spill] sm:$0xff]  ;;  %v3870_v31 = vld [vmem:[#allocation3_spill] sm:$0xff] }
 0x27f   :  { %3864 = vst [vmem:[#allocation10_spill] sm:$0xff] %v3290_v35  ;;  %3865 = vst [vmem:[#allocation12_spill] sm:$0xff] %v3294_v39  ;;  %v3306_v55 = vmul.f32 %v3066_v54, %v3868_v27  ;;  %v3310_v59 = vmul.f32 %v3066_v54, %v3870_v31  ;;  %v3871_v35 = vld [vmem:[#allocation4_spill] sm:$0xff]  ;;  %v3872_v39 = vld [vmem:[#allocation5_spill] sm:$0xff] }
 0x280   :  { %3866 = vst [vmem:[#allocation14_spill] sm:$0xff] %v3298_v43  ;;  %v3314_v63 = vmul.f32 %v3066_v54, %v3871_v35  ;;  %v3318_v3 = vmul.f32 %v3066_v54, %v3872_v39  ;;  %v3873_v43 = vld [vmem:[#allocation6_spill] sm:$0xff]  ;;  %v3335_v35 = vmul.f32 %v3066_v54, %v3074_v22  ;;  %v3339_v39 = vmul.f32 %v3066_v54, %v3078_v61 }
 0x281   :  { %3869 = vst [vmem:[#allocation16_spill] sm:$0xff] %v3306_v55  ;;  %v3322_v47 = vmul.f32 %v3066_v54, %v3873_v43  ;;  %v3327_v27 = vld [vmem:[%s3748_s3] ss:$0 sm:$0xff]  ;;  %v3875_v55 = vld [vmem:[#allocation7_spill] sm:$0xff]  ;;  %v3343_v43 = vmul.f32 %v3066_v54, %v3082_v45  ;;  %v3355_v22 = vmul.f32 %v3066_v54, %v3094_v15  ;;  %v3359_v61 = vmul.f32 %v3066_v54, %v3098_v19 }
 0x282   :  { %v3331_v31 = vmul.f32 %v3066_v54, %v3875_v55  ;;  %v3351_v55 = vmul.f32 %v3066_v54, %v3090_v29  ;;  %v1288_v45 = vadd.f32 %v3327_v27, %v3102_v23  ;;  %v1291_v29 = vadd.f32 %v3327_v27, %v3114_v6 }
 0x283   :  { %3874 = vst [vmem:[#allocation17_spill] sm:$0xff] %v3322_v47  ;;  %3876 = vst [vmem:[#allocation11_spill] sm:$0xff] %v3343_v43  ;;  %v3347_v47 = vmul.f32 %v3066_v54, %v3086_v11  ;;  %v1289_v43 = vadd.f32 %v3327_v27, %v3106_v38  ;;  %v1290_v11 = vadd.f32 %v3327_v27, %v3110_v7 }
 0x284   :  { %3877 = vst [vmem:[#allocation13_spill] sm:$0xff] %v3355_v22  ;;  %v1292_v15 = vadd.f32 %v3327_v27, %v3118_v9  ;;  %v1293_v22 = vadd.f32 %v3327_v27, %v3122_v37  ;;  %v1294_v54 = vadd.f32 %v3327_v27, %v3126_v46  ;;  %v1295_v19 = vadd.f32 %v3327_v27, %v3130_v13 }
 0x285   :  { %v1296_v23 = vadd.f32 %v3327_v27, %v3134_v10  ;;  %v1297_v38 = vadd.f32 %v3327_v27, %v3138_v14  ;;  %v1298_v7 = vadd.f32 %v3327_v27, %v3142_v49  ;;  %v1299_v6 = vadd.f32 %v3327_v27, %v3146_v53  ;;  %1352 = vst.msk [vmem:[%s3749_s4] sm:$0xff] %vm169_vm0, %v1288_v45 }
 0x286   :  { %1353 = vst.msk [vmem:[%s3749_s4 + $0x8] sm:$0xff] %vm169_vm0, %v1289_v43  ;;  %1354 = vst.msk [vmem:[%s3749_s4 + $0x10] sm:$0xff] %vm169_vm0, %v1290_v11  ;;  %v1300_v9 = vadd.f32 %v3327_v27, %v3150_v33  ;;  %v1301_v37 = vadd.f32 %v3327_v27, %v3154_v2  ;;  %v1302_v46 = vadd.f32 %v3327_v27, %v3158_v5 }
 0x287   :  { %1355 = vst.msk [vmem:[%s3749_s4 + $0x18] sm:$0xff] %vm169_vm0, %v1291_v29  ;;  %v1303_v13 = vadd.f32 %v3327_v27, %v3162_v25  ;;  %1356 = vst.msk [vmem:[%s3749_s4 + $0x20] sm:$0xff] %vm169_vm0, %v1292_v15  ;;  %v1304_v10 = vadd.f32 %v3327_v27, %v3166_v32  ;;  %v1305_v14 = vadd.f32 %v3327_v27, %v3170_v17  ;;  %v3882_v43 = vld [vmem:[#allocation14_spill] sm:$0xff] }
 0x288   :  { %1357 = vst.msk [vmem:[%s3749_s4 + $0x28] sm:$0xff] %vm169_vm0, %v1293_v22  ;;  %1358 = vst.msk [vmem:[%s3749_s4 + $0x30] sm:$0xff] %vm169_vm0, %v1294_v54  ;;  %v1306_v49 = vadd.f32 %v3327_v27, %v3174_v44  ;;  %v1307_v53 = vadd.f32 %v3327_v27, %v3178_v48  ;;  %v1308_v33 = vadd.f32 %v3327_v27, %v3182_v52  ;;  %v3883_v11 = vld [vmem:[#allocation16_spill] sm:$0xff] }
 0x289   :  { %1359 = vst.msk [vmem:[%s3749_s4 + $0x38] sm:$0xff] %vm169_vm0, %v1295_v19  ;;  %1360 = vst.msk [vmem:[%s3749_s4 + $0x40] sm:$0xff] %vm169_vm0, %v1296_v23  ;;  %v1309_v2 = vadd.f32 %v3327_v27, %v3186_v56  ;;  %v1310_v5 = vadd.f32 %v3327_v27, %v3190_v60  ;;  %v1311_v25 = vadd.f32 %v3327_v27, %v3194_v0 }
 0x28a   :  { %1361 = vst.msk [vmem:[%s3749_s4 + $0x48] sm:$0xff] %vm169_vm0, %v1297_v38  ;;  %1362 = vst.msk [vmem:[%s3749_s4 + $0x50] sm:$0xff] %vm169_vm0, %v1298_v7  ;;  %v1312_v32 = vadd.f32 %v3327_v27, %v3198_v4  ;;  %v1313_v17 = vadd.f32 %v3327_v27, %v3202_v8  ;;  %v1314_v44 = vadd.f32 %v3327_v27, %v3206_v12  ;;  %v3884_v19 = vld [vmem:[#allocation17_spill] sm:$0xff]  ;;  %v3885_v38 = vld [vmem:[#allocation11_spill] sm:$0xff] }
 0x28b   :  { %1363 = vst.msk [vmem:[%s3749_s4 + $0x58] sm:$0xff] %vm169_vm0, %v1299_v6  ;;  %1364 = vst.msk [vmem:[%s3749_s4 + $0x60] sm:$0xff] %vm169_vm0, %v1300_v9  ;;  %v1315_v48 = vadd.f32 %v3327_v27, %v3210_v16  ;;  %v1316_v52 = vadd.f32 %v3327_v27, %v3214_v30  ;;  %v1317_v56 = vadd.f32 %v3327_v27, %v3218_v26 }
 0x28c   :  { %1365 = vst.msk [vmem:[%s3749_s4 + $0x68] sm:$0xff] %vm169_vm0, %v1301_v37  ;;  %1366 = vst.msk [vmem:[%s3749_s4 + $0x70] sm:$0xff] %vm169_vm0, %v1302_v46  ;;  %v1318_v60 = vadd.f32 %v3327_v27, %v3222_v1  ;;  %v1319_v0 = vadd.f32 %v3327_v27, %v3226_v40  ;;  %v1320_v4 = vadd.f32 %v3327_v27, %v3230_v18 }
 0x28d   :  { %1367 = vst.msk [vmem:[%s3749_s4 + $0x78] sm:$0xff] %vm169_vm0, %v1303_v13  ;;  %1368 = vst.msk [vmem:[%s3749_s4 + $0x80] sm:$0xff] %vm169_vm0, %v1304_v10  ;;  %v1321_v8 = vadd.f32 %v3327_v27, %v3234_v58  ;;  %v1322_v12 = vadd.f32 %v3327_v27, %v3238_v21  ;;  %v1323_v16 = vadd.f32 %v3327_v27, %v3242_v41 }
 0x28e   :  { %1369 = vst.msk [vmem:[%s3749_s4 + $0x88] sm:$0xff] %vm169_vm0, %v1305_v14  ;;  %1370 = vst.msk [vmem:[%s3749_s4 + $0x90] sm:$0xff] %vm169_vm0, %v1306_v49  ;;  %v1324_v30 = vadd.f32 %v3327_v27, %v3246_v42  ;;  %v1325_v26 = vadd.f32 %v3327_v27, %v3250_v34  ;;  %v1326_v1 = vadd.f32 %v3327_v27, %v3254_v24  ;;  %v3878_v34 = vld [vmem:[#allocation8_spill] sm:$0xff] }
 0x28f   :  { %1371 = vst.msk [vmem:[%s3749_s4 + $0x98] sm:$0xff] %vm169_vm0, %v1307_v53  ;;  %1372 = vst.msk [vmem:[%s3749_s4 + $0xa0] sm:$0xff] %vm169_vm0, %v1308_v33  ;;  %v1327_v40 = vadd.f32 %v3327_v27, %v3258_v62  ;;  %v1328_v18 = vadd.f32 %v3327_v27, %v3262_v36  ;;  %v1329_v58 = vadd.f32 %v3327_v27, %v3266_v20  ;;  %v3879_v62 = vld [vmem:[#allocation9_spill] sm:$0xff]  ;;  %v3880_v20 = vld [vmem:[#allocation10_spill] sm:$0xff] }
 0x290   :  { %1373 = vst.msk [vmem:[%s3749_s4 + $0xa8] sm:$0xff] %vm169_vm0, %v1309_v2  ;;  %1374 = vst.msk [vmem:[%s3749_s4 + $0xb0] sm:$0xff] %vm169_vm0, %v1310_v5  ;;  %v1330_v21 = vadd.f32 %v3327_v27, %v3270_v28  ;;  %v1331_v41 = vadd.f32 %v3327_v27, %v3274_v50  ;;  %v1332_v42 = vadd.f32 %v3327_v27, %v3278_v57  ;;  %v3881_v50 = vld [vmem:[#allocation12_spill] sm:$0xff] }
 0x291   :  { %1375 = vst.msk [vmem:[%s3749_s4 + $0xb8] sm:$0xff] %vm169_vm0, %v1311_v25  ;;  %1376 = vst.msk [vmem:[%s3749_s4 + $0xc0] sm:$0xff] %vm169_vm0, %v1312_v32  ;;  %v1333_v24 = vadd.f32 %v3327_v27, %v3878_v34  ;;  %v1334_v36 = vadd.f32 %v3327_v27, %v3879_v62  ;;  %v1335_v28 = vadd.f32 %v3327_v27, %v3880_v20 }
 0x292   :  { %1377 = vst.msk [vmem:[%s3749_s4 + $0xc8] sm:$0xff] %vm169_vm0, %v1313_v17  ;;  %1378 = vst.msk [vmem:[%s3749_s4 + $0xd0] sm:$0xff] %vm169_vm0, %v1314_v44  ;;  %v1336_v57 = vadd.f32 %v3327_v27, %v3881_v50  ;;  %v1337_v22 = vadd.f32 %v3327_v27, %v3882_v43  ;;  %v1338_v45 = vadd.f32 %v3327_v27, %v3302_v51 }
 0x293   :  { %1379 = vst.msk [vmem:[%s3749_s4 + $0xd8] sm:$0xff] %vm169_vm0, %v1315_v48  ;;  %1380 = vst.msk [vmem:[%s3749_s4 + $0xe0] sm:$0xff] %vm169_vm0, %v1316_v52  ;;  %v1339_v29 = vadd.f32 %v3327_v27, %v3883_v11  ;;  %v1340_v51 = vadd.f32 %v3327_v27, %v3310_v59  ;;  %v1341_v15 = vadd.f32 %v3327_v27, %v3314_v63 }
 0x294   :  { %1381 = vst.msk [vmem:[%s3749_s4 + $0xe8] sm:$0xff] %vm169_vm0, %v1317_v56  ;;  %1382 = vst.msk [vmem:[%s3749_s4 + $0xf0] sm:$0xff] %vm169_vm0, %v1318_v60  ;;  %v1342_v54 = vadd.f32 %v3327_v27, %v3318_v3  ;;  %v1343_v23 = vadd.f32 %v3327_v27, %v3884_v19  ;;  %v1344_v59 = vadd.f32 %v3327_v27, %v3331_v31 }
 0x295   :  { %1383 = vst.msk [vmem:[%s3749_s4 + $0xf8] sm:$0xff] %vm169_vm0, %v1319_v0  ;;  %1384 = vst.msk [vmem:[%s3749_s4 + $0x100] sm:$0xff] %vm169_vm0, %v1320_v4  ;;  %v1345_v63 = vadd.f32 %v3327_v27, %v3335_v35  ;;  %v1346_v3 = vadd.f32 %v3327_v27, %v3339_v39  ;;  %v1347_v7 = vadd.f32 %v3327_v27, %v3885_v38  ;;  %v3886_v39 = vld [vmem:[#allocation13_spill] sm:$0xff] }
 0x296   :  { %1385 = vst.msk [vmem:[%s3749_s4 + $0x108] sm:$0xff] %vm169_vm0, %v1321_v8  ;;  %1386 = vst.msk [vmem:[%s3749_s4 + $0x110] sm:$0xff] %vm169_vm0, %v1322_v12  ;;  %v1348_v31 = vadd.f32 %v3327_v27, %v3347_v47  ;;  %v1349_v35 = vadd.f32 %v3327_v27, %v3351_v55  ;;  %v1350_v6 = vadd.f32 %v3327_v27, %v3886_v39 }
 0x297   :  { %1387 = vst.msk [vmem:[%s3749_s4 + $0x118] sm:$0xff] %vm169_vm0, %v1323_v16  ;;  %1388 = vst.msk [vmem:[%s3749_s4 + $0x120] sm:$0xff] %vm169_vm0, %v1324_v30  ;;  %v1351_v9 = vadd.f32 %v3327_v27, %v3359_v61 }
 0x298   :  { %1389 = vst.msk [vmem:[%s3749_s4 + $0x128] sm:$0xff] %vm169_vm0, %v1325_v26  ;;  %1390 = vst.msk [vmem:[%s3749_s4 + $0x130] sm:$0xff] %vm169_vm0, %v1326_v1 }
 0x299   :  { %1391 = vst.msk [vmem:[%s3749_s4 + $0x138] sm:$0xff] %vm169_vm0, %v1327_v40  ;;  %1392 = vst.msk [vmem:[%s3749_s4 + $0x140] sm:$0xff] %vm169_vm0, %v1328_v18 }
 0x29a   :  { %1393 = vst.msk [vmem:[%s3749_s4 + $0x148] sm:$0xff] %vm169_vm0, %v1329_v58  ;;  %1394 = vst.msk [vmem:[%s3749_s4 + $0x150] sm:$0xff] %vm169_vm0, %v1330_v21 }
 0x29b   :  { %1395 = vst.msk [vmem:[%s3749_s4 + $0x158] sm:$0xff] %vm169_vm0, %v1331_v41  ;;  %1396 = vst.msk [vmem:[%s3749_s4 + $0x160] sm:$0xff] %vm169_vm0, %v1332_v42 }
 0x29c   :  { %1397 = vst.msk [vmem:[%s3749_s4 + $0x168] sm:$0xff] %vm169_vm0, %v1333_v24  ;;  %1398 = vst.msk [vmem:[%s3749_s4 + $0x170] sm:$0xff] %vm169_vm0, %v1334_v36 }
 0x29d   :  { %1399 = vst.msk [vmem:[%s3749_s4 + $0x178] sm:$0xff] %vm169_vm0, %v1335_v28  ;;  %1400 = vst.msk [vmem:[%s3749_s4 + $0x180] sm:$0xff] %vm169_vm0, %v1336_v57 }
 0x29e   :  { %1401 = vst.msk [vmem:[%s3749_s4 + $0x188] sm:$0xff] %vm169_vm0, %v1337_v22  ;;  %1402 = vst.msk [vmem:[%s3749_s4 + $0x190] sm:$0xff] %vm169_vm0, %v1338_v45 }
 0x29f   :  { %1403 = vst.msk [vmem:[%s3749_s4 + $0x198] sm:$0xff] %vm169_vm0, %v1339_v29  ;;  %1404 = vst.msk [vmem:[%s3749_s4 + $0x1a0] sm:$0xff] %vm169_vm0, %v1340_v51 }
 0x2a0   :  { %1405 = vst.msk [vmem:[%s3749_s4 + $0x1a8] sm:$0xff] %vm169_vm0, %v1341_v15  ;;  %1406 = vst.msk [vmem:[%s3749_s4 + $0x1b0] sm:$0xff] %vm169_vm0, %v1342_v54 }
 0x2a1   :  { %1407 = vst.msk [vmem:[%s3749_s4 + $0x1b8] sm:$0xff] %vm169_vm0, %v1343_v23  ;;  %1408 = vst.msk [vmem:[%s3749_s4 + $0x1c0] sm:$0xff] %vm169_vm0, %v1344_v59 }
 0x2a2   :  { %1409 = vst.msk [vmem:[%s3749_s4 + $0x1c8] sm:$0xff] %vm169_vm0, %v1345_v63  ;;  %1410 = vst.msk [vmem:[%s3749_s4 + $0x1d0] sm:$0xff] %vm169_vm0, %v1346_v3 }
 0x2a3   :  { %1411 = vst.msk [vmem:[%s3749_s4 + $0x1d8] sm:$0xff] %vm169_vm0, %v1347_v7  ;;  %1412 = vst.msk [vmem:[%s3749_s4 + $0x1e0] sm:$0xff] %vm169_vm0, %v1348_v31 }
 0x2a4   :  { %1413 = vst.msk [vmem:[%s3749_s4 + $0x1e8] sm:$0xff] %vm169_vm0, %v1349_v35  ;;  %1414 = vst.msk [vmem:[%s3749_s4 + $0x1f0] sm:$0xff] %vm169_vm0, %v1350_v6 }
 0x2a5   :  { %1415 = vst.msk [vmem:[%s3749_s4 + $0x1f8] sm:$0xff] %vm169_vm0, %v1351_v9 }

// kernel: heatmap2feat_forward.17
= control target key start
LH: loop header
LB: loop body
LE: loop exit
PB: predicated region body
PF: predicated region fallthrough
CT: control target
= control target key end

     0   :  { %vm169_vm0 = vcmask 523264   ;;  %s1952_s1 = inlined_call_operand.vmem [shape: f32[576,64], index: 1, kind: input, shape index: {}]   ;;  %s1953_s0 = inlined_call_operand.vmem [shape: f32[128,576], index: 0, kind: input, shape index: {}]   ;;  %s1954_s2 = inlined_call_operand.vmem [shape: f32[1,64], index: 2, kind: input, shape index: {}]   ;;  %s1955_s3 = inlined_call_operand.vmem [shape: f32[1,64], index: 3, kind: input, shape index: {}]   ;;  %s1956_s4 = inlined_call_operand.vmem [shape: f32[128,64], index: 4, kind: output, shape index: {}]  }
   0x1   :  { %v128_v0 = vld [vmem:[%s1952_s1 + $0xf8] sm:$0xff]  ;;  %v127_v4 = vld [vmem:[%s1952_s1 + $0xf0] sm:$0xff]  ;;  %v126_v8 = vld [vmem:[%s1952_s1 + $0xe8] sm:$0xff] }
   0x2   :  { %v160_v1 = vld [vmem:[%s1952_s1 + $0x1f8] sm:$0xff]  ;;  %880 = vmatprep.subr.mxu0 %v128_v0  ;;  %v159_v5 = vld [vmem:[%s1952_s1 + $0x1f0] sm:$0xff]  ;;  %v158_v9 = vld [vmem:[%s1952_s1 + $0x1e8] sm:$0xff] }
   0x3   :  { %v112_v2 = vld [vmem:[%s1952_s1 + $0x78] sm:$0xff]  ;;  %960 = vmatprep.subr.mxu1 %v160_v1  ;;  %v111_v6 = vld [vmem:[%s1952_s1 + $0x70] sm:$0xff]  ;;  %v110_v10 = vld [vmem:[%s1952_s1 + $0x68] sm:$0xff] }
   0x4   :  { %v144_v3 = vld [vmem:[%s1952_s1 + $0x178] sm:$0xff]  ;;  %881 = vmatpush3.msra.mxu0 %v112_v2  ;;  %v143_v7 = vld [vmem:[%s1952_s1 + $0x170] sm:$0xff]  ;;  %v142_v11 = vld [vmem:[%s1952_s1 + $0x168] sm:$0xff] }
   0x5   :  { %961 = vmatpush3.msra.mxu1 %v144_v3  ;;  %882 = vmatprep.subr.mxu0 %v127_v4  ;;  %v125_v12 = vld [vmem:[%s1952_s1 + $0xe0] sm:$0xff]  ;;  %v124_v16 = vld [vmem:[%s1952_s1 + $0xd8] sm:$0xff]  ;;  %v123_v20 = vld [vmem:[%s1952_s1 + $0xd0] sm:$0xff] }
   0x6   :  { %962 = vmatprep.subr.mxu1 %v159_v5  ;;  %883 = vmatpush3.msra.mxu0 %v111_v6  ;;  %v157_v13 = vld [vmem:[%s1952_s1 + $0x1e0] sm:$0xff]  ;;  %v156_v17 = vld [vmem:[%s1952_s1 + $0x1d8] sm:$0xff]  ;;  %v155_v21 = vld [vmem:[%s1952_s1 + $0x1d0] sm:$0xff] }
   0x7   :  { %963 = vmatpush3.msra.mxu1 %v143_v7  ;;  %884 = vmatprep.subr.mxu0 %v126_v8  ;;  %v109_v14 = vld [vmem:[%s1952_s1 + $0x60] sm:$0xff]  ;;  %v108_v18 = vld [vmem:[%s1952_s1 + $0x58] sm:$0xff]  ;;  %v107_v22 = vld [vmem:[%s1952_s1 + $0x50] sm:$0xff] }
   0x8   :  { %964 = vmatprep.subr.mxu1 %v158_v9  ;;  %v141_v15 = vld [vmem:[%s1952_s1 + $0x160] sm:$0xff]  ;;  %885 = vmatpush3.msra.mxu0 %v110_v10  ;;  %v140_v19 = vld [vmem:[%s1952_s1 + $0x158] sm:$0xff]  ;;  %v139_v23 = vld [vmem:[%s1952_s1 + $0x150] sm:$0xff] }
   0x9   :  { %965 = vmatpush3.msra.mxu1 %v142_v11  ;;  %886 = vmatprep.subr.mxu0 %v125_v12  ;;  %v122_v24 = vld [vmem:[%s1952_s1 + $0xc8] sm:$0xff]  ;;  %v121_v28 = vld [vmem:[%s1952_s1 + $0xc0] sm:$0xff]  ;;  %v120_v32 = vld [vmem:[%s1952_s1 + $0xb8] sm:$0xff] }
   0xa   :  { %966 = vmatprep.subr.mxu1 %v157_v13  ;;  %887 = vmatpush3.msra.mxu0 %v109_v14  ;;  %v154_v25 = vld [vmem:[%s1952_s1 + $0x1c8] sm:$0xff]  ;;  %v153_v29 = vld [vmem:[%s1952_s1 + $0x1c0] sm:$0xff]  ;;  %v152_v33 = vld [vmem:[%s1952_s1 + $0x1b8] sm:$0xff] }
   0xb   :  { %967 = vmatpush3.msra.mxu1 %v141_v15  ;;  %888 = vmatprep.subr.mxu0 %v124_v16  ;;  %v106_v26 = vld [vmem:[%s1952_s1 + $0x48] sm:$0xff]  ;;  %v105_v30 = vld [vmem:[%s1952_s1 + $0x40] sm:$0xff]  ;;  %v104_v34 = vld [vmem:[%s1952_s1 + $0x38] sm:$0xff] }
   0xc   :  { %968 = vmatprep.subr.mxu1 %v156_v17  ;;  %889 = vmatpush3.msra.mxu0 %v108_v18  ;;  %v138_v27 = vld [vmem:[%s1952_s1 + $0x148] sm:$0xff]  ;;  %v137_v31 = vld [vmem:[%s1952_s1 + $0x140] sm:$0xff]  ;;  %v136_v35 = vld [vmem:[%s1952_s1 + $0x138] sm:$0xff] }
   0xd   :  { %969 = vmatpush3.msra.mxu1 %v140_v19  ;;  %890 = vmatprep.subr.mxu0 %v123_v20  ;;  %v119_v36 = vld [vmem:[%s1952_s1 + $0xb0] sm:$0xff]  ;;  %v118_v40 = vld [vmem:[%s1952_s1 + $0xa8] sm:$0xff]  ;;  %v117_v44 = vld [vmem:[%s1952_s1 + $0xa0] sm:$0xff] }
   0xe   :  { %970 = vmatprep.subr.mxu1 %v155_v21  ;;  %891 = vmatpush3.msra.mxu0 %v107_v22  ;;  %v151_v37 = vld [vmem:[%s1952_s1 + $0x1b0] sm:$0xff]  ;;  %v150_v41 = vld [vmem:[%s1952_s1 + $0x1a8] sm:$0xff]  ;;  %v149_v45 = vld [vmem:[%s1952_s1 + $0x1a0] sm:$0xff] }
   0xf   :  { %971 = vmatpush3.msra.mxu1 %v139_v23  ;;  %892 = vmatprep.subr.mxu0 %v122_v24  ;;  %v103_v38 = vld [vmem:[%s1952_s1 + $0x30] sm:$0xff]  ;;  %v102_v42 = vld [vmem:[%s1952_s1 + $0x28] sm:$0xff]  ;;  %v101_v46 = vld [vmem:[%s1952_s1 + $0x20] sm:$0xff] }
  0x10   :  { %972 = vmatprep.subr.mxu1 %v154_v25  ;;  %893 = vmatpush3.msra.mxu0 %v106_v26  ;;  %v135_v39 = vld [vmem:[%s1952_s1 + $0x130] sm:$0xff]  ;;  %v134_v43 = vld [vmem:[%s1952_s1 + $0x128] sm:$0xff]  ;;  %v133_v47 = vld [vmem:[%s1952_s1 + $0x120] sm:$0xff] }
  0x11   :  { %973 = vmatpush3.msra.mxu1 %v138_v27  ;;  %894 = vmatprep.subr.mxu0 %v121_v28  ;;  %v116_v48 = vld [vmem:[%s1952_s1 + $0x98] sm:$0xff]  ;;  %v115_v52 = vld [vmem:[%s1952_s1 + $0x90] sm:$0xff]  ;;  %v114_v56 = vld [vmem:[%s1952_s1 + $0x88] sm:$0xff] }
  0x12   :  { %974 = vmatprep.subr.mxu1 %v153_v29  ;;  %895 = vmatpush3.msra.mxu0 %v105_v30  ;;  %v148_v49 = vld [vmem:[%s1952_s1 + $0x198] sm:$0xff]  ;;  %v147_v53 = vld [vmem:[%s1952_s1 + $0x190] sm:$0xff]  ;;  %v146_v57 = vld [vmem:[%s1952_s1 + $0x188] sm:$0xff] }
  0x13   :  { %975 = vmatpush3.msra.mxu1 %v137_v31  ;;  %896 = vmatprep.subr.mxu0 %v120_v32  ;;  %v100_v50 = vld [vmem:[%s1952_s1 + $0x18] sm:$0xff]  ;;  %v99_v54 = vld [vmem:[%s1952_s1 + $0x10] sm:$0xff]  ;;  %v98_v58 = vld [vmem:[%s1952_s1 + $0x8] sm:$0xff] }
  0x14   :  { %976 = vmatprep.subr.mxu1 %v152_v33  ;;  %897 = vmatpush3.msra.mxu0 %v104_v34  ;;  %v132_v51 = vld [vmem:[%s1952_s1 + $0x118] sm:$0xff]  ;;  %v131_v55 = vld [vmem:[%s1952_s1 + $0x110] sm:$0xff]  ;;  %v130_v59 = vld [vmem:[%s1952_s1 + $0x108] sm:$0xff] }
  0x15   :  { %977 = vmatpush3.msra.mxu1 %v136_v35  ;;  %898 = vmatprep.subr.mxu0 %v119_v36  ;;  %v113_v60 = vld [vmem:[%s1952_s1 + $0x80] sm:$0xff]  ;;  %v18_v63 = vld [vmem:[%s1953_s0 + $0x8] sm:$0xff]  ;;  %v20_v1 = vld [vmem:[%s1953_s0 + $0x18] sm:$0xff] }
  0x16   :  { %978 = vmatprep.subr.mxu1 %v151_v37  ;;  %899 = vmatpush3.msra.mxu0 %v103_v38  ;;  %v145_v61 = vld [vmem:[%s1952_s1 + $0x180] sm:$0xff]  ;;  %v19_v3 = vld [vmem:[%s1953_s0 + $0x10] sm:$0xff]  ;;  %v168_v4 = vld [vmem:[%s1952_s1 + $0x238] sm:$0xff] }
  0x17   :  { %979 = vmatpush3.msra.mxu1 %v135_v39  ;;  %900 = vmatprep.subr.mxu0 %v118_v40  ;;  %v97_v62 = vld [vmem:[%s1952_s1] sm:$0xff]  ;;  %v23_v5 = vld [vmem:[%s1953_s0 + $0x30] sm:$0xff]  ;;  %v22_v8 = vld [vmem:[%s1953_s0 + $0x28] sm:$0xff] }
  0x18   :  { %980 = vmatprep.subr.mxu1 %v150_v41  ;;  %901 = vmatpush3.msra.mxu0 %v102_v42  ;;  %v129_v0 = vld [vmem:[%s1952_s1 + $0x100] sm:$0xff]  ;;  %v167_v7 = vld [vmem:[%s1952_s1 + $0x230] sm:$0xff]  ;;  %v24_v9 = vld [vmem:[%s1953_s0 + $0x38] sm:$0xff] }
  0x19   :  { %981 = vmatpush3.msra.mxu1 %v134_v43  ;;  %902 = vmatprep.subr.mxu0 %v117_v44  ;;  %v17_v2 = vld [vmem:[%s1953_s0] sm:$0xff]  ;;  %v28_v10 = vld [vmem:[%s1953_s0 + $0x58] sm:$0xff]  ;;  %v30_v11 = vld [vmem:[%s1953_s0 + $0x68] sm:$0xff] }
  0x1a   :  { %982 = vmatprep.subr.mxu1 %v149_v45  ;;  %903 = vmatpush3.msra.mxu0 %v101_v46  ;;  %v25_v6 = vld [vmem:[%s1953_s0 + $0x40] sm:$0xff]  ;;  %v166_v12 = vld [vmem:[%s1952_s1 + $0x228] sm:$0xff]  ;;  %v27_v13 = vld [vmem:[%s1953_s0 + $0x50] sm:$0xff] }
  0x1b   :  { %983 = vmatpush3.msra.mxu1 %v133_v47  ;;  %904 = vmatprep.subr.mxu0 %v116_v48  ;;  %v29_v14 = vld [vmem:[%s1953_s0 + $0x60] sm:$0xff]  ;;  %v35_v16 = vld [vmem:[%s1953_s0 + $0x90] sm:$0xff]  ;;  %v32_v18 = vld [vmem:[%s1953_s0 + $0x78] sm:$0xff] }
  0x1c   :  { %984 = vmatprep.subr.mxu1 %v148_v49  ;;  %905 = vmatpush3.msra.mxu0 %v100_v50  ;;  %v33_v15 = vld [vmem:[%s1953_s0 + $0x80] sm:$0xff]  ;;  %v34_v19 = vld [vmem:[%s1953_s0 + $0x88] sm:$0xff]  ;;  %v40_v21 = vld [vmem:[%s1953_s0 + $0xb8] sm:$0xff] }
  0x1d   :  { %985 = vmatpush3.msra.mxu1 %v132_v51  ;;  %906 = vmatprep.subr.mxu0 %v115_v52  ;;  %v165_v17 = vld [vmem:[%s1952_s1 + $0x220] sm:$0xff]  ;;  %v38_v20 = vld [vmem:[%s1953_s0 + $0xa8] sm:$0xff]  ;;  %v164_v22 = vld [vmem:[%s1952_s1 + $0x218] sm:$0xff] }
  0x1e   :  { %986 = vmatprep.subr.mxu1 %v147_v53  ;;  %907 = vmatpush3.msra.mxu0 %v99_v54  ;;  %v37_v23 = vld [vmem:[%s1953_s0 + $0xa0] sm:$0xff]  ;;  %v39_v24 = vld [vmem:[%s1953_s0 + $0xb0] sm:$0xff]  ;;  %v42_v28 = vld [vmem:[%s1953_s0 + $0xc8] sm:$0xff] }
  0x1f   :  { %987 = vmatpush3.msra.mxu1 %v131_v55  ;;  %908 = vmatprep.subr.mxu0 %v114_v56  ;;  %v43_v25 = vld [vmem:[%s1953_s0 + $0xd0] sm:$0xff]  ;;  %v45_v26 = vld [vmem:[%s1953_s0 + $0xe0] sm:$0xff]  ;;  %v44_v29 = vld [vmem:[%s1953_s0 + $0xd8] sm:$0xff] }
  0x20   :  { %988 = vmatprep.subr.mxu1 %v146_v57  ;;  %909 = vmatpush3.msra.mxu0 %v98_v58  ;;  %v163_v27 = vld [vmem:[%s1952_s1 + $0x210] sm:$0xff]  ;;  %v48_v30 = vld [vmem:[%s1953_s0 + $0xf8] sm:$0xff]  ;;  %v50_v31 = vld [vmem:[%s1953_s0 + $0x108] sm:$0xff] }
  0x21   :  { %989 = vmatpush3.msra.mxu1 %v130_v59  ;;  %910 = vmatprep.subr.mxu0 %v113_v60  ;;  %v162_v32 = vld [vmem:[%s1952_s1 + $0x208] sm:$0xff]  ;;  %v47_v33 = vld [vmem:[%s1953_s0 + $0xf0] sm:$0xff]  ;;  %v49_v34 = vld [vmem:[%s1953_s0 + $0x100] sm:$0xff] }
  0x22   :  { %990 = vmatprep.subr.mxu1 %v145_v61  ;;  %911 = vmatpush3.msra.mxu0 %v97_v62  ;;  %v53_v35 = vld [vmem:[%s1953_s0 + $0x120] sm:$0xff]  ;;  %v55_v36 = vld [vmem:[%s1953_s0 + $0x130] sm:$0xff]  ;;  %v52_v38 = vld [vmem:[%s1953_s0 + $0x118] sm:$0xff] }
  0x23   :  { %282 = vmatprep.mubr.f32.mxu0 %v18_v63  ;;  %991 = vmatpush3.msra.mxu1 %v129_v0  ;;  %v161_v37 = vld [vmem:[%s1952_s1 + $0x200] sm:$0xff]  ;;  %v54_v39 = vld [vmem:[%s1953_s0 + $0x128] sm:$0xff]  ;;  %v60_v41 = vld [vmem:[%s1953_s0 + $0x158] sm:$0xff] }
  0x24   :  { %427 = vmatprep.mubr.f32.mxu1 %v20_v1  ;;  %283 = vmatmul.mubr.f32.vlgmr.msra.gmra.mxu0 %v17_v2  ;;  %v58_v40 = vld [vmem:[%s1953_s0 + $0x148] sm:$0xff]  ;;  %v57_v42 = vld [vmem:[%s1953_s0 + $0x140] sm:$0xff]  ;;  %v59_v43 = vld [vmem:[%s1953_s0 + $0x150] sm:$0xff] }
  0x25   :  { %428 = vmatmul.mubr.f32.vlgmr.msra.gmra.mxu1 %v19_v3  ;;  %1064 = vmatprep.subr.mxu0 %v168_v4  ;;  %v63_v44 = vld [vmem:[%s1953_s0 + $0x170] sm:$0xff]  ;;  %v65_v45 = vld [vmem:[%s1953_s0 + $0x180] sm:$0xff]  ;;  %v62_v46 = vld [vmem:[%s1953_s0 + $0x168] sm:$0xff] }
  0x26   :  { %287 = vmatprep.mubr.f32.mxu0 %v23_v5  ;;  %1065 = vmatpush3.msra.mxu0 %v168_v4  ;;  %v64_v47 = vld [vmem:[%s1953_s0 + $0x178] sm:$0xff]  ;;  %v70_v49 = vld [vmem:[%s1953_s0 + $0x1a8] sm:$0xff]  ;;  %v67_v50 = vld [vmem:[%s1953_s0 + $0x190] sm:$0xff] }
  0x27   :  { %432 = vmatprep.mubr.f32.mxu1 %v25_v6  ;;  %1066 = vmatprep.subr.mxu0 %v167_v7  ;;  %v68_v48 = vld [vmem:[%s1953_s0 + $0x198] sm:$0xff]  ;;  %v69_v51 = vld [vmem:[%s1953_s0 + $0x1a0] sm:$0xff]  ;;  %v75_v53 = vld [vmem:[%s1953_s0 + $0x1d0] sm:$0xff] }
  0x28   :  { %1104 = vmatprep.subr.mxu1 %v168_v4  ;;  %288 = vmatmul.mubr.f32.gmra.mxu0 %v22_v8  ;;  %v73_v52 = vld [vmem:[%s1953_s0 + $0x1c0] sm:$0xff]  ;;  %v72_v54 = vld [vmem:[%s1953_s0 + $0x1b8] sm:$0xff]  ;;  %v74_v55 = vld [vmem:[%s1953_s0 + $0x1c8] sm:$0xff] }
  0x29   :  { %433 = vmatmul.mubr.f32.gmra.mxu1 %v24_v9  ;;  %292 = vmatprep.mubr.f32.mxu0 %v28_v10  ;;  %v78_v56 = vld [vmem:[%s1953_s0 + $0x1e8] sm:$0xff]  ;;  %v80_v57 = vld [vmem:[%s1953_s0 + $0x1f8] sm:$0xff]  ;;  %v77_v58 = vld [vmem:[%s1953_s0 + $0x1e0] sm:$0xff] }
  0x2a   :  { %437 = vmatprep.mubr.f32.mxu1 %v30_v11  ;;  %1067 = vmatpush3.msra.mxu0 %v167_v7  ;;  %v79_v59 = vld [vmem:[%s1953_s0 + $0x1f0] sm:$0xff]  ;;  %v85_v61 = vld [vmem:[%s1953_s0 + $0x220] sm:$0xff]  ;;  %v82_v62 = vld [vmem:[%s1953_s0 + $0x208] sm:$0xff] }
  0x2b   :  { %1112 = vmatpush3.msra.mxu1 %v168_v4  ;;  %1068 = vmatprep.subr.mxu0 %v166_v12  ;;  %v83_v60 = vld [vmem:[%s1953_s0 + $0x210] sm:$0xff]  ;;  %v84_v63 = vld [vmem:[%s1953_s0 + $0x218] sm:$0xff]  ;;  %v90_v1 = vld [vmem:[%s1953_s0 + $0x248] sm:$0xff] }
  0x2c   :  { %1105 = vmatprep.subr.mxu1 %v167_v7  ;;  %293 = vmatmul.mubr.f32.gmra.mxu0 %v27_v13  ;;  %v88_v0 = vld [vmem:[%s1953_s0 + $0x238] sm:$0xff]  ;;  %v87_v2 = vld [vmem:[%s1953_s0 + $0x230] sm:$0xff]  ;;  %v89_v3 = vld [vmem:[%s1953_s0 + $0x240] sm:$0xff] }
  0x2d   :  { %438 = vmatmul.mubr.f32.gmra.mxu1 %v29_v14  ;;  %297 = vmatprep.mubr.f32.mxu0 %v33_v15  ;;  %v93_v4 = vld [vmem:[%s1953_s0 + $0x260] sm:$0xff]  ;;  %v95_v5 = vld [vmem:[%s1953_s0 + $0x270] sm:$0xff]  ;;  %v92_v6 = vld [vmem:[%s1953_s0 + $0x258] sm:$0xff] }
  0x2e   :  { %442 = vmatprep.mubr.f32.mxu1 %v35_v16  ;;  %1069 = vmatpush3.msra.mxu0 %v166_v12  ;;  %v21_v8 = vld [vmem:[%s1953_s0 + $0x20] sm:$0xff]  ;;  %v26_v10 = vld [vmem:[%s1953_s0 + $0x48] sm:$0xff]  ;;  %v71_v13 = vld [vmem:[%s1953_s0 + $0x1b0] sm:$0xff] }
  0x2f   :  { %1113 = vmatpush3.msra.mxu1 %v167_v7  ;;  %1070 = vmatprep.subr.mxu0 %v165_v17  ;;  %v94_v7 = vld [vmem:[%s1953_s0 + $0x268] sm:$0xff]  ;;  %v61_v9 = vld [vmem:[%s1953_s0 + $0x160] sm:$0xff]  ;;  %v36_v14 = vld [vmem:[%s1953_s0 + $0x98] sm:$0xff] }
  0x30   :  { %1106 = vmatprep.subr.mxu1 %v166_v12  ;;  %298 = vmatmul.mubr.f32.gmra.mxu0 %v32_v18  ;;  %v66_v11 = vld [vmem:[%s1953_s0 + $0x188] sm:$0xff]  ;;  %v76_v15 = vld [vmem:[%s1953_s0 + $0x1d8] sm:$0xff]  ;;  %v41_v16 = vld [vmem:[%s1953_s0 + $0xc0] sm:$0xff] }
  0x31   :  { %443 = vmatmul.mubr.f32.gmra.mxu1 %v34_v19  ;;  %302 = vmatprep.mubr.f32.mxu0 %v38_v20  ;;  %v46_v18 = vld [vmem:[%s1953_s0 + $0xe8] sm:$0xff]  ;;  %v51_v20 = vld [vmem:[%s1953_s0 + $0x110] sm:$0xff] }
  0x32   :  { %447 = vmatprep.mubr.f32.mxu1 %v40_v21  ;;  %1071 = vmatpush3.msra.mxu0 %v165_v17  ;;  %v86_v19 = vld [vmem:[%s1953_s0 + $0x228] sm:$0xff]  ;;  %v91_v21 = vld [vmem:[%s1953_s0 + $0x250] sm:$0xff] }
  0x33   :  { %1114 = vmatpush3.msra.mxu1 %v166_v12  ;;  %1072 = vmatprep.subr.mxu0 %v164_v22  ;;  %v31_v12 = vld [vmem:[%s1953_s0 + $0x70] sm:$0xff] }
  0x34   :  { %1107 = vmatprep.subr.mxu1 %v165_v17  ;;  %303 = vmatmul.mubr.f32.gmra.mxu0 %v37_v23  ;;  %v96_v23 = vld [vmem:[%s1953_s0 + $0x278] sm:$0xff] }
  0x35   :  { %448 = vmatmul.mubr.f32.gmra.mxu1 %v39_v24  ;;  %307 = vmatprep.mubr.f32.mxu0 %v43_v25 }
  0x36   :  { %452 = vmatprep.mubr.f32.mxu1 %v45_v26  ;;  %1073 = vmatpush3.msra.mxu0 %v164_v22 }
  0x37   :  { %1115 = vmatpush3.msra.mxu1 %v165_v17  ;;  %1074 = vmatprep.subr.mxu0 %v163_v27  ;;  %v81_v17 = vld [vmem:[%s1953_s0 + $0x200] sm:$0xff] }
  0x38   :  { %1108 = vmatprep.subr.mxu1 %v164_v22  ;;  %308 = vmatmul.mubr.f32.gmra.mxu0 %v42_v28 }
  0x39   :  { %453 = vmatmul.mubr.f32.gmra.mxu1 %v44_v29  ;;  %312 = vmatprep.mubr.f32.mxu0 %v48_v30 }
  0x3a   :  { %457 = vmatprep.mubr.f32.mxu1 %v50_v31  ;;  %1075 = vmatpush3.msra.mxu0 %v163_v27 }
  0x3b   :  { %1116 = vmatpush3.msra.mxu1 %v164_v22  ;;  %1076 = vmatprep.subr.mxu0 %v162_v32  ;;  %v56_v22 = vld [vmem:[%s1953_s0 + $0x138] sm:$0xff] }
  0x3c   :  { %1109 = vmatprep.subr.mxu1 %v163_v27  ;;  %313 = vmatmul.mubr.f32.gmra.mxu0 %v47_v33 }
  0x3d   :  { %458 = vmatmul.mubr.f32.gmra.mxu1 %v49_v34  ;;  %317 = vmatprep.mubr.f32.mxu0 %v53_v35 }
  0x3e   :  { %462 = vmatprep.mubr.f32.mxu1 %v55_v36  ;;  %1077 = vmatpush3.msra.mxu0 %v162_v32 }
  0x3f   :  { %1117 = vmatpush3.msra.mxu1 %v163_v27  ;;  %1078 = vmatprep.subr.mxu0 %v161_v37 }
  0x40   :  { %1110 = vmatprep.subr.mxu1 %v162_v32  ;;  %318 = vmatmul.mubr.f32.gmra.mxu0 %v52_v38 }
  0x41   :  { %463 = vmatmul.mubr.f32.gmra.mxu1 %v54_v39  ;;  %322 = vmatprep.mubr.f32.mxu0 %v58_v40 }
  0x42   :  { %467 = vmatprep.mubr.f32.mxu1 %v60_v41  ;;  %1079 = vmatpush3.msra.mxu0 %v161_v37 }
  0x43   :  { %1118 = vmatpush3.msra.mxu1 %v162_v32 }
  0x44   :  { %1111 = vmatprep.subr.mxu1 %v161_v37  ;;  %323 = vmatmul.mubr.f32.gmra.mxu0 %v57_v42 }
  0x45   :  { %468 = vmatmul.mubr.f32.gmra.mxu1 %v59_v43  ;;  %327 = vmatprep.mubr.f32.mxu0 %v63_v44 }
  0x46   :  { %472 = vmatprep.mubr.f32.mxu1 %v65_v45  ;;  %1119 = vmatpush3.msra.mxu1 %v161_v37 }
  0x48   :  { %328 = vmatmul.mubr.f32.gmra.mxu0 %v62_v46 }
  0x49   :  { %473 = vmatmul.mubr.f32.gmra.mxu1 %v64_v47  ;;  %332 = vmatprep.mubr.f32.mxu0 %v68_v48 }
  0x4a   :  { %477 = vmatprep.mubr.f32.mxu1 %v70_v49 }
  0x4c   :  { %333 = vmatmul.mubr.f32.gmra.mxu0 %v67_v50 }
  0x4d   :  { %478 = vmatmul.mubr.f32.gmra.mxu1 %v69_v51  ;;  %337 = vmatprep.mubr.f32.mxu0 %v73_v52 }
  0x4e   :  { %482 = vmatprep.mubr.f32.mxu1 %v75_v53 }
  0x50   :  { %338 = vmatmul.mubr.f32.gmra.mxu0 %v72_v54 }
  0x51   :  { %483 = vmatmul.mubr.f32.gmra.mxu1 %v74_v55  ;;  %342 = vmatprep.mubr.f32.mxu0 %v78_v56 }
  0x52   :  { %487 = vmatprep.mubr.f32.mxu1 %v80_v57 }
  0x54   :  { %343 = vmatmul.mubr.f32.gmra.mxu0 %v77_v58 }
  0x55   :  { %488 = vmatmul.mubr.f32.gmra.mxu1 %v79_v59  ;;  %347 = vmatprep.mubr.f32.mxu0 %v83_v60 }
  0x56   :  { %492 = vmatprep.mubr.f32.mxu1 %v85_v61 }
  0x58   :  { %348 = vmatmul.mubr.f32.gmra.mxu0 %v82_v62 }
  0x59   :  { %493 = vmatmul.mubr.f32.gmra.mxu1 %v84_v63  ;;  %352 = vmatprep.mubr.f32.mxu0 %v88_v0 }
  0x5a   :  { %497 = vmatprep.mubr.f32.mxu1 %v90_v1 }
  0x5c   :  { %353 = vmatmul.mubr.f32.gmra.mxu0 %v87_v2 }
  0x5d   :  { %498 = vmatmul.mubr.f32.gmra.mxu1 %v89_v3  ;;  %357 = vmatprep.mubr.f32.mxu0 %v93_v4 }
  0x5e   :  { %502 = vmatprep.mubr.f32.mxu1 %v95_v5 }
  0x60   :  { %358 = vmatmul.mubr.f32.gmra.mxu0 %v92_v6 }
  0x61   :  { %503 = vmatmul.mubr.f32.gmra.mxu1 %v94_v7  ;;  %1080 = vmatprep.mubr.msk.f32.mxu0 %vm169_vm0, %v21_v8 }
  0x62   :  { %1092 = vmatprep.mubr.msk.f32.mxu1 %vm169_vm0, %v61_v9 }
  0x64   :  { %1081 = vmatmul.mubr.msk.f32.vlgmr.msra.gmra.mxu0 %vm169_vm0, %v26_v10 }
  0x65   :  { %1093 = vmatmul.mubr.msk.f32.vlgmr.msra.gmra.mxu1 %vm169_vm0, %v66_v11  ;;  %1083 = vmatprep.mubr.msk.f32.mxu0 %vm169_vm0, %v31_v12 }
  0x66   :  { %1095 = vmatprep.mubr.msk.f32.mxu1 %vm169_vm0, %v71_v13 }
  0x68   :  { %1084 = vmatmul.mubr.msk.f32.gmra.mxu0 %vm169_vm0, %v36_v14 }
  0x69   :  { %1096 = vmatmul.mubr.msk.f32.gmra.mxu1 %vm169_vm0, %v76_v15  ;;  %1086 = vmatprep.mubr.msk.f32.mxu0 %vm169_vm0, %v41_v16 }
  0x6a   :  { %1098 = vmatprep.mubr.msk.f32.mxu1 %vm169_vm0, %v81_v17 }
  0x6c   :  { %1087 = vmatmul.mubr.msk.f32.gmra.mxu0 %vm169_vm0, %v46_v18 }
  0x6d   :  { %1099 = vmatmul.mubr.msk.f32.gmra.mxu1 %vm169_vm0, %v86_v19  ;;  %1089 = vmatprep.mubr.msk.f32.mxu0 %vm169_vm0, %v51_v20 }
  0x6e   :  { %1101 = vmatprep.mubr.msk.f32.mxu1 %vm169_vm0, %v91_v21 }
  0x70   :  { %1090 = vmatmul.mubr.msk.f32.gmra.mxu0 %vm169_vm0, %v56_v22 }
  0x71   :  { %1102 = vmatmul.mubr.msk.f32.gmra.mxu1 %vm169_vm0, %v96_v23 }
  0xe4   :  { %v912_v24 = vpop.f32.mrf.mxu0 }
  0xe5   :  { %v992_v25 = vpop.f32.mrf.mxu1 }
  0xe6   :  { %v913_v26 = vpop.f32.mrf.mxu0 }
  0xe7   :  { %v993_v27 = vpop.f32.mrf.mxu1  ;;  %v914_v20 = vadd.f32 %v913_v26, %v912_v24 }
  0xe8   :  { %v915_v28 = vpop.f32.mrf.mxu0  ;;  %v994_v21 = vadd.f32 %v993_v27, %v992_v25 }
  0xe9   :  { %v995_v29 = vpop.f32.mrf.mxu1 }
  0xea   :  { %v916_v30 = vpop.f32.mrf.mxu0 }
  0xeb   :  { %v996_v31 = vpop.f32.mrf.mxu1  ;;  %v917_v22 = vadd.f32 %v916_v30, %v915_v28 }
  0xec   :  { %v1619_v32 = vpop.f32.mrf.mxu0  ;;  %v997_v23 = vadd.f32 %v996_v31, %v995_v29 }
  0xed   :  { %v1621_v33 = vpop.f32.mrf.mxu1 }
  0xee   :  { %v919_v34 = vpop.f32.mrf.mxu0 }
  0xef   :  { %v999_v35 = vpop.f32.mrf.mxu1 }
  0xf0   :  { %v921_v36 = vpop.f32.mrf.mxu0  ;;  %v1000_v24 = vadd.f32 %v999_v35, %v1621_v33 }
  0xf1   :  { %v1001_v37 = vpop.f32.mrf.mxu1 }
  0xf2   :  { %v922_v38 = vpop.f32.mrf.mxu0 }
  0xf3   :  { %v1002_v39 = vpop.f32.mrf.mxu1  ;;  %v923_v25 = vadd.f32 %v922_v38, %v921_v36 }
  0xf4   :  { %v1623_v40 = vpop.f32.mrf.mxu0  ;;  %v1003_v26 = vadd.f32 %v1002_v39, %v1001_v37 }
  0xf5   :  { %v1625_v41 = vpop.f32.mrf.mxu1 }
  0xf6   :  { %v925_v42 = vpop.f32.mrf.mxu0 }
  0xf7   :  { %v1005_v43 = vpop.f32.mrf.mxu1  ;;  %v926_v31 = vadd.f32 %v925_v42, %v1623_v40 }
  0xf8   :  { %v927_v44 = vpop.f32.mrf.mxu0 }
  0xf9   :  { %v1007_v45 = vpop.f32.mrf.mxu1 }
  0xfa   :  { %v928_v46 = vpop.f32.mrf.mxu0 }
  0xfb   :  { %v1008_v47 = vpop.f32.mrf.mxu1 }
  0xfc   :  { %v1627_v48 = vpop.f32.mrf.mxu0 }
  0xfd   :  { %v1629_v49 = vpop.f32.mrf.mxu1 }
  0xfe   :  { %v1631_v50 = vpop.f32.mrf.mxu0 }
  0xff   :  { %v1633_v51 = vpop.f32.mrf.mxu1  ;;  %v932_v40 = vadd.f32 %v1631_v50, %v1627_v48 }
 0x100   :  { %v1635_v52 = vpop.f32.mrf.mxu0 }
 0x101   :  { %v1637_v53 = vpop.f32.mrf.mxu1 }
 0x102   :  { %v1639_v54 = vpop.f32.mrf.mxu0 }
 0x103   :  { %v1641_v55 = vpop.f32.mrf.mxu1 }
 0x104   :  { %v1643_v56 = vpop.f32.mrf.mxu0 }
 0x105   :  { %v1645_v57 = vpop.f32.mrf.mxu1 }
 0x106   :  { %v1647_v58 = vpop.f32.mrf.mxu0 }
 0x107   :  { %v1649_v59 = vpop.f32.mrf.mxu1 }
 0x108   :  { %v1651_v60 = vpop.f32.mrf.mxu0  ;;  %v1018_v48 = vadd.f32 %v1649_v59, %v1645_v57 }
 0x109   :  { %v1653_v61 = vpop.f32.mrf.mxu1 }
 0x10a   :  { %v1655_v62 = vpop.f32.mrf.mxu0 }
 0x10b   :  { %v1657_v63 = vpop.f32.mrf.mxu1 }
 0x10c   :  { %v1659_v0 = vpop.f32.mrf.mxu0 }
 0x10d   :  { %v1661_v1 = vpop.f32.mrf.mxu1 }
 0x10e   :  { %v1663_v2 = vpop.f32.mrf.mxu0 }
 0x10f   :  { %v1665_v3 = vpop.f32.mrf.mxu1 }
 0x110   :  { %v1667_v4 = vpop.f32.mrf.mxu0 }
 0x111   :  { %v1669_v5 = vpop.f32.mrf.mxu1 }
 0x112   :  { %v1671_v6 = vpop.f32.mrf.mxu0 }
 0x113   :  { %v1673_v7 = vpop.f32.mrf.mxu1 }
 0x114   :  { %v1675_v8 = vpop.f32.mrf.mxu0 }
 0x115   :  { %v1677_v9 = vpop.f32.mrf.mxu1 }
 0x116   :  { %1957 = vst [vmem:[#allocation2_spill] sm:$0xff] %v1677_v9  ;;  %v1679_v10 = vpop.f32.mrf.mxu0 }
 0x117   :  { %v1681_v11 = vpop.f32.mrf.mxu1 }
 0x118   :  { %1958 = vst [vmem:[#allocation3_spill] sm:$0xff] %v1681_v11  ;;  %v1683_v12 = vpop.f32.mrf.mxu0 }
 0x119   :  { %1959 = vst [vmem:[#allocation4_spill] sm:$0xff] %v1683_v12  ;;  %v1685_v13 = vpop.f32.mrf.mxu1 }
 0x11a   :  { %1960 = vst [vmem:[#allocation5_spill] sm:$0xff] %v1685_v13  ;;  %v1687_v14 = vpop.f32.mrf.mxu0 }
 0x11b   :  { %1961 = vst [vmem:[#allocation6_spill] sm:$0xff] %v1687_v14  ;;  %v1689_v15 = vpop.f32.mrf.mxu1 }
 0x11c   :  { %1962 = vst [vmem:[#allocation7_spill] sm:$0xff] %v1689_v15  ;;  %v1691_v16 = vpop.f32.mrf.mxu0  ;;  %v435_v15 = vadd.f32 %v997_v23, %v917_v22  ;;  %v1006_v22 = vadd.f32 %v1005_v43, %v1625_v41  ;;  %v929_v23 = vadd.f32 %v928_v46, %v927_v44  ;;  %v935_v46 = vadd.f32 %v1639_v54, %v1635_v52 }
 0x11d   :  { %1963 = vst [vmem:[#allocation8_spill] sm:$0xff] %v1691_v16  ;;  %v1693_v17 = vpop.f32.mrf.mxu1  ;;  %v1021_v54 = vadd.f32 %v1657_v63, %v1653_v61 }
 0x11e   :  { %1964 = vst [vmem:[#allocation9_spill] sm:$0xff] %v1693_v17  ;;  %v1695_v18 = vpop.f32.mrf.mxu0  ;;  %v430_v17 = vadd.f32 %v994_v21, %v914_v20  ;;  %v450_v44 = vadd.f32 %v1006_v22, %v926_v31  ;;  %v1968_v31 = vld [vmem:[#allocation2_spill] sm:$0xff] }
 0x11f   :  { %1965 = vst [vmem:[#allocation10_spill] sm:$0xff] %v1695_v18  ;;  %v1697_v19 = vpop.f32.mrf.mxu1  ;;  %v920_v18 = vadd.f32 %v919_v34, %v1619_v32  ;;  %v445_v34 = vadd.f32 %v1003_v26, %v923_v25  ;;  %v1969_v22 = vld [vmem:[#allocation3_spill] sm:$0xff] }
 0x120   :  { %v1699_v11 = vpop.f32.mrf.mxu0 }
 0x121   :  { %v1701_v12 = vpop.f32.mrf.mxu1  ;;  %v440_v33 = vadd.f32 %v1000_v24, %v920_v18 }
 0x122   :  { %1966 = vst [vmem:[#allocation11_spill] sm:$0xff] %v1701_v12  ;;  %v1703_v13 = vpop.f32.mrf.mxu0 }
 0x123   :  { %v1705_v14 = vpop.f32.mrf.mxu1 }
 0x124   :  { %1967 = vst [vmem:[#allocation12_spill] sm:$0xff] %v1705_v14  ;;  %v1082_v16 = vpop.f32.mrf.mxu0  ;;  %v1009_v14 = vadd.f32 %v1008_v47, %v1007_v45  ;;  %v1012_v45 = vadd.f32 %v1633_v51, %v1629_v49  ;;  %v1015_v47 = vadd.f32 %v1641_v55, %v1637_v53  ;;  %v941_v53 = vadd.f32 %v1655_v62, %v1651_v60 }
 0x125   :  { %v1707_v9 = vpop.f32.mrf.mxu1  ;;  %v1711_v29 = vadd.f32 %v1082_v16, %v435_v15  ;;  %v938_v15 = vadd.f32 %v1647_v58, %v1643_v56  ;;  %v1024_v60 = vadd.f32 %v1665_v3, %v1661_v1  ;;  %v950_v3 = vadd.f32 %v1679_v10, %v1675_v8 }
 0x126   :  { %v574_v27 = vpop.f32.mrf.mxu0  ;;  %v455_v42 = vadd.f32 %v1009_v14, %v929_v23  ;;  %v465_v58 = vadd.f32 %v1015_v47, %v935_v46  ;;  %v460_v59 = vadd.f32 %v1012_v45, %v932_v40  ;;  %v475_v25 = vadd.f32 %v1021_v54, %v941_v53  ;;  %v1974_v45 = vld [vmem:[#allocation8_spill] sm:$0xff]  ;;  %v1975_v46 = vld [vmem:[#allocation10_spill] sm:$0xff] }
 0x127   :  { %v614_v28 = vpop.f32.mrf.mxu1  ;;  %v1713_v30 = vadd.f32 %v574_v27, %v430_v17  ;;  %v654_v37 = vsel %vm169_vm0, %v1711_v29, 0.0  ;;  %v944_v17 = vadd.f32 %v1663_v2, %v1659_v0  ;;  %v470_v18 = vadd.f32 %v1018_v48, %v938_v15 }
 0x128   :  { %v1085_v12 = vpop.f32.mrf.mxu0  ;;  %v947_v27 = vadd.f32 %v1671_v6, %v1667_v4  ;;  %v1027_v0 = vadd.f32 %v1673_v7, %v1669_v5  ;;  %v1030_v23 = vadd.f32 %v1969_v22, %v1968_v31  ;;  %v1970_v6 = vld [vmem:[#allocation4_spill] sm:$0xff]  ;;  %v1971_v7 = vld [vmem:[#allocation6_spill] sm:$0xff]  ;;  %v956_v47 = vadd.f32 %v1975_v46, %v1974_v45 }
 0x129   :  { %v653_v32 = vsel %vm169_vm0, %v1713_v30, 0.0  ;;  %v1719_v35 = vpop.f32.mrf.mxu1  ;;  %v1723_v38 = vadd.f32 %v1085_v12, %v445_v34  ;;  %v1767_v2 = vadd.f32 %v614_v28, %v470_v18  ;;  %v480_v4 = vadd.f32 %v1024_v60, %v944_v17  ;;  %v1977_v53 = vld [vmem:[#allocation11_spill] sm:$0xff] }
 0x12a   :  { %v584_v36 = vpop.f32.mrf.mxu0  ;;  %v655_v41 = vadd.f32 %v654_v37, %v653_v32  ;;  %v953_v28 = vadd.f32 %v1971_v7, %v1970_v6  ;;  %v1973_v37 = vld [vmem:[#allocation7_spill] sm:$0xff]  ;;  %v485_v10 = vadd.f32 %v1027_v0, %v947_v27 }
 0x12b   :  { %v1725_v39 = vadd.f32 %v584_v36, %v440_v33  ;;  %v624_v14 = vpop.f32.mrf.mxu1  ;;  %v658_v49 = vsel %vm169_vm0, %v1723_v38, 0.0  ;;  %v1776_v33 = vadd.f32 %v1707_v9, %v475_v25  ;;  %v1972_v36 = vld [vmem:[#allocation5_spill] sm:$0xff]  ;;  %v668_v8 = vsel %vm169_vm0, %v1767_v2, 0.0  ;;  %v1978_v54 = vld [vmem:[#allocation12_spill] sm:$0xff] }
 0x12c   :  { %v1088_v43 = vpop.f32.mrf.mxu0  ;;  %v1033_v40 = vadd.f32 %v1973_v37, %v1972_v36 }
 0x12d   :  { %v656_v12 = vsel %vm169_vm0, %v1725_v39, 0.0  ;;  %v1743_v51 = vadd.f32 %v1088_v43, %v455_v42  ;;  %v1100_v20 = vpop.f32.mrf.mxu1  ;;  %v1786_v42 = vadd.f32 %v624_v14, %v480_v4  ;;  %v490_v43 = vadd.f32 %v1030_v23, %v950_v3 }
 0x12e   :  { %v657_v50 = vadd.f32 %v656_v12, %v655_v41  ;;  %v594_v16 = vpop.f32.mrf.mxu0  ;;  %v1976_v12 = vld [vmem:[#allocation9_spill] sm:$0xff]  ;;  %v670_v48 = vsel %vm169_vm0, %v1776_v33, 0.0  ;;  %v959_v14 = vadd.f32 %v1703_v13, %v1699_v11 }
 0x12f   :  { %v1745_v52 = vadd.f32 %v594_v16, %v450_v44  ;;  %v662_v61 = vsel %vm169_vm0, %v1743_v51, 0.0  ;;  %v634_v32 = vpop.f32.mrf.mxu1  ;;  %v1036_v15 = vadd.f32 %v1697_v19, %v1976_v12  ;;  %v495_v16 = vadd.f32 %v1033_v40, %v953_v28 }
 0x130   :  { %v659_v55 = vadd.f32 %v658_v49, %v657_v50  ;;  %v1091_v56 = vpop.f32.mrf.mxu0  ;;  %v1795_v50 = vadd.f32 %v1719_v35, %v485_v10 }
 0x131   :  { %v660_v57 = vsel %vm169_vm0, %v1745_v52, 0.0  ;;  %v1759_v62 = vadd.f32 %v1091_v56, %v465_v58  ;;  %v1103_v9 = vpop.f32.mrf.mxu1  ;;  %v672_v56 = vsel %vm169_vm0, %v1786_v42, 0.0  ;;  %v640_v17 = vadd.f32 %v1100_v20, %v495_v16 }
 0x132   :  { %v661_v21 = vadd.f32 %v660_v57, %v659_v55  ;;  %v604_v24 = vpop.f32.mrf.mxu0  ;;  %v1039_v55 = vadd.f32 %v1978_v54, %v1977_v53  ;;  %v635_v57 = vadd.f32 %v634_v32, %v490_v43  ;;  %v500_v35 = vadd.f32 %v1036_v15, %v956_v47 }
 0x133   :  { %v1761_v63 = vadd.f32 %v604_v24, %v460_v59  ;;  %v666_v5 = vsel %vm169_vm0, %v1759_v62, 0.0  ;;  %v644_v58 = vpop.f32.mrf.mxu1  ;;  %v674_v59 = vsel %vm169_vm0, %v1795_v50, 0.0  ;;  %v678_v13 = vsel %vm169_vm0, %v640_v17, 0.0 }
 0x134   :  { %v663_v26 = vadd.f32 %v662_v61, %v661_v21  ;;  %v676_v21 = vsel %vm169_vm0, %v635_v57, 0.0  ;;  %v505_v24 = vadd.f32 %v1039_v55, %v959_v14  ;;  %v645_v60 = vadd.f32 %v644_v58, %v500_v35 }
 0x135   :  { %v664_v1 = vsel %vm169_vm0, %v1761_v63, 0.0 }
 0x136   :  { %v665_v34 = vadd.f32 %v664_v1, %v663_v26  ;;  %v650_v61 = vadd.f32 %v1103_v9, %v505_v24  ;;  %v680_v26 = vsel %vm169_vm0, %v645_v60, 0.0 }
 0x138   :  { %v667_v41 = vadd.f32 %v666_v5, %v665_v34  ;;  %v682_v0 = vsel %vm169_vm0, %v650_v61, 0.0 }
 0x13a   :  { %v669_v44 = vadd.f32 %v668_v8, %v667_v41 }
 0x13c   :  { %v671_v49 = vadd.f32 %v670_v48, %v669_v44 }
 0x13e   :  { %v673_v19 = vadd.f32 %v672_v56, %v671_v49 }
 0x140   :  { %v675_v18 = vadd.f32 %v674_v59, %v673_v19 }
 0x142   :  { %v677_v11 = vadd.f32 %v676_v21, %v675_v18 }
 0x144   :  { %v679_v25 = vadd.f32 %v678_v13, %v677_v11 }
 0x146   :  { %v681_v27 = vadd.f32 %v680_v26, %v679_v25 }
 0x148   :  { %v683_v1 = vadd.f32 %v682_v0, %v681_v27 }
 0x14a   :  { %v684_v3 = vrot.slane %v683_v1, 4 }
 0x14c   :  { %v685_v31 = vadd.f32 %v684_v3, %v683_v1 }
 0x14e   :  { %v686_v20 = vrot.slane %v685_v31, 2 }
 0x150   :  { %v687_v22 = vadd.f32 %v686_v20, %v685_v31 }
 0x152   :  { %v688_v23 = vrot.slane %v687_v22, 1 }
 0x154   :  { %v689_v32 = vadd.f32 %v688_v23, %v687_v22 }
 0x156   :  { %v691_v34 = vmul.f32 0.0078125, %v689_v32 }
 0x158   :  { %v1810_v4 = vsub.f32 %v1713_v30, %v691_v34  ;;  %v1813_v5 = vsub.f32 %v1711_v29, %v691_v34  ;;  %v1816_v6 = vsub.f32 %v1725_v39, %v691_v34  ;;  %v1819_v7 = vsub.f32 %v1723_v38, %v691_v34 }
 0x159   :  { %v1826_v37 = vsub.f32 %v1745_v52, %v691_v34  ;;  %v1831_v29 = vsub.f32 %v1743_v51, %v691_v34  ;;  %v1838_v8 = vsub.f32 %v1761_v63, %v691_v34  ;;  %v1844_v51 = vsub.f32 %v1759_v62, %v691_v34 }
 0x15a   :  { %v708_v28 = vmul.f32 %v1810_v4, %v1810_v4  ;;  %v709_v36 = vmul.f32 %v1813_v5, %v1813_v5  ;;  %v710_v30 = vmul.f32 %v1816_v6, %v1816_v6  ;;  %v711_v39 = vmul.f32 %v1819_v7, %v1819_v7 }
 0x15b   :  { %v712_v52 = vmul.f32 %v1826_v37, %v1826_v37  ;;  %v713_v9 = vmul.f32 %v1831_v29, %v1831_v29  ;;  %v1850_v46 = vsub.f32 %v1767_v2, %v691_v34  ;;  %v714_v63 = vmul.f32 %v1838_v8, %v1838_v8 }
 0x15c   :  { %v724_v38 = vsel %vm169_vm0, %v708_v28, 0.0  ;;  %v725_v40 = vsel %vm169_vm0, %v709_v36, 0.0  ;;  %v727_v10 = vsel %vm169_vm0, %v710_v30, 0.0  ;;  %v729_v44 = vsel %vm169_vm0, %v711_v39, 0.0 }
 0x15d   :  { %v726_v41 = vadd.f32 %v725_v40, %v724_v38  ;;  %v731_v47 = vsel %vm169_vm0, %v712_v52, 0.0  ;;  %v701_v15 = vsub.f32 %v1776_v33, %v691_v34  ;;  %v715_v62 = vmul.f32 %v1844_v51, %v1844_v51 }
 0x15e   :  { %v733_v48 = vsel %vm169_vm0, %v713_v9, 0.0  ;;  %v702_v49 = vsub.f32 %v1786_v42, %v691_v34  ;;  %v716_v2 = vmul.f32 %v1850_v46, %v1850_v46  ;;  %v735_v14 = vsel %vm169_vm0, %v714_v63, 0.0 }
 0x15f   :  { %v728_v43 = vadd.f32 %v727_v10, %v726_v41  ;;  %v703_v54 = vsub.f32 %v1795_v50, %v691_v34  ;;  %v717_v55 = vmul.f32 %v701_v15, %v701_v15  ;;  %v737_v56 = vsel %vm169_vm0, %v715_v62, 0.0  ;;  %v878_v62 = vld [vmem:[%s1954_s2] ss:$0 sm:$0xff] }
 0x160   :  { %v704_v58 = vsub.f32 %v635_v57, %v691_v34  ;;  %v718_v19 = vmul.f32 %v702_v49, %v702_v49  ;;  %v739_v59 = vsel %vm169_vm0, %v716_v2, 0.0  ;;  %v705_v18 = vsub.f32 %v640_v17, %v691_v34 }
 0x161   :  { %v730_v45 = vadd.f32 %v729_v44, %v728_v43  ;;  %v719_v21 = vmul.f32 %v703_v54, %v703_v54  ;;  %v741_v42 = vsel %vm169_vm0, %v717_v55, 0.0  ;;  %v706_v11 = vsub.f32 %v645_v60, %v691_v34 }
 0x162   :  { %v720_v13 = vmul.f32 %v704_v58, %v704_v58  ;;  %v743_v25 = vsel %vm169_vm0, %v718_v19, 0.0  ;;  %v707_v50 = vsub.f32 %v650_v61, %v691_v34  ;;  %v721_v27 = vmul.f32 %v705_v18, %v705_v18  ;;  %v879_v19 = vld [vmem:[%s1955_s3] ss:$0 sm:$0xff] }
 0x163   :  { %v732_v12 = vadd.f32 %v731_v47, %v730_v45  ;;  %v745_v0 = vsel %vm169_vm0, %v719_v21, 0.0  ;;  %v722_v57 = vmul.f32 %v706_v11, %v706_v11 }
 0x164   :  { %v747_v3 = vsel %vm169_vm0, %v720_v13, 0.0  ;;  %v723_v20 = vmul.f32 %v707_v50, %v707_v50  ;;  %v749_v17 = vsel %vm169_vm0, %v721_v27, 0.0 }
 0x165   :  { %v734_v16 = vadd.f32 %v733_v48, %v732_v12  ;;  %v751_v23 = vsel %vm169_vm0, %v722_v57, 0.0 }
 0x166   :  { %v753_v32 = vsel %vm169_vm0, %v723_v20, 0.0 }
 0x167   :  { %v736_v53 = vadd.f32 %v735_v14, %v734_v16 }
 0x169   :  { %v738_v33 = vadd.f32 %v737_v56, %v736_v53 }
 0x16b   :  { %v740_v35 = vadd.f32 %v739_v59, %v738_v33 }
 0x16d   :  { %v742_v24 = vadd.f32 %v741_v42, %v740_v35 }
 0x16f   :  { %v744_v26 = vadd.f32 %v743_v25, %v742_v24 }
 0x171   :  { %v746_v1 = vadd.f32 %v745_v0, %v744_v26 }
 0x173   :  { %v748_v31 = vadd.f32 %v747_v3, %v746_v1 }
 0x175   :  { %v750_v22 = vadd.f32 %v749_v17, %v748_v31 }
 0x177   :  { %v752_v60 = vadd.f32 %v751_v23, %v750_v22 }
 0x179   :  { %v754_v28 = vadd.f32 %v753_v32, %v752_v60 }
 0x17b   :  { %v755_v36 = vrot.slane %v754_v28, 4 }
 0x17d   :  { %v756_v61 = vadd.f32 %v755_v36, %v754_v28 }
 0x17f   :  { %v757_v34 = vrot.slane %v756_v61, 2 }
 0x181   :  { %v758_v30 = vadd.f32 %v757_v34, %v756_v61 }
 0x183   :  { %v759_v39 = vrot.slane %v758_v30, 1 }
 0x185   :  { %v760_v38 = vadd.f32 %v759_v39, %v758_v30 }
 0x187   :  { %v761_v40 = vmul.f32 0.0078125, %v760_v38 }
 0x189   :  { %v762_v41 = vadd.f32 1e-05, %v761_v40 }
 0x18b   :  { %1120 = vrsqrt.f32 %v762_v41 }
 0x198   :  { %v1121_v52 = vpop.eup %1120 }
 0x199   :  { %v764_v10 = vmul.f32 %v1121_v52, %v1810_v4  ;;  %v765_v43 = vmul.f32 %v1121_v52, %v1813_v5  ;;  %v766_v9 = vmul.f32 %v1121_v52, %v1816_v6  ;;  %v767_v44 = vmul.f32 %v1121_v52, %v1819_v7 }
 0x19a   :  { %v768_v45 = vmul.f32 %v1121_v52, %v1826_v37  ;;  %v769_v63 = vmul.f32 %v1121_v52, %v1831_v29  ;;  %v770_v47 = vmul.f32 %v1121_v52, %v1838_v8  ;;  %v771_v12 = vmul.f32 %v1121_v52, %v1844_v51 }
 0x19b   :  { %v772_v4 = vmul.f32 %v1121_v52, %v1850_v46  ;;  %v773_v48 = vmul.f32 %v1121_v52, %v701_v15  ;;  %v774_v5 = vmul.f32 %v1121_v52, %v702_v49  ;;  %v775_v16 = vmul.f32 %v1121_v52, %v703_v54 }
 0x19c   :  { %v776_v6 = vmul.f32 %v1121_v52, %v704_v58  ;;  %v777_v2 = vmul.f32 %v1121_v52, %v705_v18  ;;  %v778_v7 = vmul.f32 %v1121_v52, %v706_v11  ;;  %v779_v14 = vmul.f32 %v1121_v52, %v707_v50 }
 0x19d   :  { %v787_v37 = vmul.f32 %v878_v62, %v764_v10  ;;  %v788_v53 = vmul.f32 %v878_v62, %v765_v43  ;;  %v789_v29 = vmul.f32 %v878_v62, %v766_v9  ;;  %v790_v55 = vmul.f32 %v878_v62, %v767_v44 }
 0x19e   :  { %v791_v8 = vmul.f32 %v878_v62, %v768_v45  ;;  %v792_v56 = vmul.f32 %v878_v62, %v769_v63  ;;  %v793_v51 = vmul.f32 %v878_v62, %v770_v47  ;;  %v794_v33 = vmul.f32 %v878_v62, %v771_v12 }
 0x19f   :  { %v795_v46 = vmul.f32 %v878_v62, %v772_v4  ;;  %v796_v15 = vmul.f32 %v878_v62, %v773_v48  ;;  %v797_v49 = vmul.f32 %v878_v62, %v774_v5  ;;  %v798_v54 = vmul.f32 %v878_v62, %v775_v16 }
 0x1a0   :  { %v799_v58 = vmul.f32 %v878_v62, %v776_v6  ;;  %v800_v59 = vmul.f32 %v878_v62, %v777_v2  ;;  %v801_v35 = vmul.f32 %v878_v62, %v778_v7  ;;  %v802_v18 = vmul.f32 %v878_v62, %v779_v14 }
 0x1a1   :  { %v810_v21 = vadd.f32 %v879_v19, %v787_v37  ;;  %v811_v42 = vadd.f32 %v879_v19, %v788_v53  ;;  %v812_v24 = vadd.f32 %v879_v19, %v789_v29  ;;  %v813_v11 = vadd.f32 %v879_v19, %v790_v55 }
 0x1a2   :  { %v814_v13 = vadd.f32 %v879_v19, %v791_v8  ;;  %v815_v25 = vadd.f32 %v879_v19, %v792_v56  ;;  %v816_v26 = vadd.f32 %v879_v19, %v793_v51  ;;  %v817_v50 = vadd.f32 %v879_v19, %v794_v33 }
 0x1a3   :  { %v818_v27 = vadd.f32 %v879_v19, %v795_v46  ;;  %v819_v0 = vadd.f32 %v879_v19, %v796_v15  ;;  %v820_v1 = vadd.f32 %v879_v19, %v797_v49  ;;  %v821_v57 = vadd.f32 %v879_v19, %v798_v54 }
 0x1a4   :  { %v822_v3 = vadd.f32 %v879_v19, %v799_v58  ;;  %v823_v31 = vadd.f32 %v879_v19, %v800_v59  ;;  %v824_v20 = vadd.f32 %v879_v19, %v801_v35  ;;  %v825_v17 = vadd.f32 %v879_v19, %v802_v18 }
 0x1a5   :  { %v826_v22 = vmax.f32 %v810_v21, 0.0  ;;  %v827_v23 = vmax.f32 %v811_v42, 0.0  ;;  %v828_v60 = vmax.f32 %v812_v24, 0.0  ;;  %v829_v32 = vmax.f32 %v813_v11, 0.0 }
 0x1a6   :  { %v830_v28 = vmax.f32 %v814_v13, 0.0  ;;  %v831_v36 = vmax.f32 %v815_v25, 0.0  ;;  %v832_v61 = vmax.f32 %v816_v26, 0.0  ;;  %v833_v34 = vmax.f32 %v817_v50, 0.0 }
 0x1a7   :  { %v834_v30 = vmax.f32 %v818_v27, 0.0  ;;  %v835_v39 = vmax.f32 %v819_v0, 0.0  ;;  %v836_v38 = vmax.f32 %v820_v1, 0.0  ;;  %v837_v40 = vmax.f32 %v821_v57, 0.0  ;;  %842 = vst.msk [vmem:[%s1956_s4] sm:$0xff] %vm169_vm0, %v826_v22  ;;  %843 = vst.msk [vmem:[%s1956_s4 + $0x8] sm:$0xff] %vm169_vm0, %v827_v23 }
 0x1a8   :  { %844 = vst.msk [vmem:[%s1956_s4 + $0x10] sm:$0xff] %vm169_vm0, %v828_v60  ;;  %845 = vst.msk [vmem:[%s1956_s4 + $0x18] sm:$0xff] %vm169_vm0, %v829_v32  ;;  %v838_v41 = vmax.f32 %v822_v3, 0.0  ;;  %v839_v52 = vmax.f32 %v823_v31, 0.0  ;;  %v840_v10 = vmax.f32 %v824_v20, 0.0  ;;  %v841_v43 = vmax.f32 %v825_v17, 0.0 }
 0x1a9   :  { %846 = vst.msk [vmem:[%s1956_s4 + $0x20] sm:$0xff] %vm169_vm0, %v830_v28  ;;  %847 = vst.msk [vmem:[%s1956_s4 + $0x28] sm:$0xff] %vm169_vm0, %v831_v36 }
 0x1aa   :  { %848 = vst.msk [vmem:[%s1956_s4 + $0x30] sm:$0xff] %vm169_vm0, %v832_v61  ;;  %849 = vst.msk [vmem:[%s1956_s4 + $0x38] sm:$0xff] %vm169_vm0, %v833_v34 }
 0x1ab   :  { %850 = vst.msk [vmem:[%s1956_s4 + $0x40] sm:$0xff] %vm169_vm0, %v834_v30  ;;  %851 = vst.msk [vmem:[%s1956_s4 + $0x48] sm:$0xff] %vm169_vm0, %v835_v39 }
 0x1ac   :  { %852 = vst.msk [vmem:[%s1956_s4 + $0x50] sm:$0xff] %vm169_vm0, %v836_v38  ;;  %853 = vst.msk [vmem:[%s1956_s4 + $0x58] sm:$0xff] %vm169_vm0, %v837_v40 }
 0x1ad   :  { %854 = vst.msk [vmem:[%s1956_s4 + $0x60] sm:$0xff] %vm169_vm0, %v838_v41  ;;  %855 = vst.msk [vmem:[%s1956_s4 + $0x68] sm:$0xff] %vm169_vm0, %v839_v52 }
 0x1ae   :  { %856 = vst.msk [vmem:[%s1956_s4 + $0x70] sm:$0xff] %vm169_vm0, %v840_v10  ;;  %857 = vst.msk [vmem:[%s1956_s4 + $0x78] sm:$0xff] %vm169_vm0, %v841_v43 }

// kernel: heatmap2feat_forward.18
= control target key start
LH: loop header
LB: loop body
LE: loop exit
PB: predicated region body
PF: predicated region fallthrough
CT: control target
= control target key end

     0   :  { %vm172_vm0 = vcmask 523264   ;;  %s2040_s1 = inlined_call_operand.vmem [shape: f32[576,64], index: 1, kind: input, shape index: {}]   ;;  %s2041_s0 = inlined_call_operand.vmem [shape: f32[128,576], index: 0, kind: input, shape index: {}]   ;;  %s2042_s2 = inlined_call_operand.vmem [shape: f32[1,64], index: 2, kind: input, shape index: {}]   ;;  %s2043_s3 = inlined_call_operand.vmem [shape: f32[1,64], index: 3, kind: input, shape index: {}]   ;;  %s2044_s4 = inlined_call_operand.vmem [shape: f32[128,64], index: 4, kind: input, shape index: {}]   ;;  %s2045_s5 = inlined_call_operand.vmem [shape: f32[128,64], index: 5, kind: output, shape index: {}]  }
   0x1   :  { %v131_v0 = vld [vmem:[%s2040_s1 + $0xf8] sm:$0xff]  ;;  %v130_v4 = vld [vmem:[%s2040_s1 + $0xf0] sm:$0xff]  ;;  %v129_v8 = vld [vmem:[%s2040_s1 + $0xe8] sm:$0xff] }
   0x2   :  { %v163_v1 = vld [vmem:[%s2040_s1 + $0x1f8] sm:$0xff]  ;;  %915 = vmatprep.subr.mxu0 %v131_v0  ;;  %v162_v5 = vld [vmem:[%s2040_s1 + $0x1f0] sm:$0xff]  ;;  %v161_v9 = vld [vmem:[%s2040_s1 + $0x1e8] sm:$0xff] }
   0x3   :  { %v115_v2 = vld [vmem:[%s2040_s1 + $0x78] sm:$0xff]  ;;  %995 = vmatprep.subr.mxu1 %v163_v1  ;;  %v114_v6 = vld [vmem:[%s2040_s1 + $0x70] sm:$0xff]  ;;  %v113_v10 = vld [vmem:[%s2040_s1 + $0x68] sm:$0xff] }
   0x4   :  { %v147_v3 = vld [vmem:[%s2040_s1 + $0x178] sm:$0xff]  ;;  %916 = vmatpush3.msra.mxu0 %v115_v2  ;;  %v146_v7 = vld [vmem:[%s2040_s1 + $0x170] sm:$0xff]  ;;  %v145_v11 = vld [vmem:[%s2040_s1 + $0x168] sm:$0xff] }
   0x5   :  { %996 = vmatpush3.msra.mxu1 %v147_v3  ;;  %917 = vmatprep.subr.mxu0 %v130_v4  ;;  %v128_v12 = vld [vmem:[%s2040_s1 + $0xe0] sm:$0xff]  ;;  %v127_v16 = vld [vmem:[%s2040_s1 + $0xd8] sm:$0xff]  ;;  %v126_v20 = vld [vmem:[%s2040_s1 + $0xd0] sm:$0xff] }
   0x6   :  { %997 = vmatprep.subr.mxu1 %v162_v5  ;;  %918 = vmatpush3.msra.mxu0 %v114_v6  ;;  %v160_v13 = vld [vmem:[%s2040_s1 + $0x1e0] sm:$0xff]  ;;  %v159_v17 = vld [vmem:[%s2040_s1 + $0x1d8] sm:$0xff]  ;;  %v158_v21 = vld [vmem:[%s2040_s1 + $0x1d0] sm:$0xff] }
   0x7   :  { %998 = vmatpush3.msra.mxu1 %v146_v7  ;;  %919 = vmatprep.subr.mxu0 %v129_v8  ;;  %v112_v14 = vld [vmem:[%s2040_s1 + $0x60] sm:$0xff]  ;;  %v111_v18 = vld [vmem:[%s2040_s1 + $0x58] sm:$0xff]  ;;  %v110_v22 = vld [vmem:[%s2040_s1 + $0x50] sm:$0xff] }
   0x8   :  { %999 = vmatprep.subr.mxu1 %v161_v9  ;;  %v144_v15 = vld [vmem:[%s2040_s1 + $0x160] sm:$0xff]  ;;  %920 = vmatpush3.msra.mxu0 %v113_v10  ;;  %v143_v19 = vld [vmem:[%s2040_s1 + $0x158] sm:$0xff]  ;;  %v142_v23 = vld [vmem:[%s2040_s1 + $0x150] sm:$0xff] }
   0x9   :  { %1000 = vmatpush3.msra.mxu1 %v145_v11  ;;  %921 = vmatprep.subr.mxu0 %v128_v12  ;;  %v125_v24 = vld [vmem:[%s2040_s1 + $0xc8] sm:$0xff]  ;;  %v124_v28 = vld [vmem:[%s2040_s1 + $0xc0] sm:$0xff]  ;;  %v123_v32 = vld [vmem:[%s2040_s1 + $0xb8] sm:$0xff] }
   0xa   :  { %1001 = vmatprep.subr.mxu1 %v160_v13  ;;  %922 = vmatpush3.msra.mxu0 %v112_v14  ;;  %v157_v25 = vld [vmem:[%s2040_s1 + $0x1c8] sm:$0xff]  ;;  %v156_v29 = vld [vmem:[%s2040_s1 + $0x1c0] sm:$0xff]  ;;  %v155_v33 = vld [vmem:[%s2040_s1 + $0x1b8] sm:$0xff] }
   0xb   :  { %1002 = vmatpush3.msra.mxu1 %v144_v15  ;;  %923 = vmatprep.subr.mxu0 %v127_v16  ;;  %v109_v26 = vld [vmem:[%s2040_s1 + $0x48] sm:$0xff]  ;;  %v108_v30 = vld [vmem:[%s2040_s1 + $0x40] sm:$0xff]  ;;  %v107_v34 = vld [vmem:[%s2040_s1 + $0x38] sm:$0xff] }
   0xc   :  { %1003 = vmatprep.subr.mxu1 %v159_v17  ;;  %924 = vmatpush3.msra.mxu0 %v111_v18  ;;  %v141_v27 = vld [vmem:[%s2040_s1 + $0x148] sm:$0xff]  ;;  %v140_v31 = vld [vmem:[%s2040_s1 + $0x140] sm:$0xff]  ;;  %v139_v35 = vld [vmem:[%s2040_s1 + $0x138] sm:$0xff] }
   0xd   :  { %1004 = vmatpush3.msra.mxu1 %v143_v19  ;;  %925 = vmatprep.subr.mxu0 %v126_v20  ;;  %v122_v36 = vld [vmem:[%s2040_s1 + $0xb0] sm:$0xff]  ;;  %v121_v40 = vld [vmem:[%s2040_s1 + $0xa8] sm:$0xff]  ;;  %v120_v44 = vld [vmem:[%s2040_s1 + $0xa0] sm:$0xff] }
   0xe   :  { %1005 = vmatprep.subr.mxu1 %v158_v21  ;;  %926 = vmatpush3.msra.mxu0 %v110_v22  ;;  %v154_v37 = vld [vmem:[%s2040_s1 + $0x1b0] sm:$0xff]  ;;  %v153_v41 = vld [vmem:[%s2040_s1 + $0x1a8] sm:$0xff]  ;;  %v152_v45 = vld [vmem:[%s2040_s1 + $0x1a0] sm:$0xff] }
   0xf   :  { %1006 = vmatpush3.msra.mxu1 %v142_v23  ;;  %927 = vmatprep.subr.mxu0 %v125_v24  ;;  %v106_v38 = vld [vmem:[%s2040_s1 + $0x30] sm:$0xff]  ;;  %v105_v42 = vld [vmem:[%s2040_s1 + $0x28] sm:$0xff]  ;;  %v104_v46 = vld [vmem:[%s2040_s1 + $0x20] sm:$0xff] }
  0x10   :  { %1007 = vmatprep.subr.mxu1 %v157_v25  ;;  %928 = vmatpush3.msra.mxu0 %v109_v26  ;;  %v138_v39 = vld [vmem:[%s2040_s1 + $0x130] sm:$0xff]  ;;  %v137_v43 = vld [vmem:[%s2040_s1 + $0x128] sm:$0xff]  ;;  %v136_v47 = vld [vmem:[%s2040_s1 + $0x120] sm:$0xff] }
  0x11   :  { %1008 = vmatpush3.msra.mxu1 %v141_v27  ;;  %929 = vmatprep.subr.mxu0 %v124_v28  ;;  %v119_v48 = vld [vmem:[%s2040_s1 + $0x98] sm:$0xff]  ;;  %v118_v52 = vld [vmem:[%s2040_s1 + $0x90] sm:$0xff]  ;;  %v117_v56 = vld [vmem:[%s2040_s1 + $0x88] sm:$0xff] }
  0x12   :  { %1009 = vmatprep.subr.mxu1 %v156_v29  ;;  %930 = vmatpush3.msra.mxu0 %v108_v30  ;;  %v151_v49 = vld [vmem:[%s2040_s1 + $0x198] sm:$0xff]  ;;  %v150_v53 = vld [vmem:[%s2040_s1 + $0x190] sm:$0xff]  ;;  %v149_v57 = vld [vmem:[%s2040_s1 + $0x188] sm:$0xff] }
  0x13   :  { %1010 = vmatpush3.msra.mxu1 %v140_v31  ;;  %931 = vmatprep.subr.mxu0 %v123_v32  ;;  %v103_v50 = vld [vmem:[%s2040_s1 + $0x18] sm:$0xff]  ;;  %v102_v54 = vld [vmem:[%s2040_s1 + $0x10] sm:$0xff]  ;;  %v101_v58 = vld [vmem:[%s2040_s1 + $0x8] sm:$0xff] }
  0x14   :  { %1011 = vmatprep.subr.mxu1 %v155_v33  ;;  %932 = vmatpush3.msra.mxu0 %v107_v34  ;;  %v135_v51 = vld [vmem:[%s2040_s1 + $0x118] sm:$0xff]  ;;  %v134_v55 = vld [vmem:[%s2040_s1 + $0x110] sm:$0xff]  ;;  %v133_v59 = vld [vmem:[%s2040_s1 + $0x108] sm:$0xff] }
  0x15   :  { %1012 = vmatpush3.msra.mxu1 %v139_v35  ;;  %933 = vmatprep.subr.mxu0 %v122_v36  ;;  %v116_v60 = vld [vmem:[%s2040_s1 + $0x80] sm:$0xff]  ;;  %v21_v63 = vld [vmem:[%s2041_s0 + $0x8] sm:$0xff]  ;;  %v23_v1 = vld [vmem:[%s2041_s0 + $0x18] sm:$0xff] }
  0x16   :  { %1013 = vmatprep.subr.mxu1 %v154_v37  ;;  %934 = vmatpush3.msra.mxu0 %v106_v38  ;;  %v148_v61 = vld [vmem:[%s2040_s1 + $0x180] sm:$0xff]  ;;  %v22_v3 = vld [vmem:[%s2041_s0 + $0x10] sm:$0xff]  ;;  %v171_v4 = vld [vmem:[%s2040_s1 + $0x238] sm:$0xff] }
  0x17   :  { %1014 = vmatpush3.msra.mxu1 %v138_v39  ;;  %935 = vmatprep.subr.mxu0 %v121_v40  ;;  %v100_v62 = vld [vmem:[%s2040_s1] sm:$0xff]  ;;  %v26_v5 = vld [vmem:[%s2041_s0 + $0x30] sm:$0xff]  ;;  %v25_v8 = vld [vmem:[%s2041_s0 + $0x28] sm:$0xff] }
  0x18   :  { %1015 = vmatprep.subr.mxu1 %v153_v41  ;;  %936 = vmatpush3.msra.mxu0 %v105_v42  ;;  %v132_v0 = vld [vmem:[%s2040_s1 + $0x100] sm:$0xff]  ;;  %v170_v7 = vld [vmem:[%s2040_s1 + $0x230] sm:$0xff]  ;;  %v27_v9 = vld [vmem:[%s2041_s0 + $0x38] sm:$0xff] }
  0x19   :  { %1016 = vmatpush3.msra.mxu1 %v137_v43  ;;  %937 = vmatprep.subr.mxu0 %v120_v44  ;;  %v20_v2 = vld [vmem:[%s2041_s0] sm:$0xff]  ;;  %v31_v10 = vld [vmem:[%s2041_s0 + $0x58] sm:$0xff]  ;;  %v33_v11 = vld [vmem:[%s2041_s0 + $0x68] sm:$0xff] }
  0x1a   :  { %1017 = vmatprep.subr.mxu1 %v152_v45  ;;  %938 = vmatpush3.msra.mxu0 %v104_v46  ;;  %v28_v6 = vld [vmem:[%s2041_s0 + $0x40] sm:$0xff]  ;;  %v169_v12 = vld [vmem:[%s2040_s1 + $0x228] sm:$0xff]  ;;  %v30_v13 = vld [vmem:[%s2041_s0 + $0x50] sm:$0xff] }
  0x1b   :  { %1018 = vmatpush3.msra.mxu1 %v136_v47  ;;  %939 = vmatprep.subr.mxu0 %v119_v48  ;;  %v32_v14 = vld [vmem:[%s2041_s0 + $0x60] sm:$0xff]  ;;  %v38_v16 = vld [vmem:[%s2041_s0 + $0x90] sm:$0xff]  ;;  %v35_v18 = vld [vmem:[%s2041_s0 + $0x78] sm:$0xff] }
  0x1c   :  { %1019 = vmatprep.subr.mxu1 %v151_v49  ;;  %940 = vmatpush3.msra.mxu0 %v103_v50  ;;  %v36_v15 = vld [vmem:[%s2041_s0 + $0x80] sm:$0xff]  ;;  %v37_v19 = vld [vmem:[%s2041_s0 + $0x88] sm:$0xff]  ;;  %v43_v21 = vld [vmem:[%s2041_s0 + $0xb8] sm:$0xff] }
  0x1d   :  { %1020 = vmatpush3.msra.mxu1 %v135_v51  ;;  %941 = vmatprep.subr.mxu0 %v118_v52  ;;  %v168_v17 = vld [vmem:[%s2040_s1 + $0x220] sm:$0xff]  ;;  %v41_v20 = vld [vmem:[%s2041_s0 + $0xa8] sm:$0xff]  ;;  %v167_v22 = vld [vmem:[%s2040_s1 + $0x218] sm:$0xff] }
  0x1e   :  { %1021 = vmatprep.subr.mxu1 %v150_v53  ;;  %942 = vmatpush3.msra.mxu0 %v102_v54  ;;  %v40_v23 = vld [vmem:[%s2041_s0 + $0xa0] sm:$0xff]  ;;  %v42_v24 = vld [vmem:[%s2041_s0 + $0xb0] sm:$0xff]  ;;  %v45_v28 = vld [vmem:[%s2041_s0 + $0xc8] sm:$0xff] }
  0x1f   :  { %1022 = vmatpush3.msra.mxu1 %v134_v55  ;;  %943 = vmatprep.subr.mxu0 %v117_v56  ;;  %v46_v25 = vld [vmem:[%s2041_s0 + $0xd0] sm:$0xff]  ;;  %v48_v26 = vld [vmem:[%s2041_s0 + $0xe0] sm:$0xff]  ;;  %v47_v29 = vld [vmem:[%s2041_s0 + $0xd8] sm:$0xff] }
  0x20   :  { %1023 = vmatprep.subr.mxu1 %v149_v57  ;;  %944 = vmatpush3.msra.mxu0 %v101_v58  ;;  %v166_v27 = vld [vmem:[%s2040_s1 + $0x210] sm:$0xff]  ;;  %v51_v30 = vld [vmem:[%s2041_s0 + $0xf8] sm:$0xff]  ;;  %v53_v31 = vld [vmem:[%s2041_s0 + $0x108] sm:$0xff] }
  0x21   :  { %1024 = vmatpush3.msra.mxu1 %v133_v59  ;;  %945 = vmatprep.subr.mxu0 %v116_v60  ;;  %v165_v32 = vld [vmem:[%s2040_s1 + $0x208] sm:$0xff]  ;;  %v50_v33 = vld [vmem:[%s2041_s0 + $0xf0] sm:$0xff]  ;;  %v52_v34 = vld [vmem:[%s2041_s0 + $0x100] sm:$0xff] }
  0x22   :  { %1025 = vmatprep.subr.mxu1 %v148_v61  ;;  %946 = vmatpush3.msra.mxu0 %v100_v62  ;;  %v56_v35 = vld [vmem:[%s2041_s0 + $0x120] sm:$0xff]  ;;  %v58_v36 = vld [vmem:[%s2041_s0 + $0x130] sm:$0xff]  ;;  %v55_v38 = vld [vmem:[%s2041_s0 + $0x118] sm:$0xff] }
  0x23   :  { %285 = vmatprep.mubr.f32.mxu0 %v21_v63  ;;  %1026 = vmatpush3.msra.mxu1 %v132_v0  ;;  %v164_v37 = vld [vmem:[%s2040_s1 + $0x200] sm:$0xff]  ;;  %v57_v39 = vld [vmem:[%s2041_s0 + $0x128] sm:$0xff]  ;;  %v63_v41 = vld [vmem:[%s2041_s0 + $0x158] sm:$0xff] }
  0x24   :  { %430 = vmatprep.mubr.f32.mxu1 %v23_v1  ;;  %286 = vmatmul.mubr.f32.vlgmr.msra.gmra.mxu0 %v20_v2  ;;  %v61_v40 = vld [vmem:[%s2041_s0 + $0x148] sm:$0xff]  ;;  %v60_v42 = vld [vmem:[%s2041_s0 + $0x140] sm:$0xff]  ;;  %v62_v43 = vld [vmem:[%s2041_s0 + $0x150] sm:$0xff] }
  0x25   :  { %431 = vmatmul.mubr.f32.vlgmr.msra.gmra.mxu1 %v22_v3  ;;  %1099 = vmatprep.subr.mxu0 %v171_v4  ;;  %v66_v44 = vld [vmem:[%s2041_s0 + $0x170] sm:$0xff]  ;;  %v68_v45 = vld [vmem:[%s2041_s0 + $0x180] sm:$0xff]  ;;  %v65_v46 = vld [vmem:[%s2041_s0 + $0x168] sm:$0xff] }
  0x26   :  { %290 = vmatprep.mubr.f32.mxu0 %v26_v5  ;;  %1100 = vmatpush3.msra.mxu0 %v171_v4  ;;  %v67_v47 = vld [vmem:[%s2041_s0 + $0x178] sm:$0xff]  ;;  %v73_v49 = vld [vmem:[%s2041_s0 + $0x1a8] sm:$0xff]  ;;  %v70_v50 = vld [vmem:[%s2041_s0 + $0x190] sm:$0xff] }
  0x27   :  { %435 = vmatprep.mubr.f32.mxu1 %v28_v6  ;;  %1101 = vmatprep.subr.mxu0 %v170_v7  ;;  %v71_v48 = vld [vmem:[%s2041_s0 + $0x198] sm:$0xff]  ;;  %v72_v51 = vld [vmem:[%s2041_s0 + $0x1a0] sm:$0xff]  ;;  %v78_v53 = vld [vmem:[%s2041_s0 + $0x1d0] sm:$0xff] }
  0x28   :  { %1139 = vmatprep.subr.mxu1 %v171_v4  ;;  %291 = vmatmul.mubr.f32.gmra.mxu0 %v25_v8  ;;  %v76_v52 = vld [vmem:[%s2041_s0 + $0x1c0] sm:$0xff]  ;;  %v75_v54 = vld [vmem:[%s2041_s0 + $0x1b8] sm:$0xff]  ;;  %v77_v55 = vld [vmem:[%s2041_s0 + $0x1c8] sm:$0xff] }
  0x29   :  { %436 = vmatmul.mubr.f32.gmra.mxu1 %v27_v9  ;;  %295 = vmatprep.mubr.f32.mxu0 %v31_v10  ;;  %v81_v56 = vld [vmem:[%s2041_s0 + $0x1e8] sm:$0xff]  ;;  %v83_v57 = vld [vmem:[%s2041_s0 + $0x1f8] sm:$0xff]  ;;  %v80_v58 = vld [vmem:[%s2041_s0 + $0x1e0] sm:$0xff] }
  0x2a   :  { %440 = vmatprep.mubr.f32.mxu1 %v33_v11  ;;  %1102 = vmatpush3.msra.mxu0 %v170_v7  ;;  %v82_v59 = vld [vmem:[%s2041_s0 + $0x1f0] sm:$0xff]  ;;  %v88_v61 = vld [vmem:[%s2041_s0 + $0x220] sm:$0xff]  ;;  %v85_v62 = vld [vmem:[%s2041_s0 + $0x208] sm:$0xff] }
  0x2b   :  { %1147 = vmatpush3.msra.mxu1 %v171_v4  ;;  %1103 = vmatprep.subr.mxu0 %v169_v12  ;;  %v86_v60 = vld [vmem:[%s2041_s0 + $0x210] sm:$0xff]  ;;  %v87_v63 = vld [vmem:[%s2041_s0 + $0x218] sm:$0xff]  ;;  %v93_v1 = vld [vmem:[%s2041_s0 + $0x248] sm:$0xff] }
  0x2c   :  { %1140 = vmatprep.subr.mxu1 %v170_v7  ;;  %296 = vmatmul.mubr.f32.gmra.mxu0 %v30_v13  ;;  %v91_v0 = vld [vmem:[%s2041_s0 + $0x238] sm:$0xff]  ;;  %v90_v2 = vld [vmem:[%s2041_s0 + $0x230] sm:$0xff]  ;;  %v92_v3 = vld [vmem:[%s2041_s0 + $0x240] sm:$0xff] }
  0x2d   :  { %441 = vmatmul.mubr.f32.gmra.mxu1 %v32_v14  ;;  %300 = vmatprep.mubr.f32.mxu0 %v36_v15  ;;  %v96_v4 = vld [vmem:[%s2041_s0 + $0x260] sm:$0xff]  ;;  %v98_v5 = vld [vmem:[%s2041_s0 + $0x270] sm:$0xff]  ;;  %v95_v6 = vld [vmem:[%s2041_s0 + $0x258] sm:$0xff] }
  0x2e   :  { %445 = vmatprep.mubr.f32.mxu1 %v38_v16  ;;  %1104 = vmatpush3.msra.mxu0 %v169_v12  ;;  %v24_v8 = vld [vmem:[%s2041_s0 + $0x20] sm:$0xff]  ;;  %v29_v10 = vld [vmem:[%s2041_s0 + $0x48] sm:$0xff]  ;;  %v74_v13 = vld [vmem:[%s2041_s0 + $0x1b0] sm:$0xff] }
  0x2f   :  { %1148 = vmatpush3.msra.mxu1 %v170_v7  ;;  %1105 = vmatprep.subr.mxu0 %v168_v17  ;;  %v97_v7 = vld [vmem:[%s2041_s0 + $0x268] sm:$0xff]  ;;  %v64_v9 = vld [vmem:[%s2041_s0 + $0x160] sm:$0xff]  ;;  %v39_v14 = vld [vmem:[%s2041_s0 + $0x98] sm:$0xff] }
  0x30   :  { %1141 = vmatprep.subr.mxu1 %v169_v12  ;;  %301 = vmatmul.mubr.f32.gmra.mxu0 %v35_v18  ;;  %v69_v11 = vld [vmem:[%s2041_s0 + $0x188] sm:$0xff]  ;;  %v79_v15 = vld [vmem:[%s2041_s0 + $0x1d8] sm:$0xff]  ;;  %v44_v16 = vld [vmem:[%s2041_s0 + $0xc0] sm:$0xff] }
  0x31   :  { %446 = vmatmul.mubr.f32.gmra.mxu1 %v37_v19  ;;  %305 = vmatprep.mubr.f32.mxu0 %v41_v20  ;;  %v49_v18 = vld [vmem:[%s2041_s0 + $0xe8] sm:$0xff]  ;;  %v54_v20 = vld [vmem:[%s2041_s0 + $0x110] sm:$0xff] }
  0x32   :  { %450 = vmatprep.mubr.f32.mxu1 %v43_v21  ;;  %1106 = vmatpush3.msra.mxu0 %v168_v17  ;;  %v89_v19 = vld [vmem:[%s2041_s0 + $0x228] sm:$0xff]  ;;  %v94_v21 = vld [vmem:[%s2041_s0 + $0x250] sm:$0xff] }
  0x33   :  { %1149 = vmatpush3.msra.mxu1 %v169_v12  ;;  %1107 = vmatprep.subr.mxu0 %v167_v22  ;;  %v34_v12 = vld [vmem:[%s2041_s0 + $0x70] sm:$0xff] }
  0x34   :  { %1142 = vmatprep.subr.mxu1 %v168_v17  ;;  %306 = vmatmul.mubr.f32.gmra.mxu0 %v40_v23  ;;  %v99_v23 = vld [vmem:[%s2041_s0 + $0x278] sm:$0xff] }
  0x35   :  { %451 = vmatmul.mubr.f32.gmra.mxu1 %v42_v24  ;;  %310 = vmatprep.mubr.f32.mxu0 %v46_v25 }
  0x36   :  { %455 = vmatprep.mubr.f32.mxu1 %v48_v26  ;;  %1108 = vmatpush3.msra.mxu0 %v167_v22 }
  0x37   :  { %1150 = vmatpush3.msra.mxu1 %v168_v17  ;;  %1109 = vmatprep.subr.mxu0 %v166_v27  ;;  %v84_v17 = vld [vmem:[%s2041_s0 + $0x200] sm:$0xff] }
  0x38   :  { %1143 = vmatprep.subr.mxu1 %v167_v22  ;;  %311 = vmatmul.mubr.f32.gmra.mxu0 %v45_v28 }
  0x39   :  { %456 = vmatmul.mubr.f32.gmra.mxu1 %v47_v29  ;;  %315 = vmatprep.mubr.f32.mxu0 %v51_v30 }
  0x3a   :  { %460 = vmatprep.mubr.f32.mxu1 %v53_v31  ;;  %1110 = vmatpush3.msra.mxu0 %v166_v27 }
  0x3b   :  { %1151 = vmatpush3.msra.mxu1 %v167_v22  ;;  %1111 = vmatprep.subr.mxu0 %v165_v32  ;;  %v59_v22 = vld [vmem:[%s2041_s0 + $0x138] sm:$0xff] }
  0x3c   :  { %1144 = vmatprep.subr.mxu1 %v166_v27  ;;  %316 = vmatmul.mubr.f32.gmra.mxu0 %v50_v33 }
  0x3d   :  { %461 = vmatmul.mubr.f32.gmra.mxu1 %v52_v34  ;;  %320 = vmatprep.mubr.f32.mxu0 %v56_v35 }
  0x3e   :  { %465 = vmatprep.mubr.f32.mxu1 %v58_v36  ;;  %1112 = vmatpush3.msra.mxu0 %v165_v32 }
  0x3f   :  { %1152 = vmatpush3.msra.mxu1 %v166_v27  ;;  %1113 = vmatprep.subr.mxu0 %v164_v37 }
  0x40   :  { %1145 = vmatprep.subr.mxu1 %v165_v32  ;;  %321 = vmatmul.mubr.f32.gmra.mxu0 %v55_v38 }
  0x41   :  { %466 = vmatmul.mubr.f32.gmra.mxu1 %v57_v39  ;;  %325 = vmatprep.mubr.f32.mxu0 %v61_v40 }
  0x42   :  { %470 = vmatprep.mubr.f32.mxu1 %v63_v41  ;;  %1114 = vmatpush3.msra.mxu0 %v164_v37 }
  0x43   :  { %1153 = vmatpush3.msra.mxu1 %v165_v32 }
  0x44   :  { %1146 = vmatprep.subr.mxu1 %v164_v37  ;;  %326 = vmatmul.mubr.f32.gmra.mxu0 %v60_v42 }
  0x45   :  { %471 = vmatmul.mubr.f32.gmra.mxu1 %v62_v43  ;;  %330 = vmatprep.mubr.f32.mxu0 %v66_v44 }
  0x46   :  { %475 = vmatprep.mubr.f32.mxu1 %v68_v45  ;;  %1154 = vmatpush3.msra.mxu1 %v164_v37 }
  0x48   :  { %331 = vmatmul.mubr.f32.gmra.mxu0 %v65_v46 }
  0x49   :  { %476 = vmatmul.mubr.f32.gmra.mxu1 %v67_v47  ;;  %335 = vmatprep.mubr.f32.mxu0 %v71_v48 }
  0x4a   :  { %480 = vmatprep.mubr.f32.mxu1 %v73_v49 }
  0x4c   :  { %336 = vmatmul.mubr.f32.gmra.mxu0 %v70_v50 }
  0x4d   :  { %481 = vmatmul.mubr.f32.gmra.mxu1 %v72_v51  ;;  %340 = vmatprep.mubr.f32.mxu0 %v76_v52 }
  0x4e   :  { %485 = vmatprep.mubr.f32.mxu1 %v78_v53 }
  0x50   :  { %341 = vmatmul.mubr.f32.gmra.mxu0 %v75_v54 }
  0x51   :  { %486 = vmatmul.mubr.f32.gmra.mxu1 %v77_v55  ;;  %345 = vmatprep.mubr.f32.mxu0 %v81_v56 }
  0x52   :  { %490 = vmatprep.mubr.f32.mxu1 %v83_v57 }
  0x54   :  { %346 = vmatmul.mubr.f32.gmra.mxu0 %v80_v58 }
  0x55   :  { %491 = vmatmul.mubr.f32.gmra.mxu1 %v82_v59  ;;  %350 = vmatprep.mubr.f32.mxu0 %v86_v60 }
  0x56   :  { %495 = vmatprep.mubr.f32.mxu1 %v88_v61 }
  0x58   :  { %351 = vmatmul.mubr.f32.gmra.mxu0 %v85_v62 }
  0x59   :  { %496 = vmatmul.mubr.f32.gmra.mxu1 %v87_v63  ;;  %355 = vmatprep.mubr.f32.mxu0 %v91_v0 }
  0x5a   :  { %500 = vmatprep.mubr.f32.mxu1 %v93_v1 }
  0x5c   :  { %356 = vmatmul.mubr.f32.gmra.mxu0 %v90_v2 }
  0x5d   :  { %501 = vmatmul.mubr.f32.gmra.mxu1 %v92_v3  ;;  %360 = vmatprep.mubr.f32.mxu0 %v96_v4 }
  0x5e   :  { %505 = vmatprep.mubr.f32.mxu1 %v98_v5 }
  0x60   :  { %361 = vmatmul.mubr.f32.gmra.mxu0 %v95_v6 }
  0x61   :  { %506 = vmatmul.mubr.f32.gmra.mxu1 %v97_v7  ;;  %1115 = vmatprep.mubr.msk.f32.mxu0 %vm172_vm0, %v24_v8 }
  0x62   :  { %1127 = vmatprep.mubr.msk.f32.mxu1 %vm172_vm0, %v64_v9 }
  0x64   :  { %1116 = vmatmul.mubr.msk.f32.vlgmr.msra.gmra.mxu0 %vm172_vm0, %v29_v10 }
  0x65   :  { %1128 = vmatmul.mubr.msk.f32.vlgmr.msra.gmra.mxu1 %vm172_vm0, %v69_v11  ;;  %1118 = vmatprep.mubr.msk.f32.mxu0 %vm172_vm0, %v34_v12 }
  0x66   :  { %1130 = vmatprep.mubr.msk.f32.mxu1 %vm172_vm0, %v74_v13 }
  0x68   :  { %1119 = vmatmul.mubr.msk.f32.gmra.mxu0 %vm172_vm0, %v39_v14 }
  0x69   :  { %1131 = vmatmul.mubr.msk.f32.gmra.mxu1 %vm172_vm0, %v79_v15  ;;  %1121 = vmatprep.mubr.msk.f32.mxu0 %vm172_vm0, %v44_v16 }
  0x6a   :  { %1133 = vmatprep.mubr.msk.f32.mxu1 %vm172_vm0, %v84_v17 }
  0x6c   :  { %1122 = vmatmul.mubr.msk.f32.gmra.mxu0 %vm172_vm0, %v49_v18 }
  0x6d   :  { %1134 = vmatmul.mubr.msk.f32.gmra.mxu1 %vm172_vm0, %v89_v19  ;;  %1124 = vmatprep.mubr.msk.f32.mxu0 %vm172_vm0, %v54_v20 }
  0x6e   :  { %1136 = vmatprep.mubr.msk.f32.mxu1 %vm172_vm0, %v94_v21 }
  0x70   :  { %1125 = vmatmul.mubr.msk.f32.gmra.mxu0 %vm172_vm0, %v59_v22 }
  0x71   :  { %1137 = vmatmul.mubr.msk.f32.gmra.mxu1 %vm172_vm0, %v99_v23 }
  0xe4   :  { %v947_v24 = vpop.f32.mrf.mxu0 }
  0xe5   :  { %v1027_v25 = vpop.f32.mrf.mxu1 }
  0xe6   :  { %v948_v26 = vpop.f32.mrf.mxu0 }
  0xe7   :  { %v1028_v27 = vpop.f32.mrf.mxu1  ;;  %v949_v20 = vadd.f32 %v948_v26, %v947_v24 }
  0xe8   :  { %v950_v28 = vpop.f32.mrf.mxu0  ;;  %v1029_v21 = vadd.f32 %v1028_v27, %v1027_v25 }
  0xe9   :  { %v1030_v29 = vpop.f32.mrf.mxu1 }
  0xea   :  { %v951_v30 = vpop.f32.mrf.mxu0 }
  0xeb   :  { %v1031_v31 = vpop.f32.mrf.mxu1  ;;  %v952_v22 = vadd.f32 %v951_v30, %v950_v28 }
  0xec   :  { %v1659_v32 = vpop.f32.mrf.mxu0  ;;  %v1032_v23 = vadd.f32 %v1031_v31, %v1030_v29 }
  0xed   :  { %v1661_v33 = vpop.f32.mrf.mxu1 }
  0xee   :  { %v954_v34 = vpop.f32.mrf.mxu0 }
  0xef   :  { %v1034_v35 = vpop.f32.mrf.mxu1 }
  0xf0   :  { %v956_v36 = vpop.f32.mrf.mxu0  ;;  %v1035_v24 = vadd.f32 %v1034_v35, %v1661_v33 }
  0xf1   :  { %v1036_v37 = vpop.f32.mrf.mxu1 }
  0xf2   :  { %v957_v38 = vpop.f32.mrf.mxu0 }
  0xf3   :  { %v1037_v39 = vpop.f32.mrf.mxu1  ;;  %v958_v25 = vadd.f32 %v957_v38, %v956_v36 }
  0xf4   :  { %v1663_v40 = vpop.f32.mrf.mxu0  ;;  %v1038_v26 = vadd.f32 %v1037_v39, %v1036_v37 }
  0xf5   :  { %v1665_v41 = vpop.f32.mrf.mxu1 }
  0xf6   :  { %v960_v42 = vpop.f32.mrf.mxu0 }
  0xf7   :  { %v1040_v43 = vpop.f32.mrf.mxu1  ;;  %v961_v31 = vadd.f32 %v960_v42, %v1663_v40 }
  0xf8   :  { %v962_v44 = vpop.f32.mrf.mxu0 }
  0xf9   :  { %v1042_v45 = vpop.f32.mrf.mxu1 }
  0xfa   :  { %v963_v46 = vpop.f32.mrf.mxu0 }
  0xfb   :  { %v1043_v47 = vpop.f32.mrf.mxu1 }
  0xfc   :  { %v1667_v48 = vpop.f32.mrf.mxu0 }
  0xfd   :  { %v1669_v49 = vpop.f32.mrf.mxu1 }
  0xfe   :  { %v1671_v50 = vpop.f32.mrf.mxu0 }
  0xff   :  { %v1673_v51 = vpop.f32.mrf.mxu1  ;;  %v967_v40 = vadd.f32 %v1671_v50, %v1667_v48 }
 0x100   :  { %v1675_v52 = vpop.f32.mrf.mxu0 }
 0x101   :  { %v1677_v53 = vpop.f32.mrf.mxu1 }
 0x102   :  { %v1679_v54 = vpop.f32.mrf.mxu0 }
 0x103   :  { %v1681_v55 = vpop.f32.mrf.mxu1 }
 0x104   :  { %v1683_v56 = vpop.f32.mrf.mxu0 }
 0x105   :  { %v1685_v57 = vpop.f32.mrf.mxu1 }
 0x106   :  { %v1687_v58 = vpop.f32.mrf.mxu0 }
 0x107   :  { %v1689_v59 = vpop.f32.mrf.mxu1 }
 0x108   :  { %v1691_v60 = vpop.f32.mrf.mxu0  ;;  %v1053_v48 = vadd.f32 %v1689_v59, %v1685_v57 }
 0x109   :  { %v1693_v61 = vpop.f32.mrf.mxu1 }
 0x10a   :  { %v1695_v62 = vpop.f32.mrf.mxu0 }
 0x10b   :  { %v1697_v63 = vpop.f32.mrf.mxu1 }
 0x10c   :  { %v1699_v0 = vpop.f32.mrf.mxu0 }
 0x10d   :  { %v1701_v1 = vpop.f32.mrf.mxu1 }
 0x10e   :  { %v1703_v2 = vpop.f32.mrf.mxu0 }
 0x10f   :  { %v1705_v3 = vpop.f32.mrf.mxu1 }
 0x110   :  { %v1707_v4 = vpop.f32.mrf.mxu0 }
 0x111   :  { %v1709_v5 = vpop.f32.mrf.mxu1 }
 0x112   :  { %v1711_v6 = vpop.f32.mrf.mxu0 }
 0x113   :  { %v1713_v7 = vpop.f32.mrf.mxu1 }
 0x114   :  { %v1715_v8 = vpop.f32.mrf.mxu0 }
 0x115   :  { %v1717_v9 = vpop.f32.mrf.mxu1 }
 0x116   :  { %2046 = vst [vmem:[#allocation2_spill] sm:$0xff] %v1717_v9  ;;  %v1719_v10 = vpop.f32.mrf.mxu0 }
 0x117   :  { %v1721_v11 = vpop.f32.mrf.mxu1 }
 0x118   :  { %2047 = vst [vmem:[#allocation3_spill] sm:$0xff] %v1721_v11  ;;  %v1723_v12 = vpop.f32.mrf.mxu0 }
 0x119   :  { %2048 = vst [vmem:[#allocation4_spill] sm:$0xff] %v1723_v12  ;;  %v1725_v13 = vpop.f32.mrf.mxu1 }
 0x11a   :  { %2049 = vst [vmem:[#allocation5_spill] sm:$0xff] %v1725_v13  ;;  %v1727_v14 = vpop.f32.mrf.mxu0 }
 0x11b   :  { %2050 = vst [vmem:[#allocation6_spill] sm:$0xff] %v1727_v14  ;;  %v1729_v15 = vpop.f32.mrf.mxu1 }
 0x11c   :  { %2051 = vst [vmem:[#allocation7_spill] sm:$0xff] %v1729_v15  ;;  %v1731_v16 = vpop.f32.mrf.mxu0  ;;  %v438_v15 = vadd.f32 %v1032_v23, %v952_v22  ;;  %v1041_v22 = vadd.f32 %v1040_v43, %v1665_v41  ;;  %v964_v23 = vadd.f32 %v963_v46, %v962_v44  ;;  %v970_v46 = vadd.f32 %v1679_v54, %v1675_v52 }
 0x11d   :  { %2052 = vst [vmem:[#allocation8_spill] sm:$0xff] %v1731_v16  ;;  %v1733_v17 = vpop.f32.mrf.mxu1  ;;  %v1056_v54 = vadd.f32 %v1697_v63, %v1693_v61 }
 0x11e   :  { %2053 = vst [vmem:[#allocation9_spill] sm:$0xff] %v1733_v17  ;;  %v1735_v18 = vpop.f32.mrf.mxu0  ;;  %v433_v17 = vadd.f32 %v1029_v21, %v949_v20  ;;  %v453_v44 = vadd.f32 %v1041_v22, %v961_v31  ;;  %v2057_v31 = vld [vmem:[#allocation2_spill] sm:$0xff] }
 0x11f   :  { %2054 = vst [vmem:[#allocation10_spill] sm:$0xff] %v1735_v18  ;;  %v1737_v19 = vpop.f32.mrf.mxu1  ;;  %v955_v18 = vadd.f32 %v954_v34, %v1659_v32  ;;  %v448_v34 = vadd.f32 %v1038_v26, %v958_v25  ;;  %v2058_v22 = vld [vmem:[#allocation3_spill] sm:$0xff] }
 0x120   :  { %v1739_v11 = vpop.f32.mrf.mxu0 }
 0x121   :  { %v1741_v12 = vpop.f32.mrf.mxu1  ;;  %v443_v33 = vadd.f32 %v1035_v24, %v955_v18 }
 0x122   :  { %2055 = vst [vmem:[#allocation11_spill] sm:$0xff] %v1741_v12  ;;  %v1743_v13 = vpop.f32.mrf.mxu0 }
 0x123   :  { %v1745_v14 = vpop.f32.mrf.mxu1 }
 0x124   :  { %2056 = vst [vmem:[#allocation12_spill] sm:$0xff] %v1745_v14  ;;  %v1117_v16 = vpop.f32.mrf.mxu0  ;;  %v1044_v14 = vadd.f32 %v1043_v47, %v1042_v45  ;;  %v1047_v45 = vadd.f32 %v1673_v51, %v1669_v49  ;;  %v1050_v47 = vadd.f32 %v1681_v55, %v1677_v53  ;;  %v976_v53 = vadd.f32 %v1695_v62, %v1691_v60 }
 0x125   :  { %v1747_v9 = vpop.f32.mrf.mxu1  ;;  %v1751_v29 = vadd.f32 %v1117_v16, %v438_v15  ;;  %v973_v15 = vadd.f32 %v1687_v58, %v1683_v56  ;;  %v1059_v60 = vadd.f32 %v1705_v3, %v1701_v1  ;;  %v985_v3 = vadd.f32 %v1719_v10, %v1715_v8 }
 0x126   :  { %v577_v27 = vpop.f32.mrf.mxu0  ;;  %v458_v42 = vadd.f32 %v1044_v14, %v964_v23  ;;  %v468_v58 = vadd.f32 %v1050_v47, %v970_v46  ;;  %v463_v59 = vadd.f32 %v1047_v45, %v967_v40  ;;  %v478_v25 = vadd.f32 %v1056_v54, %v976_v53  ;;  %v2063_v45 = vld [vmem:[#allocation8_spill] sm:$0xff]  ;;  %v2064_v46 = vld [vmem:[#allocation10_spill] sm:$0xff] }
 0x127   :  { %v617_v28 = vpop.f32.mrf.mxu1  ;;  %v1753_v30 = vadd.f32 %v577_v27, %v433_v17  ;;  %v657_v37 = vsel %vm172_vm0, %v1751_v29, 0.0  ;;  %v979_v17 = vadd.f32 %v1703_v2, %v1699_v0  ;;  %v473_v18 = vadd.f32 %v1053_v48, %v973_v15 }
 0x128   :  { %v1120_v12 = vpop.f32.mrf.mxu0  ;;  %v982_v27 = vadd.f32 %v1711_v6, %v1707_v4  ;;  %v1062_v0 = vadd.f32 %v1713_v7, %v1709_v5  ;;  %v1065_v23 = vadd.f32 %v2058_v22, %v2057_v31  ;;  %v2059_v6 = vld [vmem:[#allocation4_spill] sm:$0xff]  ;;  %v2060_v7 = vld [vmem:[#allocation6_spill] sm:$0xff]  ;;  %v991_v47 = vadd.f32 %v2064_v46, %v2063_v45 }
 0x129   :  { %v656_v32 = vsel %vm172_vm0, %v1753_v30, 0.0  ;;  %v1759_v35 = vpop.f32.mrf.mxu1  ;;  %v1763_v38 = vadd.f32 %v1120_v12, %v448_v34  ;;  %v1807_v2 = vadd.f32 %v617_v28, %v473_v18  ;;  %v483_v4 = vadd.f32 %v1059_v60, %v979_v17  ;;  %v2066_v53 = vld [vmem:[#allocation11_spill] sm:$0xff] }
 0x12a   :  { %v587_v36 = vpop.f32.mrf.mxu0  ;;  %v658_v41 = vadd.f32 %v657_v37, %v656_v32  ;;  %v988_v28 = vadd.f32 %v2060_v7, %v2059_v6  ;;  %v2062_v37 = vld [vmem:[#allocation7_spill] sm:$0xff]  ;;  %v488_v10 = vadd.f32 %v1062_v0, %v982_v27 }
 0x12b   :  { %v1765_v39 = vadd.f32 %v587_v36, %v443_v33  ;;  %v627_v14 = vpop.f32.mrf.mxu1  ;;  %v661_v49 = vsel %vm172_vm0, %v1763_v38, 0.0  ;;  %v1816_v33 = vadd.f32 %v1747_v9, %v478_v25  ;;  %v2061_v36 = vld [vmem:[#allocation5_spill] sm:$0xff]  ;;  %v671_v8 = vsel %vm172_vm0, %v1807_v2, 0.0  ;;  %v2067_v54 = vld [vmem:[#allocation12_spill] sm:$0xff] }
 0x12c   :  { %v1123_v43 = vpop.f32.mrf.mxu0  ;;  %v1068_v40 = vadd.f32 %v2062_v37, %v2061_v36 }
 0x12d   :  { %v659_v12 = vsel %vm172_vm0, %v1765_v39, 0.0  ;;  %v1783_v51 = vadd.f32 %v1123_v43, %v458_v42  ;;  %v1135_v20 = vpop.f32.mrf.mxu1  ;;  %v1826_v42 = vadd.f32 %v627_v14, %v483_v4  ;;  %v493_v43 = vadd.f32 %v1065_v23, %v985_v3 }
 0x12e   :  { %v660_v50 = vadd.f32 %v659_v12, %v658_v41  ;;  %v597_v16 = vpop.f32.mrf.mxu0  ;;  %v2065_v12 = vld [vmem:[#allocation9_spill] sm:$0xff]  ;;  %v673_v48 = vsel %vm172_vm0, %v1816_v33, 0.0  ;;  %v994_v14 = vadd.f32 %v1743_v13, %v1739_v11 }
 0x12f   :  { %v1785_v52 = vadd.f32 %v597_v16, %v453_v44  ;;  %v665_v61 = vsel %vm172_vm0, %v1783_v51, 0.0  ;;  %v637_v32 = vpop.f32.mrf.mxu1  ;;  %v1071_v15 = vadd.f32 %v1737_v19, %v2065_v12  ;;  %v498_v16 = vadd.f32 %v1068_v40, %v988_v28 }
 0x130   :  { %v662_v55 = vadd.f32 %v661_v49, %v660_v50  ;;  %v1126_v56 = vpop.f32.mrf.mxu0  ;;  %v1835_v50 = vadd.f32 %v1759_v35, %v488_v10 }
 0x131   :  { %v663_v57 = vsel %vm172_vm0, %v1785_v52, 0.0  ;;  %v1799_v62 = vadd.f32 %v1126_v56, %v468_v58  ;;  %v1138_v9 = vpop.f32.mrf.mxu1  ;;  %v675_v56 = vsel %vm172_vm0, %v1826_v42, 0.0  ;;  %v643_v17 = vadd.f32 %v1135_v20, %v498_v16 }
 0x132   :  { %v664_v21 = vadd.f32 %v663_v57, %v662_v55  ;;  %v607_v24 = vpop.f32.mrf.mxu0  ;;  %v1074_v55 = vadd.f32 %v2067_v54, %v2066_v53  ;;  %v638_v57 = vadd.f32 %v637_v32, %v493_v43  ;;  %v503_v35 = vadd.f32 %v1071_v15, %v991_v47 }
 0x133   :  { %v1801_v63 = vadd.f32 %v607_v24, %v463_v59  ;;  %v669_v5 = vsel %vm172_vm0, %v1799_v62, 0.0  ;;  %v647_v58 = vpop.f32.mrf.mxu1  ;;  %v677_v59 = vsel %vm172_vm0, %v1835_v50, 0.0  ;;  %v681_v13 = vsel %vm172_vm0, %v643_v17, 0.0 }
 0x134   :  { %v666_v26 = vadd.f32 %v665_v61, %v664_v21  ;;  %v679_v21 = vsel %vm172_vm0, %v638_v57, 0.0  ;;  %v508_v24 = vadd.f32 %v1074_v55, %v994_v14  ;;  %v648_v60 = vadd.f32 %v647_v58, %v503_v35 }
 0x135   :  { %v667_v1 = vsel %vm172_vm0, %v1801_v63, 0.0 }
 0x136   :  { %v668_v34 = vadd.f32 %v667_v1, %v666_v26  ;;  %v653_v61 = vadd.f32 %v1138_v9, %v508_v24  ;;  %v683_v26 = vsel %vm172_vm0, %v648_v60, 0.0 }
 0x138   :  { %v670_v41 = vadd.f32 %v669_v5, %v668_v34  ;;  %v685_v0 = vsel %vm172_vm0, %v653_v61, 0.0 }
 0x13a   :  { %v672_v44 = vadd.f32 %v671_v8, %v670_v41 }
 0x13c   :  { %v674_v49 = vadd.f32 %v673_v48, %v672_v44 }
 0x13e   :  { %v676_v19 = vadd.f32 %v675_v56, %v674_v49 }
 0x140   :  { %v678_v18 = vadd.f32 %v677_v59, %v676_v19 }
 0x142   :  { %v680_v11 = vadd.f32 %v679_v21, %v678_v18 }
 0x144   :  { %v682_v25 = vadd.f32 %v681_v13, %v680_v11 }
 0x146   :  { %v684_v27 = vadd.f32 %v683_v26, %v682_v25 }
 0x148   :  { %v686_v1 = vadd.f32 %v685_v0, %v684_v27 }
 0x14a   :  { %v687_v3 = vrot.slane %v686_v1, 4 }
 0x14c   :  { %v688_v31 = vadd.f32 %v687_v3, %v686_v1 }
 0x14e   :  { %v689_v20 = vrot.slane %v688_v31, 2 }
 0x150   :  { %v690_v22 = vadd.f32 %v689_v20, %v688_v31 }
 0x152   :  { %v691_v23 = vrot.slane %v690_v22, 1 }
 0x154   :  { %v692_v32 = vadd.f32 %v691_v23, %v690_v22 }
 0x156   :  { %v694_v34 = vmul.f32 0.0078125, %v692_v32 }
 0x158   :  { %v1850_v4 = vsub.f32 %v1753_v30, %v694_v34  ;;  %v1853_v5 = vsub.f32 %v1751_v29, %v694_v34  ;;  %v1856_v6 = vsub.f32 %v1765_v39, %v694_v34  ;;  %v1859_v7 = vsub.f32 %v1763_v38, %v694_v34 }
 0x159   :  { %v1866_v37 = vsub.f32 %v1785_v52, %v694_v34  ;;  %v1871_v29 = vsub.f32 %v1783_v51, %v694_v34  ;;  %v1878_v8 = vsub.f32 %v1801_v63, %v694_v34  ;;  %v1884_v51 = vsub.f32 %v1799_v62, %v694_v34 }
 0x15a   :  { %v711_v28 = vmul.f32 %v1850_v4, %v1850_v4  ;;  %v712_v36 = vmul.f32 %v1853_v5, %v1853_v5  ;;  %v713_v30 = vmul.f32 %v1856_v6, %v1856_v6  ;;  %v714_v39 = vmul.f32 %v1859_v7, %v1859_v7 }
 0x15b   :  { %v715_v52 = vmul.f32 %v1866_v37, %v1866_v37  ;;  %v716_v9 = vmul.f32 %v1871_v29, %v1871_v29  ;;  %v1890_v46 = vsub.f32 %v1807_v2, %v694_v34  ;;  %v717_v63 = vmul.f32 %v1878_v8, %v1878_v8 }
 0x15c   :  { %v727_v38 = vsel %vm172_vm0, %v711_v28, 0.0  ;;  %v728_v40 = vsel %vm172_vm0, %v712_v36, 0.0  ;;  %v730_v10 = vsel %vm172_vm0, %v713_v30, 0.0  ;;  %v732_v44 = vsel %vm172_vm0, %v714_v39, 0.0 }
 0x15d   :  { %v729_v41 = vadd.f32 %v728_v40, %v727_v38  ;;  %v734_v47 = vsel %vm172_vm0, %v715_v52, 0.0  ;;  %v704_v15 = vsub.f32 %v1816_v33, %v694_v34  ;;  %v718_v62 = vmul.f32 %v1884_v51, %v1884_v51 }
 0x15e   :  { %v736_v48 = vsel %vm172_vm0, %v716_v9, 0.0  ;;  %v705_v49 = vsub.f32 %v1826_v42, %v694_v34  ;;  %v719_v2 = vmul.f32 %v1890_v46, %v1890_v46  ;;  %v738_v14 = vsel %vm172_vm0, %v717_v63, 0.0 }
 0x15f   :  { %v731_v43 = vadd.f32 %v730_v10, %v729_v41  ;;  %v706_v54 = vsub.f32 %v1835_v50, %v694_v34  ;;  %v720_v55 = vmul.f32 %v704_v15, %v704_v15  ;;  %v740_v56 = vsel %vm172_vm0, %v718_v62, 0.0  ;;  %v913_v62 = vld [vmem:[%s2042_s2] ss:$0 sm:$0xff] }
 0x160   :  { %v707_v58 = vsub.f32 %v638_v57, %v694_v34  ;;  %v721_v19 = vmul.f32 %v705_v49, %v705_v49  ;;  %v742_v59 = vsel %vm172_vm0, %v719_v2, 0.0  ;;  %v708_v18 = vsub.f32 %v643_v17, %v694_v34 }
 0x161   :  { %v733_v45 = vadd.f32 %v732_v44, %v731_v43  ;;  %v722_v21 = vmul.f32 %v706_v54, %v706_v54  ;;  %v744_v42 = vsel %vm172_vm0, %v720_v55, 0.0  ;;  %v709_v11 = vsub.f32 %v648_v60, %v694_v34 }
 0x162   :  { %v723_v13 = vmul.f32 %v707_v58, %v707_v58  ;;  %v746_v25 = vsel %vm172_vm0, %v721_v19, 0.0  ;;  %v710_v50 = vsub.f32 %v653_v61, %v694_v34  ;;  %v724_v27 = vmul.f32 %v708_v18, %v708_v18  ;;  %v914_v19 = vld [vmem:[%s2043_s3] ss:$0 sm:$0xff] }
 0x163   :  { %v735_v12 = vadd.f32 %v734_v47, %v733_v45  ;;  %v748_v0 = vsel %vm172_vm0, %v722_v21, 0.0  ;;  %v725_v57 = vmul.f32 %v709_v11, %v709_v11  ;;  %v829_v21 = vld [vmem:[%s2044_s4] sm:$0xff] }
 0x164   :  { %v750_v3 = vsel %vm172_vm0, %v723_v13, 0.0  ;;  %v726_v20 = vmul.f32 %v710_v50, %v710_v50  ;;  %v752_v17 = vsel %vm172_vm0, %v724_v27, 0.0 }
 0x165   :  { %v737_v16 = vadd.f32 %v736_v48, %v735_v12  ;;  %v754_v23 = vsel %vm172_vm0, %v725_v57, 0.0 }
 0x166   :  { %v756_v32 = vsel %vm172_vm0, %v726_v20, 0.0  ;;  %v835_v20 = vld [vmem:[%s2044_s4 + $0x30] sm:$0xff] }
 0x167   :  { %v739_v53 = vadd.f32 %v738_v14, %v737_v16 }
 0x169   :  { %v741_v33 = vadd.f32 %v740_v56, %v739_v53 }
 0x16b   :  { %v743_v35 = vadd.f32 %v742_v59, %v741_v33 }
 0x16d   :  { %v745_v24 = vadd.f32 %v744_v42, %v743_v35 }
 0x16f   :  { %v747_v26 = vadd.f32 %v746_v25, %v745_v24  ;;  %v830_v25 = vld [vmem:[%s2044_s4 + $0x8] sm:$0xff] }
 0x171   :  { %v749_v1 = vadd.f32 %v748_v0, %v747_v26  ;;  %v831_v26 = vld [vmem:[%s2044_s4 + $0x10] sm:$0xff] }
 0x173   :  { %v751_v31 = vadd.f32 %v750_v3, %v749_v1  ;;  %v833_v3 = vld [vmem:[%s2044_s4 + $0x20] sm:$0xff] }
 0x175   :  { %v753_v22 = vadd.f32 %v752_v17, %v751_v31  ;;  %v834_v31 = vld [vmem:[%s2044_s4 + $0x28] sm:$0xff] }
 0x177   :  { %v755_v60 = vadd.f32 %v754_v23, %v753_v22 }
 0x179   :  { %v757_v28 = vadd.f32 %v756_v32, %v755_v60  ;;  %v836_v32 = vld [vmem:[%s2044_s4 + $0x38] sm:$0xff] }
 0x17b   :  { %v758_v36 = vrot.slane %v757_v28, 4 }
 0x17d   :  { %v759_v61 = vadd.f32 %v758_v36, %v757_v28  ;;  %v837_v28 = vld [vmem:[%s2044_s4 + $0x40] sm:$0xff]  ;;  %v838_v36 = vld [vmem:[%s2044_s4 + $0x48] sm:$0xff] }
 0x17f   :  { %v760_v34 = vrot.slane %v759_v61, 2 }
 0x181   :  { %v761_v30 = vadd.f32 %v760_v34, %v759_v61 }
 0x183   :  { %v762_v39 = vrot.slane %v761_v30, 1 }
 0x185   :  { %v763_v38 = vadd.f32 %v762_v39, %v761_v30 }
 0x187   :  { %v764_v40 = vmul.f32 0.0078125, %v763_v38  ;;  %v839_v38 = vld [vmem:[%s2044_s4 + $0x50] sm:$0xff] }
 0x189   :  { %v765_v41 = vadd.f32 1e-05, %v764_v40  ;;  %v840_v40 = vld [vmem:[%s2044_s4 + $0x58] sm:$0xff] }
 0x18b   :  { %1155 = vrsqrt.f32 %v765_v41  ;;  %v841_v41 = vld [vmem:[%s2044_s4 + $0x60] sm:$0xff] }
 0x198   :  { %v1156_v52 = vpop.eup %1155 }
 0x199   :  { %v767_v10 = vmul.f32 %v1156_v52, %v1850_v4  ;;  %v768_v43 = vmul.f32 %v1156_v52, %v1853_v5  ;;  %v769_v9 = vmul.f32 %v1156_v52, %v1856_v6  ;;  %v770_v44 = vmul.f32 %v1156_v52, %v1859_v7 }
 0x19a   :  { %v771_v45 = vmul.f32 %v1156_v52, %v1866_v37  ;;  %v772_v63 = vmul.f32 %v1156_v52, %v1871_v29  ;;  %v773_v47 = vmul.f32 %v1156_v52, %v1878_v8  ;;  %v774_v12 = vmul.f32 %v1156_v52, %v1884_v51 }
 0x19b   :  { %v775_v4 = vmul.f32 %v1156_v52, %v1890_v46  ;;  %v776_v48 = vmul.f32 %v1156_v52, %v704_v15  ;;  %v777_v5 = vmul.f32 %v1156_v52, %v705_v49  ;;  %v778_v16 = vmul.f32 %v1156_v52, %v706_v54 }
 0x19c   :  { %v779_v6 = vmul.f32 %v1156_v52, %v707_v58  ;;  %v780_v2 = vmul.f32 %v1156_v52, %v708_v18  ;;  %v781_v7 = vmul.f32 %v1156_v52, %v709_v11  ;;  %v782_v14 = vmul.f32 %v1156_v52, %v710_v50  ;;  %v832_v50 = vld [vmem:[%s2044_s4 + $0x18] sm:$0xff]  ;;  %v842_v52 = vld [vmem:[%s2044_s4 + $0x68] sm:$0xff] }
 0x19d   :  { %v790_v37 = vmul.f32 %v913_v62, %v767_v10  ;;  %v791_v53 = vmul.f32 %v913_v62, %v768_v43  ;;  %v792_v29 = vmul.f32 %v913_v62, %v769_v9  ;;  %v793_v55 = vmul.f32 %v913_v62, %v770_v44  ;;  %v843_v10 = vld [vmem:[%s2044_s4 + $0x70] sm:$0xff]  ;;  %v844_v43 = vld [vmem:[%s2044_s4 + $0x78] sm:$0xff] }
 0x19e   :  { %v794_v8 = vmul.f32 %v913_v62, %v771_v45  ;;  %v795_v56 = vmul.f32 %v913_v62, %v772_v63  ;;  %v796_v51 = vmul.f32 %v913_v62, %v773_v47  ;;  %v797_v33 = vmul.f32 %v913_v62, %v774_v12 }
 0x19f   :  { %v798_v46 = vmul.f32 %v913_v62, %v775_v4  ;;  %v799_v15 = vmul.f32 %v913_v62, %v776_v48  ;;  %v800_v49 = vmul.f32 %v913_v62, %v777_v5  ;;  %v801_v54 = vmul.f32 %v913_v62, %v778_v16 }
 0x1a0   :  { %v802_v58 = vmul.f32 %v913_v62, %v779_v6  ;;  %v803_v59 = vmul.f32 %v913_v62, %v780_v2  ;;  %v804_v35 = vmul.f32 %v913_v62, %v781_v7  ;;  %v805_v18 = vmul.f32 %v913_v62, %v782_v14 }
 0x1a1   :  { %v813_v42 = vadd.f32 %v914_v19, %v790_v37  ;;  %v814_v24 = vadd.f32 %v914_v19, %v791_v53  ;;  %v815_v11 = vadd.f32 %v914_v19, %v792_v29  ;;  %v816_v13 = vadd.f32 %v914_v19, %v793_v55 }
 0x1a2   :  { %v817_v27 = vadd.f32 %v914_v19, %v794_v8  ;;  %v818_v0 = vadd.f32 %v914_v19, %v795_v56  ;;  %v819_v1 = vadd.f32 %v914_v19, %v796_v51  ;;  %v820_v57 = vadd.f32 %v914_v19, %v797_v33 }
 0x1a3   :  { %v821_v17 = vadd.f32 %v914_v19, %v798_v46  ;;  %v822_v22 = vadd.f32 %v914_v19, %v799_v15  ;;  %v823_v23 = vadd.f32 %v914_v19, %v800_v49  ;;  %v824_v60 = vadd.f32 %v914_v19, %v801_v54 }
 0x1a4   :  { %v825_v61 = vadd.f32 %v914_v19, %v802_v58  ;;  %v826_v34 = vadd.f32 %v914_v19, %v803_v59  ;;  %v827_v30 = vadd.f32 %v914_v19, %v804_v35  ;;  %v828_v39 = vadd.f32 %v914_v19, %v805_v18 }
 0x1a5   :  { %v845_v9 = vadd.f32 %v829_v21, %v813_v42  ;;  %v846_v44 = vadd.f32 %v830_v25, %v814_v24  ;;  %v847_v45 = vadd.f32 %v831_v26, %v815_v11  ;;  %v848_v63 = vadd.f32 %v832_v50, %v816_v13 }
 0x1a6   :  { %v849_v47 = vadd.f32 %v833_v3, %v817_v27  ;;  %v850_v12 = vadd.f32 %v834_v31, %v818_v0  ;;  %v851_v62 = vadd.f32 %v835_v20, %v819_v1  ;;  %v852_v4 = vadd.f32 %v836_v32, %v820_v57 }
 0x1a7   :  { %v853_v48 = vadd.f32 %v837_v28, %v821_v17  ;;  %v854_v5 = vadd.f32 %v838_v36, %v822_v22  ;;  %v855_v16 = vadd.f32 %v839_v38, %v823_v23  ;;  %v856_v6 = vadd.f32 %v840_v40, %v824_v60 }
 0x1a8   :  { %v857_v2 = vadd.f32 %v841_v41, %v825_v61  ;;  %v858_v7 = vadd.f32 %v842_v52, %v826_v34  ;;  %v859_v14 = vadd.f32 %v843_v10, %v827_v30  ;;  %v860_v37 = vadd.f32 %v844_v43, %v828_v39 }
 0x1a9   :  { %v861_v53 = vmax.f32 %v845_v9, 0.0  ;;  %v862_v29 = vmax.f32 %v846_v44, 0.0  ;;  %v863_v55 = vmax.f32 %v847_v45, 0.0  ;;  %v864_v8 = vmax.f32 %v848_v63, 0.0 }
 0x1aa   :  { %v865_v56 = vmax.f32 %v849_v47, 0.0  ;;  %v866_v51 = vmax.f32 %v850_v12, 0.0  ;;  %v867_v33 = vmax.f32 %v851_v62, 0.0  ;;  %v868_v19 = vmax.f32 %v852_v4, 0.0 }
 0x1ab   :  { %v869_v46 = vmax.f32 %v853_v48, 0.0  ;;  %v870_v15 = vmax.f32 %v854_v5, 0.0  ;;  %v871_v49 = vmax.f32 %v855_v16, 0.0  ;;  %v872_v54 = vmax.f32 %v856_v6, 0.0  ;;  %877 = vst.msk [vmem:[%s2045_s5] sm:$0xff] %vm172_vm0, %v861_v53  ;;  %878 = vst.msk [vmem:[%s2045_s5 + $0x8] sm:$0xff] %vm172_vm0, %v862_v29 }
 0x1ac   :  { %879 = vst.msk [vmem:[%s2045_s5 + $0x10] sm:$0xff] %vm172_vm0, %v863_v55  ;;  %880 = vst.msk [vmem:[%s2045_s5 + $0x18] sm:$0xff] %vm172_vm0, %v864_v8  ;;  %v873_v58 = vmax.f32 %v857_v2, 0.0  ;;  %v874_v59 = vmax.f32 %v858_v7, 0.0  ;;  %v875_v35 = vmax.f32 %v859_v14, 0.0  ;;  %v876_v18 = vmax.f32 %v860_v37, 0.0 }
 0x1ad   :  { %881 = vst.msk [vmem:[%s2045_s5 + $0x20] sm:$0xff] %vm172_vm0, %v865_v56  ;;  %882 = vst.msk [vmem:[%s2045_s5 + $0x28] sm:$0xff] %vm172_vm0, %v866_v51 }
 0x1ae   :  { %883 = vst.msk [vmem:[%s2045_s5 + $0x30] sm:$0xff] %vm172_vm0, %v867_v33  ;;  %884 = vst.msk [vmem:[%s2045_s5 + $0x38] sm:$0xff] %vm172_vm0, %v868_v19 }
 0x1af   :  { %885 = vst.msk [vmem:[%s2045_s5 + $0x40] sm:$0xff] %vm172_vm0, %v869_v46  ;;  %886 = vst.msk [vmem:[%s2045_s5 + $0x48] sm:$0xff] %vm172_vm0, %v870_v15 }
 0x1b0   :  { %887 = vst.msk [vmem:[%s2045_s5 + $0x50] sm:$0xff] %vm172_vm0, %v871_v49  ;;  %888 = vst.msk [vmem:[%s2045_s5 + $0x58] sm:$0xff] %vm172_vm0, %v872_v54 }
 0x1b1   :  { %889 = vst.msk [vmem:[%s2045_s5 + $0x60] sm:$0xff] %vm172_vm0, %v873_v58  ;;  %890 = vst.msk [vmem:[%s2045_s5 + $0x68] sm:$0xff] %vm172_vm0, %v874_v59 }
 0x1b2   :  { %891 = vst.msk [vmem:[%s2045_s5 + $0x70] sm:$0xff] %vm172_vm0, %v875_v35  ;;  %892 = vst.msk [vmem:[%s2045_s5 + $0x78] sm:$0xff] %vm172_vm0, %v876_v18 }

// kernel: heatmap2feat_forward.21
= control target key start
LH: loop header
LB: loop body
LE: loop exit
PB: predicated region body
PF: predicated region fallthrough
CT: control target
= control target key end

     0   :  { %vm109_vm0 = vcmask 523264   ;;  %s911_s1 = inlined_call_operand.vmem [shape: f32[576,128], index: 1, kind: input, shape index: {}]   ;;  %s912_s0 = inlined_call_operand.vmem [shape: f32[32,576], index: 0, kind: input, shape index: {}]   ;;  %s913_s2 = inlined_call_operand.vmem [shape: f32[1,128], index: 2, kind: input, shape index: {}]   ;;  %s914_s3 = inlined_call_operand.vmem [shape: f32[1,128], index: 3, kind: input, shape index: {}]   ;;  %s915_s4 = inlined_call_operand.vmem [shape: f32[32,128], index: 4, kind: output, shape index: {}]  }
   0x1   :  { %v68_v0 = vld [vmem:[%s911_s1 + $0xf8] sm:$0xff]  ;;  %v67_v4 = vld [vmem:[%s911_s1 + $0xf0] sm:$0xff]  ;;  %v66_v8 = vld [vmem:[%s911_s1 + $0xe8] sm:$0xff] }
   0x2   :  { %v100_v1 = vld [vmem:[%s911_s1 + $0x1f8] sm:$0xff]  ;;  %452 = vmatprep.subr.mxu0 %v68_v0  ;;  %v99_v5 = vld [vmem:[%s911_s1 + $0x1f0] sm:$0xff]  ;;  %v98_v9 = vld [vmem:[%s911_s1 + $0x1e8] sm:$0xff] }
   0x3   :  { %v52_v2 = vld [vmem:[%s911_s1 + $0x78] sm:$0xff]  ;;  %496 = vmatprep.subr.mxu1 %v100_v1  ;;  %v51_v6 = vld [vmem:[%s911_s1 + $0x70] sm:$0xff]  ;;  %v50_v10 = vld [vmem:[%s911_s1 + $0x68] sm:$0xff] }
   0x4   :  { %v84_v3 = vld [vmem:[%s911_s1 + $0x178] sm:$0xff]  ;;  %453 = vmatpush3.msra.mxu0 %v52_v2  ;;  %v83_v7 = vld [vmem:[%s911_s1 + $0x170] sm:$0xff]  ;;  %v82_v11 = vld [vmem:[%s911_s1 + $0x168] sm:$0xff] }
   0x5   :  { %497 = vmatpush3.msra.mxu1 %v84_v3  ;;  %454 = vmatprep.subr.mxu0 %v67_v4  ;;  %v65_v12 = vld [vmem:[%s911_s1 + $0xe0] sm:$0xff]  ;;  %v64_v16 = vld [vmem:[%s911_s1 + $0xd8] sm:$0xff]  ;;  %v63_v20 = vld [vmem:[%s911_s1 + $0xd0] sm:$0xff] }
   0x6   :  { %498 = vmatprep.subr.mxu1 %v99_v5  ;;  %455 = vmatpush3.msra.mxu0 %v51_v6  ;;  %v97_v13 = vld [vmem:[%s911_s1 + $0x1e0] sm:$0xff]  ;;  %v96_v17 = vld [vmem:[%s911_s1 + $0x1d8] sm:$0xff]  ;;  %v95_v21 = vld [vmem:[%s911_s1 + $0x1d0] sm:$0xff] }
   0x7   :  { %499 = vmatpush3.msra.mxu1 %v83_v7  ;;  %456 = vmatprep.subr.mxu0 %v66_v8  ;;  %v49_v14 = vld [vmem:[%s911_s1 + $0x60] sm:$0xff]  ;;  %v48_v18 = vld [vmem:[%s911_s1 + $0x58] sm:$0xff]  ;;  %v47_v22 = vld [vmem:[%s911_s1 + $0x50] sm:$0xff] }
   0x8   :  { %500 = vmatprep.subr.mxu1 %v98_v9  ;;  %v81_v15 = vld [vmem:[%s911_s1 + $0x160] sm:$0xff]  ;;  %457 = vmatpush3.msra.mxu0 %v50_v10  ;;  %v80_v19 = vld [vmem:[%s911_s1 + $0x158] sm:$0xff]  ;;  %v79_v23 = vld [vmem:[%s911_s1 + $0x150] sm:$0xff] }
   0x9   :  { %501 = vmatpush3.msra.mxu1 %v82_v11  ;;  %458 = vmatprep.subr.mxu0 %v65_v12  ;;  %v62_v24 = vld [vmem:[%s911_s1 + $0xc8] sm:$0xff]  ;;  %v61_v28 = vld [vmem:[%s911_s1 + $0xc0] sm:$0xff]  ;;  %v60_v32 = vld [vmem:[%s911_s1 + $0xb8] sm:$0xff] }
   0xa   :  { %502 = vmatprep.subr.mxu1 %v97_v13  ;;  %459 = vmatpush3.msra.mxu0 %v49_v14  ;;  %v94_v25 = vld [vmem:[%s911_s1 + $0x1c8] sm:$0xff]  ;;  %v93_v29 = vld [vmem:[%s911_s1 + $0x1c0] sm:$0xff]  ;;  %v92_v33 = vld [vmem:[%s911_s1 + $0x1b8] sm:$0xff] }
   0xb   :  { %503 = vmatpush3.msra.mxu1 %v81_v15  ;;  %460 = vmatprep.subr.mxu0 %v64_v16  ;;  %v46_v26 = vld [vmem:[%s911_s1 + $0x48] sm:$0xff]  ;;  %v45_v30 = vld [vmem:[%s911_s1 + $0x40] sm:$0xff]  ;;  %v44_v34 = vld [vmem:[%s911_s1 + $0x38] sm:$0xff] }
   0xc   :  { %504 = vmatprep.subr.mxu1 %v96_v17  ;;  %461 = vmatpush3.msra.mxu0 %v48_v18  ;;  %v78_v27 = vld [vmem:[%s911_s1 + $0x148] sm:$0xff]  ;;  %v77_v31 = vld [vmem:[%s911_s1 + $0x140] sm:$0xff]  ;;  %v76_v35 = vld [vmem:[%s911_s1 + $0x138] sm:$0xff] }
   0xd   :  { %505 = vmatpush3.msra.mxu1 %v80_v19  ;;  %462 = vmatprep.subr.mxu0 %v63_v20  ;;  %v59_v36 = vld [vmem:[%s911_s1 + $0xb0] sm:$0xff]  ;;  %v58_v40 = vld [vmem:[%s911_s1 + $0xa8] sm:$0xff]  ;;  %v57_v44 = vld [vmem:[%s911_s1 + $0xa0] sm:$0xff] }
   0xe   :  { %506 = vmatprep.subr.mxu1 %v95_v21  ;;  %463 = vmatpush3.msra.mxu0 %v47_v22  ;;  %v91_v37 = vld [vmem:[%s911_s1 + $0x1b0] sm:$0xff]  ;;  %v90_v41 = vld [vmem:[%s911_s1 + $0x1a8] sm:$0xff]  ;;  %v89_v45 = vld [vmem:[%s911_s1 + $0x1a0] sm:$0xff] }
   0xf   :  { %507 = vmatpush3.msra.mxu1 %v79_v23  ;;  %464 = vmatprep.subr.mxu0 %v62_v24  ;;  %v43_v38 = vld [vmem:[%s911_s1 + $0x30] sm:$0xff]  ;;  %v42_v42 = vld [vmem:[%s911_s1 + $0x28] sm:$0xff]  ;;  %v41_v46 = vld [vmem:[%s911_s1 + $0x20] sm:$0xff] }
  0x10   :  { %508 = vmatprep.subr.mxu1 %v94_v25  ;;  %465 = vmatpush3.msra.mxu0 %v46_v26  ;;  %v75_v39 = vld [vmem:[%s911_s1 + $0x130] sm:$0xff]  ;;  %v74_v43 = vld [vmem:[%s911_s1 + $0x128] sm:$0xff]  ;;  %v73_v47 = vld [vmem:[%s911_s1 + $0x120] sm:$0xff] }
  0x11   :  { %509 = vmatpush3.msra.mxu1 %v78_v27  ;;  %466 = vmatprep.subr.mxu0 %v61_v28  ;;  %v56_v48 = vld [vmem:[%s911_s1 + $0x98] sm:$0xff]  ;;  %v55_v52 = vld [vmem:[%s911_s1 + $0x90] sm:$0xff]  ;;  %v54_v56 = vld [vmem:[%s911_s1 + $0x88] sm:$0xff] }
  0x12   :  { %510 = vmatprep.subr.mxu1 %v93_v29  ;;  %467 = vmatpush3.msra.mxu0 %v45_v30  ;;  %v88_v49 = vld [vmem:[%s911_s1 + $0x198] sm:$0xff]  ;;  %v87_v53 = vld [vmem:[%s911_s1 + $0x190] sm:$0xff]  ;;  %v86_v57 = vld [vmem:[%s911_s1 + $0x188] sm:$0xff] }
  0x13   :  { %511 = vmatpush3.msra.mxu1 %v77_v31  ;;  %468 = vmatprep.subr.mxu0 %v60_v32  ;;  %v40_v50 = vld [vmem:[%s911_s1 + $0x18] sm:$0xff]  ;;  %v39_v54 = vld [vmem:[%s911_s1 + $0x10] sm:$0xff]  ;;  %v38_v58 = vld [vmem:[%s911_s1 + $0x8] sm:$0xff] }
  0x14   :  { %512 = vmatprep.subr.mxu1 %v92_v33  ;;  %469 = vmatpush3.msra.mxu0 %v44_v34  ;;  %v72_v51 = vld [vmem:[%s911_s1 + $0x118] sm:$0xff]  ;;  %v71_v55 = vld [vmem:[%s911_s1 + $0x110] sm:$0xff]  ;;  %v70_v59 = vld [vmem:[%s911_s1 + $0x108] sm:$0xff] }
  0x15   :  { %513 = vmatpush3.msra.mxu1 %v76_v35  ;;  %470 = vmatprep.subr.mxu0 %v59_v36  ;;  %v53_v60 = vld [vmem:[%s911_s1 + $0x80] sm:$0xff]  ;;  %v18_v63 = vld [vmem:[%s912_s0 + $0x8] sm:$0xff]  ;;  %v20_v1 = vld [vmem:[%s912_s0 + $0x18] sm:$0xff] }
  0x16   :  { %514 = vmatprep.subr.mxu1 %v91_v37  ;;  %471 = vmatpush3.msra.mxu0 %v43_v38  ;;  %v85_v61 = vld [vmem:[%s911_s1 + $0x180] sm:$0xff]  ;;  %v19_v3 = vld [vmem:[%s912_s0 + $0x10] sm:$0xff]  ;;  %v108_v4 = vld [vmem:[%s911_s1 + $0x238] sm:$0xff] }
  0x17   :  { %515 = vmatpush3.msra.mxu1 %v75_v39  ;;  %472 = vmatprep.subr.mxu0 %v58_v40  ;;  %v37_v62 = vld [vmem:[%s911_s1] sm:$0xff]  ;;  %v107_v5 = vld [vmem:[%s911_s1 + $0x230] sm:$0xff]  ;;  %v22_v8 = vld [vmem:[%s912_s0 + $0x28] sm:$0xff] }
  0x18   :  { %516 = vmatprep.subr.mxu1 %v90_v41  ;;  %473 = vmatpush3.msra.mxu0 %v42_v42  ;;  %v69_v0 = vld [vmem:[%s911_s1 + $0x100] sm:$0xff]  ;;  %v23_v6 = vld [vmem:[%s912_s0 + $0x30] sm:$0xff]  ;;  %v24_v9 = vld [vmem:[%s912_s0 + $0x38] sm:$0xff] }
  0x19   :  { %517 = vmatpush3.msra.mxu1 %v74_v43  ;;  %474 = vmatprep.subr.mxu0 %v57_v44  ;;  %v17_v2 = vld [vmem:[%s912_s0] sm:$0xff]  ;;  %v106_v10 = vld [vmem:[%s911_s1 + $0x228] sm:$0xff]  ;;  %v28_v12 = vld [vmem:[%s912_s0 + $0x58] sm:$0xff] }
  0x1a   :  { %518 = vmatprep.subr.mxu1 %v89_v45  ;;  %475 = vmatpush3.msra.mxu0 %v41_v46  ;;  %v25_v7 = vld [vmem:[%s912_s0 + $0x40] sm:$0xff]  ;;  %v30_v13 = vld [vmem:[%s912_s0 + $0x68] sm:$0xff]  ;;  %v27_v14 = vld [vmem:[%s912_s0 + $0x50] sm:$0xff] }
  0x1b   :  { %519 = vmatpush3.msra.mxu1 %v73_v47  ;;  %476 = vmatprep.subr.mxu0 %v56_v48  ;;  %v105_v11 = vld [vmem:[%s911_s1 + $0x220] sm:$0xff]  ;;  %v104_v16 = vld [vmem:[%s911_s1 + $0x218] sm:$0xff]  ;;  %v103_v17 = vld [vmem:[%s911_s1 + $0x210] sm:$0xff] }
  0x1c   :  { %520 = vmatprep.subr.mxu1 %v88_v49  ;;  %477 = vmatpush3.msra.mxu0 %v40_v50  ;;  %v29_v15 = vld [vmem:[%s912_s0 + $0x60] sm:$0xff]  ;;  %v35_v19 = vld [vmem:[%s912_s0 + $0x90] sm:$0xff]  ;;  %v32_v20 = vld [vmem:[%s912_s0 + $0x78] sm:$0xff] }
  0x1d   :  { %521 = vmatpush3.msra.mxu1 %v72_v51  ;;  %478 = vmatprep.subr.mxu0 %v55_v52  ;;  %v33_v18 = vld [vmem:[%s912_s0 + $0x80] sm:$0xff]  ;;  %v34_v21 = vld [vmem:[%s912_s0 + $0x88] sm:$0xff]  ;;  %v31_v25 = vld [vmem:[%s912_s0 + $0x70] sm:$0xff] }
  0x1e   :  { %522 = vmatprep.subr.mxu1 %v87_v53  ;;  %479 = vmatpush3.msra.mxu0 %v39_v54  ;;  %v102_v22 = vld [vmem:[%s911_s1 + $0x208] sm:$0xff]  ;;  %v101_v23 = vld [vmem:[%s911_s1 + $0x200] sm:$0xff]  ;;  %v36_v27 = vld [vmem:[%s912_s0 + $0x98] sm:$0xff] }
  0x1f   :  { %523 = vmatpush3.msra.mxu1 %v71_v55  ;;  %480 = vmatprep.subr.mxu0 %v54_v56  ;;  %v21_v24 = vld [vmem:[%s912_s0 + $0x20] sm:$0xff]  ;;  %v26_v26 = vld [vmem:[%s912_s0 + $0x48] sm:$0xff] }
  0x20   :  { %524 = vmatprep.subr.mxu1 %v86_v57  ;;  %481 = vmatpush3.msra.mxu0 %v38_v58 }
  0x21   :  { %525 = vmatpush3.msra.mxu1 %v70_v59  ;;  %482 = vmatprep.subr.mxu0 %v53_v60 }
  0x22   :  { %526 = vmatprep.subr.mxu1 %v85_v61  ;;  %483 = vmatpush3.msra.mxu0 %v37_v62 }
  0x23   :  { %186 = vmatprep.mubr.f32.mxu0 %v18_v63  ;;  %527 = vmatpush3.msra.mxu1 %v69_v0 }
  0x24   :  { %271 = vmatprep.mubr.f32.mxu1 %v20_v1  ;;  %187 = vmatmul.mubr.f32.vlgmr.msra.gmra.mxu0 %v17_v2 }
  0x25   :  { %272 = vmatmul.mubr.f32.vlgmr.msra.gmra.mxu1 %v19_v3  ;;  %552 = vmatprep.subr.mxu0 %v108_v4 }
  0x26   :  { %574 = vmatprep.subr.mxu1 %v108_v4  ;;  %553 = vmatpush3.msra.mxu0 %v108_v4 }
  0x27   :  { %582 = vmatpush3.msra.mxu1 %v108_v4  ;;  %554 = vmatprep.subr.mxu0 %v107_v5 }
  0x28   :  { %575 = vmatprep.subr.mxu1 %v107_v5  ;;  %191 = vmatprep.mubr.f32.mxu0 %v23_v6 }
  0x29   :  { %276 = vmatprep.mubr.f32.mxu1 %v25_v7  ;;  %555 = vmatpush3.msra.mxu0 %v107_v5 }
  0x2a   :  { %583 = vmatpush3.msra.mxu1 %v107_v5  ;;  %192 = vmatmul.mubr.f32.gmra.mxu0 %v22_v8 }
  0x2b   :  { %277 = vmatmul.mubr.f32.gmra.mxu1 %v24_v9  ;;  %556 = vmatprep.subr.mxu0 %v106_v10 }
  0x2c   :  { %576 = vmatprep.subr.mxu1 %v106_v10  ;;  %557 = vmatpush3.msra.mxu0 %v106_v10 }
  0x2d   :  { %584 = vmatpush3.msra.mxu1 %v106_v10  ;;  %558 = vmatprep.subr.mxu0 %v105_v11 }
  0x2e   :  { %577 = vmatprep.subr.mxu1 %v105_v11  ;;  %196 = vmatprep.mubr.f32.mxu0 %v28_v12 }
  0x2f   :  { %281 = vmatprep.mubr.f32.mxu1 %v30_v13  ;;  %559 = vmatpush3.msra.mxu0 %v105_v11 }
  0x30   :  { %585 = vmatpush3.msra.mxu1 %v105_v11  ;;  %197 = vmatmul.mubr.f32.gmra.mxu0 %v27_v14 }
  0x31   :  { %282 = vmatmul.mubr.f32.gmra.mxu1 %v29_v15  ;;  %560 = vmatprep.subr.mxu0 %v104_v16 }
  0x32   :  { %578 = vmatprep.subr.mxu1 %v104_v16  ;;  %561 = vmatpush3.msra.mxu0 %v104_v16 }
  0x33   :  { %586 = vmatpush3.msra.mxu1 %v104_v16  ;;  %562 = vmatprep.subr.mxu0 %v103_v17 }
  0x34   :  { %579 = vmatprep.subr.mxu1 %v103_v17  ;;  %201 = vmatprep.mubr.f32.mxu0 %v33_v18 }
  0x35   :  { %286 = vmatprep.mubr.f32.mxu1 %v35_v19  ;;  %563 = vmatpush3.msra.mxu0 %v103_v17 }
  0x36   :  { %587 = vmatpush3.msra.mxu1 %v103_v17  ;;  %202 = vmatmul.mubr.f32.gmra.mxu0 %v32_v20 }
  0x37   :  { %287 = vmatmul.mubr.f32.gmra.mxu1 %v34_v21  ;;  %564 = vmatprep.subr.mxu0 %v102_v22 }
  0x38   :  { %580 = vmatprep.subr.mxu1 %v102_v22  ;;  %565 = vmatpush3.msra.mxu0 %v102_v22 }
  0x39   :  { %588 = vmatpush3.msra.mxu1 %v102_v22  ;;  %566 = vmatprep.subr.mxu0 %v101_v23 }
  0x3a   :  { %581 = vmatprep.subr.mxu1 %v101_v23  ;;  %567 = vmatpush3.msra.mxu0 %v101_v23 }
  0x3b   :  { %589 = vmatpush3.msra.mxu1 %v101_v23  ;;  %568 = vmatprep.mubr.msk.f32.mxu0 %vm109_vm0, %v21_v24 }
  0x3c   :  { %571 = vmatprep.mubr.msk.f32.mxu1 %vm109_vm0, %v31_v25  ;;  %569 = vmatmul.mubr.msk.f32.vlgmr.msra.gmra.mxu0 %vm109_vm0, %v26_v26 }
  0x3d   :  { %572 = vmatmul.mubr.msk.f32.vlgmr.msra.gmra.mxu1 %vm109_vm0, %v36_v27 }
  0xe4   :  { %v484_v28 = vpop.f32.mrf.mxu0 }
  0xe5   :  { %v528_v29 = vpop.f32.mrf.mxu1 }
  0xe6   :  { %v485_v30 = vpop.f32.mrf.mxu0 }
  0xe7   :  { %v529_v31 = vpop.f32.mrf.mxu1  ;;  %v486_v44 = vadd.f32 %v485_v30, %v484_v28  ;;  %v450_v30 = vld [vmem:[%s913_s2] ss:$0 sm:$0xff] }
  0xe8   :  { %v530_v45 = vadd.f32 %v529_v31, %v528_v29 }
  0xea   :  { %v487_v32 = vpop.f32.mrf.mxu0  ;;  %v274_v55 = vadd.f32 %v530_v45, %v486_v44 }
  0xeb   :  { %v531_v33 = vpop.f32.mrf.mxu1 }
  0xec   :  { %v488_v34 = vpop.f32.mrf.mxu0 }
  0xed   :  { %v532_v35 = vpop.f32.mrf.mxu1  ;;  %v489_v46 = vadd.f32 %v488_v34, %v487_v32 }
  0xee   :  { %v533_v47 = vadd.f32 %v532_v35, %v531_v33  ;;  %v451_v35 = vld [vmem:[%s914_s3] ss:$0 sm:$0xff] }
  0xf0   :  { %v490_v36 = vpop.f32.mrf.mxu0  ;;  %v279_v54 = vadd.f32 %v533_v47, %v489_v46 }
  0xf1   :  { %v534_v37 = vpop.f32.mrf.mxu1 }
  0xf2   :  { %v491_v38 = vpop.f32.mrf.mxu0 }
  0xf3   :  { %v535_v39 = vpop.f32.mrf.mxu1  ;;  %v492_v48 = vadd.f32 %v491_v38, %v490_v36 }
  0xf4   :  { %v536_v49 = vadd.f32 %v535_v39, %v534_v37 }
  0xf6   :  { %v493_v40 = vpop.f32.mrf.mxu0  ;;  %v284_v61 = vadd.f32 %v536_v49, %v492_v48 }
  0xf7   :  { %v537_v41 = vpop.f32.mrf.mxu1 }
  0xf8   :  { %v494_v42 = vpop.f32.mrf.mxu0 }
  0xf9   :  { %v538_v43 = vpop.f32.mrf.mxu1  ;;  %v495_v50 = vadd.f32 %v494_v42, %v493_v40 }
  0xfa   :  { %v539_v51 = vadd.f32 %v538_v43, %v537_v41 }
  0xfc   :  { %v570_v52 = vpop.f32.mrf.mxu0  ;;  %v289_v59 = vadd.f32 %v539_v51, %v495_v50 }
  0xfd   :  { %v573_v53 = vpop.f32.mrf.mxu1  ;;  %v364_v58 = vadd.f32 %v570_v52, %v279_v54 }
  0xfe   :  { %v358_v56 = vpop.f32.mrf.mxu0  ;;  %v374_v0 = vadd.f32 %v573_v53, %v289_v59 }
  0xff   :  { %v368_v57 = vpop.f32.mrf.mxu1  ;;  %v359_v60 = vadd.f32 %v358_v56, %v274_v55 }
 0x100   :  { %v369_v63 = vadd.f32 %v368_v57, %v284_v61 }
 0x101   :  { %v377_v62 = vadd.f32 %v364_v58, %v359_v60 }
 0x103   :  { %v378_v1 = vadd.f32 %v377_v62, %v369_v63 }
 0x105   :  { %v379_v2 = vadd.f32 %v378_v1, %v374_v0 }
 0x107   :  { %v380_v3 = vrot.slane %v379_v2, 4 }
 0x109   :  { %v381_v4 = vadd.f32 %v380_v3, %v379_v2 }
 0x10b   :  { %v382_v5 = vrot.slane %v381_v4, 2 }
 0x10d   :  { %v383_v6 = vadd.f32 %v382_v5, %v381_v4 }
 0x10f   :  { %v384_v7 = vrot.slane %v383_v6, 1 }
 0x111   :  { %v385_v8 = vadd.f32 %v384_v7, %v383_v6 }
 0x113   :  { %v387_v9 = vmul.f32 0.03125, %v385_v8 }
 0x115   :  { %v388_v10 = vsub.f32 %v359_v60, %v387_v9  ;;  %v389_v11 = vsub.f32 %v364_v58, %v387_v9  ;;  %v390_v12 = vsub.f32 %v369_v63, %v387_v9  ;;  %v391_v13 = vsub.f32 %v374_v0, %v387_v9 }
 0x117   :  { %v392_v14 = vmul.f32 %v388_v10, %v388_v10  ;;  %v393_v15 = vmul.f32 %v389_v11, %v389_v11  ;;  %v394_v16 = vmul.f32 %v390_v12, %v390_v12  ;;  %v395_v18 = vmul.f32 %v391_v13, %v391_v13 }
 0x119   :  { %v396_v17 = vadd.f32 %v393_v15, %v392_v14 }
 0x11b   :  { %v397_v19 = vadd.f32 %v396_v17, %v394_v16 }
 0x11d   :  { %v398_v20 = vadd.f32 %v397_v19, %v395_v18 }
 0x11f   :  { %v399_v21 = vrot.slane %v398_v20, 4 }
 0x121   :  { %v400_v22 = vadd.f32 %v399_v21, %v398_v20 }
 0x123   :  { %v401_v23 = vrot.slane %v400_v22, 2 }
 0x125   :  { %v402_v24 = vadd.f32 %v401_v23, %v400_v22 }
 0x127   :  { %v403_v25 = vrot.slane %v402_v24, 1 }
 0x129   :  { %v404_v26 = vadd.f32 %v403_v25, %v402_v24 }
 0x12b   :  { %v405_v27 = vmul.f32 0.03125, %v404_v26 }
 0x12d   :  { %v406_v28 = vadd.f32 1e-05, %v405_v27 }
 0x12f   :  { %590 = vrsqrt.f32 %v406_v28 }
 0x13c   :  { %v591_v29 = vpop.eup %590 }
 0x13d   :  { %v408_v31 = vmul.f32 %v591_v29, %v388_v10  ;;  %v409_v32 = vmul.f32 %v591_v29, %v389_v11  ;;  %v410_v33 = vmul.f32 %v591_v29, %v390_v12  ;;  %v411_v34 = vmul.f32 %v591_v29, %v391_v13 }
 0x13f   :  { %v419_v36 = vmul.f32 %v450_v30, %v408_v31  ;;  %v420_v37 = vmul.f32 %v450_v30, %v409_v32  ;;  %v421_v38 = vmul.f32 %v450_v30, %v410_v33  ;;  %v422_v39 = vmul.f32 %v450_v30, %v411_v34 }
 0x141   :  { %v430_v40 = vadd.f32 %v451_v35, %v419_v36  ;;  %v431_v41 = vadd.f32 %v451_v35, %v420_v37  ;;  %v432_v42 = vadd.f32 %v451_v35, %v421_v38  ;;  %v433_v43 = vadd.f32 %v451_v35, %v422_v39 }
 0x143   :  { %v434_v44 = vmax.f32 %v430_v40, 0.0  ;;  %v435_v45 = vmax.f32 %v431_v41, 0.0  ;;  %v436_v46 = vmax.f32 %v432_v42, 0.0  ;;  %v437_v47 = vmax.f32 %v433_v43, 0.0 }
 0x145   :  { %438 = vst [vmem:[%s915_s4] sm:$0xff] %v434_v44  ;;  %439 = vst [vmem:[%s915_s4 + $0x8] sm:$0xff] %v435_v45 }
 0x146   :  { %440 = vst [vmem:[%s915_s4 + $0x10] sm:$0xff] %v436_v46  ;;  %441 = vst [vmem:[%s915_s4 + $0x18] sm:$0xff] %v437_v47 }

// kernel: heatmap2feat_forward.22
= control target key start
LH: loop header
LB: loop body
LE: loop exit
PB: predicated region body
PF: predicated region fallthrough
CT: control target
= control target key end

     0   :  { %vm29_vm0 = vcmask 523264   ;;  %s329_s1 = inlined_call_operand.vmem [shape: f32[64,128], index: 1, kind: input, shape index: {}]   ;;  %s330_s0 = inlined_call_operand.vmem [shape: f32[32,64], index: 0, kind: input, shape index: {}]   ;;  %s331_s2 = inlined_call_operand.vmem [shape: f32[1,128], index: 2, kind: input, shape index: {}]   ;;  %s332_s3 = inlined_call_operand.vmem [shape: f32[1,128], index: 3, kind: input, shape index: {}]   ;;  %s333_s4 = inlined_call_operand.vmem [shape: f32[32,128], index: 4, kind: output, shape index: {}]  }
   0x1   :  { %v28_v0 = vld [vmem:[%s329_s1 + $0x38] sm:$0xff]  ;;  %v27_v1 = vld [vmem:[%s329_s1 + $0x30] sm:$0xff]  ;;  %v26_v2 = vld [vmem:[%s329_s1 + $0x28] sm:$0xff] }
   0x2   :  { %210 = vmatprep.subr.mxu0 %v28_v0  ;;  %232 = vmatprep.subr.mxu1 %v28_v0  ;;  %v25_v3 = vld [vmem:[%s329_s1 + $0x20] sm:$0xff]  ;;  %v24_v4 = vld [vmem:[%s329_s1 + $0x18] sm:$0xff]  ;;  %v23_v5 = vld [vmem:[%s329_s1 + $0x10] sm:$0xff] }
   0x3   :  { %211 = vmatpush3.msra.mxu0 %v28_v0  ;;  %240 = vmatpush3.msra.mxu1 %v28_v0  ;;  %v22_v6 = vld [vmem:[%s329_s1 + $0x8] sm:$0xff]  ;;  %v21_v7 = vld [vmem:[%s329_s1] sm:$0xff]  ;;  %v19_v9 = vld [vmem:[%s330_s0 + $0x10] sm:$0xff] }
   0x4   :  { %212 = vmatprep.subr.mxu0 %v27_v1  ;;  %233 = vmatprep.subr.mxu1 %v27_v1  ;;  %v17_v8 = vld [vmem:[%s330_s0] sm:$0xff]  ;;  %v18_v10 = vld [vmem:[%s330_s0 + $0x8] sm:$0xff]  ;;  %v20_v11 = vld [vmem:[%s330_s0 + $0x18] sm:$0xff] }
   0x5   :  { %213 = vmatpush3.msra.mxu0 %v27_v1  ;;  %241 = vmatpush3.msra.mxu1 %v27_v1  ;;  %v196_v46 = vld [vmem:[%s331_s2] ss:$0 sm:$0xff] }
   0x6   :  { %214 = vmatprep.subr.mxu0 %v26_v2  ;;  %234 = vmatprep.subr.mxu1 %v26_v2  ;;  %v197_v51 = vld [vmem:[%s332_s3] ss:$0 sm:$0xff] }
   0x7   :  { %215 = vmatpush3.msra.mxu0 %v26_v2  ;;  %242 = vmatpush3.msra.mxu1 %v26_v2 }
   0x8   :  { %216 = vmatprep.subr.mxu0 %v25_v3  ;;  %235 = vmatprep.subr.mxu1 %v25_v3 }
   0x9   :  { %217 = vmatpush3.msra.mxu0 %v25_v3  ;;  %243 = vmatpush3.msra.mxu1 %v25_v3 }
   0xa   :  { %218 = vmatprep.subr.mxu0 %v24_v4  ;;  %236 = vmatprep.subr.mxu1 %v24_v4 }
   0xb   :  { %219 = vmatpush3.msra.mxu0 %v24_v4  ;;  %244 = vmatpush3.msra.mxu1 %v24_v4 }
   0xc   :  { %220 = vmatprep.subr.mxu0 %v23_v5  ;;  %237 = vmatprep.subr.mxu1 %v23_v5 }
   0xd   :  { %221 = vmatpush3.msra.mxu0 %v23_v5  ;;  %245 = vmatpush3.msra.mxu1 %v23_v5 }
   0xe   :  { %222 = vmatprep.subr.mxu0 %v22_v6  ;;  %238 = vmatprep.subr.mxu1 %v22_v6 }
   0xf   :  { %223 = vmatpush3.msra.mxu0 %v22_v6  ;;  %246 = vmatpush3.msra.mxu1 %v22_v6 }
  0x10   :  { %224 = vmatprep.subr.mxu0 %v21_v7  ;;  %239 = vmatprep.subr.mxu1 %v21_v7 }
  0x11   :  { %225 = vmatpush3.msra.mxu0 %v21_v7  ;;  %247 = vmatpush3.msra.mxu1 %v21_v7 }
  0x12   :  { %226 = vmatprep.mubr.msk.f32.mxu0 %vm29_vm0, %v17_v8  ;;  %229 = vmatprep.mubr.msk.f32.mxu1 %vm29_vm0, %v19_v9 }
  0x13   :  { %227 = vmatmul.mubr.msk.f32.vlgmr.msra.gmra.mxu0 %vm29_vm0, %v18_v10  ;;  %230 = vmatmul.mubr.msk.f32.vlgmr.msra.gmra.mxu1 %vm29_vm0, %v20_v11 }
  0xd3   :  { %v228_v12 = vpop.f32.mrf.mxu0  ;;  %v231_v13 = vpop.f32.mrf.mxu1 }
  0xd5   :  { %v108_v14 = vpop.f32.mrf.mxu0  ;;  %v118_v16 = vpop.f32.mrf.mxu1 }
  0xd6   :  { %v127_v15 = vadd.f32 %v228_v12, %v108_v14 }
  0xd8   :  { %v128_v17 = vadd.f32 %v127_v15, %v118_v16 }
  0xda   :  { %v129_v18 = vadd.f32 %v231_v13, %v128_v17 }
  0xdc   :  { %v130_v19 = vrot.slane %v129_v18, 4 }
  0xde   :  { %v131_v20 = vadd.f32 %v130_v19, %v129_v18 }
  0xe0   :  { %v132_v21 = vrot.slane %v131_v20, 2 }
  0xe2   :  { %v133_v22 = vadd.f32 %v132_v21, %v131_v20 }
  0xe4   :  { %v134_v23 = vrot.slane %v133_v22, 1 }
  0xe6   :  { %v135_v24 = vadd.f32 %v134_v23, %v133_v22 }
  0xe8   :  { %v137_v25 = vmul.f32 0.03125, %v135_v24 }
  0xea   :  { %v138_v26 = vsub.f32 %v108_v14, %v137_v25  ;;  %v139_v27 = vsub.f32 %v228_v12, %v137_v25  ;;  %v140_v28 = vsub.f32 %v118_v16, %v137_v25  ;;  %v141_v29 = vsub.f32 %v231_v13, %v137_v25 }
  0xec   :  { %v142_v30 = vmul.f32 %v138_v26, %v138_v26  ;;  %v143_v31 = vmul.f32 %v139_v27, %v139_v27  ;;  %v144_v32 = vmul.f32 %v140_v28, %v140_v28  ;;  %v145_v34 = vmul.f32 %v141_v29, %v141_v29 }
  0xee   :  { %v146_v33 = vadd.f32 %v143_v31, %v142_v30 }
  0xf0   :  { %v147_v35 = vadd.f32 %v146_v33, %v144_v32 }
  0xf2   :  { %v148_v36 = vadd.f32 %v147_v35, %v145_v34 }
  0xf4   :  { %v149_v37 = vrot.slane %v148_v36, 4 }
  0xf6   :  { %v150_v38 = vadd.f32 %v149_v37, %v148_v36 }
  0xf8   :  { %v151_v39 = vrot.slane %v150_v38, 2 }
  0xfa   :  { %v152_v40 = vadd.f32 %v151_v39, %v150_v38 }
  0xfc   :  { %v153_v41 = vrot.slane %v152_v40, 1 }
  0xfe   :  { %v154_v42 = vadd.f32 %v153_v41, %v152_v40 }
 0x100   :  { %v155_v43 = vmul.f32 0.03125, %v154_v42 }
 0x102   :  { %v156_v44 = vadd.f32 1e-05, %v155_v43 }
 0x104   :  { %248 = vrsqrt.f32 %v156_v44 }
 0x111   :  { %v249_v45 = vpop.eup %248 }
 0x112   :  { %v158_v47 = vmul.f32 %v249_v45, %v138_v26  ;;  %v159_v48 = vmul.f32 %v249_v45, %v139_v27  ;;  %v160_v49 = vmul.f32 %v249_v45, %v140_v28  ;;  %v161_v50 = vmul.f32 %v249_v45, %v141_v29 }
 0x114   :  { %v169_v52 = vmul.f32 %v196_v46, %v158_v47  ;;  %v170_v53 = vmul.f32 %v196_v46, %v159_v48  ;;  %v171_v54 = vmul.f32 %v196_v46, %v160_v49  ;;  %v172_v55 = vmul.f32 %v196_v46, %v161_v50 }
 0x116   :  { %v180_v56 = vadd.f32 %v197_v51, %v169_v52  ;;  %v181_v57 = vadd.f32 %v197_v51, %v170_v53  ;;  %v182_v58 = vadd.f32 %v197_v51, %v171_v54  ;;  %v183_v59 = vadd.f32 %v197_v51, %v172_v55 }
 0x118   :  { %184 = vst [vmem:[%s333_s4] sm:$0xff] %v180_v56  ;;  %185 = vst [vmem:[%s333_s4 + $0x8] sm:$0xff] %v181_v57 }
 0x119   :  { %186 = vst [vmem:[%s333_s4 + $0x10] sm:$0xff] %v182_v58  ;;  %187 = vst [vmem:[%s333_s4 + $0x18] sm:$0xff] %v183_v59 }

// kernel: heatmap2feat_forward.23
= control target key start
LH: loop header
LB: loop body
LE: loop exit
PB: predicated region body
PF: predicated region fallthrough
CT: control target
= control target key end

     0   :  { %s1572_s1 = inlined_call_operand.vmem [shape: f32[1152,128], index: 1, kind: input, shape index: {}]   ;;  %s1573_s0 = inlined_call_operand.vmem [shape: f32[32,1152], index: 0, kind: input, shape index: {}]   ;;  %s1574_s2 = inlined_call_operand.vmem [shape: f32[1,128], index: 2, kind: input, shape index: {}]   ;;  %s1575_s3 = inlined_call_operand.vmem [shape: f32[1,128], index: 3, kind: input, shape index: {}]   ;;  %s1576_s4 = inlined_call_operand.vmem [shape: f32[32,128], index: 4, kind: input, shape index: {}]   ;;  %s1577_s5 = inlined_call_operand.vmem [shape: f32[32,128], index: 5, kind: output, shape index: {}]  }
   0x1   :  { %v87_v0 = vld [vmem:[%s1572_s1 + $0xf8] sm:$0xff]  ;;  %v86_v4 = vld [vmem:[%s1572_s1 + $0xf0] sm:$0xff]  ;;  %v85_v8 = vld [vmem:[%s1572_s1 + $0xe8] sm:$0xff] }
   0x2   :  { %v119_v1 = vld [vmem:[%s1572_s1 + $0x1f8] sm:$0xff]  ;;  %704 = vmatprep.subr.mxu0 %v87_v0  ;;  %v118_v5 = vld [vmem:[%s1572_s1 + $0x1f0] sm:$0xff]  ;;  %v117_v9 = vld [vmem:[%s1572_s1 + $0x1e8] sm:$0xff] }
   0x3   :  { %v71_v2 = vld [vmem:[%s1572_s1 + $0x78] sm:$0xff]  ;;  %748 = vmatprep.subr.mxu1 %v119_v1  ;;  %v70_v6 = vld [vmem:[%s1572_s1 + $0x70] sm:$0xff]  ;;  %v69_v10 = vld [vmem:[%s1572_s1 + $0x68] sm:$0xff] }
   0x4   :  { %v103_v3 = vld [vmem:[%s1572_s1 + $0x178] sm:$0xff]  ;;  %705 = vmatpush3.msra.mxu0 %v71_v2  ;;  %v102_v7 = vld [vmem:[%s1572_s1 + $0x170] sm:$0xff]  ;;  %v101_v11 = vld [vmem:[%s1572_s1 + $0x168] sm:$0xff] }
   0x5   :  { %749 = vmatpush3.msra.mxu1 %v103_v3  ;;  %706 = vmatprep.subr.mxu0 %v86_v4  ;;  %v84_v12 = vld [vmem:[%s1572_s1 + $0xe0] sm:$0xff]  ;;  %v83_v16 = vld [vmem:[%s1572_s1 + $0xd8] sm:$0xff]  ;;  %v82_v20 = vld [vmem:[%s1572_s1 + $0xd0] sm:$0xff] }
   0x6   :  { %750 = vmatprep.subr.mxu1 %v118_v5  ;;  %707 = vmatpush3.msra.mxu0 %v70_v6  ;;  %v116_v13 = vld [vmem:[%s1572_s1 + $0x1e0] sm:$0xff]  ;;  %v115_v17 = vld [vmem:[%s1572_s1 + $0x1d8] sm:$0xff]  ;;  %v114_v21 = vld [vmem:[%s1572_s1 + $0x1d0] sm:$0xff] }
   0x7   :  { %751 = vmatpush3.msra.mxu1 %v102_v7  ;;  %708 = vmatprep.subr.mxu0 %v85_v8  ;;  %v68_v14 = vld [vmem:[%s1572_s1 + $0x60] sm:$0xff]  ;;  %v67_v18 = vld [vmem:[%s1572_s1 + $0x58] sm:$0xff]  ;;  %v66_v22 = vld [vmem:[%s1572_s1 + $0x50] sm:$0xff] }
   0x8   :  { %752 = vmatprep.subr.mxu1 %v117_v9  ;;  %v100_v15 = vld [vmem:[%s1572_s1 + $0x160] sm:$0xff]  ;;  %709 = vmatpush3.msra.mxu0 %v69_v10  ;;  %v99_v19 = vld [vmem:[%s1572_s1 + $0x158] sm:$0xff]  ;;  %v98_v23 = vld [vmem:[%s1572_s1 + $0x150] sm:$0xff] }
   0x9   :  { %753 = vmatpush3.msra.mxu1 %v101_v11  ;;  %710 = vmatprep.subr.mxu0 %v84_v12  ;;  %v81_v24 = vld [vmem:[%s1572_s1 + $0xc8] sm:$0xff]  ;;  %v80_v28 = vld [vmem:[%s1572_s1 + $0xc0] sm:$0xff]  ;;  %v79_v32 = vld [vmem:[%s1572_s1 + $0xb8] sm:$0xff] }
   0xa   :  { %754 = vmatprep.subr.mxu1 %v116_v13  ;;  %711 = vmatpush3.msra.mxu0 %v68_v14  ;;  %v113_v25 = vld [vmem:[%s1572_s1 + $0x1c8] sm:$0xff]  ;;  %v112_v29 = vld [vmem:[%s1572_s1 + $0x1c0] sm:$0xff]  ;;  %v111_v33 = vld [vmem:[%s1572_s1 + $0x1b8] sm:$0xff] }
   0xb   :  { %755 = vmatpush3.msra.mxu1 %v100_v15  ;;  %712 = vmatprep.subr.mxu0 %v83_v16  ;;  %v65_v26 = vld [vmem:[%s1572_s1 + $0x48] sm:$0xff]  ;;  %v64_v30 = vld [vmem:[%s1572_s1 + $0x40] sm:$0xff]  ;;  %v63_v34 = vld [vmem:[%s1572_s1 + $0x38] sm:$0xff] }
   0xc   :  { %756 = vmatprep.subr.mxu1 %v115_v17  ;;  %713 = vmatpush3.msra.mxu0 %v67_v18  ;;  %v97_v27 = vld [vmem:[%s1572_s1 + $0x148] sm:$0xff]  ;;  %v96_v31 = vld [vmem:[%s1572_s1 + $0x140] sm:$0xff]  ;;  %v95_v35 = vld [vmem:[%s1572_s1 + $0x138] sm:$0xff] }
   0xd   :  { %757 = vmatpush3.msra.mxu1 %v99_v19  ;;  %714 = vmatprep.subr.mxu0 %v82_v20  ;;  %v78_v36 = vld [vmem:[%s1572_s1 + $0xb0] sm:$0xff]  ;;  %v77_v40 = vld [vmem:[%s1572_s1 + $0xa8] sm:$0xff]  ;;  %v76_v44 = vld [vmem:[%s1572_s1 + $0xa0] sm:$0xff] }
   0xe   :  { %758 = vmatprep.subr.mxu1 %v114_v21  ;;  %715 = vmatpush3.msra.mxu0 %v66_v22  ;;  %v110_v37 = vld [vmem:[%s1572_s1 + $0x1b0] sm:$0xff]  ;;  %v109_v41 = vld [vmem:[%s1572_s1 + $0x1a8] sm:$0xff]  ;;  %v108_v45 = vld [vmem:[%s1572_s1 + $0x1a0] sm:$0xff] }
   0xf   :  { %759 = vmatpush3.msra.mxu1 %v98_v23  ;;  %716 = vmatprep.subr.mxu0 %v81_v24  ;;  %v62_v38 = vld [vmem:[%s1572_s1 + $0x30] sm:$0xff]  ;;  %v61_v42 = vld [vmem:[%s1572_s1 + $0x28] sm:$0xff]  ;;  %v60_v46 = vld [vmem:[%s1572_s1 + $0x20] sm:$0xff] }
  0x10   :  { %760 = vmatprep.subr.mxu1 %v113_v25  ;;  %717 = vmatpush3.msra.mxu0 %v65_v26  ;;  %v94_v39 = vld [vmem:[%s1572_s1 + $0x130] sm:$0xff]  ;;  %v93_v43 = vld [vmem:[%s1572_s1 + $0x128] sm:$0xff]  ;;  %v92_v47 = vld [vmem:[%s1572_s1 + $0x120] sm:$0xff] }
  0x11   :  { %761 = vmatpush3.msra.mxu1 %v97_v27  ;;  %718 = vmatprep.subr.mxu0 %v80_v28  ;;  %v75_v48 = vld [vmem:[%s1572_s1 + $0x98] sm:$0xff]  ;;  %v74_v52 = vld [vmem:[%s1572_s1 + $0x90] sm:$0xff]  ;;  %v73_v56 = vld [vmem:[%s1572_s1 + $0x88] sm:$0xff] }
  0x12   :  { %762 = vmatprep.subr.mxu1 %v112_v29  ;;  %719 = vmatpush3.msra.mxu0 %v64_v30  ;;  %v107_v49 = vld [vmem:[%s1572_s1 + $0x198] sm:$0xff]  ;;  %v106_v53 = vld [vmem:[%s1572_s1 + $0x190] sm:$0xff]  ;;  %v105_v57 = vld [vmem:[%s1572_s1 + $0x188] sm:$0xff] }
  0x13   :  { %763 = vmatpush3.msra.mxu1 %v96_v31  ;;  %720 = vmatprep.subr.mxu0 %v79_v32  ;;  %v59_v50 = vld [vmem:[%s1572_s1 + $0x18] sm:$0xff]  ;;  %v58_v54 = vld [vmem:[%s1572_s1 + $0x10] sm:$0xff]  ;;  %v57_v58 = vld [vmem:[%s1572_s1 + $0x8] sm:$0xff] }
  0x14   :  { %764 = vmatprep.subr.mxu1 %v111_v33  ;;  %721 = vmatpush3.msra.mxu0 %v63_v34  ;;  %v91_v51 = vld [vmem:[%s1572_s1 + $0x118] sm:$0xff]  ;;  %v90_v55 = vld [vmem:[%s1572_s1 + $0x110] sm:$0xff]  ;;  %v89_v59 = vld [vmem:[%s1572_s1 + $0x108] sm:$0xff] }
  0x15   :  { %765 = vmatpush3.msra.mxu1 %v95_v35  ;;  %722 = vmatprep.subr.mxu0 %v78_v36  ;;  %v72_v60 = vld [vmem:[%s1572_s1 + $0x80] sm:$0xff]  ;;  %v21_v63 = vld [vmem:[%s1573_s0 + $0x8] sm:$0xff]  ;;  %v23_v1 = vld [vmem:[%s1573_s0 + $0x18] sm:$0xff] }
  0x16   :  { %766 = vmatprep.subr.mxu1 %v110_v37  ;;  %723 = vmatpush3.msra.mxu0 %v62_v38  ;;  %v104_v61 = vld [vmem:[%s1572_s1 + $0x180] sm:$0xff]  ;;  %v22_v3 = vld [vmem:[%s1573_s0 + $0x10] sm:$0xff]  ;;  %v151_v4 = vld [vmem:[%s1572_s1 + $0x2f8] sm:$0xff] }
  0x17   :  { %767 = vmatpush3.msra.mxu1 %v94_v39  ;;  %724 = vmatprep.subr.mxu0 %v77_v40  ;;  %v56_v62 = vld [vmem:[%s1572_s1] sm:$0xff]  ;;  %v183_v5 = vld [vmem:[%s1572_s1 + $0x3f8] sm:$0xff]  ;;  %v150_v8 = vld [vmem:[%s1572_s1 + $0x2f0] sm:$0xff] }
  0x18   :  { %768 = vmatprep.subr.mxu1 %v109_v41  ;;  %725 = vmatpush3.msra.mxu0 %v61_v42  ;;  %v88_v0 = vld [vmem:[%s1572_s1 + $0x100] sm:$0xff]  ;;  %v135_v6 = vld [vmem:[%s1572_s1 + $0x278] sm:$0xff]  ;;  %v182_v9 = vld [vmem:[%s1572_s1 + $0x3f0] sm:$0xff] }
  0x19   :  { %769 = vmatpush3.msra.mxu1 %v93_v43  ;;  %726 = vmatprep.subr.mxu0 %v76_v44  ;;  %v20_v2 = vld [vmem:[%s1573_s0] sm:$0xff]  ;;  %v167_v7 = vld [vmem:[%s1572_s1 + $0x378] sm:$0xff]  ;;  %v134_v10 = vld [vmem:[%s1572_s1 + $0x270] sm:$0xff] }
  0x1a   :  { %770 = vmatprep.subr.mxu1 %v108_v45  ;;  %727 = vmatpush3.msra.mxu0 %v60_v46  ;;  %v166_v11 = vld [vmem:[%s1572_s1 + $0x370] sm:$0xff]  ;;  %v149_v12 = vld [vmem:[%s1572_s1 + $0x2e8] sm:$0xff]  ;;  %v148_v16 = vld [vmem:[%s1572_s1 + $0x2e0] sm:$0xff] }
  0x1b   :  { %771 = vmatpush3.msra.mxu1 %v92_v47  ;;  %728 = vmatprep.subr.mxu0 %v75_v48  ;;  %v181_v13 = vld [vmem:[%s1572_s1 + $0x3e8] sm:$0xff]  ;;  %v180_v17 = vld [vmem:[%s1572_s1 + $0x3e0] sm:$0xff]  ;;  %v147_v20 = vld [vmem:[%s1572_s1 + $0x2d8] sm:$0xff] }
  0x1c   :  { %772 = vmatprep.subr.mxu1 %v107_v49  ;;  %729 = vmatpush3.msra.mxu0 %v59_v50  ;;  %v133_v14 = vld [vmem:[%s1572_s1 + $0x268] sm:$0xff]  ;;  %v132_v18 = vld [vmem:[%s1572_s1 + $0x260] sm:$0xff]  ;;  %v179_v21 = vld [vmem:[%s1572_s1 + $0x3d8] sm:$0xff] }
  0x1d   :  { %773 = vmatpush3.msra.mxu1 %v91_v51  ;;  %730 = vmatprep.subr.mxu0 %v74_v52  ;;  %v165_v15 = vld [vmem:[%s1572_s1 + $0x368] sm:$0xff]  ;;  %v164_v19 = vld [vmem:[%s1572_s1 + $0x360] sm:$0xff]  ;;  %v131_v22 = vld [vmem:[%s1572_s1 + $0x258] sm:$0xff] }
  0x1e   :  { %774 = vmatprep.subr.mxu1 %v106_v53  ;;  %731 = vmatpush3.msra.mxu0 %v58_v54  ;;  %v163_v23 = vld [vmem:[%s1572_s1 + $0x358] sm:$0xff]  ;;  %v146_v24 = vld [vmem:[%s1572_s1 + $0x2d0] sm:$0xff]  ;;  %v145_v28 = vld [vmem:[%s1572_s1 + $0x2c8] sm:$0xff] }
  0x1f   :  { %775 = vmatpush3.msra.mxu1 %v90_v55  ;;  %732 = vmatprep.subr.mxu0 %v73_v56  ;;  %v178_v25 = vld [vmem:[%s1572_s1 + $0x3d0] sm:$0xff]  ;;  %v177_v29 = vld [vmem:[%s1572_s1 + $0x3c8] sm:$0xff]  ;;  %v144_v32 = vld [vmem:[%s1572_s1 + $0x2c0] sm:$0xff] }
  0x20   :  { %776 = vmatprep.subr.mxu1 %v105_v57  ;;  %733 = vmatpush3.msra.mxu0 %v57_v58  ;;  %v130_v26 = vld [vmem:[%s1572_s1 + $0x250] sm:$0xff]  ;;  %v129_v30 = vld [vmem:[%s1572_s1 + $0x248] sm:$0xff]  ;;  %v176_v33 = vld [vmem:[%s1572_s1 + $0x3c0] sm:$0xff] }
  0x21   :  { %777 = vmatpush3.msra.mxu1 %v89_v59  ;;  %734 = vmatprep.subr.mxu0 %v72_v60  ;;  %v162_v27 = vld [vmem:[%s1572_s1 + $0x350] sm:$0xff]  ;;  %v161_v31 = vld [vmem:[%s1572_s1 + $0x348] sm:$0xff]  ;;  %v128_v34 = vld [vmem:[%s1572_s1 + $0x240] sm:$0xff] }
  0x22   :  { %778 = vmatprep.subr.mxu1 %v104_v61  ;;  %735 = vmatpush3.msra.mxu0 %v56_v62  ;;  %v160_v35 = vld [vmem:[%s1572_s1 + $0x340] sm:$0xff]  ;;  %v143_v36 = vld [vmem:[%s1572_s1 + $0x2b8] sm:$0xff]  ;;  %v30_v40 = vld [vmem:[%s1573_s0 + $0x50] sm:$0xff] }
  0x23   :  { %264 = vmatprep.mubr.f32.mxu0 %v21_v63  ;;  %779 = vmatpush3.msra.mxu1 %v88_v0  ;;  %v175_v37 = vld [vmem:[%s1572_s1 + $0x3b8] sm:$0xff]  ;;  %v32_v41 = vld [vmem:[%s1573_s0 + $0x60] sm:$0xff]  ;;  %v142_v42 = vld [vmem:[%s1572_s1 + $0x2b0] sm:$0xff] }
  0x24   :  { %349 = vmatprep.mubr.f32.mxu1 %v23_v1  ;;  %265 = vmatmul.mubr.f32.vlgmr.msra.gmra.mxu0 %v20_v2  ;;  %v127_v38 = vld [vmem:[%s1572_s1 + $0x238] sm:$0xff]  ;;  %v174_v43 = vld [vmem:[%s1572_s1 + $0x3b0] sm:$0xff]  ;;  %v29_v44 = vld [vmem:[%s1573_s0 + $0x48] sm:$0xff] }
  0x25   :  { %350 = vmatmul.mubr.f32.vlgmr.msra.gmra.mxu1 %v22_v3  ;;  %792 = vmatprep.subr.mxu0 %v151_v4  ;;  %v159_v39 = vld [vmem:[%s1572_s1 + $0x338] sm:$0xff]  ;;  %v126_v46 = vld [vmem:[%s1572_s1 + $0x230] sm:$0xff]  ;;  %v141_v48 = vld [vmem:[%s1572_s1 + $0x2a8] sm:$0xff] }
  0x26   :  { %836 = vmatprep.subr.mxu1 %v183_v5  ;;  %793 = vmatpush3.msra.mxu0 %v135_v6  ;;  %v31_v45 = vld [vmem:[%s1573_s0 + $0x58] sm:$0xff]  ;;  %v158_v47 = vld [vmem:[%s1572_s1 + $0x330] sm:$0xff]  ;;  %v173_v49 = vld [vmem:[%s1572_s1 + $0x3a8] sm:$0xff] }
  0x27   :  { %837 = vmatpush3.msra.mxu1 %v167_v7  ;;  %794 = vmatprep.subr.mxu0 %v150_v8  ;;  %v125_v50 = vld [vmem:[%s1572_s1 + $0x228] sm:$0xff]  ;;  %v39_v52 = vld [vmem:[%s1573_s0 + $0x98] sm:$0xff]  ;;  %v140_v54 = vld [vmem:[%s1572_s1 + $0x2a0] sm:$0xff] }
  0x28   :  { %838 = vmatprep.subr.mxu1 %v182_v9  ;;  %795 = vmatpush3.msra.mxu0 %v134_v10  ;;  %v157_v51 = vld [vmem:[%s1572_s1 + $0x328] sm:$0xff]  ;;  %v172_v55 = vld [vmem:[%s1572_s1 + $0x3a0] sm:$0xff]  ;;  %v38_v56 = vld [vmem:[%s1573_s0 + $0x90] sm:$0xff] }
  0x29   :  { %839 = vmatpush3.msra.mxu1 %v166_v11  ;;  %796 = vmatprep.subr.mxu0 %v149_v12  ;;  %v41_v53 = vld [vmem:[%s1573_s0 + $0xa8] sm:$0xff]  ;;  %v40_v57 = vld [vmem:[%s1573_s0 + $0xa0] sm:$0xff]  ;;  %v139_v60 = vld [vmem:[%s1572_s1 + $0x298] sm:$0xff] }
  0x2a   :  { %840 = vmatprep.subr.mxu1 %v181_v13  ;;  %797 = vmatpush3.msra.mxu0 %v133_v14  ;;  %v124_v58 = vld [vmem:[%s1572_s1 + $0x220] sm:$0xff]  ;;  %v171_v61 = vld [vmem:[%s1572_s1 + $0x398] sm:$0xff]  ;;  %v50_v1 = vld [vmem:[%s1573_s0 + $0xf0] sm:$0xff] }
  0x2b   :  { %841 = vmatpush3.msra.mxu1 %v165_v15  ;;  %798 = vmatprep.subr.mxu0 %v148_v16  ;;  %v156_v59 = vld [vmem:[%s1572_s1 + $0x320] sm:$0xff]  ;;  %v123_v62 = vld [vmem:[%s1572_s1 + $0x218] sm:$0xff]  ;;  %v138_v2 = vld [vmem:[%s1572_s1 + $0x290] sm:$0xff] }
  0x2c   :  { %842 = vmatprep.subr.mxu1 %v180_v17  ;;  %799 = vmatpush3.msra.mxu0 %v132_v18  ;;  %v155_v63 = vld [vmem:[%s1572_s1 + $0x318] sm:$0xff]  ;;  %v48_v0 = vld [vmem:[%s1573_s0 + $0xe0] sm:$0xff]  ;;  %v170_v3 = vld [vmem:[%s1572_s1 + $0x390] sm:$0xff] }
  0x2d   :  { %843 = vmatpush3.msra.mxu1 %v164_v19  ;;  %800 = vmatprep.subr.mxu0 %v147_v20  ;;  %v47_v4 = vld [vmem:[%s1573_s0 + $0xd8] sm:$0xff]  ;;  %v49_v5 = vld [vmem:[%s1573_s0 + $0xe8] sm:$0xff]  ;;  %v122_v6 = vld [vmem:[%s1572_s1 + $0x210] sm:$0xff] }
  0x2e   :  { %844 = vmatprep.subr.mxu1 %v179_v21  ;;  %801 = vmatpush3.msra.mxu0 %v131_v22  ;;  %v154_v7 = vld [vmem:[%s1572_s1 + $0x310] sm:$0xff]  ;;  %v137_v8 = vld [vmem:[%s1572_s1 + $0x288] sm:$0xff]  ;;  %v136_v12 = vld [vmem:[%s1572_s1 + $0x280] sm:$0xff] }
  0x2f   :  { %845 = vmatpush3.msra.mxu1 %v163_v23  ;;  %802 = vmatprep.subr.mxu0 %v146_v24  ;;  %v169_v9 = vld [vmem:[%s1572_s1 + $0x388] sm:$0xff]  ;;  %v168_v13 = vld [vmem:[%s1572_s1 + $0x380] sm:$0xff]  ;;  %v27_v18 = vld [vmem:[%s1573_s0 + $0x38] sm:$0xff] }
  0x30   :  { %846 = vmatprep.subr.mxu1 %v178_v25  ;;  %803 = vmatpush3.msra.mxu0 %v130_v26  ;;  %v121_v10 = vld [vmem:[%s1572_s1 + $0x208] sm:$0xff]  ;;  %v120_v14 = vld [vmem:[%s1572_s1 + $0x200] sm:$0xff]  ;;  %v199_v19 = vld [vmem:[%s1572_s1 + $0x478] sm:$0xff] }
  0x31   :  { %847 = vmatpush3.msra.mxu1 %v162_v27  ;;  %804 = vmatprep.subr.mxu0 %v145_v28  ;;  %v153_v11 = vld [vmem:[%s1572_s1 + $0x308] sm:$0xff]  ;;  %v152_v16 = vld [vmem:[%s1572_s1 + $0x300] sm:$0xff]  ;;  %v26_v20 = vld [vmem:[%s1573_s0 + $0x30] sm:$0xff] }
  0x32   :  { %848 = vmatprep.subr.mxu1 %v177_v29  ;;  %805 = vmatpush3.msra.mxu0 %v129_v30  ;;  %v25_v15 = vld [vmem:[%s1573_s0 + $0x28] sm:$0xff]  ;;  %v24_v17 = vld [vmem:[%s1573_s0 + $0x20] sm:$0xff]  ;;  %v198_v21 = vld [vmem:[%s1572_s1 + $0x470] sm:$0xff] }
  0x33   :  { %849 = vmatpush3.msra.mxu1 %v161_v31  ;;  %806 = vmatprep.subr.mxu0 %v144_v32  ;;  %v34_v22 = vld [vmem:[%s1573_s0 + $0x70] sm:$0xff]  ;;  %v33_v23 = vld [vmem:[%s1573_s0 + $0x68] sm:$0xff]  ;;  %v36_v25 = vld [vmem:[%s1573_s0 + $0x80] sm:$0xff] }
  0x34   :  { %850 = vmatprep.subr.mxu1 %v176_v33  ;;  %807 = vmatpush3.msra.mxu0 %v128_v34  ;;  %v197_v24 = vld [vmem:[%s1572_s1 + $0x468] sm:$0xff]  ;;  %v196_v26 = vld [vmem:[%s1572_s1 + $0x460] sm:$0xff]  ;;  %v35_v27 = vld [vmem:[%s1573_s0 + $0x78] sm:$0xff] }
  0x35   :  { %851 = vmatpush3.msra.mxu1 %v160_v35  ;;  %808 = vmatprep.subr.mxu0 %v143_v36  ;;  %v43_v28 = vld [vmem:[%s1573_s0 + $0xb8] sm:$0xff]  ;;  %v42_v29 = vld [vmem:[%s1573_s0 + $0xb0] sm:$0xff]  ;;  %v45_v31 = vld [vmem:[%s1573_s0 + $0xc8] sm:$0xff] }
  0x36   :  { %852 = vmatprep.subr.mxu1 %v175_v37  ;;  %809 = vmatpush3.msra.mxu0 %v127_v38  ;;  %v195_v30 = vld [vmem:[%s1572_s1 + $0x458] sm:$0xff]  ;;  %v194_v32 = vld [vmem:[%s1572_s1 + $0x450] sm:$0xff]  ;;  %v44_v33 = vld [vmem:[%s1573_s0 + $0xc0] sm:$0xff] }
  0x37   :  { %853 = vmatpush3.msra.mxu1 %v159_v39  ;;  %269 = vmatprep.mubr.f32.mxu0 %v30_v40  ;;  %v52_v34 = vld [vmem:[%s1573_s0 + $0x100] sm:$0xff]  ;;  %v51_v35 = vld [vmem:[%s1573_s0 + $0xf8] sm:$0xff]  ;;  %v193_v36 = vld [vmem:[%s1572_s1 + $0x448] sm:$0xff] }
  0x38   :  { %354 = vmatprep.mubr.f32.mxu1 %v32_v41  ;;  %810 = vmatprep.subr.mxu0 %v142_v42  ;;  %v54_v37 = vld [vmem:[%s1573_s0 + $0x110] sm:$0xff]  ;;  %v192_v38 = vld [vmem:[%s1572_s1 + $0x440] sm:$0xff]  ;;  %v53_v39 = vld [vmem:[%s1573_s0 + $0x108] sm:$0xff] }
  0x39   :  { %854 = vmatprep.subr.mxu1 %v174_v43  ;;  %270 = vmatmul.mubr.f32.gmra.mxu0 %v29_v44  ;;  %v191_v40 = vld [vmem:[%s1572_s1 + $0x438] sm:$0xff]  ;;  %v190_v41 = vld [vmem:[%s1572_s1 + $0x430] sm:$0xff]  ;;  %v189_v42 = vld [vmem:[%s1572_s1 + $0x428] sm:$0xff] }
  0x3a   :  { %355 = vmatmul.mubr.f32.gmra.mxu1 %v31_v45  ;;  %811 = vmatpush3.msra.mxu0 %v126_v46  ;;  %v188_v43 = vld [vmem:[%s1572_s1 + $0x420] sm:$0xff]  ;;  %v187_v44 = vld [vmem:[%s1572_s1 + $0x418] sm:$0xff]  ;;  %v186_v45 = vld [vmem:[%s1572_s1 + $0x410] sm:$0xff] }
  0x3b   :  { %855 = vmatpush3.msra.mxu1 %v158_v47  ;;  %812 = vmatprep.subr.mxu0 %v141_v48  ;;  %v185_v46 = vld [vmem:[%s1572_s1 + $0x408] sm:$0xff]  ;;  %v184_v47 = vld [vmem:[%s1572_s1 + $0x400] sm:$0xff] }
  0x3c   :  { %856 = vmatprep.subr.mxu1 %v173_v49  ;;  %813 = vmatpush3.msra.mxu0 %v125_v50  ;;  %v28_v48 = vld [vmem:[%s1573_s0 + $0x40] sm:$0xff]  ;;  %v46_v49 = vld [vmem:[%s1573_s0 + $0xd0] sm:$0xff]  ;;  %v37_v50 = vld [vmem:[%s1573_s0 + $0x88] sm:$0xff] }
  0x3d   :  { %857 = vmatpush3.msra.mxu1 %v157_v51  ;;  %274 = vmatprep.mubr.f32.mxu0 %v39_v52  ;;  %v55_v51 = vld [vmem:[%s1573_s0 + $0x118] sm:$0xff] }
  0x3e   :  { %359 = vmatprep.mubr.f32.mxu1 %v41_v53  ;;  %814 = vmatprep.subr.mxu0 %v140_v54 }
  0x3f   :  { %858 = vmatprep.subr.mxu1 %v172_v55  ;;  %275 = vmatmul.mubr.f32.gmra.mxu0 %v38_v56 }
  0x40   :  { %360 = vmatmul.mubr.f32.gmra.mxu1 %v40_v57  ;;  %815 = vmatpush3.msra.mxu0 %v124_v58 }
  0x41   :  { %859 = vmatpush3.msra.mxu1 %v156_v59  ;;  %816 = vmatprep.subr.mxu0 %v139_v60 }
  0x42   :  { %860 = vmatprep.subr.mxu1 %v171_v61  ;;  %817 = vmatpush3.msra.mxu0 %v123_v62 }
  0x43   :  { %861 = vmatpush3.msra.mxu1 %v155_v63  ;;  %279 = vmatprep.mubr.f32.mxu0 %v48_v0 }
  0x44   :  { %364 = vmatprep.mubr.f32.mxu1 %v50_v1  ;;  %818 = vmatprep.subr.mxu0 %v138_v2 }
  0x45   :  { %862 = vmatprep.subr.mxu1 %v170_v3  ;;  %280 = vmatmul.mubr.f32.gmra.mxu0 %v47_v4 }
  0x46   :  { %365 = vmatmul.mubr.f32.gmra.mxu1 %v49_v5  ;;  %819 = vmatpush3.msra.mxu0 %v122_v6 }
  0x47   :  { %863 = vmatpush3.msra.mxu1 %v154_v7  ;;  %820 = vmatprep.subr.mxu0 %v137_v8 }
  0x48   :  { %864 = vmatprep.subr.mxu1 %v169_v9  ;;  %821 = vmatpush3.msra.mxu0 %v121_v10 }
  0x49   :  { %865 = vmatpush3.msra.mxu1 %v153_v11  ;;  %822 = vmatprep.subr.mxu0 %v136_v12 }
  0x4a   :  { %866 = vmatprep.subr.mxu1 %v168_v13  ;;  %823 = vmatpush3.msra.mxu0 %v120_v14 }
  0x4b   :  { %434 = vmatprep.mubr.f32.mxu0 %v25_v15  ;;  %867 = vmatpush3.msra.mxu1 %v152_v16 }
  0x4c   :  { %435 = vmatmul.mubr.f32.vlgmr.msra.gmra.mxu0 %v24_v17  ;;  %519 = vmatprep.mubr.f32.mxu1 %v27_v18 }
  0x4d   :  { %900 = vmatprep.subr.mxu0 %v199_v19  ;;  %938 = vmatprep.subr.mxu1 %v199_v19 }
  0x4e   :  { %520 = vmatmul.mubr.f32.vlgmr.msra.gmra.mxu1 %v26_v20  ;;  %901 = vmatpush3.msra.mxu0 %v199_v19 }
  0x4f   :  { %954 = vmatpush3.msra.mxu1 %v199_v19  ;;  %902 = vmatprep.subr.mxu0 %v198_v21 }
  0x50   :  { %939 = vmatprep.subr.mxu1 %v198_v21  ;;  %439 = vmatprep.mubr.f32.mxu0 %v34_v22 }
  0x51   :  { %903 = vmatpush3.msra.mxu0 %v198_v21  ;;  %955 = vmatpush3.msra.mxu1 %v198_v21 }
  0x52   :  { %440 = vmatmul.mubr.f32.gmra.mxu0 %v33_v23  ;;  %904 = vmatprep.subr.mxu0 %v197_v24 }
  0x53   :  { %940 = vmatprep.subr.mxu1 %v197_v24  ;;  %524 = vmatprep.mubr.f32.mxu1 %v36_v25 }
  0x54   :  { %905 = vmatpush3.msra.mxu0 %v197_v24  ;;  %956 = vmatpush3.msra.mxu1 %v197_v24 }
  0x55   :  { %906 = vmatprep.subr.mxu0 %v196_v26  ;;  %525 = vmatmul.mubr.f32.gmra.mxu1 %v35_v27 }
  0x56   :  { %941 = vmatprep.subr.mxu1 %v196_v26  ;;  %444 = vmatprep.mubr.f32.mxu0 %v43_v28 }
  0x57   :  { %907 = vmatpush3.msra.mxu0 %v196_v26  ;;  %957 = vmatpush3.msra.mxu1 %v196_v26 }
  0x58   :  { %445 = vmatmul.mubr.f32.gmra.mxu0 %v42_v29  ;;  %908 = vmatprep.subr.mxu0 %v195_v30 }
  0x59   :  { %942 = vmatprep.subr.mxu1 %v195_v30  ;;  %529 = vmatprep.mubr.f32.mxu1 %v45_v31 }
  0x5a   :  { %909 = vmatpush3.msra.mxu0 %v195_v30  ;;  %958 = vmatpush3.msra.mxu1 %v195_v30 }
  0x5b   :  { %910 = vmatprep.subr.mxu0 %v194_v32  ;;  %530 = vmatmul.mubr.f32.gmra.mxu1 %v44_v33 }
  0x5c   :  { %943 = vmatprep.subr.mxu1 %v194_v32  ;;  %449 = vmatprep.mubr.f32.mxu0 %v52_v34 }
  0x5d   :  { %911 = vmatpush3.msra.mxu0 %v194_v32  ;;  %959 = vmatpush3.msra.mxu1 %v194_v32 }
  0x5e   :  { %450 = vmatmul.mubr.f32.gmra.mxu0 %v51_v35  ;;  %912 = vmatprep.subr.mxu0 %v193_v36 }
  0x5f   :  { %944 = vmatprep.subr.mxu1 %v193_v36  ;;  %534 = vmatprep.mubr.f32.mxu1 %v54_v37 }
  0x60   :  { %913 = vmatpush3.msra.mxu0 %v193_v36  ;;  %960 = vmatpush3.msra.mxu1 %v193_v36 }
  0x61   :  { %914 = vmatprep.subr.mxu0 %v192_v38  ;;  %535 = vmatmul.mubr.f32.gmra.mxu1 %v53_v39 }
  0x62   :  { %945 = vmatprep.subr.mxu1 %v192_v38  ;;  %915 = vmatpush3.msra.mxu0 %v192_v38 }
  0x63   :  { %961 = vmatpush3.msra.mxu1 %v192_v38  ;;  %916 = vmatprep.subr.mxu0 %v191_v40 }
  0x64   :  { %946 = vmatprep.subr.mxu1 %v191_v40  ;;  %917 = vmatpush3.msra.mxu0 %v191_v40 }
  0x65   :  { %962 = vmatpush3.msra.mxu1 %v191_v40  ;;  %918 = vmatprep.subr.mxu0 %v190_v41 }
  0x66   :  { %947 = vmatprep.subr.mxu1 %v190_v41  ;;  %919 = vmatpush3.msra.mxu0 %v190_v41 }
  0x67   :  { %963 = vmatpush3.msra.mxu1 %v190_v41  ;;  %920 = vmatprep.subr.mxu0 %v189_v42 }
  0x68   :  { %948 = vmatprep.subr.mxu1 %v189_v42  ;;  %921 = vmatpush3.msra.mxu0 %v189_v42 }
  0x69   :  { %964 = vmatpush3.msra.mxu1 %v189_v42  ;;  %922 = vmatprep.subr.mxu0 %v188_v43 }
  0x6a   :  { %949 = vmatprep.subr.mxu1 %v188_v43  ;;  %923 = vmatpush3.msra.mxu0 %v188_v43 }
  0x6b   :  { %965 = vmatpush3.msra.mxu1 %v188_v43  ;;  %924 = vmatprep.subr.mxu0 %v187_v44 }
  0x6c   :  { %950 = vmatprep.subr.mxu1 %v187_v44  ;;  %925 = vmatpush3.msra.mxu0 %v187_v44 }
  0x6d   :  { %966 = vmatpush3.msra.mxu1 %v187_v44  ;;  %926 = vmatprep.subr.mxu0 %v186_v45 }
  0x6e   :  { %951 = vmatprep.subr.mxu1 %v186_v45  ;;  %927 = vmatpush3.msra.mxu0 %v186_v45 }
  0x6f   :  { %967 = vmatpush3.msra.mxu1 %v186_v45  ;;  %928 = vmatprep.subr.mxu0 %v185_v46 }
  0x70   :  { %952 = vmatprep.subr.mxu1 %v185_v46  ;;  %929 = vmatpush3.msra.mxu0 %v185_v46 }
  0x71   :  { %968 = vmatpush3.msra.mxu1 %v185_v46  ;;  %930 = vmatprep.subr.mxu0 %v184_v47 }
  0x72   :  { %953 = vmatprep.subr.mxu1 %v184_v47  ;;  %931 = vmatpush3.msra.mxu0 %v184_v47 }
  0x73   :  { %969 = vmatpush3.msra.mxu1 %v184_v47  ;;  %932 = vmatprep.mubr.f32.mxu0 %v28_v48 }
  0x74   :  { %935 = vmatprep.mubr.f32.mxu1 %v46_v49  ;;  %933 = vmatmul.mubr.f32.vlgmr.msra.gmra.mxu0 %v37_v50 }
  0x75   :  { %936 = vmatmul.mubr.f32.vlgmr.msra.gmra.mxu1 %v55_v51 }
  0xe4   :  { %v736_v52 = vpop.f32.mrf.mxu0 }
  0xe5   :  { %v780_v54 = vpop.f32.mrf.mxu1 }
  0xe6   :  { %v737_v53 = vpop.f32.mrf.mxu0 }
  0xe7   :  { %v781_v56 = vpop.f32.mrf.mxu1  ;;  %v738_v15 = vadd.f32 %v737_v53, %v736_v52 }
  0xe8   :  { %v782_v16 = vadd.f32 %v781_v56, %v780_v54 }
  0xea   :  { %v352_v25 = vadd.f32 %v782_v16, %v738_v15 }
  0xf9   :  { %v739_v55 = vpop.f32.mrf.mxu0 }
  0xfa   :  { %v783_v58 = vpop.f32.mrf.mxu1 }
  0xfb   :  { %v740_v57 = vpop.f32.mrf.mxu0 }
  0xfc   :  { %v784_v60 = vpop.f32.mrf.mxu1  ;;  %v741_v19 = vadd.f32 %v740_v57, %v739_v55 }
  0xfd   :  { %v785_v20 = vadd.f32 %v784_v60, %v783_v58 }
  0xff   :  { %v742_v59 = vpop.f32.mrf.mxu0  ;;  %v357_v28 = vadd.f32 %v785_v20, %v741_v19 }
 0x100   :  { %v786_v62 = vpop.f32.mrf.mxu1 }
 0x101   :  { %v743_v61 = vpop.f32.mrf.mxu0 }
 0x102   :  { %v787_v0 = vpop.f32.mrf.mxu1  ;;  %v744_v21 = vadd.f32 %v743_v61, %v742_v59 }
 0x103   :  { %v788_v22 = vadd.f32 %v787_v0, %v786_v62 }
 0x105   :  { %v745_v63 = vpop.f32.mrf.mxu0  ;;  %v362_v32 = vadd.f32 %v788_v22, %v744_v21  ;;  %v702_v22 = vld [vmem:[%s1574_s2] ss:$0 sm:$0xff] }
 0x106   :  { %v789_v2 = vpop.f32.mrf.mxu1 }
 0x107   :  { %v746_v1 = vpop.f32.mrf.mxu0 }
 0x108   :  { %v790_v4 = vpop.f32.mrf.mxu1  ;;  %v747_v29 = vadd.f32 %v746_v1, %v745_v63 }
 0x109   :  { %v791_v30 = vadd.f32 %v790_v4, %v789_v2 }
 0x10b   :  { %v367_v39 = vadd.f32 %v791_v30, %v747_v29 }
 0x10c   :  { %v824_v3 = vpop.f32.mrf.mxu0 }
 0x10e   :  { %v868_v5 = vpop.f32.mrf.mxu1  ;;  %v825_v6 = vpop.f32.mrf.mxu0 }
 0x10f   :  { %v826_v23 = vadd.f32 %v825_v6, %v824_v3 }
 0x110   :  { %v869_v7 = vpop.f32.mrf.mxu1 }
 0x111   :  { %v437_v33 = vadd.f32 %v826_v23, %v352_v25  ;;  %v870_v34 = vadd.f32 %v869_v7, %v868_v5 }
 0x112   :  { %v827_v8 = vpop.f32.mrf.mxu0 }
 0x113   :  { %v522_v47 = vadd.f32 %v870_v34, %v437_v33  ;;  %v683_v33 = vld [vmem:[%s1576_s4 + $0x8] sm:$0xff]  ;;  %v684_v34 = vld [vmem:[%s1576_s4 + $0x10] sm:$0xff] }
 0x114   :  { %v828_v9 = vpop.f32.mrf.mxu0 }
 0x115   :  { %v871_v10 = vpop.f32.mrf.mxu1  ;;  %v829_v24 = vadd.f32 %v828_v9, %v827_v8 }
 0x117   :  { %v872_v12 = vpop.f32.mrf.mxu1  ;;  %v442_v35 = vadd.f32 %v829_v24, %v357_v28 }
 0x118   :  { %v830_v11 = vpop.f32.mrf.mxu0  ;;  %v873_v36 = vadd.f32 %v872_v12, %v871_v10 }
 0x11a   :  { %v831_v13 = vpop.f32.mrf.mxu0  ;;  %v527_v46 = vadd.f32 %v873_v36, %v442_v35  ;;  %v685_v35 = vld [vmem:[%s1576_s4 + $0x18] sm:$0xff] }
 0x11b   :  { %v874_v14 = vpop.f32.mrf.mxu1  ;;  %v832_v31 = vadd.f32 %v831_v13, %v830_v11 }
 0x11d   :  { %v875_v18 = vpop.f32.mrf.mxu1  ;;  %v447_v40 = vadd.f32 %v832_v31, %v362_v32  ;;  %v682_v32 = vld [vmem:[%s1576_s4] sm:$0xff] }
 0x11e   :  { %v833_v17 = vpop.f32.mrf.mxu0  ;;  %v876_v41 = vadd.f32 %v875_v18, %v874_v14 }
 0x120   :  { %v834_v26 = vpop.f32.mrf.mxu0  ;;  %v532_v52 = vadd.f32 %v876_v41, %v447_v40 }
 0x121   :  { %v877_v27 = vpop.f32.mrf.mxu1  ;;  %v835_v37 = vadd.f32 %v834_v26, %v833_v17 }
 0x123   :  { %v878_v38 = vpop.f32.mrf.mxu1  ;;  %v452_v44 = vadd.f32 %v835_v37, %v367_v39 }
 0x124   :  { %v879_v45 = vadd.f32 %v878_v38, %v877_v27  ;;  %v703_v27 = vld [vmem:[%s1575_s3] ss:$0 sm:$0xff] }
 0x126   :  { %v537_v53 = vadd.f32 %v879_v45, %v452_v44 }
 0x134   :  { %v934_v42 = vpop.f32.mrf.mxu0 }
 0x135   :  { %v937_v43 = vpop.f32.mrf.mxu1  ;;  %v612_v50 = vadd.f32 %v934_v42, %v527_v46 }
 0x136   :  { %v606_v48 = vpop.f32.mrf.mxu0  ;;  %v622_v56 = vadd.f32 %v937_v43, %v537_v53 }
 0x137   :  { %v616_v49 = vpop.f32.mrf.mxu1  ;;  %v607_v51 = vadd.f32 %v606_v48, %v522_v47 }
 0x138   :  { %v617_v55 = vadd.f32 %v616_v49, %v532_v52 }
 0x139   :  { %v625_v54 = vadd.f32 %v612_v50, %v607_v51 }
 0x13b   :  { %v626_v57 = vadd.f32 %v625_v54, %v617_v55 }
 0x13d   :  { %v627_v58 = vadd.f32 %v626_v57, %v622_v56 }
 0x13f   :  { %v628_v59 = vrot.slane %v627_v58, 4 }
 0x141   :  { %v629_v60 = vadd.f32 %v628_v59, %v627_v58 }
 0x143   :  { %v630_v61 = vrot.slane %v629_v60, 2 }
 0x145   :  { %v631_v62 = vadd.f32 %v630_v61, %v629_v60 }
 0x147   :  { %v632_v63 = vrot.slane %v631_v62, 1 }
 0x149   :  { %v633_v0 = vadd.f32 %v632_v63, %v631_v62 }
 0x14b   :  { %v635_v1 = vmul.f32 0.03125, %v633_v0 }
 0x14d   :  { %v636_v2 = vsub.f32 %v607_v51, %v635_v1  ;;  %v637_v3 = vsub.f32 %v612_v50, %v635_v1  ;;  %v638_v4 = vsub.f32 %v617_v55, %v635_v1  ;;  %v639_v5 = vsub.f32 %v622_v56, %v635_v1 }
 0x14f   :  { %v640_v6 = vmul.f32 %v636_v2, %v636_v2  ;;  %v641_v7 = vmul.f32 %v637_v3, %v637_v3  ;;  %v642_v8 = vmul.f32 %v638_v4, %v638_v4  ;;  %v643_v10 = vmul.f32 %v639_v5, %v639_v5 }
 0x151   :  { %v644_v9 = vadd.f32 %v641_v7, %v640_v6 }
 0x153   :  { %v645_v11 = vadd.f32 %v644_v9, %v642_v8 }
 0x155   :  { %v646_v12 = vadd.f32 %v645_v11, %v643_v10 }
 0x157   :  { %v647_v13 = vrot.slane %v646_v12, 4 }
 0x159   :  { %v648_v14 = vadd.f32 %v647_v13, %v646_v12 }
 0x15b   :  { %v649_v15 = vrot.slane %v648_v14, 2 }
 0x15d   :  { %v650_v16 = vadd.f32 %v649_v15, %v648_v14 }
 0x15f   :  { %v651_v17 = vrot.slane %v650_v16, 1 }
 0x161   :  { %v652_v18 = vadd.f32 %v651_v17, %v650_v16 }
 0x163   :  { %v653_v19 = vmul.f32 0.03125, %v652_v18 }
 0x165   :  { %v654_v20 = vadd.f32 1e-05, %v653_v19 }
 0x167   :  { %970 = vrsqrt.f32 %v654_v20 }
 0x174   :  { %v971_v21 = vpop.eup %970 }
 0x175   :  { %v656_v23 = vmul.f32 %v971_v21, %v636_v2  ;;  %v657_v24 = vmul.f32 %v971_v21, %v637_v3  ;;  %v658_v25 = vmul.f32 %v971_v21, %v638_v4  ;;  %v659_v26 = vmul.f32 %v971_v21, %v639_v5 }
 0x177   :  { %v667_v28 = vmul.f32 %v702_v22, %v656_v23  ;;  %v668_v29 = vmul.f32 %v702_v22, %v657_v24  ;;  %v669_v30 = vmul.f32 %v702_v22, %v658_v25  ;;  %v670_v31 = vmul.f32 %v702_v22, %v659_v26 }
 0x179   :  { %v678_v36 = vadd.f32 %v703_v27, %v667_v28  ;;  %v679_v37 = vadd.f32 %v703_v27, %v668_v29  ;;  %v680_v38 = vadd.f32 %v703_v27, %v669_v30  ;;  %v681_v39 = vadd.f32 %v703_v27, %v670_v31 }
 0x17b   :  { %v686_v40 = vadd.f32 %v682_v32, %v678_v36  ;;  %v687_v41 = vadd.f32 %v683_v33, %v679_v37  ;;  %v688_v42 = vadd.f32 %v684_v34, %v680_v38  ;;  %v689_v43 = vadd.f32 %v685_v35, %v681_v39 }
 0x17d   :  { %v690_v44 = vmax.f32 %v686_v40, 0.0  ;;  %v691_v45 = vmax.f32 %v687_v41, 0.0  ;;  %v692_v46 = vmax.f32 %v688_v42, 0.0  ;;  %v693_v47 = vmax.f32 %v689_v43, 0.0 }
 0x17f   :  { %694 = vst [vmem:[%s1577_s5] sm:$0xff] %v690_v44  ;;  %695 = vst [vmem:[%s1577_s5 + $0x8] sm:$0xff] %v691_v45 }
 0x180   :  { %696 = vst [vmem:[%s1577_s5 + $0x10] sm:$0xff] %v692_v46  ;;  %697 = vst [vmem:[%s1577_s5 + $0x18] sm:$0xff] %v693_v47 }

// kernel: heatmap2feat_forward.24
= control target key start
LH: loop header
LB: loop body
LE: loop exit
PB: predicated region body
PF: predicated region fallthrough
CT: control target
= control target key end

     0   :  { %s1544_s1 = inlined_call_operand.vmem [shape: f32[1152,128], index: 1, kind: input, shape index: {}]   ;;  %s1545_s0 = inlined_call_operand.vmem [shape: f32[32,1152], index: 0, kind: input, shape index: {}]   ;;  %s1546_s2 = inlined_call_operand.vmem [shape: f32[1,128], index: 2, kind: input, shape index: {}]   ;;  %s1547_s3 = inlined_call_operand.vmem [shape: f32[1,128], index: 3, kind: input, shape index: {}]   ;;  %s1548_s4 = inlined_call_operand.vmem [shape: f32[32,128], index: 4, kind: output, shape index: {}]  }
   0x1   :  { %v84_v0 = vld [vmem:[%s1544_s1 + $0xf8] sm:$0xff]  ;;  %v83_v4 = vld [vmem:[%s1544_s1 + $0xf0] sm:$0xff]  ;;  %v82_v8 = vld [vmem:[%s1544_s1 + $0xe8] sm:$0xff] }
   0x2   :  { %v116_v1 = vld [vmem:[%s1544_s1 + $0x1f8] sm:$0xff]  ;;  %693 = vmatprep.subr.mxu0 %v84_v0  ;;  %v115_v5 = vld [vmem:[%s1544_s1 + $0x1f0] sm:$0xff]  ;;  %v114_v9 = vld [vmem:[%s1544_s1 + $0x1e8] sm:$0xff] }
   0x3   :  { %v68_v2 = vld [vmem:[%s1544_s1 + $0x78] sm:$0xff]  ;;  %737 = vmatprep.subr.mxu1 %v116_v1  ;;  %v67_v6 = vld [vmem:[%s1544_s1 + $0x70] sm:$0xff]  ;;  %v66_v10 = vld [vmem:[%s1544_s1 + $0x68] sm:$0xff] }
   0x4   :  { %v100_v3 = vld [vmem:[%s1544_s1 + $0x178] sm:$0xff]  ;;  %694 = vmatpush3.msra.mxu0 %v68_v2  ;;  %v99_v7 = vld [vmem:[%s1544_s1 + $0x170] sm:$0xff]  ;;  %v98_v11 = vld [vmem:[%s1544_s1 + $0x168] sm:$0xff] }
   0x5   :  { %738 = vmatpush3.msra.mxu1 %v100_v3  ;;  %695 = vmatprep.subr.mxu0 %v83_v4  ;;  %v81_v12 = vld [vmem:[%s1544_s1 + $0xe0] sm:$0xff]  ;;  %v80_v16 = vld [vmem:[%s1544_s1 + $0xd8] sm:$0xff]  ;;  %v79_v20 = vld [vmem:[%s1544_s1 + $0xd0] sm:$0xff] }
   0x6   :  { %739 = vmatprep.subr.mxu1 %v115_v5  ;;  %696 = vmatpush3.msra.mxu0 %v67_v6  ;;  %v113_v13 = vld [vmem:[%s1544_s1 + $0x1e0] sm:$0xff]  ;;  %v112_v17 = vld [vmem:[%s1544_s1 + $0x1d8] sm:$0xff]  ;;  %v111_v21 = vld [vmem:[%s1544_s1 + $0x1d0] sm:$0xff] }
   0x7   :  { %740 = vmatpush3.msra.mxu1 %v99_v7  ;;  %697 = vmatprep.subr.mxu0 %v82_v8  ;;  %v65_v14 = vld [vmem:[%s1544_s1 + $0x60] sm:$0xff]  ;;  %v64_v18 = vld [vmem:[%s1544_s1 + $0x58] sm:$0xff]  ;;  %v63_v22 = vld [vmem:[%s1544_s1 + $0x50] sm:$0xff] }
   0x8   :  { %741 = vmatprep.subr.mxu1 %v114_v9  ;;  %v97_v15 = vld [vmem:[%s1544_s1 + $0x160] sm:$0xff]  ;;  %698 = vmatpush3.msra.mxu0 %v66_v10  ;;  %v96_v19 = vld [vmem:[%s1544_s1 + $0x158] sm:$0xff]  ;;  %v95_v23 = vld [vmem:[%s1544_s1 + $0x150] sm:$0xff] }
   0x9   :  { %742 = vmatpush3.msra.mxu1 %v98_v11  ;;  %699 = vmatprep.subr.mxu0 %v81_v12  ;;  %v78_v24 = vld [vmem:[%s1544_s1 + $0xc8] sm:$0xff]  ;;  %v77_v28 = vld [vmem:[%s1544_s1 + $0xc0] sm:$0xff]  ;;  %v76_v32 = vld [vmem:[%s1544_s1 + $0xb8] sm:$0xff] }
   0xa   :  { %743 = vmatprep.subr.mxu1 %v113_v13  ;;  %700 = vmatpush3.msra.mxu0 %v65_v14  ;;  %v110_v25 = vld [vmem:[%s1544_s1 + $0x1c8] sm:$0xff]  ;;  %v109_v29 = vld [vmem:[%s1544_s1 + $0x1c0] sm:$0xff]  ;;  %v108_v33 = vld [vmem:[%s1544_s1 + $0x1b8] sm:$0xff] }
   0xb   :  { %744 = vmatpush3.msra.mxu1 %v97_v15  ;;  %701 = vmatprep.subr.mxu0 %v80_v16  ;;  %v62_v26 = vld [vmem:[%s1544_s1 + $0x48] sm:$0xff]  ;;  %v61_v30 = vld [vmem:[%s1544_s1 + $0x40] sm:$0xff]  ;;  %v60_v34 = vld [vmem:[%s1544_s1 + $0x38] sm:$0xff] }
   0xc   :  { %745 = vmatprep.subr.mxu1 %v112_v17  ;;  %702 = vmatpush3.msra.mxu0 %v64_v18  ;;  %v94_v27 = vld [vmem:[%s1544_s1 + $0x148] sm:$0xff]  ;;  %v93_v31 = vld [vmem:[%s1544_s1 + $0x140] sm:$0xff]  ;;  %v92_v35 = vld [vmem:[%s1544_s1 + $0x138] sm:$0xff] }
   0xd   :  { %746 = vmatpush3.msra.mxu1 %v96_v19  ;;  %703 = vmatprep.subr.mxu0 %v79_v20  ;;  %v75_v36 = vld [vmem:[%s1544_s1 + $0xb0] sm:$0xff]  ;;  %v74_v40 = vld [vmem:[%s1544_s1 + $0xa8] sm:$0xff]  ;;  %v73_v44 = vld [vmem:[%s1544_s1 + $0xa0] sm:$0xff] }
   0xe   :  { %747 = vmatprep.subr.mxu1 %v111_v21  ;;  %704 = vmatpush3.msra.mxu0 %v63_v22  ;;  %v107_v37 = vld [vmem:[%s1544_s1 + $0x1b0] sm:$0xff]  ;;  %v106_v41 = vld [vmem:[%s1544_s1 + $0x1a8] sm:$0xff]  ;;  %v105_v45 = vld [vmem:[%s1544_s1 + $0x1a0] sm:$0xff] }
   0xf   :  { %748 = vmatpush3.msra.mxu1 %v95_v23  ;;  %705 = vmatprep.subr.mxu0 %v78_v24  ;;  %v59_v38 = vld [vmem:[%s1544_s1 + $0x30] sm:$0xff]  ;;  %v58_v42 = vld [vmem:[%s1544_s1 + $0x28] sm:$0xff]  ;;  %v57_v46 = vld [vmem:[%s1544_s1 + $0x20] sm:$0xff] }
  0x10   :  { %749 = vmatprep.subr.mxu1 %v110_v25  ;;  %706 = vmatpush3.msra.mxu0 %v62_v26  ;;  %v91_v39 = vld [vmem:[%s1544_s1 + $0x130] sm:$0xff]  ;;  %v90_v43 = vld [vmem:[%s1544_s1 + $0x128] sm:$0xff]  ;;  %v89_v47 = vld [vmem:[%s1544_s1 + $0x120] sm:$0xff] }
  0x11   :  { %750 = vmatpush3.msra.mxu1 %v94_v27  ;;  %707 = vmatprep.subr.mxu0 %v77_v28  ;;  %v72_v48 = vld [vmem:[%s1544_s1 + $0x98] sm:$0xff]  ;;  %v71_v52 = vld [vmem:[%s1544_s1 + $0x90] sm:$0xff]  ;;  %v70_v56 = vld [vmem:[%s1544_s1 + $0x88] sm:$0xff] }
  0x12   :  { %751 = vmatprep.subr.mxu1 %v109_v29  ;;  %708 = vmatpush3.msra.mxu0 %v61_v30  ;;  %v104_v49 = vld [vmem:[%s1544_s1 + $0x198] sm:$0xff]  ;;  %v103_v53 = vld [vmem:[%s1544_s1 + $0x190] sm:$0xff]  ;;  %v102_v57 = vld [vmem:[%s1544_s1 + $0x188] sm:$0xff] }
  0x13   :  { %752 = vmatpush3.msra.mxu1 %v93_v31  ;;  %709 = vmatprep.subr.mxu0 %v76_v32  ;;  %v56_v50 = vld [vmem:[%s1544_s1 + $0x18] sm:$0xff]  ;;  %v55_v54 = vld [vmem:[%s1544_s1 + $0x10] sm:$0xff]  ;;  %v54_v58 = vld [vmem:[%s1544_s1 + $0x8] sm:$0xff] }
  0x14   :  { %753 = vmatprep.subr.mxu1 %v108_v33  ;;  %710 = vmatpush3.msra.mxu0 %v60_v34  ;;  %v88_v51 = vld [vmem:[%s1544_s1 + $0x118] sm:$0xff]  ;;  %v87_v55 = vld [vmem:[%s1544_s1 + $0x110] sm:$0xff]  ;;  %v86_v59 = vld [vmem:[%s1544_s1 + $0x108] sm:$0xff] }
  0x15   :  { %754 = vmatpush3.msra.mxu1 %v92_v35  ;;  %711 = vmatprep.subr.mxu0 %v75_v36  ;;  %v69_v60 = vld [vmem:[%s1544_s1 + $0x80] sm:$0xff]  ;;  %v18_v63 = vld [vmem:[%s1545_s0 + $0x8] sm:$0xff]  ;;  %v20_v1 = vld [vmem:[%s1545_s0 + $0x18] sm:$0xff] }
  0x16   :  { %755 = vmatprep.subr.mxu1 %v107_v37  ;;  %712 = vmatpush3.msra.mxu0 %v59_v38  ;;  %v101_v61 = vld [vmem:[%s1544_s1 + $0x180] sm:$0xff]  ;;  %v19_v3 = vld [vmem:[%s1545_s0 + $0x10] sm:$0xff]  ;;  %v148_v4 = vld [vmem:[%s1544_s1 + $0x2f8] sm:$0xff] }
  0x17   :  { %756 = vmatpush3.msra.mxu1 %v91_v39  ;;  %713 = vmatprep.subr.mxu0 %v74_v40  ;;  %v53_v62 = vld [vmem:[%s1544_s1] sm:$0xff]  ;;  %v180_v5 = vld [vmem:[%s1544_s1 + $0x3f8] sm:$0xff]  ;;  %v147_v8 = vld [vmem:[%s1544_s1 + $0x2f0] sm:$0xff] }
  0x18   :  { %757 = vmatprep.subr.mxu1 %v106_v41  ;;  %714 = vmatpush3.msra.mxu0 %v58_v42  ;;  %v85_v0 = vld [vmem:[%s1544_s1 + $0x100] sm:$0xff]  ;;  %v132_v6 = vld [vmem:[%s1544_s1 + $0x278] sm:$0xff]  ;;  %v179_v9 = vld [vmem:[%s1544_s1 + $0x3f0] sm:$0xff] }
  0x19   :  { %758 = vmatpush3.msra.mxu1 %v90_v43  ;;  %715 = vmatprep.subr.mxu0 %v73_v44  ;;  %v17_v2 = vld [vmem:[%s1545_s0] sm:$0xff]  ;;  %v164_v7 = vld [vmem:[%s1544_s1 + $0x378] sm:$0xff]  ;;  %v131_v10 = vld [vmem:[%s1544_s1 + $0x270] sm:$0xff] }
  0x1a   :  { %759 = vmatprep.subr.mxu1 %v105_v45  ;;  %716 = vmatpush3.msra.mxu0 %v57_v46  ;;  %v163_v11 = vld [vmem:[%s1544_s1 + $0x370] sm:$0xff]  ;;  %v146_v12 = vld [vmem:[%s1544_s1 + $0x2e8] sm:$0xff]  ;;  %v145_v16 = vld [vmem:[%s1544_s1 + $0x2e0] sm:$0xff] }
  0x1b   :  { %760 = vmatpush3.msra.mxu1 %v89_v47  ;;  %717 = vmatprep.subr.mxu0 %v72_v48  ;;  %v178_v13 = vld [vmem:[%s1544_s1 + $0x3e8] sm:$0xff]  ;;  %v177_v17 = vld [vmem:[%s1544_s1 + $0x3e0] sm:$0xff]  ;;  %v144_v20 = vld [vmem:[%s1544_s1 + $0x2d8] sm:$0xff] }
  0x1c   :  { %761 = vmatprep.subr.mxu1 %v104_v49  ;;  %718 = vmatpush3.msra.mxu0 %v56_v50  ;;  %v130_v14 = vld [vmem:[%s1544_s1 + $0x268] sm:$0xff]  ;;  %v129_v18 = vld [vmem:[%s1544_s1 + $0x260] sm:$0xff]  ;;  %v176_v21 = vld [vmem:[%s1544_s1 + $0x3d8] sm:$0xff] }
  0x1d   :  { %762 = vmatpush3.msra.mxu1 %v88_v51  ;;  %719 = vmatprep.subr.mxu0 %v71_v52  ;;  %v162_v15 = vld [vmem:[%s1544_s1 + $0x368] sm:$0xff]  ;;  %v161_v19 = vld [vmem:[%s1544_s1 + $0x360] sm:$0xff]  ;;  %v128_v22 = vld [vmem:[%s1544_s1 + $0x258] sm:$0xff] }
  0x1e   :  { %763 = vmatprep.subr.mxu1 %v103_v53  ;;  %720 = vmatpush3.msra.mxu0 %v55_v54  ;;  %v160_v23 = vld [vmem:[%s1544_s1 + $0x358] sm:$0xff]  ;;  %v143_v24 = vld [vmem:[%s1544_s1 + $0x2d0] sm:$0xff]  ;;  %v142_v28 = vld [vmem:[%s1544_s1 + $0x2c8] sm:$0xff] }
  0x1f   :  { %764 = vmatpush3.msra.mxu1 %v87_v55  ;;  %721 = vmatprep.subr.mxu0 %v70_v56  ;;  %v175_v25 = vld [vmem:[%s1544_s1 + $0x3d0] sm:$0xff]  ;;  %v174_v29 = vld [vmem:[%s1544_s1 + $0x3c8] sm:$0xff]  ;;  %v141_v32 = vld [vmem:[%s1544_s1 + $0x2c0] sm:$0xff] }
  0x20   :  { %765 = vmatprep.subr.mxu1 %v102_v57  ;;  %722 = vmatpush3.msra.mxu0 %v54_v58  ;;  %v127_v26 = vld [vmem:[%s1544_s1 + $0x250] sm:$0xff]  ;;  %v126_v30 = vld [vmem:[%s1544_s1 + $0x248] sm:$0xff]  ;;  %v173_v33 = vld [vmem:[%s1544_s1 + $0x3c0] sm:$0xff] }
  0x21   :  { %766 = vmatpush3.msra.mxu1 %v86_v59  ;;  %723 = vmatprep.subr.mxu0 %v69_v60  ;;  %v159_v27 = vld [vmem:[%s1544_s1 + $0x350] sm:$0xff]  ;;  %v158_v31 = vld [vmem:[%s1544_s1 + $0x348] sm:$0xff]  ;;  %v125_v34 = vld [vmem:[%s1544_s1 + $0x240] sm:$0xff] }
  0x22   :  { %767 = vmatprep.subr.mxu1 %v101_v61  ;;  %724 = vmatpush3.msra.mxu0 %v53_v62  ;;  %v157_v35 = vld [vmem:[%s1544_s1 + $0x340] sm:$0xff]  ;;  %v140_v36 = vld [vmem:[%s1544_s1 + $0x2b8] sm:$0xff]  ;;  %v27_v40 = vld [vmem:[%s1545_s0 + $0x50] sm:$0xff] }
  0x23   :  { %261 = vmatprep.mubr.f32.mxu0 %v18_v63  ;;  %768 = vmatpush3.msra.mxu1 %v85_v0  ;;  %v172_v37 = vld [vmem:[%s1544_s1 + $0x3b8] sm:$0xff]  ;;  %v29_v41 = vld [vmem:[%s1545_s0 + $0x60] sm:$0xff]  ;;  %v139_v42 = vld [vmem:[%s1544_s1 + $0x2b0] sm:$0xff] }
  0x24   :  { %346 = vmatprep.mubr.f32.mxu1 %v20_v1  ;;  %262 = vmatmul.mubr.f32.vlgmr.msra.gmra.mxu0 %v17_v2  ;;  %v124_v38 = vld [vmem:[%s1544_s1 + $0x238] sm:$0xff]  ;;  %v171_v43 = vld [vmem:[%s1544_s1 + $0x3b0] sm:$0xff]  ;;  %v26_v44 = vld [vmem:[%s1545_s0 + $0x48] sm:$0xff] }
  0x25   :  { %347 = vmatmul.mubr.f32.vlgmr.msra.gmra.mxu1 %v19_v3  ;;  %781 = vmatprep.subr.mxu0 %v148_v4  ;;  %v156_v39 = vld [vmem:[%s1544_s1 + $0x338] sm:$0xff]  ;;  %v123_v46 = vld [vmem:[%s1544_s1 + $0x230] sm:$0xff]  ;;  %v138_v48 = vld [vmem:[%s1544_s1 + $0x2a8] sm:$0xff] }
  0x26   :  { %825 = vmatprep.subr.mxu1 %v180_v5  ;;  %782 = vmatpush3.msra.mxu0 %v132_v6  ;;  %v28_v45 = vld [vmem:[%s1545_s0 + $0x58] sm:$0xff]  ;;  %v155_v47 = vld [vmem:[%s1544_s1 + $0x330] sm:$0xff]  ;;  %v170_v49 = vld [vmem:[%s1544_s1 + $0x3a8] sm:$0xff] }
  0x27   :  { %826 = vmatpush3.msra.mxu1 %v164_v7  ;;  %783 = vmatprep.subr.mxu0 %v147_v8  ;;  %v122_v50 = vld [vmem:[%s1544_s1 + $0x228] sm:$0xff]  ;;  %v36_v52 = vld [vmem:[%s1545_s0 + $0x98] sm:$0xff]  ;;  %v137_v54 = vld [vmem:[%s1544_s1 + $0x2a0] sm:$0xff] }
  0x28   :  { %827 = vmatprep.subr.mxu1 %v179_v9  ;;  %784 = vmatpush3.msra.mxu0 %v131_v10  ;;  %v154_v51 = vld [vmem:[%s1544_s1 + $0x328] sm:$0xff]  ;;  %v169_v55 = vld [vmem:[%s1544_s1 + $0x3a0] sm:$0xff]  ;;  %v35_v56 = vld [vmem:[%s1545_s0 + $0x90] sm:$0xff] }
  0x29   :  { %828 = vmatpush3.msra.mxu1 %v163_v11  ;;  %785 = vmatprep.subr.mxu0 %v146_v12  ;;  %v38_v53 = vld [vmem:[%s1545_s0 + $0xa8] sm:$0xff]  ;;  %v37_v57 = vld [vmem:[%s1545_s0 + $0xa0] sm:$0xff]  ;;  %v136_v60 = vld [vmem:[%s1544_s1 + $0x298] sm:$0xff] }
  0x2a   :  { %829 = vmatprep.subr.mxu1 %v178_v13  ;;  %786 = vmatpush3.msra.mxu0 %v130_v14  ;;  %v121_v58 = vld [vmem:[%s1544_s1 + $0x220] sm:$0xff]  ;;  %v168_v61 = vld [vmem:[%s1544_s1 + $0x398] sm:$0xff]  ;;  %v47_v1 = vld [vmem:[%s1545_s0 + $0xf0] sm:$0xff] }
  0x2b   :  { %830 = vmatpush3.msra.mxu1 %v162_v15  ;;  %787 = vmatprep.subr.mxu0 %v145_v16  ;;  %v153_v59 = vld [vmem:[%s1544_s1 + $0x320] sm:$0xff]  ;;  %v120_v62 = vld [vmem:[%s1544_s1 + $0x218] sm:$0xff]  ;;  %v135_v2 = vld [vmem:[%s1544_s1 + $0x290] sm:$0xff] }
  0x2c   :  { %831 = vmatprep.subr.mxu1 %v177_v17  ;;  %788 = vmatpush3.msra.mxu0 %v129_v18  ;;  %v152_v63 = vld [vmem:[%s1544_s1 + $0x318] sm:$0xff]  ;;  %v45_v0 = vld [vmem:[%s1545_s0 + $0xe0] sm:$0xff]  ;;  %v167_v3 = vld [vmem:[%s1544_s1 + $0x390] sm:$0xff] }
  0x2d   :  { %832 = vmatpush3.msra.mxu1 %v161_v19  ;;  %789 = vmatprep.subr.mxu0 %v144_v20  ;;  %v44_v4 = vld [vmem:[%s1545_s0 + $0xd8] sm:$0xff]  ;;  %v46_v5 = vld [vmem:[%s1545_s0 + $0xe8] sm:$0xff]  ;;  %v119_v6 = vld [vmem:[%s1544_s1 + $0x210] sm:$0xff] }
  0x2e   :  { %833 = vmatprep.subr.mxu1 %v176_v21  ;;  %790 = vmatpush3.msra.mxu0 %v128_v22  ;;  %v151_v7 = vld [vmem:[%s1544_s1 + $0x310] sm:$0xff]  ;;  %v134_v8 = vld [vmem:[%s1544_s1 + $0x288] sm:$0xff]  ;;  %v133_v12 = vld [vmem:[%s1544_s1 + $0x280] sm:$0xff] }
  0x2f   :  { %834 = vmatpush3.msra.mxu1 %v160_v23  ;;  %791 = vmatprep.subr.mxu0 %v143_v24  ;;  %v166_v9 = vld [vmem:[%s1544_s1 + $0x388] sm:$0xff]  ;;  %v165_v13 = vld [vmem:[%s1544_s1 + $0x380] sm:$0xff]  ;;  %v24_v18 = vld [vmem:[%s1545_s0 + $0x38] sm:$0xff] }
  0x30   :  { %835 = vmatprep.subr.mxu1 %v175_v25  ;;  %792 = vmatpush3.msra.mxu0 %v127_v26  ;;  %v118_v10 = vld [vmem:[%s1544_s1 + $0x208] sm:$0xff]  ;;  %v117_v14 = vld [vmem:[%s1544_s1 + $0x200] sm:$0xff]  ;;  %v196_v19 = vld [vmem:[%s1544_s1 + $0x478] sm:$0xff] }
  0x31   :  { %836 = vmatpush3.msra.mxu1 %v159_v27  ;;  %793 = vmatprep.subr.mxu0 %v142_v28  ;;  %v150_v11 = vld [vmem:[%s1544_s1 + $0x308] sm:$0xff]  ;;  %v149_v16 = vld [vmem:[%s1544_s1 + $0x300] sm:$0xff]  ;;  %v23_v20 = vld [vmem:[%s1545_s0 + $0x30] sm:$0xff] }
  0x32   :  { %837 = vmatprep.subr.mxu1 %v174_v29  ;;  %794 = vmatpush3.msra.mxu0 %v126_v30  ;;  %v22_v15 = vld [vmem:[%s1545_s0 + $0x28] sm:$0xff]  ;;  %v21_v17 = vld [vmem:[%s1545_s0 + $0x20] sm:$0xff]  ;;  %v195_v21 = vld [vmem:[%s1544_s1 + $0x470] sm:$0xff] }
  0x33   :  { %838 = vmatpush3.msra.mxu1 %v158_v31  ;;  %795 = vmatprep.subr.mxu0 %v141_v32  ;;  %v31_v22 = vld [vmem:[%s1545_s0 + $0x70] sm:$0xff]  ;;  %v30_v23 = vld [vmem:[%s1545_s0 + $0x68] sm:$0xff]  ;;  %v33_v25 = vld [vmem:[%s1545_s0 + $0x80] sm:$0xff] }
  0x34   :  { %839 = vmatprep.subr.mxu1 %v173_v33  ;;  %796 = vmatpush3.msra.mxu0 %v125_v34  ;;  %v194_v24 = vld [vmem:[%s1544_s1 + $0x468] sm:$0xff]  ;;  %v193_v26 = vld [vmem:[%s1544_s1 + $0x460] sm:$0xff]  ;;  %v32_v27 = vld [vmem:[%s1545_s0 + $0x78] sm:$0xff] }
  0x35   :  { %840 = vmatpush3.msra.mxu1 %v157_v35  ;;  %797 = vmatprep.subr.mxu0 %v140_v36  ;;  %v40_v28 = vld [vmem:[%s1545_s0 + $0xb8] sm:$0xff]  ;;  %v39_v29 = vld [vmem:[%s1545_s0 + $0xb0] sm:$0xff]  ;;  %v42_v31 = vld [vmem:[%s1545_s0 + $0xc8] sm:$0xff] }
  0x36   :  { %841 = vmatprep.subr.mxu1 %v172_v37  ;;  %798 = vmatpush3.msra.mxu0 %v124_v38  ;;  %v192_v30 = vld [vmem:[%s1544_s1 + $0x458] sm:$0xff]  ;;  %v191_v32 = vld [vmem:[%s1544_s1 + $0x450] sm:$0xff]  ;;  %v41_v33 = vld [vmem:[%s1545_s0 + $0xc0] sm:$0xff] }
  0x37   :  { %842 = vmatpush3.msra.mxu1 %v156_v39  ;;  %266 = vmatprep.mubr.f32.mxu0 %v27_v40  ;;  %v49_v34 = vld [vmem:[%s1545_s0 + $0x100] sm:$0xff]  ;;  %v48_v35 = vld [vmem:[%s1545_s0 + $0xf8] sm:$0xff]  ;;  %v190_v36 = vld [vmem:[%s1544_s1 + $0x448] sm:$0xff] }
  0x38   :  { %351 = vmatprep.mubr.f32.mxu1 %v29_v41  ;;  %799 = vmatprep.subr.mxu0 %v139_v42  ;;  %v51_v37 = vld [vmem:[%s1545_s0 + $0x110] sm:$0xff]  ;;  %v189_v38 = vld [vmem:[%s1544_s1 + $0x440] sm:$0xff]  ;;  %v50_v39 = vld [vmem:[%s1545_s0 + $0x108] sm:$0xff] }
  0x39   :  { %843 = vmatprep.subr.mxu1 %v171_v43  ;;  %267 = vmatmul.mubr.f32.gmra.mxu0 %v26_v44  ;;  %v188_v40 = vld [vmem:[%s1544_s1 + $0x438] sm:$0xff]  ;;  %v187_v41 = vld [vmem:[%s1544_s1 + $0x430] sm:$0xff]  ;;  %v186_v42 = vld [vmem:[%s1544_s1 + $0x428] sm:$0xff] }
  0x3a   :  { %352 = vmatmul.mubr.f32.gmra.mxu1 %v28_v45  ;;  %800 = vmatpush3.msra.mxu0 %v123_v46  ;;  %v185_v43 = vld [vmem:[%s1544_s1 + $0x420] sm:$0xff]  ;;  %v184_v44 = vld [vmem:[%s1544_s1 + $0x418] sm:$0xff]  ;;  %v183_v45 = vld [vmem:[%s1544_s1 + $0x410] sm:$0xff] }
  0x3b   :  { %844 = vmatpush3.msra.mxu1 %v155_v47  ;;  %801 = vmatprep.subr.mxu0 %v138_v48  ;;  %v182_v46 = vld [vmem:[%s1544_s1 + $0x408] sm:$0xff]  ;;  %v181_v47 = vld [vmem:[%s1544_s1 + $0x400] sm:$0xff] }
  0x3c   :  { %845 = vmatprep.subr.mxu1 %v170_v49  ;;  %802 = vmatpush3.msra.mxu0 %v122_v50  ;;  %v25_v48 = vld [vmem:[%s1545_s0 + $0x40] sm:$0xff]  ;;  %v43_v49 = vld [vmem:[%s1545_s0 + $0xd0] sm:$0xff]  ;;  %v34_v50 = vld [vmem:[%s1545_s0 + $0x88] sm:$0xff] }
  0x3d   :  { %846 = vmatpush3.msra.mxu1 %v154_v51  ;;  %271 = vmatprep.mubr.f32.mxu0 %v36_v52  ;;  %v52_v51 = vld [vmem:[%s1545_s0 + $0x118] sm:$0xff] }
  0x3e   :  { %356 = vmatprep.mubr.f32.mxu1 %v38_v53  ;;  %803 = vmatprep.subr.mxu0 %v137_v54 }
  0x3f   :  { %847 = vmatprep.subr.mxu1 %v169_v55  ;;  %272 = vmatmul.mubr.f32.gmra.mxu0 %v35_v56 }
  0x40   :  { %357 = vmatmul.mubr.f32.gmra.mxu1 %v37_v57  ;;  %804 = vmatpush3.msra.mxu0 %v121_v58 }
  0x41   :  { %848 = vmatpush3.msra.mxu1 %v153_v59  ;;  %805 = vmatprep.subr.mxu0 %v136_v60 }
  0x42   :  { %849 = vmatprep.subr.mxu1 %v168_v61  ;;  %806 = vmatpush3.msra.mxu0 %v120_v62 }
  0x43   :  { %850 = vmatpush3.msra.mxu1 %v152_v63  ;;  %276 = vmatprep.mubr.f32.mxu0 %v45_v0 }
  0x44   :  { %361 = vmatprep.mubr.f32.mxu1 %v47_v1  ;;  %807 = vmatprep.subr.mxu0 %v135_v2 }
  0x45   :  { %851 = vmatprep.subr.mxu1 %v167_v3  ;;  %277 = vmatmul.mubr.f32.gmra.mxu0 %v44_v4 }
  0x46   :  { %362 = vmatmul.mubr.f32.gmra.mxu1 %v46_v5  ;;  %808 = vmatpush3.msra.mxu0 %v119_v6 }
  0x47   :  { %852 = vmatpush3.msra.mxu1 %v151_v7  ;;  %809 = vmatprep.subr.mxu0 %v134_v8 }
  0x48   :  { %853 = vmatprep.subr.mxu1 %v166_v9  ;;  %810 = vmatpush3.msra.mxu0 %v118_v10 }
  0x49   :  { %854 = vmatpush3.msra.mxu1 %v150_v11  ;;  %811 = vmatprep.subr.mxu0 %v133_v12 }
  0x4a   :  { %855 = vmatprep.subr.mxu1 %v165_v13  ;;  %812 = vmatpush3.msra.mxu0 %v117_v14 }
  0x4b   :  { %431 = vmatprep.mubr.f32.mxu0 %v22_v15  ;;  %856 = vmatpush3.msra.mxu1 %v149_v16 }
  0x4c   :  { %432 = vmatmul.mubr.f32.vlgmr.msra.gmra.mxu0 %v21_v17  ;;  %516 = vmatprep.mubr.f32.mxu1 %v24_v18 }
  0x4d   :  { %889 = vmatprep.subr.mxu0 %v196_v19  ;;  %927 = vmatprep.subr.mxu1 %v196_v19 }
  0x4e   :  { %517 = vmatmul.mubr.f32.vlgmr.msra.gmra.mxu1 %v23_v20  ;;  %890 = vmatpush3.msra.mxu0 %v196_v19 }
  0x4f   :  { %943 = vmatpush3.msra.mxu1 %v196_v19  ;;  %891 = vmatprep.subr.mxu0 %v195_v21 }
  0x50   :  { %928 = vmatprep.subr.mxu1 %v195_v21  ;;  %436 = vmatprep.mubr.f32.mxu0 %v31_v22 }
  0x51   :  { %892 = vmatpush3.msra.mxu0 %v195_v21  ;;  %944 = vmatpush3.msra.mxu1 %v195_v21 }
  0x52   :  { %437 = vmatmul.mubr.f32.gmra.mxu0 %v30_v23  ;;  %893 = vmatprep.subr.mxu0 %v194_v24 }
  0x53   :  { %929 = vmatprep.subr.mxu1 %v194_v24  ;;  %521 = vmatprep.mubr.f32.mxu1 %v33_v25 }
  0x54   :  { %894 = vmatpush3.msra.mxu0 %v194_v24  ;;  %945 = vmatpush3.msra.mxu1 %v194_v24 }
  0x55   :  { %895 = vmatprep.subr.mxu0 %v193_v26  ;;  %522 = vmatmul.mubr.f32.gmra.mxu1 %v32_v27 }
  0x56   :  { %930 = vmatprep.subr.mxu1 %v193_v26  ;;  %441 = vmatprep.mubr.f32.mxu0 %v40_v28 }
  0x57   :  { %896 = vmatpush3.msra.mxu0 %v193_v26  ;;  %946 = vmatpush3.msra.mxu1 %v193_v26 }
  0x58   :  { %442 = vmatmul.mubr.f32.gmra.mxu0 %v39_v29  ;;  %897 = vmatprep.subr.mxu0 %v192_v30 }
  0x59   :  { %931 = vmatprep.subr.mxu1 %v192_v30  ;;  %526 = vmatprep.mubr.f32.mxu1 %v42_v31 }
  0x5a   :  { %898 = vmatpush3.msra.mxu0 %v192_v30  ;;  %947 = vmatpush3.msra.mxu1 %v192_v30 }
  0x5b   :  { %899 = vmatprep.subr.mxu0 %v191_v32  ;;  %527 = vmatmul.mubr.f32.gmra.mxu1 %v41_v33 }
  0x5c   :  { %932 = vmatprep.subr.mxu1 %v191_v32  ;;  %446 = vmatprep.mubr.f32.mxu0 %v49_v34 }
  0x5d   :  { %900 = vmatpush3.msra.mxu0 %v191_v32  ;;  %948 = vmatpush3.msra.mxu1 %v191_v32 }
  0x5e   :  { %447 = vmatmul.mubr.f32.gmra.mxu0 %v48_v35  ;;  %901 = vmatprep.subr.mxu0 %v190_v36 }
  0x5f   :  { %933 = vmatprep.subr.mxu1 %v190_v36  ;;  %531 = vmatprep.mubr.f32.mxu1 %v51_v37 }
  0x60   :  { %902 = vmatpush3.msra.mxu0 %v190_v36  ;;  %949 = vmatpush3.msra.mxu1 %v190_v36 }
  0x61   :  { %903 = vmatprep.subr.mxu0 %v189_v38  ;;  %532 = vmatmul.mubr.f32.gmra.mxu1 %v50_v39 }
  0x62   :  { %934 = vmatprep.subr.mxu1 %v189_v38  ;;  %904 = vmatpush3.msra.mxu0 %v189_v38 }
  0x63   :  { %950 = vmatpush3.msra.mxu1 %v189_v38  ;;  %905 = vmatprep.subr.mxu0 %v188_v40 }
  0x64   :  { %935 = vmatprep.subr.mxu1 %v188_v40  ;;  %906 = vmatpush3.msra.mxu0 %v188_v40 }
  0x65   :  { %951 = vmatpush3.msra.mxu1 %v188_v40  ;;  %907 = vmatprep.subr.mxu0 %v187_v41 }
  0x66   :  { %936 = vmatprep.subr.mxu1 %v187_v41  ;;  %908 = vmatpush3.msra.mxu0 %v187_v41 }
  0x67   :  { %952 = vmatpush3.msra.mxu1 %v187_v41  ;;  %909 = vmatprep.subr.mxu0 %v186_v42 }
  0x68   :  { %937 = vmatprep.subr.mxu1 %v186_v42  ;;  %910 = vmatpush3.msra.mxu0 %v186_v42 }
  0x69   :  { %953 = vmatpush3.msra.mxu1 %v186_v42  ;;  %911 = vmatprep.subr.mxu0 %v185_v43 }
  0x6a   :  { %938 = vmatprep.subr.mxu1 %v185_v43  ;;  %912 = vmatpush3.msra.mxu0 %v185_v43 }
  0x6b   :  { %954 = vmatpush3.msra.mxu1 %v185_v43  ;;  %913 = vmatprep.subr.mxu0 %v184_v44 }
  0x6c   :  { %939 = vmatprep.subr.mxu1 %v184_v44  ;;  %914 = vmatpush3.msra.mxu0 %v184_v44 }
  0x6d   :  { %955 = vmatpush3.msra.mxu1 %v184_v44  ;;  %915 = vmatprep.subr.mxu0 %v183_v45 }
  0x6e   :  { %940 = vmatprep.subr.mxu1 %v183_v45  ;;  %916 = vmatpush3.msra.mxu0 %v183_v45 }
  0x6f   :  { %956 = vmatpush3.msra.mxu1 %v183_v45  ;;  %917 = vmatprep.subr.mxu0 %v182_v46 }
  0x70   :  { %941 = vmatprep.subr.mxu1 %v182_v46  ;;  %918 = vmatpush3.msra.mxu0 %v182_v46 }
  0x71   :  { %957 = vmatpush3.msra.mxu1 %v182_v46  ;;  %919 = vmatprep.subr.mxu0 %v181_v47 }
  0x72   :  { %942 = vmatprep.subr.mxu1 %v181_v47  ;;  %920 = vmatpush3.msra.mxu0 %v181_v47 }
  0x73   :  { %958 = vmatpush3.msra.mxu1 %v181_v47  ;;  %921 = vmatprep.mubr.f32.mxu0 %v25_v48 }
  0x74   :  { %924 = vmatprep.mubr.f32.mxu1 %v43_v49  ;;  %922 = vmatmul.mubr.f32.vlgmr.msra.gmra.mxu0 %v34_v50 }
  0x75   :  { %925 = vmatmul.mubr.f32.vlgmr.msra.gmra.mxu1 %v52_v51 }
  0xe4   :  { %v725_v52 = vpop.f32.mrf.mxu0 }
  0xe5   :  { %v769_v54 = vpop.f32.mrf.mxu1 }
  0xe6   :  { %v726_v53 = vpop.f32.mrf.mxu0 }
  0xe7   :  { %v770_v56 = vpop.f32.mrf.mxu1  ;;  %v727_v15 = vadd.f32 %v726_v53, %v725_v52 }
  0xe8   :  { %v771_v16 = vadd.f32 %v770_v56, %v769_v54 }
  0xea   :  { %v349_v25 = vadd.f32 %v771_v16, %v727_v15 }
  0xf9   :  { %v728_v55 = vpop.f32.mrf.mxu0 }
  0xfa   :  { %v772_v58 = vpop.f32.mrf.mxu1 }
  0xfb   :  { %v729_v57 = vpop.f32.mrf.mxu0 }
  0xfc   :  { %v773_v60 = vpop.f32.mrf.mxu1  ;;  %v730_v19 = vadd.f32 %v729_v57, %v728_v55 }
  0xfd   :  { %v774_v20 = vadd.f32 %v773_v60, %v772_v58 }
  0xff   :  { %v731_v59 = vpop.f32.mrf.mxu0  ;;  %v354_v28 = vadd.f32 %v774_v20, %v730_v19 }
 0x100   :  { %v775_v62 = vpop.f32.mrf.mxu1 }
 0x101   :  { %v732_v61 = vpop.f32.mrf.mxu0 }
 0x102   :  { %v776_v0 = vpop.f32.mrf.mxu1  ;;  %v733_v21 = vadd.f32 %v732_v61, %v731_v59 }
 0x103   :  { %v777_v22 = vadd.f32 %v776_v0, %v775_v62 }
 0x105   :  { %v734_v63 = vpop.f32.mrf.mxu0  ;;  %v359_v32 = vadd.f32 %v777_v22, %v733_v21  ;;  %v691_v22 = vld [vmem:[%s1546_s2] ss:$0 sm:$0xff] }
 0x106   :  { %v778_v2 = vpop.f32.mrf.mxu1 }
 0x107   :  { %v735_v1 = vpop.f32.mrf.mxu0 }
 0x108   :  { %v779_v4 = vpop.f32.mrf.mxu1  ;;  %v736_v29 = vadd.f32 %v735_v1, %v734_v63 }
 0x109   :  { %v780_v30 = vadd.f32 %v779_v4, %v778_v2 }
 0x10b   :  { %v364_v39 = vadd.f32 %v780_v30, %v736_v29 }
 0x10c   :  { %v813_v3 = vpop.f32.mrf.mxu0 }
 0x10e   :  { %v857_v5 = vpop.f32.mrf.mxu1  ;;  %v814_v6 = vpop.f32.mrf.mxu0 }
 0x10f   :  { %v815_v23 = vadd.f32 %v814_v6, %v813_v3 }
 0x110   :  { %v858_v7 = vpop.f32.mrf.mxu1 }
 0x111   :  { %v434_v33 = vadd.f32 %v815_v23, %v349_v25  ;;  %v859_v34 = vadd.f32 %v858_v7, %v857_v5 }
 0x112   :  { %v816_v8 = vpop.f32.mrf.mxu0 }
 0x113   :  { %v519_v47 = vadd.f32 %v859_v34, %v434_v33 }
 0x114   :  { %v817_v9 = vpop.f32.mrf.mxu0 }
 0x115   :  { %v860_v10 = vpop.f32.mrf.mxu1  ;;  %v818_v24 = vadd.f32 %v817_v9, %v816_v8 }
 0x117   :  { %v861_v12 = vpop.f32.mrf.mxu1  ;;  %v439_v35 = vadd.f32 %v818_v24, %v354_v28 }
 0x118   :  { %v819_v11 = vpop.f32.mrf.mxu0  ;;  %v862_v36 = vadd.f32 %v861_v12, %v860_v10 }
 0x11a   :  { %v820_v13 = vpop.f32.mrf.mxu0  ;;  %v524_v46 = vadd.f32 %v862_v36, %v439_v35 }
 0x11b   :  { %v863_v14 = vpop.f32.mrf.mxu1  ;;  %v821_v31 = vadd.f32 %v820_v13, %v819_v11 }
 0x11d   :  { %v864_v18 = vpop.f32.mrf.mxu1  ;;  %v444_v40 = vadd.f32 %v821_v31, %v359_v32 }
 0x11e   :  { %v822_v17 = vpop.f32.mrf.mxu0  ;;  %v865_v41 = vadd.f32 %v864_v18, %v863_v14 }
 0x120   :  { %v823_v26 = vpop.f32.mrf.mxu0  ;;  %v529_v52 = vadd.f32 %v865_v41, %v444_v40 }
 0x121   :  { %v866_v27 = vpop.f32.mrf.mxu1  ;;  %v824_v37 = vadd.f32 %v823_v26, %v822_v17 }
 0x123   :  { %v867_v38 = vpop.f32.mrf.mxu1  ;;  %v449_v44 = vadd.f32 %v824_v37, %v364_v39 }
 0x124   :  { %v868_v45 = vadd.f32 %v867_v38, %v866_v27  ;;  %v692_v27 = vld [vmem:[%s1547_s3] ss:$0 sm:$0xff] }
 0x126   :  { %v534_v53 = vadd.f32 %v868_v45, %v449_v44 }
 0x134   :  { %v923_v42 = vpop.f32.mrf.mxu0 }
 0x135   :  { %v926_v43 = vpop.f32.mrf.mxu1  ;;  %v609_v50 = vadd.f32 %v923_v42, %v524_v46 }
 0x136   :  { %v603_v48 = vpop.f32.mrf.mxu0  ;;  %v619_v56 = vadd.f32 %v926_v43, %v534_v53 }
 0x137   :  { %v613_v49 = vpop.f32.mrf.mxu1  ;;  %v604_v51 = vadd.f32 %v603_v48, %v519_v47 }
 0x138   :  { %v614_v55 = vadd.f32 %v613_v49, %v529_v52 }
 0x139   :  { %v622_v54 = vadd.f32 %v609_v50, %v604_v51 }
 0x13b   :  { %v623_v57 = vadd.f32 %v622_v54, %v614_v55 }
 0x13d   :  { %v624_v58 = vadd.f32 %v623_v57, %v619_v56 }
 0x13f   :  { %v625_v59 = vrot.slane %v624_v58, 4 }
 0x141   :  { %v626_v60 = vadd.f32 %v625_v59, %v624_v58 }
 0x143   :  { %v627_v61 = vrot.slane %v626_v60, 2 }
 0x145   :  { %v628_v62 = vadd.f32 %v627_v61, %v626_v60 }
 0x147   :  { %v629_v63 = vrot.slane %v628_v62, 1 }
 0x149   :  { %v630_v0 = vadd.f32 %v629_v63, %v628_v62 }
 0x14b   :  { %v632_v1 = vmul.f32 0.03125, %v630_v0 }
 0x14d   :  { %v633_v2 = vsub.f32 %v604_v51, %v632_v1  ;;  %v634_v3 = vsub.f32 %v609_v50, %v632_v1  ;;  %v635_v4 = vsub.f32 %v614_v55, %v632_v1  ;;  %v636_v5 = vsub.f32 %v619_v56, %v632_v1 }
 0x14f   :  { %v637_v6 = vmul.f32 %v633_v2, %v633_v2  ;;  %v638_v7 = vmul.f32 %v634_v3, %v634_v3  ;;  %v639_v8 = vmul.f32 %v635_v4, %v635_v4  ;;  %v640_v10 = vmul.f32 %v636_v5, %v636_v5 }
 0x151   :  { %v641_v9 = vadd.f32 %v638_v7, %v637_v6 }
 0x153   :  { %v642_v11 = vadd.f32 %v641_v9, %v639_v8 }
 0x155   :  { %v643_v12 = vadd.f32 %v642_v11, %v640_v10 }
 0x157   :  { %v644_v13 = vrot.slane %v643_v12, 4 }
 0x159   :  { %v645_v14 = vadd.f32 %v644_v13, %v643_v12 }
 0x15b   :  { %v646_v15 = vrot.slane %v645_v14, 2 }
 0x15d   :  { %v647_v16 = vadd.f32 %v646_v15, %v645_v14 }
 0x15f   :  { %v648_v17 = vrot.slane %v647_v16, 1 }
 0x161   :  { %v649_v18 = vadd.f32 %v648_v17, %v647_v16 }
 0x163   :  { %v650_v19 = vmul.f32 0.03125, %v649_v18 }
 0x165   :  { %v651_v20 = vadd.f32 1e-05, %v650_v19 }
 0x167   :  { %959 = vrsqrt.f32 %v651_v20 }
 0x174   :  { %v960_v21 = vpop.eup %959 }
 0x175   :  { %v653_v23 = vmul.f32 %v960_v21, %v633_v2  ;;  %v654_v24 = vmul.f32 %v960_v21, %v634_v3  ;;  %v655_v25 = vmul.f32 %v960_v21, %v635_v4  ;;  %v656_v26 = vmul.f32 %v960_v21, %v636_v5 }
 0x177   :  { %v664_v28 = vmul.f32 %v691_v22, %v653_v23  ;;  %v665_v29 = vmul.f32 %v691_v22, %v654_v24  ;;  %v666_v30 = vmul.f32 %v691_v22, %v655_v25  ;;  %v667_v31 = vmul.f32 %v691_v22, %v656_v26 }
 0x179   :  { %v675_v32 = vadd.f32 %v692_v27, %v664_v28  ;;  %v676_v33 = vadd.f32 %v692_v27, %v665_v29  ;;  %v677_v34 = vadd.f32 %v692_v27, %v666_v30  ;;  %v678_v35 = vadd.f32 %v692_v27, %v667_v31 }
 0x17b   :  { %v679_v36 = vmax.f32 %v675_v32, 0.0  ;;  %v680_v37 = vmax.f32 %v676_v33, 0.0  ;;  %v681_v38 = vmax.f32 %v677_v34, 0.0  ;;  %v682_v39 = vmax.f32 %v678_v35, 0.0 }
 0x17d   :  { %683 = vst [vmem:[%s1548_s4] sm:$0xff] %v679_v36  ;;  %684 = vst [vmem:[%s1548_s4 + $0x8] sm:$0xff] %v680_v37 }
 0x17e   :  { %685 = vst [vmem:[%s1548_s4 + $0x10] sm:$0xff] %v681_v38  ;;  %686 = vst [vmem:[%s1548_s4 + $0x18] sm:$0xff] %v682_v39 }

// kernel: squeeze.2
= control target key start
LH: loop header
LB: loop body
LE: loop exit
PB: predicated region body
PF: predicated region fallthrough
CT: control target
= control target key end

     0   :  { %s131_s8 = smov 104   ;;  %s132_s9 = smov 112   ;;  %vm8_vm0 = vcmask 64512   ;;  %s222_s0 = inlined_call_operand.vmem [shape: f32[128], index: 0, kind: input, shape index: {}]   ;;  %s223_s1 = inlined_call_operand.vmem [shape: f32[2,8,8], index: 1, kind: output, shape index: {}]  }
   0x1   :  { %v5_v0 = vld [vmem:[%s222_s0] sm:$0x1]  ;;  %s130_s0 = smov 120   ;;  %s133_s10 = smov 96  }
   0x2   :  { %6 = vst [vmem:[#allocation0] sm:$0x1] %v5_v0  ;;  %s134_s11 = smov 88   ;;  %s135_s12 = smov 80  }
   0x3   :  { %s136_s13 = smov 72   ;;  %s137_s14 = smov 64  }
   0x4   :  { %s138_s17 = smov 56   ;;  %s139_s18 = smov 48  }
   0x5   :  { %s140_s19 = smov 40   ;;  %s141_s20 = smov 32  }
   0x6   :  { %s142_s21 = smov 24   ;;  %s143_s22 = smov 16  }
   0x7   :  { %s144_s23 = smov 8  }
   0x9   :  { %v10_v1 = vld [vmem:[#allocation0] sm:$0x1]  }
   0xa   :  { %v22_v2 = vld [vmem:[#allocation0] sm:$0x1]   ;;  %11 = vrot.lane.b32.xlu0 %v10_v1, %s130_s0 }
   0xb   :  { %23 = vrot.lane.b32.xlu1 %v22_v2, %s131_s8  ;;  %v16_v3 = vld [vmem:[#allocation0] sm:$0x1]  }
   0xc   :  { %v28_v4 = vld [vmem:[#allocation0] sm:$0x1]  }
   0xd   :  { %v34_v5 = vld [vmem:[#allocation0] sm:$0x1]  }
   0xe   :  { %17 = vrot.lane.b32.xlu0 %v16_v3, %s132_s9  ;;  %v40_v6 = vld [vmem:[#allocation0] sm:$0x1]  }
   0xf   :  { %29 = vrot.lane.b32.xlu1 %v28_v4, %s133_s10  ;;  %v46_v7 = vld [vmem:[#allocation0] sm:$0x1]  }
  0x10   :  { %v52_v8 = vld [vmem:[#allocation0] sm:$0x1]  }
  0x11   :  { %v58_v9 = vld [vmem:[#allocation0] sm:$0x1]  }
  0x12   :  { %35 = vrot.lane.b32.xlu0 %v34_v5, %s134_s11  ;;  %v64_v10 = vld [vmem:[#allocation0] sm:$0x1]  }
  0x13   :  { %41 = vrot.lane.b32.xlu1 %v40_v6, %s135_s12  ;;  %v7_v11 = vld [vmem:[#allocation0] sm:$0x1]  }
  0x14   :  { %9 = vst.msk [vmem:[%s223_s1] sm:$0x1] %vm8_vm0, %v7_v11   ;;  %v70_v12 = vld [vmem:[#allocation0] sm:$0x1]  }
  0x15   :  { %v76_v13 = vld [vmem:[#allocation0] sm:$0x1]  }
  0x16   :  { %47 = vrot.lane.b32.xlu0 %v46_v7, %s136_s13  ;;  %v82_v14 = vld [vmem:[#allocation0] sm:$0x1]  }
  0x17   :  { %53 = vrot.lane.b32.xlu1 %v52_v8, %s137_s14  ;;  %v88_v15 = vld [vmem:[#allocation0] sm:$0x1]  }
  0x18   :  { %v94_v16 = vld [vmem:[#allocation0] sm:$0x1]  }
  0x1a   :  { %59 = vrot.lane.b32.xlu0 %v58_v9, %s138_s17 }
  0x1b   :  { %65 = vrot.lane.b32.xlu1 %v64_v10, %s139_s18 }
  0x1e   :  { %71 = vrot.lane.b32.xlu0 %v70_v12, %s140_s19 }
  0x1f   :  { %77 = vrot.lane.b32.xlu1 %v76_v13, %s141_s20 }
  0x22   :  { %83 = vrot.lane.b32.xlu0 %v82_v14, %s142_s21 }
  0x23   :  { %89 = vrot.lane.b32.xlu1 %v88_v15, %s143_s22 }
  0x26   :  { %95 = vrot.lane.b32.xlu0 %v94_v16, %s144_s23 }
  0x7c   :  { %v12_v17 = vpop.permute.xlu0 %11  }
  0x7d   :  { %v24_v18 = vpop.permute.xlu1 %23   ;;  %100 = vst.msk [vmem:[%s223_s1 + $0x1] sm:$0x1] %vm8_vm0, %v12_v17  }
  0x7e   :  { %102 = vst.msk [vmem:[%s223_s1 + $0x3] sm:$0x1] %vm8_vm0, %v24_v18  }
  0x80   :  { %v18_v19 = vpop.permute.xlu0 %17  }
  0x81   :  { %v30_v20 = vpop.permute.xlu1 %29   ;;  %101 = vst.msk [vmem:[%s223_s1 + $0x2] sm:$0x1] %vm8_vm0, %v18_v19  }
  0x82   :  { %103 = vst.msk [vmem:[%s223_s1 + $0x4] sm:$0x1] %vm8_vm0, %v30_v20  }
  0x84   :  { %v36_v21 = vpop.permute.xlu0 %35  }
  0x85   :  { %v42_v22 = vpop.permute.xlu1 %41   ;;  %104 = vst.msk [vmem:[%s223_s1 + $0x5] sm:$0x1] %vm8_vm0, %v36_v21  }
  0x86   :  { %105 = vst.msk [vmem:[%s223_s1 + $0x6] sm:$0x1] %vm8_vm0, %v42_v22  }
  0x88   :  { %v48_v23 = vpop.permute.xlu0 %47  }
  0x89   :  { %v54_v24 = vpop.permute.xlu1 %53   ;;  %106 = vst.msk [vmem:[%s223_s1 + $0x7] sm:$0x1] %vm8_vm0, %v48_v23  }
  0x8a   :  { %107 = vst.msk [vmem:[%s223_s1 + $0x8] sm:$0x1] %vm8_vm0, %v54_v24  }
  0x8c   :  { %v60_v25 = vpop.permute.xlu0 %59  }
  0x8d   :  { %v66_v26 = vpop.permute.xlu1 %65   ;;  %108 = vst.msk [vmem:[%s223_s1 + $0x9] sm:$0x1] %vm8_vm0, %v60_v25  }
  0x8e   :  { %109 = vst.msk [vmem:[%s223_s1 + $0xa] sm:$0x1] %vm8_vm0, %v66_v26  }
  0x90   :  { %v72_v27 = vpop.permute.xlu0 %71  }
  0x91   :  { %v78_v28 = vpop.permute.xlu1 %77   ;;  %110 = vst.msk [vmem:[%s223_s1 + $0xb] sm:$0x1] %vm8_vm0, %v72_v27  }
  0x92   :  { %111 = vst.msk [vmem:[%s223_s1 + $0xc] sm:$0x1] %vm8_vm0, %v78_v28  }
  0x94   :  { %v84_v29 = vpop.permute.xlu0 %83  }
  0x95   :  { %v90_v30 = vpop.permute.xlu1 %89   ;;  %112 = vst.msk [vmem:[%s223_s1 + $0xd] sm:$0x1] %vm8_vm0, %v84_v29  }
  0x96   :  { %113 = vst.msk [vmem:[%s223_s1 + $0xe] sm:$0x1] %vm8_vm0, %v90_v30  }
  0x98   :  { %v96_v31 = vpop.permute.xlu0 %95  }
  0x99   :  { %114 = vst.msk [vmem:[%s223_s1 + $0xf] sm:$0x1] %vm8_vm0, %v96_v31  }

// kernel: heatmap2feat_forward.26
= control target key start
LH: loop header
LB: loop body
LE: loop exit
PB: predicated region body
PF: predicated region fallthrough
CT: control target
= control target key end

     0   :  { %v612_v0 = vmov 0   ;;  %s1204_s4 = inlined_call_operand.vmem [shape: f32[128,1], index: 4, kind: input, shape index: {}]   ;;  %s1205_s5 = inlined_call_operand.vmem [shape: f32[128,1], index: 5, kind: input, shape index: {}]   ;;  %s1206_s6 = inlined_call_operand.vmem [shape: f32[128,1], index: 6, kind: input, shape index: {}]   ;;  %s1207_s7 = inlined_call_operand.vmem [shape: f32[128,1], index: 7, kind: input, shape index: {}]   ;;  %s1208_s1 = inlined_call_operand.vmem [shape: f32[128,128], index: 1, kind: input, shape index: {}]   ;;  %s1209_s0 = inlined_call_operand.vmem [shape: f32[128,128], index: 0, kind: input, shape index: {}]   ;;  %s1210_s2 = inlined_call_operand.vmem [shape: f32[128,128], index: 2, kind: input, shape index: {}]   ;;  %s1211_s3 = inlined_call_operand.vmem [shape: f32[128,128], index: 3, kind: input, shape index: {}]   ;;  %s1212_s8 = inlined_call_operand.vmem [shape: f32[128,128], index: 8, kind: output, shape index: {}]  }
   0x1   :  { %611 = vset.pattern.permute.xlu1 %v612_v0  ;;  %610 = vset.pattern.permute.xlu0 %v612_v0  ;;  %v31_v1 = vld [vmem:[%s1204_s4 + $0x10] sm:$0xff]  ;;  %v29_v2 = vld [vmem:[%s1204_s4] sm:$0xff]  ;;  %v32_v3 = vld [vmem:[%s1204_s4 + $0x18] sm:$0xff] }
   0x2   :  { %73 = vperm.xlu1 %611, %v31_v1   ;;  %63 = vperm.xlu0 %610, %v29_v2   ;;  %v30_v4 = vld [vmem:[%s1204_s4 + $0x8] sm:$0xff]  ;;  %v33_v6 = vld [vmem:[%s1204_s4 + $0x20] sm:$0xff]  ;;  %v36_v7 = vld [vmem:[%s1204_s4 + $0x38] sm:$0xff] }
   0x3   :  { %v34_v5 = vld [vmem:[%s1204_s4 + $0x28] sm:$0xff]  ;;  %v35_v8 = vld [vmem:[%s1204_s4 + $0x30] sm:$0xff]  ;;  %v37_v10 = vld [vmem:[%s1204_s4 + $0x40] sm:$0xff] }
   0x4   :  { %v38_v9 = vld [vmem:[%s1204_s4 + $0x48] sm:$0xff]  ;;  %v40_v11 = vld [vmem:[%s1204_s4 + $0x58] sm:$0xff]  ;;  %v39_v12 = vld [vmem:[%s1204_s4 + $0x50] sm:$0xff] }
   0x5   :  { %v42_v13 = vld [vmem:[%s1204_s4 + $0x68] sm:$0xff]  ;;  %v41_v14 = vld [vmem:[%s1204_s4 + $0x60] sm:$0xff]  ;;  %v44_v15 = vld [vmem:[%s1204_s4 + $0x78] sm:$0xff] }
   0x6   :  { %78 = vperm.xlu1 %611, %v32_v3   ;;  %68 = vperm.xlu0 %610, %v30_v4   ;;  %v43_v16 = vld [vmem:[%s1204_s4 + $0x70] sm:$0xff]  ;;  %v158_v17 = vld [vmem:[%s1205_s5 + $0x8] sm:$0xff]  ;;  %v157_v18 = vld [vmem:[%s1205_s5] sm:$0xff] }
   0x7   :  { %v160_v19 = vld [vmem:[%s1205_s5 + $0x18] sm:$0xff]  ;;  %v159_v20 = vld [vmem:[%s1205_s5 + $0x10] sm:$0xff]  ;;  %v162_v21 = vld [vmem:[%s1205_s5 + $0x28] sm:$0xff] }
   0x8   :  { %v161_v22 = vld [vmem:[%s1205_s5 + $0x20] sm:$0xff]  ;;  %v164_v23 = vld [vmem:[%s1205_s5 + $0x38] sm:$0xff]  ;;  %v163_v24 = vld [vmem:[%s1205_s5 + $0x30] sm:$0xff] }
   0x9   :  { %v166_v25 = vld [vmem:[%s1205_s5 + $0x48] sm:$0xff]  ;;  %v165_v26 = vld [vmem:[%s1205_s5 + $0x40] sm:$0xff]  ;;  %v168_v27 = vld [vmem:[%s1205_s5 + $0x58] sm:$0xff] }
   0xa   :  { %88 = vperm.xlu1 %611, %v34_v5   ;;  %83 = vperm.xlu0 %610, %v33_v6   ;;  %v167_v28 = vld [vmem:[%s1205_s5 + $0x50] sm:$0xff]  ;;  %v170_v29 = vld [vmem:[%s1205_s5 + $0x68] sm:$0xff]  ;;  %v169_v30 = vld [vmem:[%s1205_s5 + $0x60] sm:$0xff] }
   0xb   :  { %v172_v31 = vld [vmem:[%s1205_s5 + $0x78] sm:$0xff]  ;;  %v171_v32 = vld [vmem:[%s1205_s5 + $0x70] sm:$0xff]  ;;  %v302_v33 = vld [vmem:[%s1206_s6 + $0x8] sm:$0xff] }
   0xc   :  { %v301_v34 = vld [vmem:[%s1206_s6] sm:$0xff]  ;;  %v304_v35 = vld [vmem:[%s1206_s6 + $0x18] sm:$0xff]  ;;  %v303_v36 = vld [vmem:[%s1206_s6 + $0x10] sm:$0xff] }
   0xd   :  { %v306_v37 = vld [vmem:[%s1206_s6 + $0x28] sm:$0xff]  ;;  %v305_v38 = vld [vmem:[%s1206_s6 + $0x20] sm:$0xff]  ;;  %v308_v39 = vld [vmem:[%s1206_s6 + $0x38] sm:$0xff] }
   0xe   :  { %98 = vperm.xlu1 %611, %v36_v7   ;;  %93 = vperm.xlu0 %610, %v35_v8   ;;  %v307_v40 = vld [vmem:[%s1206_s6 + $0x30] sm:$0xff]  ;;  %v310_v41 = vld [vmem:[%s1206_s6 + $0x48] sm:$0xff]  ;;  %v309_v42 = vld [vmem:[%s1206_s6 + $0x40] sm:$0xff] }
   0xf   :  { %v312_v43 = vld [vmem:[%s1206_s6 + $0x58] sm:$0xff]  ;;  %v311_v44 = vld [vmem:[%s1206_s6 + $0x50] sm:$0xff]  ;;  %v314_v45 = vld [vmem:[%s1206_s6 + $0x68] sm:$0xff] }
  0x10   :  { %v313_v46 = vld [vmem:[%s1206_s6 + $0x60] sm:$0xff]  ;;  %v316_v47 = vld [vmem:[%s1206_s6 + $0x78] sm:$0xff]  ;;  %v315_v48 = vld [vmem:[%s1206_s6 + $0x70] sm:$0xff] }
  0x11   :  { %v446_v49 = vld [vmem:[%s1207_s7 + $0x8] sm:$0xff]  ;;  %v445_v50 = vld [vmem:[%s1207_s7] sm:$0xff]  ;;  %v448_v51 = vld [vmem:[%s1207_s7 + $0x18] sm:$0xff] }
  0x12   :  { %108 = vperm.xlu1 %611, %v38_v9   ;;  %103 = vperm.xlu0 %610, %v37_v10   ;;  %v447_v52 = vld [vmem:[%s1207_s7 + $0x10] sm:$0xff]  ;;  %v450_v53 = vld [vmem:[%s1207_s7 + $0x28] sm:$0xff]  ;;  %v449_v54 = vld [vmem:[%s1207_s7 + $0x20] sm:$0xff] }
  0x13   :  { %v452_v55 = vld [vmem:[%s1207_s7 + $0x38] sm:$0xff]  ;;  %v451_v56 = vld [vmem:[%s1207_s7 + $0x30] sm:$0xff]  ;;  %v454_v57 = vld [vmem:[%s1207_s7 + $0x48] sm:$0xff] }
  0x14   :  { %v453_v58 = vld [vmem:[%s1207_s7 + $0x40] sm:$0xff]  ;;  %v456_v59 = vld [vmem:[%s1207_s7 + $0x58] sm:$0xff]  ;;  %v455_v60 = vld [vmem:[%s1207_s7 + $0x50] sm:$0xff] }
  0x15   :  { %v458_v61 = vld [vmem:[%s1207_s7 + $0x68] sm:$0xff]  ;;  %v457_v62 = vld [vmem:[%s1207_s7 + $0x60] sm:$0xff]  ;;  %v460_v63 = vld [vmem:[%s1207_s7 + $0x78] sm:$0xff] }
  0x16   :  { %118 = vperm.xlu1 %611, %v40_v11   ;;  %113 = vperm.xlu0 %610, %v39_v12   ;;  %v459_v0 = vld [vmem:[%s1207_s7 + $0x70] sm:$0xff] }
  0x1a   :  { %128 = vperm.xlu1 %611, %v42_v13   ;;  %123 = vperm.xlu0 %610, %v41_v14  }
  0x1e   :  { %138 = vperm.xlu1 %611, %v44_v15   ;;  %133 = vperm.xlu0 %610, %v43_v16  }
  0x22   :  { %196 = vperm.xlu1 %611, %v158_v17   ;;  %191 = vperm.xlu0 %610, %v157_v18  }
  0x26   :  { %206 = vperm.xlu1 %611, %v160_v19   ;;  %201 = vperm.xlu0 %610, %v159_v20  }
  0x2a   :  { %216 = vperm.xlu1 %611, %v162_v21   ;;  %211 = vperm.xlu0 %610, %v161_v22  }
  0x2e   :  { %226 = vperm.xlu1 %611, %v164_v23   ;;  %221 = vperm.xlu0 %610, %v163_v24  }
  0x32   :  { %236 = vperm.xlu1 %611, %v166_v25   ;;  %231 = vperm.xlu0 %610, %v165_v26  }
  0x36   :  { %246 = vperm.xlu1 %611, %v168_v27   ;;  %241 = vperm.xlu0 %610, %v167_v28  }
  0x3a   :  { %256 = vperm.xlu1 %611, %v170_v29   ;;  %251 = vperm.xlu0 %610, %v169_v30  }
  0x3e   :  { %266 = vperm.xlu1 %611, %v172_v31   ;;  %261 = vperm.xlu0 %610, %v171_v32  }
  0x42   :  { %340 = vperm.xlu1 %611, %v302_v33   ;;  %335 = vperm.xlu0 %610, %v301_v34  }
  0x46   :  { %350 = vperm.xlu1 %611, %v304_v35   ;;  %345 = vperm.xlu0 %610, %v303_v36  }
  0x4a   :  { %360 = vperm.xlu1 %611, %v306_v37   ;;  %355 = vperm.xlu0 %610, %v305_v38  }
  0x4e   :  { %370 = vperm.xlu1 %611, %v308_v39   ;;  %365 = vperm.xlu0 %610, %v307_v40  }
  0x52   :  { %380 = vperm.xlu1 %611, %v310_v41   ;;  %375 = vperm.xlu0 %610, %v309_v42  }
  0x56   :  { %390 = vperm.xlu1 %611, %v312_v43   ;;  %385 = vperm.xlu0 %610, %v311_v44  }
  0x5a   :  { %400 = vperm.xlu1 %611, %v314_v45   ;;  %395 = vperm.xlu0 %610, %v313_v46   ;;  %v174_v45 = vld [vmem:[%s1208_s1 + $0x8] sm:$0xff]  ;;  %v173_v46 = vld [vmem:[%s1208_s1] sm:$0xff] }
  0x5e   :  { %410 = vperm.xlu1 %611, %v316_v47   ;;  %405 = vperm.xlu0 %610, %v315_v48   ;;  %v45_v47 = vld [vmem:[%s1209_s0] sm:$0xff] }
  0x62   :  { %484 = vperm.xlu1 %611, %v446_v49   ;;  %479 = vperm.xlu0 %610, %v445_v50   ;;  %v46_v50 = vld [vmem:[%s1209_s0 + $0x8] sm:$0xff] }
  0x66   :  { %494 = vperm.xlu1 %611, %v448_v51   ;;  %489 = vperm.xlu0 %610, %v447_v52   ;;  %v318_v51 = vld [vmem:[%s1210_s2 + $0x8] sm:$0xff]  ;;  %v317_v52 = vld [vmem:[%s1210_s2] sm:$0xff] }
  0x6a   :  { %504 = vperm.xlu1 %611, %v450_v53   ;;  %499 = vperm.xlu0 %610, %v449_v54  }
  0x6e   :  { %514 = vperm.xlu1 %611, %v452_v55   ;;  %509 = vperm.xlu0 %610, %v451_v56  }
  0x72   :  { %524 = vperm.xlu1 %611, %v454_v57   ;;  %519 = vperm.xlu0 %610, %v453_v58   ;;  %v176_v57 = vld [vmem:[%s1208_s1 + $0x18] sm:$0xff]  ;;  %v175_v58 = vld [vmem:[%s1208_s1 + $0x10] sm:$0xff] }
  0x76   :  { %534 = vperm.xlu1 %611, %v456_v59   ;;  %529 = vperm.xlu0 %610, %v455_v60  }
  0x7a   :  { %544 = vperm.xlu1 %611, %v458_v61   ;;  %539 = vperm.xlu0 %610, %v457_v62  }
  0x7d   :  { %v850_v1 = vpop.permute.xlu1 %73  ;;  %v64_v2 = vpop.permute.xlu0 %63 }
  0x7e   :  { %554 = vperm.xlu1 %611, %v460_v63   ;;  %549 = vperm.xlu0 %610, %v459_v0   ;;  %v141_v55 = vmul.f32 %v64_v2, %v45_v47  ;;  %v47_v63 = vld [vmem:[%s1209_s0 + $0x10] sm:$0xff]  ;;  %v48_v0 = vld [vmem:[%s1209_s0 + $0x18] sm:$0xff]  ;;  %v178_v47 = vld [vmem:[%s1208_s1 + $0x28] sm:$0xff] }
  0x7f   :  { %v320_v2 = vld [vmem:[%s1210_s2 + $0x18] sm:$0xff] }
  0x81   :  { %v852_v3 = vpop.permute.xlu1 %78  ;;  %v69_v4 = vpop.permute.xlu0 %68 }
  0x82   :  { %v142_v56 = vmul.f32 %v69_v4, %v46_v50  ;;  %v177_v50 = vld [vmem:[%s1208_s1 + $0x20] sm:$0xff] }
  0x85   :  { %v854_v5 = vpop.permute.xlu1 %88  ;;  %v856_v6 = vpop.permute.xlu0 %83 }
  0x89   :  { %v858_v7 = vpop.permute.xlu1 %98  ;;  %v860_v8 = vpop.permute.xlu0 %93 }
  0x8d   :  { %v862_v9 = vpop.permute.xlu1 %108  ;;  %v864_v10 = vpop.permute.xlu0 %103 }
  0x91   :  { %v866_v11 = vpop.permute.xlu1 %118  ;;  %v868_v12 = vpop.permute.xlu0 %113 }
  0x95   :  { %v870_v13 = vpop.permute.xlu1 %128  ;;  %v872_v14 = vpop.permute.xlu0 %123 }
  0x99   :  { %v874_v15 = vpop.permute.xlu1 %138  ;;  %v876_v16 = vpop.permute.xlu0 %133 }
  0x9d   :  { %v197_v17 = vpop.permute.xlu1 %196  ;;  %v192_v18 = vpop.permute.xlu0 %191 }
  0x9e   :  { %v270_v53 = vmul.f32 %v197_v17, %v174_v45  ;;  %v269_v54 = vmul.f32 %v192_v18, %v173_v46  ;;  %v319_v18 = vld [vmem:[%s1210_s2 + $0x10] sm:$0xff] }
  0xa0   :  { %v286_v4 = vadd.f32 %v270_v53, %v142_v56  ;;  %v285_v17 = vadd.f32 %v269_v54, %v141_v55  ;;  %v50_v53 = vld [vmem:[%s1209_s0 + $0x28] sm:$0xff]  ;;  %v49_v56 = vld [vmem:[%s1209_s0 + $0x20] sm:$0xff] }
  0xa1   :  { %v207_v19 = vpop.permute.xlu1 %206  ;;  %v202_v20 = vpop.permute.xlu0 %201 }
  0xa2   :  { %v272_v45 = vmul.f32 %v207_v19, %v176_v57  ;;  %v271_v46 = vmul.f32 %v202_v20, %v175_v58 }
  0xa5   :  { %v878_v21 = vpop.permute.xlu1 %216  ;;  %v880_v22 = vpop.permute.xlu0 %211 }
  0xa9   :  { %v882_v23 = vpop.permute.xlu1 %226  ;;  %v884_v24 = vpop.permute.xlu0 %221 }
  0xad   :  { %v886_v25 = vpop.permute.xlu1 %236  ;;  %v888_v26 = vpop.permute.xlu0 %231 }
  0xb1   :  { %v890_v27 = vpop.permute.xlu1 %246  ;;  %v892_v28 = vpop.permute.xlu0 %241 }
  0xb5   :  { %v894_v29 = vpop.permute.xlu1 %256  ;;  %v896_v30 = vpop.permute.xlu0 %251 }
  0xb9   :  { %v898_v31 = vpop.permute.xlu1 %266  ;;  %v900_v32 = vpop.permute.xlu0 %261 }
  0xbd   :  { %v341_v33 = vpop.permute.xlu1 %340  ;;  %v336_v34 = vpop.permute.xlu0 %335 }
  0xbe   :  { %v414_v59 = vmul.f32 %v341_v33, %v318_v51  ;;  %v413_v60 = vmul.f32 %v336_v34, %v317_v52  ;;  %v462_v33 = vld [vmem:[%s1211_s3 + $0x8] sm:$0xff]  ;;  %v461_v34 = vld [vmem:[%s1211_s3] sm:$0xff]  ;;  %v143_v51 = vmul.f32 %v850_v1, %v47_v63  ;;  %v144_v52 = vmul.f32 %v852_v3, %v48_v0 }
  0xbf   :  { %v322_v1 = vld [vmem:[%s1210_s2 + $0x28] sm:$0xff]  ;;  %v321_v3 = vld [vmem:[%s1210_s2 + $0x20] sm:$0xff] }
  0xc0   :  { %v430_v54 = vadd.f32 %v414_v59, %v286_v4  ;;  %v429_v55 = vadd.f32 %v413_v60, %v285_v17  ;;  %v274_v59 = vmul.f32 %v878_v21, %v178_v47  ;;  %v273_v60 = vmul.f32 %v880_v22, %v177_v50  ;;  %v464_v4 = vld [vmem:[%s1211_s3 + $0x18] sm:$0xff]  ;;  %v179_v22 = vld [vmem:[%s1208_s1 + $0x30] sm:$0xff] }
  0xc1   :  { %v351_v35 = vpop.permute.xlu1 %350  ;;  %v346_v36 = vpop.permute.xlu0 %345  ;;  %v180_v21 = vld [vmem:[%s1208_s1 + $0x38] sm:$0xff] }
  0xc2   :  { %v416_v57 = vmul.f32 %v351_v35, %v320_v2  ;;  %v415_v58 = vmul.f32 %v346_v36, %v319_v18  ;;  %v463_v35 = vld [vmem:[%s1211_s3 + $0x10] sm:$0xff]  ;;  %v288_v36 = vadd.f32 %v272_v45, %v144_v52  ;;  %v287_v2 = vadd.f32 %v271_v46, %v143_v51  ;;  %v324_v52 = vld [vmem:[%s1210_s2 + $0x38] sm:$0xff] }
  0xc4   :  { %v432_v50 = vadd.f32 %v416_v57, %v288_v36  ;;  %v431_v51 = vadd.f32 %v415_v58, %v287_v2  ;;  %v275_v57 = vmul.f32 %v884_v24, %v179_v22  ;;  %v181_v58 = vld [vmem:[%s1208_s1 + $0x40] sm:$0xff] }
  0xc5   :  { %v902_v37 = vpop.permute.xlu1 %360  ;;  %v904_v38 = vpop.permute.xlu0 %355 }
  0xc6   :  { %v417_v47 = vmul.f32 %v904_v38, %v321_v3 }
  0xc9   :  { %v906_v39 = vpop.permute.xlu1 %370  ;;  %v908_v40 = vpop.permute.xlu0 %365 }
  0xca   :  { %v420_v36 = vmul.f32 %v906_v39, %v324_v52 }
  0xcd   :  { %v910_v41 = vpop.permute.xlu1 %380  ;;  %v912_v42 = vpop.permute.xlu0 %375 }
  0xd1   :  { %v914_v43 = vpop.permute.xlu1 %390  ;;  %v916_v44 = vpop.permute.xlu0 %385 }
  0xd5   :  { %v927_v48 = vpop.permute.xlu1 %400  ;;  %v929_v49 = vpop.permute.xlu0 %395 }
  0xd9   :  { %v946_v61 = vpop.permute.xlu1 %410  ;;  %v948_v62 = vpop.permute.xlu0 %405 }
  0xda   :  { %1213 = vst [vmem:[#allocation2_spill] sm:$0xff] %v948_v62  ;;  %v146_v62 = vmul.f32 %v854_v5, %v50_v53  ;;  %v52_v5 = vld [vmem:[%s1209_s0 + $0x38] sm:$0xff] }
  0xdc   :  { %v290_v53 = vadd.f32 %v274_v59, %v146_v62  ;;  %v182_v62 = vld [vmem:[%s1208_s1 + $0x48] sm:$0xff] }
  0xdd   :  { %v485_v19 = vpop.permute.xlu1 %484  ;;  %v480_v20 = vpop.permute.xlu0 %479 }
  0xde   :  { %v558_v63 = vmul.f32 %v485_v19, %v462_v33  ;;  %v557_v0 = vmul.f32 %v480_v20, %v461_v34  ;;  %v145_v33 = vmul.f32 %v856_v6, %v49_v56  ;;  %v418_v34 = vmul.f32 %v902_v37, %v322_v1  ;;  %v51_v6 = vld [vmem:[%s1209_s0 + $0x30] sm:$0xff]  ;;  %v466_v19 = vld [vmem:[%s1211_s3 + $0x28] sm:$0xff]  ;;  %v465_v20 = vld [vmem:[%s1211_s3 + $0x20] sm:$0xff] }
  0xdf   :  { %v276_v56 = vmul.f32 %v882_v23, %v180_v21  ;;  %v54_v23 = vld [vmem:[%s1209_s0 + $0x48] sm:$0xff]  ;;  %v467_v21 = vld [vmem:[%s1211_s3 + $0x30] sm:$0xff] }
  0xe0   :  { %v574_v17 = vadd.f32 %v558_v63, %v430_v54  ;;  %v573_v18 = vadd.f32 %v557_v0, %v429_v55  ;;  %v289_v54 = vadd.f32 %v273_v60, %v145_v33  ;;  %v323_v55 = vld [vmem:[%s1210_s2 + $0x30] sm:$0xff]  ;;  %v148_v63 = vmul.f32 %v858_v7, %v52_v5  ;;  %v326_v7 = vld [vmem:[%s1210_s2 + $0x48] sm:$0xff]  ;;  %v468_v33 = vld [vmem:[%s1211_s3 + $0x38] sm:$0xff] }
  0xe1   :  { %v495_v45 = vpop.permute.xlu1 %494  ;;  %v490_v46 = vpop.permute.xlu0 %489  ;;  %v147_v0 = vmul.f32 %v860_v8, %v51_v6  ;;  %v434_v59 = vadd.f32 %v418_v34, %v290_v53  ;;  %v419_v2 = vmul.f32 %v908_v40, %v323_v55  ;;  %v325_v8 = vld [vmem:[%s1210_s2 + $0x40] sm:$0xff]  ;;  %v278_v40 = vmul.f32 %v886_v25, %v182_v62  ;;  %v184_v25 = vld [vmem:[%s1208_s1 + $0x58] sm:$0xff] }
  0xe2   :  { %590 = vst [vmem:[%s1212_s8 + $0x8] sm:$0xff] %v574_v17  ;;  %589 = vst [vmem:[%s1212_s8] sm:$0xff] %v573_v18  ;;  %v560_v37 = vmul.f32 %v495_v45, %v464_v4  ;;  %v559_v38 = vmul.f32 %v490_v46, %v463_v35  ;;  %v433_v24 = vadd.f32 %v417_v47, %v289_v54  ;;  %v53_v35 = vld [vmem:[%s1209_s0 + $0x40] sm:$0xff]  ;;  %v328_v53 = vld [vmem:[%s1210_s2 + $0x58] sm:$0xff] }
  0xe3   :  { %v277_v18 = vmul.f32 %v888_v26, %v181_v58  ;;  %v292_v22 = vadd.f32 %v276_v56, %v148_v63  ;;  %v291_v34 = vadd.f32 %v275_v57, %v147_v0  ;;  %v150_v46 = vmul.f32 %v862_v9, %v54_v23  ;;  %v183_v26 = vld [vmem:[%s1208_s1 + $0x50] sm:$0xff]  ;;  %v56_v9 = vld [vmem:[%s1209_s0 + $0x58] sm:$0xff]  ;;  %v469_v56 = vld [vmem:[%s1211_s3 + $0x40] sm:$0xff] }
  0xe4   :  { %v576_v1 = vadd.f32 %v560_v37, %v432_v50  ;;  %v575_v3 = vadd.f32 %v559_v38, %v431_v51  ;;  %v149_v5 = vmul.f32 %v864_v10, %v53_v35  ;;  %v422_v6 = vmul.f32 %v910_v41, %v326_v7  ;;  %v55_v10 = vld [vmem:[%s1209_s0 + $0x50] sm:$0xff]  ;;  %v186_v58 = vld [vmem:[%s1208_s1 + $0x68] sm:$0xff] }
  0xe5   :  { %v505_v60 = vpop.permute.xlu1 %504  ;;  %v500_v4 = vpop.permute.xlu0 %499  ;;  %v421_v50 = vmul.f32 %v912_v42, %v325_v8  ;;  %v436_v37 = vadd.f32 %v420_v36, %v292_v22  ;;  %v435_v38 = vadd.f32 %v419_v2, %v291_v34  ;;  %v294_v54 = vadd.f32 %v278_v40, %v150_v46  ;;  %v472_v8 = vld [vmem:[%s1211_s3 + $0x58] sm:$0xff] }
  0xe6   :  { %592 = vst [vmem:[%s1212_s8 + $0x18] sm:$0xff] %v576_v1  ;;  %591 = vst [vmem:[%s1212_s8 + $0x10] sm:$0xff] %v575_v3  ;;  %v562_v17 = vmul.f32 %v505_v60, %v466_v19  ;;  %v561_v39 = vmul.f32 %v500_v4, %v465_v20  ;;  %v293_v55 = vadd.f32 %v277_v18, %v149_v5  ;;  %v327_v19 = vld [vmem:[%s1210_s2 + $0x50] sm:$0xff]  ;;  %v470_v20 = vld [vmem:[%s1211_s3 + $0x48] sm:$0xff] }
  0xe7   :  { %v280_v57 = vmul.f32 %v890_v27, %v184_v25  ;;  %v279_v62 = vmul.f32 %v892_v28, %v183_v26  ;;  %v185_v1 = vld [vmem:[%s1208_s1 + $0x60] sm:$0xff]  ;;  %v152_v0 = vmul.f32 %v866_v11, %v56_v9  ;;  %v151_v23 = vmul.f32 %v868_v12, %v55_v10  ;;  %v58_v27 = vld [vmem:[%s1209_s0 + $0x68] sm:$0xff]  ;;  %v332_v26 = vld [vmem:[%s1210_s2 + $0x78] sm:$0xff] }
  0xe8   :  { %v578_v47 = vadd.f32 %v562_v17, %v434_v59  ;;  %v577_v45 = vadd.f32 %v561_v39, %v433_v24  ;;  %v438_v59 = vadd.f32 %v422_v6, %v294_v54  ;;  %v437_v28 = vadd.f32 %v421_v50, %v293_v55  ;;  %v57_v4 = vld [vmem:[%s1209_s0 + $0x60] sm:$0xff]  ;;  %v330_v11 = vld [vmem:[%s1210_s2 + $0x68] sm:$0xff]  ;;  %v471_v17 = vld [vmem:[%s1211_s3 + $0x50] sm:$0xff] }
  0xe9   :  { %v515_v51 = vpop.permute.xlu1 %514  ;;  %v510_v52 = vpop.permute.xlu0 %509  ;;  %v424_v35 = vmul.f32 %v914_v43, %v328_v53  ;;  %v423_v36 = vmul.f32 %v916_v44, %v327_v19  ;;  %v329_v12 = vld [vmem:[%s1210_s2 + $0x60] sm:$0xff]  ;;  %v282_v44 = vmul.f32 %v894_v29, %v186_v58  ;;  %v281_v7 = vmul.f32 %v896_v30, %v185_v1  ;;  %v188_v29 = vld [vmem:[%s1208_s1 + $0x78] sm:$0xff]  ;;  %v187_v30 = vld [vmem:[%s1208_s1 + $0x70] sm:$0xff] }
  0xea   :  { %594 = vst [vmem:[%s1212_s8 + $0x28] sm:$0xff] %v578_v47  ;;  %593 = vst [vmem:[%s1212_s8 + $0x20] sm:$0xff] %v577_v45  ;;  %v564_v41 = vmul.f32 %v515_v51, %v468_v33  ;;  %v563_v42 = vmul.f32 %v510_v52, %v467_v21  ;;  %v296_v39 = vadd.f32 %v280_v57, %v152_v0  ;;  %v331_v51 = vld [vmem:[%s1210_s2 + $0x70] sm:$0xff]  ;;  %v474_v52 = vld [vmem:[%s1211_s3 + $0x68] sm:$0xff] }
  0xeb   :  { %v295_v40 = vadd.f32 %v279_v62, %v151_v23  ;;  %v154_v21 = vmul.f32 %v870_v13, %v58_v27  ;;  %v153_v22 = vmul.f32 %v872_v14, %v57_v4  ;;  %v426_v34 = vmul.f32 %v927_v48, %v330_v11  ;;  %v60_v13 = vld [vmem:[%s1209_s0 + $0x78] sm:$0xff]  ;;  %v59_v14 = vld [vmem:[%s1209_s0 + $0x70] sm:$0xff]  ;;  %v473_v9 = vld [vmem:[%s1211_s3 + $0x60] sm:$0xff] }
  0xec   :  { %v580_v3 = vadd.f32 %v564_v41, %v436_v37  ;;  %v579_v63 = vadd.f32 %v563_v42, %v435_v38  ;;  %v425_v47 = vmul.f32 %v929_v49, %v329_v12  ;;  %v440_v5 = vadd.f32 %v424_v35, %v296_v39  ;;  %v1214_v57 = vld [vmem:[#allocation2_spill] sm:$0xff] }
  0xed   :  { %v525_v24 = vpop.permute.xlu1 %524  ;;  %v520_v60 = vpop.permute.xlu0 %519  ;;  %v439_v25 = vadd.f32 %v423_v36, %v295_v40  ;;  %v298_v6 = vadd.f32 %v282_v44, %v154_v21  ;;  %v297_v50 = vadd.f32 %v281_v7, %v153_v22  ;;  %v284_v10 = vmul.f32 %v898_v31, %v188_v29 }
  0xee   :  { %596 = vst [vmem:[%s1212_s8 + $0x38] sm:$0xff] %v580_v3  ;;  %595 = vst [vmem:[%s1212_s8 + $0x30] sm:$0xff] %v579_v63  ;;  %v566_v2 = vmul.f32 %v525_v24, %v470_v20  ;;  %v565_v43 = vmul.f32 %v520_v60, %v469_v56  ;;  %v283_v37 = vmul.f32 %v900_v32, %v187_v30  ;;  %v475_v32 = vld [vmem:[%s1211_s3 + $0x70] sm:$0xff] }
  0xef   :  { %v156_v41 = vmul.f32 %v874_v15, %v60_v13  ;;  %v155_v42 = vmul.f32 %v876_v16, %v59_v14  ;;  %v442_v54 = vadd.f32 %v426_v34, %v298_v6  ;;  %v441_v55 = vadd.f32 %v425_v47, %v297_v50  ;;  %v476_v16 = vld [vmem:[%s1211_s3 + $0x78] sm:$0xff] }
  0xf0   :  { %v582_v18 = vadd.f32 %v566_v2, %v438_v59  ;;  %v581_v33 = vadd.f32 %v565_v43, %v437_v28  ;;  %v428_v56 = vmul.f32 %v946_v61, %v332_v26  ;;  %v427_v62 = vmul.f32 %v1214_v57, %v331_v51 }
  0xf1   :  { %v535_v45 = vpop.permute.xlu1 %534  ;;  %v530_v46 = vpop.permute.xlu0 %529  ;;  %v300_v61 = vadd.f32 %v284_v10, %v156_v41  ;;  %v299_v58 = vadd.f32 %v283_v37, %v155_v42 }
  0xf2   :  { %598 = vst [vmem:[%s1212_s8 + $0x48] sm:$0xff] %v582_v18  ;;  %597 = vst [vmem:[%s1212_s8 + $0x40] sm:$0xff] %v581_v33  ;;  %v568_v48 = vmul.f32 %v535_v45, %v472_v8  ;;  %v567_v49 = vmul.f32 %v530_v46, %v471_v17 }
  0xf3   :  { %v444_v23 = vadd.f32 %v428_v56, %v300_v61  ;;  %v443_v27 = vadd.f32 %v427_v62, %v299_v58 }
  0xf4   :  { %v584_v38 = vadd.f32 %v568_v48, %v440_v5  ;;  %v583_v53 = vadd.f32 %v567_v49, %v439_v25 }
  0xf5   :  { %v545_v19 = vpop.permute.xlu1 %544  ;;  %v540_v20 = vpop.permute.xlu0 %539 }
  0xf6   :  { %600 = vst [vmem:[%s1212_s8 + $0x58] sm:$0xff] %v584_v38  ;;  %599 = vst [vmem:[%s1212_s8 + $0x50] sm:$0xff] %v583_v53  ;;  %v570_v31 = vmul.f32 %v545_v19, %v474_v52  ;;  %v569_v15 = vmul.f32 %v540_v20, %v473_v9 }
  0xf8   :  { %v586_v1 = vadd.f32 %v570_v31, %v442_v54  ;;  %v585_v3 = vadd.f32 %v569_v15, %v441_v55 }
  0xf9   :  { %v555_v63 = vpop.permute.xlu1 %554  ;;  %v550_v0 = vpop.permute.xlu0 %549 }
  0xfa   :  { %602 = vst [vmem:[%s1212_s8 + $0x68] sm:$0xff] %v586_v1  ;;  %601 = vst [vmem:[%s1212_s8 + $0x60] sm:$0xff] %v585_v3  ;;  %v572_v59 = vmul.f32 %v555_v63, %v476_v16  ;;  %v571_v28 = vmul.f32 %v550_v0, %v475_v32 }
  0xfc   :  { %v588_v24 = vadd.f32 %v572_v59, %v444_v23  ;;  %v587_v60 = vadd.f32 %v571_v28, %v443_v27 }
  0xfe   :  { %604 = vst [vmem:[%s1212_s8 + $0x78] sm:$0xff] %v588_v24  ;;  %603 = vst [vmem:[%s1212_s8 + $0x70] sm:$0xff] %v587_v60 }

// kernel: heatmap2feat_forward.28
= control target key start
LH: loop header
LB: loop body
LE: loop exit
PB: predicated region body
PF: predicated region fallthrough
CT: control target
= control target key end

     0   :  { %vm45_vm0 = vcmask 523264   ;;  %s515_s1 = inlined_call_operand.vmem [shape: f32[64,128], index: 1, kind: input, shape index: {}]   ;;  %s516_s0 = inlined_call_operand.vmem [shape: f32[128,64], index: 0, kind: input, shape index: {}]   ;;  %s517_s2 = inlined_call_operand.vmem [shape: f32[1,128], index: 2, kind: input, shape index: {}]   ;;  %s518_s3 = inlined_call_operand.vmem [shape: f32[128,128], index: 3, kind: output, shape index: {}]  }
   0x1   :  { %v37_v0 = vld [vmem:[%s515_s1 + $0x38] sm:$0xff]  ;;  %v36_v1 = vld [vmem:[%s515_s1 + $0x30] sm:$0xff]  ;;  %v35_v2 = vld [vmem:[%s515_s1 + $0x28] sm:$0xff] }
   0x2   :  { %300 = vmatprep.subr.mxu0 %v37_v0  ;;  %340 = vmatprep.subr.mxu1 %v37_v0  ;;  %v34_v3 = vld [vmem:[%s515_s1 + $0x20] sm:$0xff]  ;;  %v33_v4 = vld [vmem:[%s515_s1 + $0x18] sm:$0xff]  ;;  %v32_v5 = vld [vmem:[%s515_s1 + $0x10] sm:$0xff] }
   0x3   :  { %301 = vmatpush3.msra.mxu0 %v37_v0  ;;  %348 = vmatpush3.msra.mxu1 %v37_v0  ;;  %v31_v6 = vld [vmem:[%s515_s1 + $0x8] sm:$0xff]  ;;  %v30_v7 = vld [vmem:[%s515_s1] sm:$0xff]  ;;  %v16_v12 = vld [vmem:[%s516_s0 + $0x10] sm:$0xff] }
   0x4   :  { %302 = vmatprep.subr.mxu0 %v36_v1  ;;  %341 = vmatprep.subr.mxu1 %v36_v1  ;;  %v14_v8 = vld [vmem:[%s516_s0] sm:$0xff]  ;;  %v15_v10 = vld [vmem:[%s516_s0 + $0x8] sm:$0xff]  ;;  %v24_v13 = vld [vmem:[%s516_s0 + $0x50] sm:$0xff] }
   0x5   :  { %303 = vmatpush3.msra.mxu0 %v36_v1  ;;  %349 = vmatpush3.msra.mxu1 %v36_v1  ;;  %v22_v9 = vld [vmem:[%s516_s0 + $0x40] sm:$0xff]  ;;  %v23_v11 = vld [vmem:[%s516_s0 + $0x48] sm:$0xff]  ;;  %v17_v14 = vld [vmem:[%s516_s0 + $0x18] sm:$0xff] }
   0x6   :  { %304 = vmatprep.subr.mxu0 %v35_v2  ;;  %342 = vmatprep.subr.mxu1 %v35_v2  ;;  %v25_v15 = vld [vmem:[%s516_s0 + $0x58] sm:$0xff]  ;;  %v18_v16 = vld [vmem:[%s516_s0 + $0x20] sm:$0xff]  ;;  %v19_v18 = vld [vmem:[%s516_s0 + $0x28] sm:$0xff] }
   0x7   :  { %305 = vmatpush3.msra.mxu0 %v35_v2  ;;  %350 = vmatpush3.msra.mxu1 %v35_v2  ;;  %v26_v17 = vld [vmem:[%s516_s0 + $0x60] sm:$0xff]  ;;  %v27_v19 = vld [vmem:[%s516_s0 + $0x68] sm:$0xff]  ;;  %v20_v20 = vld [vmem:[%s516_s0 + $0x30] sm:$0xff] }
   0x8   :  { %306 = vmatprep.subr.mxu0 %v34_v3  ;;  %343 = vmatprep.subr.mxu1 %v34_v3  ;;  %v28_v21 = vld [vmem:[%s516_s0 + $0x70] sm:$0xff]  ;;  %v21_v22 = vld [vmem:[%s516_s0 + $0x38] sm:$0xff]  ;;  %v259_v24 = vld [vmem:[%s517_s2] ss:$0 sm:$0xff] }
   0x9   :  { %307 = vmatpush3.msra.mxu0 %v34_v3  ;;  %351 = vmatpush3.msra.mxu1 %v34_v3  ;;  %v29_v23 = vld [vmem:[%s516_s0 + $0x78] sm:$0xff] }
   0xa   :  { %308 = vmatprep.subr.mxu0 %v33_v4  ;;  %344 = vmatprep.subr.mxu1 %v33_v4 }
   0xb   :  { %309 = vmatpush3.msra.mxu0 %v33_v4  ;;  %352 = vmatpush3.msra.mxu1 %v33_v4 }
   0xc   :  { %310 = vmatprep.subr.mxu0 %v32_v5  ;;  %345 = vmatprep.subr.mxu1 %v32_v5 }
   0xd   :  { %311 = vmatpush3.msra.mxu0 %v32_v5  ;;  %353 = vmatpush3.msra.mxu1 %v32_v5 }
   0xe   :  { %312 = vmatprep.subr.mxu0 %v31_v6  ;;  %346 = vmatprep.subr.mxu1 %v31_v6 }
   0xf   :  { %313 = vmatpush3.msra.mxu0 %v31_v6  ;;  %354 = vmatpush3.msra.mxu1 %v31_v6 }
  0x10   :  { %314 = vmatprep.subr.mxu0 %v30_v7  ;;  %347 = vmatprep.subr.mxu1 %v30_v7 }
  0x11   :  { %315 = vmatpush3.msra.mxu0 %v30_v7  ;;  %355 = vmatpush3.msra.mxu1 %v30_v7 }
  0x12   :  { %316 = vmatprep.mubr.msk.f32.mxu0 %vm45_vm0, %v14_v8  ;;  %328 = vmatprep.mubr.msk.f32.mxu1 %vm45_vm0, %v22_v9 }
  0x13   :  { %317 = vmatmul.mubr.msk.f32.vlgmr.msra.gmra.mxu0 %vm45_vm0, %v15_v10  ;;  %329 = vmatmul.mubr.msk.f32.vlgmr.msra.gmra.mxu1 %vm45_vm0, %v23_v11 }
  0x14   :  { %319 = vmatprep.mubr.msk.f32.mxu0 %vm45_vm0, %v16_v12  ;;  %331 = vmatprep.mubr.msk.f32.mxu1 %vm45_vm0, %v24_v13 }
  0x17   :  { %320 = vmatmul.mubr.msk.f32.gmra.mxu0 %vm45_vm0, %v17_v14  ;;  %332 = vmatmul.mubr.msk.f32.gmra.mxu1 %vm45_vm0, %v25_v15 }
  0x18   :  { %322 = vmatprep.mubr.msk.f32.mxu0 %vm45_vm0, %v18_v16  ;;  %334 = vmatprep.mubr.msk.f32.mxu1 %vm45_vm0, %v26_v17 }
  0x1b   :  { %323 = vmatmul.mubr.msk.f32.gmra.mxu0 %vm45_vm0, %v19_v18  ;;  %335 = vmatmul.mubr.msk.f32.gmra.mxu1 %vm45_vm0, %v27_v19 }
  0x1c   :  { %325 = vmatprep.mubr.msk.f32.mxu0 %vm45_vm0, %v20_v20  ;;  %337 = vmatprep.mubr.msk.f32.mxu1 %vm45_vm0, %v28_v21 }
  0x1f   :  { %326 = vmatmul.mubr.msk.f32.gmra.mxu0 %vm45_vm0, %v21_v22  ;;  %338 = vmatmul.mubr.msk.f32.gmra.mxu1 %vm45_vm0, %v29_v23 }
  0xd3   :  { %v318_v25 = vpop.f32.mrf.mxu0  ;;  %v330_v26 = vpop.f32.mrf.mxu1 }
  0xd4   :  { %v166_v27 = vadd.f32 %v318_v25, %v259_v24  ;;  %v206_v28 = vadd.f32 %v330_v26, %v259_v24 }
  0xd5   :  { %v160_v29 = vpop.f32.mrf.mxu0  ;;  %v200_v30 = vpop.f32.mrf.mxu1 }
  0xd6   :  { %240 = vst [vmem:[%s518_s3 + $0x8] sm:$0xff] %v166_v27  ;;  %248 = vst [vmem:[%s518_s3 + $0x48] sm:$0xff] %v206_v28  ;;  %v161_v31 = vadd.f32 %v259_v24, %v160_v29  ;;  %v201_v32 = vadd.f32 %v259_v24, %v200_v30 }
  0xd7   :  { %v321_v33 = vpop.f32.mrf.mxu0  ;;  %v333_v34 = vpop.f32.mrf.mxu1 }
  0xd8   :  { %239 = vst [vmem:[%s518_s3] sm:$0xff] %v161_v31  ;;  %247 = vst [vmem:[%s518_s3 + $0x40] sm:$0xff] %v201_v32  ;;  %v176_v35 = vadd.f32 %v321_v33, %v259_v24  ;;  %v216_v36 = vadd.f32 %v333_v34, %v259_v24 }
  0xd9   :  { %v170_v37 = vpop.f32.mrf.mxu0  ;;  %v210_v38 = vpop.f32.mrf.mxu1 }
  0xda   :  { %242 = vst [vmem:[%s518_s3 + $0x18] sm:$0xff] %v176_v35  ;;  %250 = vst [vmem:[%s518_s3 + $0x58] sm:$0xff] %v216_v36  ;;  %v171_v39 = vadd.f32 %v259_v24, %v170_v37  ;;  %v211_v40 = vadd.f32 %v259_v24, %v210_v38 }
  0xdb   :  { %v324_v41 = vpop.f32.mrf.mxu0  ;;  %v336_v42 = vpop.f32.mrf.mxu1 }
  0xdc   :  { %241 = vst [vmem:[%s518_s3 + $0x10] sm:$0xff] %v171_v39  ;;  %249 = vst [vmem:[%s518_s3 + $0x50] sm:$0xff] %v211_v40  ;;  %v186_v43 = vadd.f32 %v324_v41, %v259_v24  ;;  %v226_v44 = vadd.f32 %v336_v42, %v259_v24 }
  0xdd   :  { %v180_v45 = vpop.f32.mrf.mxu0  ;;  %v220_v46 = vpop.f32.mrf.mxu1 }
  0xde   :  { %244 = vst [vmem:[%s518_s3 + $0x28] sm:$0xff] %v186_v43  ;;  %252 = vst [vmem:[%s518_s3 + $0x68] sm:$0xff] %v226_v44  ;;  %v181_v47 = vadd.f32 %v259_v24, %v180_v45  ;;  %v221_v48 = vadd.f32 %v259_v24, %v220_v46 }
  0xdf   :  { %v327_v49 = vpop.f32.mrf.mxu0  ;;  %v339_v50 = vpop.f32.mrf.mxu1 }
  0xe0   :  { %243 = vst [vmem:[%s518_s3 + $0x20] sm:$0xff] %v181_v47  ;;  %251 = vst [vmem:[%s518_s3 + $0x60] sm:$0xff] %v221_v48  ;;  %v196_v51 = vadd.f32 %v327_v49, %v259_v24  ;;  %v236_v52 = vadd.f32 %v339_v50, %v259_v24 }
  0xe1   :  { %v190_v53 = vpop.f32.mrf.mxu0  ;;  %v230_v54 = vpop.f32.mrf.mxu1 }
  0xe2   :  { %246 = vst [vmem:[%s518_s3 + $0x38] sm:$0xff] %v196_v51  ;;  %254 = vst [vmem:[%s518_s3 + $0x78] sm:$0xff] %v236_v52  ;;  %v191_v55 = vadd.f32 %v259_v24, %v190_v53  ;;  %v231_v56 = vadd.f32 %v259_v24, %v230_v54 }
  0xe4   :  { %245 = vst [vmem:[%s518_s3 + $0x30] sm:$0xff] %v191_v55  ;;  %253 = vst [vmem:[%s518_s3 + $0x70] sm:$0xff] %v231_v56 }

// kernel: heatmap2feat_forward.27
= control target key start
LH: loop header
LB: loop body
LE: loop exit
PB: predicated region body
PF: predicated region fallthrough
CT: control target
= control target key end

     0   :  { %v357_v0 = vmov 0.0   ;;  %vm77_vm0 = vcmask 523264   ;;  %s677_s1 = inlined_call_operand.vmem [shape: f32[192,64], index: 1, kind: input, shape index: {}]   ;;  %s678_s0 = inlined_call_operand.vmem [shape: f32[128,192], index: 0, kind: input, shape index: {}]   ;;  %s679_s2 = inlined_call_operand.vmem [shape: f32[1,64], index: 2, kind: input, shape index: {}]   ;;  %s680_s3 = inlined_call_operand.vmem [shape: f32[128,64], index: 3, kind: output, shape index: {}]  }
   0x1   :  { %126 = vmatprep.subr.mxu0 %v357_v0  ;;  %308 = vmatprep.subr.mxu1 %v357_v0  ;;  %v61_v1 = vld [vmem:[%s677_s1 + $0x78] sm:$0xff]  ;;  %v60_v2 = vld [vmem:[%s677_s1 + $0x70] sm:$0xff]  ;;  %v59_v3 = vld [vmem:[%s677_s1 + $0x68] sm:$0xff] }
   0x2   :  { %127 = vmatpush1.msra.mxu0 %v61_v1  ;;  %332 = vmatpush1.msra.mxu1 %v61_v1  ;;  %v58_v4 = vld [vmem:[%s677_s1 + $0x60] sm:$0xff]  ;;  %v57_v5 = vld [vmem:[%s677_s1 + $0x58] sm:$0xff]  ;;  %v56_v6 = vld [vmem:[%s677_s1 + $0x50] sm:$0xff] }
   0x3   :  { %128 = vmatprep.subr.mxu0 %v357_v0  ;;  %309 = vmatprep.subr.mxu1 %v357_v0  ;;  %v55_v7 = vld [vmem:[%s677_s1 + $0x48] sm:$0xff]  ;;  %v54_v8 = vld [vmem:[%s677_s1 + $0x40] sm:$0xff]  ;;  %v53_v9 = vld [vmem:[%s677_s1 + $0x38] sm:$0xff] }
   0x4   :  { %129 = vmatpush1.msra.mxu0 %v60_v2  ;;  %333 = vmatpush1.msra.mxu1 %v60_v2  ;;  %v52_v10 = vld [vmem:[%s677_s1 + $0x30] sm:$0xff]  ;;  %v51_v11 = vld [vmem:[%s677_s1 + $0x28] sm:$0xff]  ;;  %v50_v12 = vld [vmem:[%s677_s1 + $0x20] sm:$0xff] }
   0x5   :  { %130 = vmatprep.subr.mxu0 %v357_v0  ;;  %310 = vmatprep.subr.mxu1 %v357_v0  ;;  %v49_v13 = vld [vmem:[%s677_s1 + $0x18] sm:$0xff]  ;;  %v48_v14 = vld [vmem:[%s677_s1 + $0x10] sm:$0xff]  ;;  %v47_v15 = vld [vmem:[%s677_s1 + $0x8] sm:$0xff] }
   0x6   :  { %131 = vmatpush1.msra.mxu0 %v59_v3  ;;  %334 = vmatpush1.msra.mxu1 %v59_v3  ;;  %v46_v16 = vld [vmem:[%s677_s1] sm:$0xff]  ;;  %v69_v17 = vld [vmem:[%s677_s1 + $0xb8] sm:$0xff]  ;;  %v68_v18 = vld [vmem:[%s677_s1 + $0xb0] sm:$0xff] }
   0x7   :  { %132 = vmatprep.subr.mxu0 %v357_v0  ;;  %311 = vmatprep.subr.mxu1 %v357_v0  ;;  %v67_v19 = vld [vmem:[%s677_s1 + $0xa8] sm:$0xff]  ;;  %v66_v20 = vld [vmem:[%s677_s1 + $0xa0] sm:$0xff]  ;;  %v65_v21 = vld [vmem:[%s677_s1 + $0x98] sm:$0xff] }
   0x8   :  { %133 = vmatpush1.msra.mxu0 %v58_v4  ;;  %335 = vmatpush1.msra.mxu1 %v58_v4  ;;  %v64_v22 = vld [vmem:[%s677_s1 + $0x90] sm:$0xff]  ;;  %v63_v23 = vld [vmem:[%s677_s1 + $0x88] sm:$0xff]  ;;  %v62_v24 = vld [vmem:[%s677_s1 + $0x80] sm:$0xff] }
   0x9   :  { %134 = vmatprep.subr.mxu0 %v357_v0  ;;  %312 = vmatprep.subr.mxu1 %v357_v0  ;;  %v15_v25 = vld [vmem:[%s678_s0 + $0x8] sm:$0xff]  ;;  %v14_v27 = vld [vmem:[%s678_s0] sm:$0xff]  ;;  %v17_v29 = vld [vmem:[%s678_s0 + $0x18] sm:$0xff] }
   0xa   :  { %135 = vmatpush1.msra.mxu0 %v57_v5  ;;  %336 = vmatpush1.msra.mxu1 %v57_v5  ;;  %v31_v26 = vld [vmem:[%s678_s0 + $0x88] sm:$0xff]  ;;  %v30_v28 = vld [vmem:[%s678_s0 + $0x80] sm:$0xff]  ;;  %v33_v30 = vld [vmem:[%s678_s0 + $0x98] sm:$0xff] }
   0xb   :  { %136 = vmatprep.subr.mxu0 %v357_v0  ;;  %313 = vmatprep.subr.mxu1 %v357_v0  ;;  %v16_v31 = vld [vmem:[%s678_s0 + $0x10] sm:$0xff]  ;;  %v19_v33 = vld [vmem:[%s678_s0 + $0x28] sm:$0xff]  ;;  %v18_v35 = vld [vmem:[%s678_s0 + $0x20] sm:$0xff] }
   0xc   :  { %137 = vmatpush1.msra.mxu0 %v56_v6  ;;  %337 = vmatpush1.msra.mxu1 %v56_v6  ;;  %v32_v32 = vld [vmem:[%s678_s0 + $0x90] sm:$0xff]  ;;  %v35_v34 = vld [vmem:[%s678_s0 + $0xa8] sm:$0xff]  ;;  %v34_v36 = vld [vmem:[%s678_s0 + $0xa0] sm:$0xff] }
   0xd   :  { %138 = vmatprep.subr.mxu0 %v357_v0  ;;  %314 = vmatprep.subr.mxu1 %v357_v0  ;;  %v21_v37 = vld [vmem:[%s678_s0 + $0x38] sm:$0xff]  ;;  %v20_v39 = vld [vmem:[%s678_s0 + $0x30] sm:$0xff]  ;;  %v23_v41 = vld [vmem:[%s678_s0 + $0x48] sm:$0xff] }
   0xe   :  { %139 = vmatpush1.msra.mxu0 %v55_v7  ;;  %338 = vmatpush1.msra.mxu1 %v55_v7  ;;  %v37_v38 = vld [vmem:[%s678_s0 + $0xb8] sm:$0xff]  ;;  %v36_v40 = vld [vmem:[%s678_s0 + $0xb0] sm:$0xff]  ;;  %v39_v42 = vld [vmem:[%s678_s0 + $0xc8] sm:$0xff] }
   0xf   :  { %140 = vmatprep.subr.mxu0 %v357_v0  ;;  %315 = vmatprep.subr.mxu1 %v357_v0  ;;  %v22_v43 = vld [vmem:[%s678_s0 + $0x40] sm:$0xff]  ;;  %v25_v45 = vld [vmem:[%s678_s0 + $0x58] sm:$0xff]  ;;  %v24_v47 = vld [vmem:[%s678_s0 + $0x50] sm:$0xff] }
  0x10   :  { %141 = vmatpush1.msra.mxu0 %v54_v8  ;;  %339 = vmatpush1.msra.mxu1 %v54_v8  ;;  %v38_v44 = vld [vmem:[%s678_s0 + $0xc0] sm:$0xff]  ;;  %v41_v46 = vld [vmem:[%s678_s0 + $0xd8] sm:$0xff]  ;;  %v40_v48 = vld [vmem:[%s678_s0 + $0xd0] sm:$0xff] }
  0x11   :  { %142 = vmatprep.subr.mxu0 %v357_v0  ;;  %316 = vmatprep.subr.mxu1 %v357_v0  ;;  %v27_v49 = vld [vmem:[%s678_s0 + $0x68] sm:$0xff]  ;;  %v26_v51 = vld [vmem:[%s678_s0 + $0x60] sm:$0xff]  ;;  %v29_v53 = vld [vmem:[%s678_s0 + $0x78] sm:$0xff] }
  0x12   :  { %143 = vmatpush1.msra.mxu0 %v53_v9  ;;  %340 = vmatpush1.msra.mxu1 %v53_v9  ;;  %v43_v50 = vld [vmem:[%s678_s0 + $0xe8] sm:$0xff]  ;;  %v42_v52 = vld [vmem:[%s678_s0 + $0xe0] sm:$0xff]  ;;  %v45_v54 = vld [vmem:[%s678_s0 + $0xf8] sm:$0xff] }
  0x13   :  { %144 = vmatprep.subr.mxu0 %v357_v0  ;;  %317 = vmatprep.subr.mxu1 %v357_v0  ;;  %v28_v55 = vld [vmem:[%s678_s0 + $0x70] sm:$0xff]  ;;  %v291_v57 = vld [vmem:[%s679_s2] ss:$0 sm:$0xff] }
  0x14   :  { %145 = vmatpush1.msra.mxu0 %v52_v10  ;;  %341 = vmatpush1.msra.mxu1 %v52_v10  ;;  %v44_v56 = vld [vmem:[%s678_s0 + $0xf0] sm:$0xff] }
  0x15   :  { %146 = vmatprep.subr.mxu0 %v357_v0  ;;  %318 = vmatprep.subr.mxu1 %v357_v0 }
  0x16   :  { %147 = vmatpush1.msra.mxu0 %v51_v11  ;;  %342 = vmatpush1.msra.mxu1 %v51_v11 }
  0x17   :  { %148 = vmatprep.subr.mxu0 %v357_v0  ;;  %319 = vmatprep.subr.mxu1 %v357_v0 }
  0x18   :  { %149 = vmatpush1.msra.mxu0 %v50_v12  ;;  %343 = vmatpush1.msra.mxu1 %v50_v12 }
  0x19   :  { %150 = vmatprep.subr.mxu0 %v357_v0  ;;  %320 = vmatprep.subr.mxu1 %v357_v0 }
  0x1a   :  { %151 = vmatpush1.msra.mxu0 %v49_v13  ;;  %344 = vmatpush1.msra.mxu1 %v49_v13 }
  0x1b   :  { %152 = vmatprep.subr.mxu0 %v357_v0  ;;  %321 = vmatprep.subr.mxu1 %v357_v0 }
  0x1c   :  { %153 = vmatpush1.msra.mxu0 %v48_v14  ;;  %345 = vmatpush1.msra.mxu1 %v48_v14 }
  0x1d   :  { %154 = vmatprep.subr.mxu0 %v357_v0  ;;  %322 = vmatprep.subr.mxu1 %v357_v0 }
  0x1e   :  { %155 = vmatpush1.msra.mxu0 %v47_v15  ;;  %346 = vmatpush1.msra.mxu1 %v47_v15 }
  0x1f   :  { %156 = vmatprep.subr.mxu0 %v357_v0  ;;  %323 = vmatprep.subr.mxu1 %v357_v0 }
  0x20   :  { %157 = vmatpush1.msra.mxu0 %v46_v16  ;;  %347 = vmatpush1.msra.mxu1 %v46_v16 }
  0x21   :  { %174 = vmatprep.subr.mxu0 %v357_v0  ;;  %324 = vmatprep.subr.mxu1 %v357_v0 }
  0x22   :  { %175 = vmatpush2.msra.mxu0 %v69_v17  ;;  %348 = vmatpush2.msra.mxu1 %v69_v17 }
  0x23   :  { %176 = vmatprep.subr.mxu0 %v357_v0  ;;  %325 = vmatprep.subr.mxu1 %v357_v0 }
  0x24   :  { %177 = vmatpush2.msra.mxu0 %v68_v18  ;;  %349 = vmatpush2.msra.mxu1 %v68_v18 }
  0x25   :  { %178 = vmatprep.subr.mxu0 %v357_v0  ;;  %326 = vmatprep.subr.mxu1 %v357_v0 }
  0x26   :  { %179 = vmatpush2.msra.mxu0 %v67_v19  ;;  %350 = vmatpush2.msra.mxu1 %v67_v19 }
  0x27   :  { %180 = vmatprep.subr.mxu0 %v357_v0  ;;  %327 = vmatprep.subr.mxu1 %v357_v0 }
  0x28   :  { %181 = vmatpush2.msra.mxu0 %v66_v20  ;;  %351 = vmatpush2.msra.mxu1 %v66_v20 }
  0x29   :  { %182 = vmatprep.subr.mxu0 %v357_v0  ;;  %328 = vmatprep.subr.mxu1 %v357_v0 }
  0x2a   :  { %183 = vmatpush2.msra.mxu0 %v65_v21  ;;  %352 = vmatpush2.msra.mxu1 %v65_v21 }
  0x2b   :  { %184 = vmatprep.subr.mxu0 %v357_v0  ;;  %329 = vmatprep.subr.mxu1 %v357_v0 }
  0x2c   :  { %185 = vmatpush2.msra.mxu0 %v64_v22  ;;  %353 = vmatpush2.msra.mxu1 %v64_v22 }
  0x2d   :  { %186 = vmatprep.subr.mxu0 %v357_v0  ;;  %330 = vmatprep.subr.mxu1 %v357_v0 }
  0x2e   :  { %187 = vmatpush2.msra.mxu0 %v63_v23  ;;  %354 = vmatpush2.msra.mxu1 %v63_v23 }
  0x2f   :  { %188 = vmatprep.subr.mxu0 %v357_v0  ;;  %331 = vmatprep.subr.mxu1 %v357_v0 }
  0x30   :  { %189 = vmatpush2.msra.mxu0 %v62_v24  ;;  %355 = vmatpush2.msra.mxu1 %v62_v24 }
  0x31   :  { %292 = vmatprep.mubr.msk.f32.mxu0 %vm77_vm0, %v15_v25  ;;  %300 = vmatprep.mubr.msk.f32.mxu1 %vm77_vm0, %v31_v26 }
  0x32   :  { %191 = vmatmul.mubr.f32.vlgmr.msra.gmra.mxu0 %v14_v27  ;;  %231 = vmatmul.mubr.f32.vlgmr.msra.gmra.mxu1 %v30_v28 }
  0x33   :  { %293 = vmatprep.mubr.msk.f32.mxu0 %vm77_vm0, %v17_v29  ;;  %301 = vmatprep.mubr.msk.f32.mxu1 %vm77_vm0, %v33_v30 }
  0x36   :  { %196 = vmatmul.mubr.f32.gmra.mxu0 %v16_v31  ;;  %236 = vmatmul.mubr.f32.gmra.mxu1 %v32_v32 }
  0x37   :  { %294 = vmatprep.mubr.msk.f32.mxu0 %vm77_vm0, %v19_v33  ;;  %302 = vmatprep.mubr.msk.f32.mxu1 %vm77_vm0, %v35_v34 }
  0x3a   :  { %201 = vmatmul.mubr.f32.gmra.mxu0 %v18_v35  ;;  %241 = vmatmul.mubr.f32.gmra.mxu1 %v34_v36 }
  0x3b   :  { %295 = vmatprep.mubr.msk.f32.mxu0 %vm77_vm0, %v21_v37  ;;  %303 = vmatprep.mubr.msk.f32.mxu1 %vm77_vm0, %v37_v38 }
  0x3e   :  { %206 = vmatmul.mubr.f32.gmra.mxu0 %v20_v39  ;;  %246 = vmatmul.mubr.f32.gmra.mxu1 %v36_v40 }
  0x3f   :  { %296 = vmatprep.mubr.msk.f32.mxu0 %vm77_vm0, %v23_v41  ;;  %304 = vmatprep.mubr.msk.f32.mxu1 %vm77_vm0, %v39_v42 }
  0x42   :  { %211 = vmatmul.mubr.f32.gmra.mxu0 %v22_v43  ;;  %251 = vmatmul.mubr.f32.gmra.mxu1 %v38_v44 }
  0x43   :  { %297 = vmatprep.mubr.msk.f32.mxu0 %vm77_vm0, %v25_v45  ;;  %305 = vmatprep.mubr.msk.f32.mxu1 %vm77_vm0, %v41_v46 }
  0x46   :  { %216 = vmatmul.mubr.f32.gmra.mxu0 %v24_v47  ;;  %256 = vmatmul.mubr.f32.gmra.mxu1 %v40_v48 }
  0x47   :  { %298 = vmatprep.mubr.msk.f32.mxu0 %vm77_vm0, %v27_v49  ;;  %306 = vmatprep.mubr.msk.f32.mxu1 %vm77_vm0, %v43_v50 }
  0x4a   :  { %221 = vmatmul.mubr.f32.gmra.mxu0 %v26_v51  ;;  %261 = vmatmul.mubr.f32.gmra.mxu1 %v42_v52 }
  0x4b   :  { %299 = vmatprep.mubr.msk.f32.mxu0 %vm77_vm0, %v29_v53  ;;  %307 = vmatprep.mubr.msk.f32.mxu1 %vm77_vm0, %v45_v54 }
  0x4e   :  { %226 = vmatmul.mubr.f32.gmra.mxu0 %v28_v55  ;;  %266 = vmatmul.mubr.f32.gmra.mxu1 %v44_v56 }
  0xf2   :  { %v192_v58 = vpop.f32.mrf.mxu0  ;;  %v232_v59 = vpop.f32.mrf.mxu1 }
  0xf3   :  { %v193_v60 = vadd.f32 %v291_v57, %v192_v58  ;;  %v233_v61 = vadd.f32 %v291_v57, %v232_v59 }
  0xf4   :  { %v194_v62 = vpop.f32.mrf.mxu0  ;;  %v234_v63 = vpop.f32.mrf.mxu1 }
  0xf5   :  { %271 = vst.msk [vmem:[%s680_s3] sm:$0xff] %vm77_vm0, %v193_v60  ;;  %279 = vst.msk [vmem:[%s680_s3 + $0x40] sm:$0xff] %vm77_vm0, %v233_v61 }
  0xf6   :  { %v197_v0 = vpop.f32.mrf.mxu0  ;;  %v237_v1 = vpop.f32.mrf.mxu1 }
  0xf7   :  { %v198_v2 = vadd.f32 %v291_v57, %v197_v0  ;;  %v238_v3 = vadd.f32 %v291_v57, %v237_v1 }
  0xf8   :  { %v199_v4 = vpop.f32.mrf.mxu0  ;;  %v239_v5 = vpop.f32.mrf.mxu1 }
  0xf9   :  { %272 = vst.msk [vmem:[%s680_s3 + $0x8] sm:$0xff] %vm77_vm0, %v198_v2  ;;  %280 = vst.msk [vmem:[%s680_s3 + $0x48] sm:$0xff] %vm77_vm0, %v238_v3 }
  0xfa   :  { %v202_v6 = vpop.f32.mrf.mxu0  ;;  %v242_v7 = vpop.f32.mrf.mxu1 }
  0xfb   :  { %v203_v8 = vadd.f32 %v291_v57, %v202_v6  ;;  %v243_v9 = vadd.f32 %v291_v57, %v242_v7 }
  0xfc   :  { %v204_v10 = vpop.f32.mrf.mxu0  ;;  %v244_v11 = vpop.f32.mrf.mxu1 }
  0xfd   :  { %273 = vst.msk [vmem:[%s680_s3 + $0x10] sm:$0xff] %vm77_vm0, %v203_v8  ;;  %281 = vst.msk [vmem:[%s680_s3 + $0x50] sm:$0xff] %vm77_vm0, %v243_v9 }
  0xfe   :  { %v207_v12 = vpop.f32.mrf.mxu0  ;;  %v247_v13 = vpop.f32.mrf.mxu1 }
  0xff   :  { %v208_v14 = vadd.f32 %v291_v57, %v207_v12  ;;  %v248_v15 = vadd.f32 %v291_v57, %v247_v13 }
 0x100   :  { %v209_v16 = vpop.f32.mrf.mxu0  ;;  %v249_v17 = vpop.f32.mrf.mxu1 }
 0x101   :  { %274 = vst.msk [vmem:[%s680_s3 + $0x18] sm:$0xff] %vm77_vm0, %v208_v14  ;;  %282 = vst.msk [vmem:[%s680_s3 + $0x58] sm:$0xff] %vm77_vm0, %v248_v15 }
 0x102   :  { %v212_v18 = vpop.f32.mrf.mxu0  ;;  %v252_v19 = vpop.f32.mrf.mxu1 }
 0x103   :  { %v213_v20 = vadd.f32 %v291_v57, %v212_v18  ;;  %v253_v21 = vadd.f32 %v291_v57, %v252_v19 }
 0x104   :  { %v214_v22 = vpop.f32.mrf.mxu0  ;;  %v254_v23 = vpop.f32.mrf.mxu1 }
 0x105   :  { %275 = vst.msk [vmem:[%s680_s3 + $0x20] sm:$0xff] %vm77_vm0, %v213_v20  ;;  %283 = vst.msk [vmem:[%s680_s3 + $0x60] sm:$0xff] %vm77_vm0, %v253_v21 }
 0x106   :  { %v217_v24 = vpop.f32.mrf.mxu0  ;;  %v257_v25 = vpop.f32.mrf.mxu1 }
 0x107   :  { %v218_v26 = vadd.f32 %v291_v57, %v217_v24  ;;  %v258_v27 = vadd.f32 %v291_v57, %v257_v25 }
 0x108   :  { %v219_v28 = vpop.f32.mrf.mxu0  ;;  %v259_v29 = vpop.f32.mrf.mxu1 }
 0x109   :  { %276 = vst.msk [vmem:[%s680_s3 + $0x28] sm:$0xff] %vm77_vm0, %v218_v26  ;;  %284 = vst.msk [vmem:[%s680_s3 + $0x68] sm:$0xff] %vm77_vm0, %v258_v27 }
 0x10a   :  { %v222_v30 = vpop.f32.mrf.mxu0  ;;  %v262_v31 = vpop.f32.mrf.mxu1 }
 0x10b   :  { %v223_v32 = vadd.f32 %v291_v57, %v222_v30  ;;  %v263_v33 = vadd.f32 %v291_v57, %v262_v31 }
 0x10c   :  { %v224_v34 = vpop.f32.mrf.mxu0  ;;  %v264_v35 = vpop.f32.mrf.mxu1 }
 0x10d   :  { %277 = vst.msk [vmem:[%s680_s3 + $0x30] sm:$0xff] %vm77_vm0, %v223_v32  ;;  %285 = vst.msk [vmem:[%s680_s3 + $0x70] sm:$0xff] %vm77_vm0, %v263_v33 }
 0x10e   :  { %v227_v36 = vpop.f32.mrf.mxu0  ;;  %v267_v37 = vpop.f32.mrf.mxu1 }
 0x10f   :  { %v228_v38 = vadd.f32 %v291_v57, %v227_v36  ;;  %v268_v39 = vadd.f32 %v291_v57, %v267_v37 }
 0x110   :  { %v229_v40 = vpop.f32.mrf.mxu0  ;;  %v269_v41 = vpop.f32.mrf.mxu1 }
 0x111   :  { %278 = vst.msk [vmem:[%s680_s3 + $0x38] sm:$0xff] %vm77_vm0, %v228_v38  ;;  %286 = vst.msk [vmem:[%s680_s3 + $0x78] sm:$0xff] %vm77_vm0, %v268_v39 }

// kernel: heatmap2feat_forward.29
= control target key start
LH: loop header
LB: loop body
LE: loop exit
PB: predicated region body
PF: predicated region fallthrough
CT: control target
= control target key end

     0   :  { %vm32_vm0 = vcmask 1040384   ;;  %v69_v23 = vmov 0.0   ;;  %s97_s1 = inlined_call_operand.vmem [shape: f32[9,128], index: 1, kind: input, shape index: {}]   ;;  %s98_s0 = inlined_call_operand.vmem [shape: f32[1,128], index: 0, kind: input, shape index: {}]   ;;  %s99_s2 = inlined_call_operand.vmem [shape: f32[1,128], index: 2, kind: output, shape index: {}]  }
   0x1   :  { %v18_v0 = vld [vmem:[%s97_s1] sm:$0xff]  ;;  %v19_v1 = vld [vmem:[%s97_s1 + $0x8] sm:$0x1] }
   0x2   :  { %v53_v2 = vmul.f32 -1.442695, %v18_v0  ;;  %v54_v3 = vmul.f32 -1.442695, %v19_v1  ;;  %v11_v4 = vld [vmem:[%s98_s0] sm:$0x1] }
   0x3   :  { %v52_v5 = vmul.f32 -1.442695, %v11_v4 }
   0x4   :  { %57 = vpow2.f32 %v53_v2 }
   0x5   :  { %59 = vpow2.f32 %v54_v3 }
   0x6   :  { %61 = vpow2.f32 %v52_v5 }
  0x11   :  { %v58_v6 = vpop.eup %57 }
  0x12   :  { %v60_v7 = vpop.eup %59  ;;  %v26_v8 = vadd.f32 1.0, %v58_v6 }
  0x13   :  { %v27_v9 = vadd.f32 1.0, %v60_v7  ;;  %v62_v10 = vpop.eup %61 }
  0x14   :  { %63 = vrcp.f32 %v26_v8  ;;  %v15_v11 = vadd.f32 1.0, %v62_v10 }
  0x15   :  { %65 = vrcp.f32 %v27_v9 }
  0x16   :  { %67 = vrcp.f32 %v15_v11 }
  0x21   :  { %v64_v12 = vpop.eup %63 }
  0x22   :  { %v66_v13 = vpop.eup %65 }
  0x23   :  { %v33_v14 = vsel %vm32_vm0, %v66_v13, -inf  ;;  %v68_v21 = vpop.eup %67 }
  0x24   :  { %v34_v15 = vmax.f32 %v64_v12, %v33_v14 }
  0x26   :  { %v35_v16 = vrot.slane %v34_v15, 4 }
  0x28   :  { %v36_v17 = vmax.f32 %v34_v15, %v35_v16 }
  0x2a   :  { %v37_v18 = vrot.slane %v36_v17, 2 }
  0x2c   :  { %v38_v19 = vmax.f32 %v36_v17, %v37_v18 }
  0x2e   :  { %v39_v20 = vrot.slane %v38_v19, 1 }
  0x30   :  { %v40_v22 = vmax.f32 %v38_v19, %v39_v20 }
  0x32   :  { %vm41_vm1 = vcmp.eq.f32.partialorder %v40_v22, %v68_v21 }
  0x33   :  { %v55_v24 = vsel %vm41_vm1, 1.0, %v69_v23 }
  0x34   :  { %v44_v25 = vmul.f32 %v68_v21, %v55_v24 }
  0x36   :  { %v45_v26 = vmax.f32 %v44_v25, 1.1920929e-07 }
  0x38   :  { %v46_v27 = vmin.f32 %v45_v26, 0.9999999 }
  0x3a   :  { %47 = vst [vmem:[%s99_s2] sm:$0x1] %v46_v27 }

</bundles_post_ra>
